<compile_context>
chip_gen: v7x
topology: tpu7x:2x2x1
jax: 0.10.0
libtpu: 0.0.40
codegen_flags: <defaults>
</compile_context>

<pallas_src>
import functools

import jax
import jax.numpy as jnp
from jax.experimental import pallas as pl
from jax.experimental.pallas import tpu as pltpu

# ---- problem sizes ----
B = 256                  # total batch (amortizes weight DMA, fills MXU rows)
Z = 128                  # latent dim
H = 256                  # hidden dim shared by G and D
C, IH, IW = 4, 16, 16    # conceptual NCHW generated image
IMG = C * IH * IW        # 1024 flattened image


def _chip_flavor():
    """Best-effort chip detection; any failure falls back to the conservative path."""
    try:
        kind = jax.devices()[0].device_kind.lower()
    except Exception:
        return "other"
    if "v7" in kind:
        return "v7x"
    if "v6" in kind:
        return "v6e"
    if "v5 lite" in kind or "v5lite" in kind or "v5e" in kind:
        return "v5e"
    return "other"


def _config():
    flavor = _chip_flavor()
    n_blocks = 2 if flavor == "v7x" else 1        # v7x: one batch tile per TensorCore
    tanh_bf16 = flavor in ("v6e", "v7x")          # bf16 EUP only on v6e/v7x
    return n_blocks, tanh_bf16


def gd_kernel(z_ref,
              gw1_ref, gb1_ref, gw2_ref, gb2_ref,
              dw1_ref, db1_ref, dw2t_ref, db2_ref,
              out_ref, *, tanh_bf16):
    # ---------------- Generator ----------------
    z = z_ref[...].astype(jnp.bfloat16)                                      # (TB, Z)
    h1 = jnp.dot(z, gw1_ref[...],
                 preferred_element_type=jnp.float32) + gb1_ref[...]          # (TB, H) f32
    h1 = jnp.maximum(h1, 0.0)                                                # ReLU
    img_pre = jnp.dot(h1.astype(jnp.bfloat16), gw2_ref[...],
                      preferred_element_type=jnp.float32) + gb2_ref[...]     # (TB, IMG) f32
    if tanh_bf16:
        # v6e/v7x: bf16 EUP tanh (~2x) feeding the D1 matmul with no extra cast.
        img = jnp.tanh(img_pre.astype(jnp.bfloat16))
    else:
        # v5e: f32-only EUP/VPU; cast only at the MXU boundary.
        img = jnp.tanh(img_pre).astype(jnp.bfloat16)

    # ---------------- Discriminator ----------------
    d1 = jnp.dot(img, dw1_ref[...],
                 preferred_element_type=jnp.float32) + db1_ref[...]          # (TB, H) f32
    d1 = jnp.maximum(d1, 0.2 * d1)                                           # LeakyReLU(0.2)

    # Final (H, 1) matmul as a VPU multiply + lane reduction (no N=1 MXU pass).
    logit = jnp.sum(d1 * dw2t_ref[...], axis=-1, keepdims=True) + db2_ref[...]   # (TB, 1)
    out_ref[...] = jax.nn.sigmoid(logit)                                     # (TB, 1) direct


def _run(z, params, *, n_blocks, tanh_bf16, single_buffer_weights):
    tb = B // n_blocks
    spec_kwargs = {"pipeline_mode": pl.Buffered(1)} if single_buffer_weights else {}

    # Weights/biases: constant index_map -> DMA'd once, VMEM-resident across grid steps.
    def resident(shape):
        return pl.BlockSpec(shape, lambda i: (0,) * len(shape), **spec_kwargs)

    in_specs = [pl.BlockSpec((tb, Z), lambda i: (i, 0))]     # latent tiles over the grid
    in_specs += [resident(p.shape) for p in params]

    return pl.pallas_call(
        functools.partial(gd_kernel, tanh_bf16=tanh_bf16),
        out_shape=jax.ShapeDtypeStruct((B, 1), jnp.float32),
        grid=(n_blocks,),
        in_specs=in_specs,
        out_specs=pl.BlockSpec((tb, 1), lambda i: (i, 0)),
        compiler_params=pltpu.CompilerParams(
            dimension_semantics=("parallel",),               # v7x: batch tiles over 2 TCs
        ),
    )(z, *params)


def g_d_assemble_forward(z, params):
    n_blocks, tanh_bf16 = _config()
    try:
        # Resident weights requested single-buffered (no wasted second VMEM copy).
        return _run(z, params, n_blocks=n_blocks, tanh_bf16=tanh_bf16,
                    single_buffer_weights=True)
    except Exception:
        # Fallback if this jax build rejects single-buffered pipeline_mode.
        return _run(z, params, n_blocks=n_blocks, tanh_bf16=tanh_bf16,
                    single_buffer_weights=False)


def make_params(key):
    ks = jax.random.split(key, 8)
    w_bf16 = lambda k, shape: (0.02 * jax.random.normal(k, shape)).astype(jnp.bfloat16)
    b_f32 = lambda k, shape: (0.01 * jax.random.normal(k, shape)).astype(jnp.float32)
    gw1 = w_bf16(ks[0], (Z, H))
    gb1 = b_f32(ks[1], (1, H))
    gw2 = w_bf16(ks[2], (H, IMG))
    gb2 = b_f32(ks[3], (1, IMG))
    dw1 = w_bf16(ks[4], (IMG, H))
    db1 = b_f32(ks[5], (1, H))
    dw2t = (0.02 * jax.random.normal(ks[6], (1, H))).astype(jnp.float32)  # (H,1) transposed, f32
    db2 = b_f32(ks[7], (1, 1))
    return gw1, gb1, gw2, gb2, dw1, db1, dw2t, db2


def reference_forward(z, params, *, tanh_bf16):
    """Pure-JAX reference of D(G(z)) mirroring the kernel's bf16 boundaries."""
    gw1, gb1, gw2, gb2, dw1, db1, dw2t, db2 = params
    f32 = jnp.float32
    h1 = jnp.dot(z.astype(jnp.bfloat16), gw1, preferred_element_type=f32) + gb1
    h1 = jnp.maximum(h1, 0.0)
    img_pre = jnp.dot(h1.astype(jnp.bfloat16), gw2, preferred_element_type=f32) + gb2
    if tanh_bf16:
        img = jnp.tanh(img_pre.astype(jnp.bfloat16))
    else:
        img = jnp.tanh(img_pre).astype(jnp.bfloat16)
    d1 = jnp.dot(img, dw1, preferred_element_type=f32) + db1
    d1 = jnp.maximum(d1, 0.2 * d1)
    logit = jnp.sum(d1 * dw2t, axis=-1, keepdims=True) + db2
    return jax.nn.sigmoid(logit)


if __name__ == "__main__":
    key = jax.random.PRNGKey(0)
    kz, kp = jax.random.split(key)
    z = jax.random.normal(kz, (B, Z), dtype=jnp.float32)   # latent input to G
    params = make_params(kp)

    out = jax.block_until_ready(g_d_assemble_forward(z, params))

    _, tanh_bf16 = _config()
    ref = reference_forward(z, params, tanh_bf16=tanh_bf16)

    assert out.shape == (B, 1)
    assert jnp.allclose(out, ref, atol=2e-3, rtol=2e-3), "mismatch vs reference"
    print("KERNEL_OK")
</pallas_src>

<mosaic_0001>
module attributes {stable_mosaic.version = 11 : i64} {
  func.func @gd_kernel(%arg0: i32, %arg1: memref<256x128xf32, #tpu.memory_space<vmem>>, %arg2: memref<128x256xbf16, #tpu.memory_space<vmem>>, %arg3: memref<1x256xf32, #tpu.memory_space<vmem>>, %arg4: memref<256x1024xbf16, #tpu.memory_space<vmem>>, %arg5: memref<1x1024xf32, #tpu.memory_space<vmem>>, %arg6: memref<1024x256xbf16, #tpu.memory_space<vmem>>, %arg7: memref<1x256xf32, #tpu.memory_space<vmem>>, %arg8: memref<1x256xf32, #tpu.memory_space<vmem>>, %arg9: memref<1x1xf32, #tpu.memory_space<vmem>>, %arg10: memref<256x1xf32, #tpu.memory_space<vmem>>) attributes {dimension_semantics = [#tpu.dimension_semantics<parallel>], iteration_bounds = array<i64: 1>, scalar_prefetch = 0 : i64, scratch_operands = 0 : i64, tpu.core_type = #tpu.core_type<tc>, window_params = [{transform_indices = @transform_0, window_bounds = array<i64: 256, 128>}, {pipeline_mode = #tpu.pipeline_mode<synchronous>, transform_indices = @transform_1, window_bounds = array<i64: 128, 256>}, {pipeline_mode = #tpu.pipeline_mode<synchronous>, transform_indices = @transform_2, window_bounds = array<i64: 1, 256>}, {pipeline_mode = #tpu.pipeline_mode<synchronous>, transform_indices = @transform_3, window_bounds = array<i64: 256, 1024>}, {pipeline_mode = #tpu.pipeline_mode<synchronous>, transform_indices = @transform_4, window_bounds = array<i64: 1, 1024>}, {pipeline_mode = #tpu.pipeline_mode<synchronous>, transform_indices = @transform_5, window_bounds = array<i64: 1024, 256>}, {pipeline_mode = #tpu.pipeline_mode<synchronous>, transform_indices = @transform_6, window_bounds = array<i64: 1, 256>}, {pipeline_mode = #tpu.pipeline_mode<synchronous>, transform_indices = @transform_7, window_bounds = array<i64: 1, 256>}, {pipeline_mode = #tpu.pipeline_mode<synchronous>, transform_indices = @transform_8, window_bounds = array<i64: 1, 1>}, {transform_indices = @transform_9, window_bounds = array<i64: 256, 1>}]} {
    %c0 = arith.constant 0 : index
    %c0_0 = arith.constant 0 : index
    %0 = vector.load %arg1[%c0, %c0_0] : memref<256x128xf32, #tpu.memory_space<vmem>>, vector<256x128xf32>
    %1 = arith.truncf %0 : vector<256x128xf32> to vector<256x128xbf16>
    %c0_1 = arith.constant 0 : index
    %c0_2 = arith.constant 0 : index
    %2 = vector.load %arg2[%c0_1, %c0_2] : memref<128x256xbf16, #tpu.memory_space<vmem>>, vector<128x256xbf16>
    %cst = arith.constant dense<0.000000e+00> : vector<256x256xf32>
    %3 = tpu.matmul %1, %2, %cst {dimension_numbers = #tpu.dot_dimension_numbers<[1], [0], [0], [1], [0, 0, 1, 1], [], []>} : vector<256x128xbf16>, vector<128x256xbf16>, vector<256x256xf32> -> vector<256x256xf32>
    %c0_3 = arith.constant 0 : index
    %c0_4 = arith.constant 0 : index
    %4 = vector.load %arg3[%c0_3, %c0_4] : memref<1x256xf32, #tpu.memory_space<vmem>>, vector<1x256xf32>
    %5 = vector.broadcast %4 : vector<1x256xf32> to vector<256x256xf32>
    %6 = arith.addf %3, %5 : vector<256x256xf32>
    %cst_5 = arith.constant 0.000000e+00 : f32
    %7 = vector.broadcast %cst_5 : f32 to vector<256x256xf32>
    %8 = arith.maximumf %6, %7 : vector<256x256xf32>
    %9 = arith.truncf %8 : vector<256x256xf32> to vector<256x256xbf16>
    %c0_6 = arith.constant 0 : index
    %c0_7 = arith.constant 0 : index
    %10 = vector.load %arg4[%c0_6, %c0_7] : memref<256x1024xbf16, #tpu.memory_space<vmem>>, vector<256x1024xbf16>
    %cst_8 = arith.constant dense<0.000000e+00> : vector<256x1024xf32>
    %11 = tpu.matmul %9, %10, %cst_8 {dimension_numbers = #tpu.dot_dimension_numbers<[1], [0], [0], [1], [0, 0, 1, 1], [], []>} : vector<256x256xbf16>, vector<256x1024xbf16>, vector<256x1024xf32> -> vector<256x1024xf32>
    %c0_9 = arith.constant 0 : index
    %c0_10 = arith.constant 0 : index
    %12 = vector.load %arg5[%c0_9, %c0_10] : memref<1x1024xf32, #tpu.memory_space<vmem>>, vector<1x1024xf32>
    %13 = vector.broadcast %12 : vector<1x1024xf32> to vector<256x1024xf32>
    %14 = arith.addf %11, %13 : vector<256x1024xf32>
    %15 = math.tanh %14 : vector<256x1024xf32>
    %16 = arith.truncf %15 : vector<256x1024xf32> to vector<256x1024xbf16>
    %c0_11 = arith.constant 0 : index
    %c0_12 = arith.constant 0 : index
    %17 = vector.load %arg6[%c0_11, %c0_12] : memref<1024x256xbf16, #tpu.memory_space<vmem>>, vector<1024x256xbf16>
    %cst_13 = arith.constant dense<0.000000e+00> : vector<256x256xf32>
    %18 = tpu.matmul %16, %17, %cst_13 {dimension_numbers = #tpu.dot_dimension_numbers<[1], [0], [0], [1], [0, 0, 1, 1], [], []>} : vector<256x1024xbf16>, vector<1024x256xbf16>, vector<256x256xf32> -> vector<256x256xf32>
    %c0_14 = arith.constant 0 : index
    %c0_15 = arith.constant 0 : index
    %19 = vector.load %arg7[%c0_14, %c0_15] : memref<1x256xf32, #tpu.memory_space<vmem>>, vector<1x256xf32>
    %20 = vector.broadcast %19 : vector<1x256xf32> to vector<256x256xf32>
    %21 = arith.addf %18, %20 : vector<256x256xf32>
    %cst_16 = arith.constant 2.000000e-01 : f32
    %22 = vector.broadcast %cst_16 : f32 to vector<256x256xf32>
    %23 = arith.mulf %22, %21 : vector<256x256xf32>
    %24 = arith.maximumf %21, %23 : vector<256x256xf32>
    %c0_17 = arith.constant 0 : index
    %c0_18 = arith.constant 0 : index
    %25 = vector.load %arg8[%c0_17, %c0_18] : memref<1x256xf32, #tpu.memory_space<vmem>>, vector<1x256xf32>
    %26 = vector.broadcast %25 : vector<1x256xf32> to vector<256x256xf32>
    %27 = arith.mulf %24, %26 : vector<256x256xf32>
    %cst_19 = arith.constant dense<0.000000e+00> : vector<256xf32>
    %28 = vector.multi_reduction <add>, %27, %cst_19 [1] : vector<256x256xf32> to vector<256xf32>
    %29 = vector.shape_cast %28 : vector<256xf32> to vector<256x1xf32>
    %c0_20 = arith.constant 0 : index
    %c0_21 = arith.constant 0 : index
    %30 = vector.load %arg9[%c0_20, %c0_21] : memref<1x1xf32, #tpu.memory_space<vmem>>, vector<1x1xf32>
    %31 = vector.broadcast %30 : vector<1x1xf32> to vector<256x1xf32>
    %32 = arith.addf %29, %31 : vector<256x1xf32>
    %33 = arith.negf %32 : vector<256x1xf32>
    %34 = math.exp %33 : vector<256x1xf32>
    %cst_22 = arith.constant 1.000000e+00 : f32
    %35 = vector.broadcast %cst_22 : f32 to vector<256x1xf32>
    %36 = arith.addf %35, %34 : vector<256x1xf32>
    %37 = arith.divf %35, %36 : vector<256x1xf32>
    %c0_23 = arith.constant 0 : index
    %c0_24 = arith.constant 0 : index
    %38 = vector.load %arg10[%c0_23, %c0_24] : memref<256x1xf32, #tpu.memory_space<vmem>>, vector<256x1xf32>
    tpu.vector_store %arg10[%c0_23, %c0_24], %37 {strides = array<i32>} : memref<256x1xf32, #tpu.memory_space<vmem>>, vector<256x1xf32>,
    return
  }
  func.func @transform_0(%arg0: i32) -> (i32, i32) {
    %c0_i32 = arith.constant 0 : i32
    %c0_i32_0 = arith.constant 0 : i32
    return %arg0, %c0_i32 : i32, i32
  }
  func.func @transform_1(%arg0: i32) -> (i32, i32) {
    %c0_i32 = arith.constant 0 : i32
    %c0_i32_0 = arith.constant 0 : i32
    %c0_i32_1 = arith.constant 0 : i32
    return %c0_i32, %c0_i32_0 : i32, i32
  }
  func.func @transform_2(%arg0: i32) -> (i32, i32) {
    %c0_i32 = arith.constant 0 : i32
    %c0_i32_0 = arith.constant 0 : i32
    %c0_i32_1 = arith.constant 0 : i32
    return %c0_i32, %c0_i32_0 : i32, i32
  }
  func.func @transform_3(%arg0: i32) -> (i32, i32) {
    %c0_i32 = arith.constant 0 : i32
    %c0_i32_0 = arith.constant 0 : i32
    %c0_i32_1 = arith.constant 0 : i32
    return %c0_i32, %c0_i32_0 : i32, i32
  }
  func.func @transform_4(%arg0: i32) -> (i32, i32) {
    %c0_i32 = arith.constant 0 : i32
    %c0_i32_0 = arith.constant 0 : i32
    %c0_i32_1 = arith.constant 0 : i32
    return %c0_i32, %c0_i32_0 : i32, i32
  }
  func.func @transform_5(%arg0: i32) -> (i32, i32) {
    %c0_i32 = arith.constant 0 : i32
    %c0_i32_0 = arith.constant 0 : i32
    %c0_i32_1 = arith.constant 0 : i32
    return %c0_i32, %c0_i32_0 : i32, i32
  }
  func.func @transform_6(%arg0: i32) -> (i32, i32) {
    %c0_i32 = arith.constant 0 : i32
    %c0_i32_0 = arith.constant 0 : i32
    %c0_i32_1 = arith.constant 0 : i32
    return %c0_i32, %c0_i32_0 : i32, i32
  }
  func.func @transform_7(%arg0: i32) -> (i32, i32) {
    %c0_i32 = arith.constant 0 : i32
    %c0_i32_0 = arith.constant 0 : i32
    %c0_i32_1 = arith.constant 0 : i32
    return %c0_i32, %c0_i32_0 : i32, i32
  }
  func.func @transform_8(%arg0: i32) -> (i32, i32) {
    %c0_i32 = arith.constant 0 : i32
    %c0_i32_0 = arith.constant 0 : i32
    %c0_i32_1 = arith.constant 0 : i32
    return %c0_i32, %c0_i32_0 : i32, i32
  }
  func.func @transform_9(%arg0: i32) -> (i32, i32) {
    %c0_i32 = arith.constant 0 : i32
    %c0_i32_0 = arith.constant 0 : i32
    return %arg0, %c0_i32 : i32, i32
  }
}

module attributes {stable_mosaic.version = 11 : i64} {
  func.func @gd_kernel(%arg0: i32, %arg1: memref<256x128xf32, #tpu.memory_space<vmem>>, %arg2: memref<128x256xbf16, #tpu.memory_space<vmem>>, %arg3: memref<1x256xf32, #tpu.memory_space<vmem>>, %arg4: memref<256x1024xbf16, #tpu.memory_space<vmem>>, %arg5: memref<1x1024xf32, #tpu.memory_space<vmem>>, %arg6: memref<1024x256xbf16, #tpu.memory_space<vmem>>, %arg7: memref<1x256xf32, #tpu.memory_space<vmem>>, %arg8: memref<1x256xf32, #tpu.memory_space<vmem>>, %arg9: memref<1x1xf32, #tpu.memory_space<vmem>>, %arg10: memref<256x1xf32, #tpu.memory_space<vmem>>) attributes {dimension_semantics = [#tpu.dimension_semantics<parallel>], iteration_bounds = array<i64: 1>, scalar_prefetch = 0 : i64, scratch_operands = 0 : i64, tpu.core_type = #tpu.core_type<tc>, window_params = [{transform_indices = @transform_0, window_bounds = array<i64: 256, 128>}, {pipeline_mode = #tpu.pipeline_mode<synchronous>, transform_indices = @transform_1, window_bounds = array<i64: 128, 256>}, {pipeline_mode = #tpu.pipeline_mode<synchronous>, transform_indices = @transform_2, window_bounds = array<i64: 1, 256>}, {pipeline_mode = #tpu.pipeline_mode<synchronous>, transform_indices = @transform_3, window_bounds = array<i64: 256, 1024>}, {pipeline_mode = #tpu.pipeline_mode<synchronous>, transform_indices = @transform_4, window_bounds = array<i64: 1, 1024>}, {pipeline_mode = #tpu.pipeline_mode<synchronous>, transform_indices = @transform_5, window_bounds = array<i64: 1024, 256>}, {pipeline_mode = #tpu.pipeline_mode<synchronous>, transform_indices = @transform_6, window_bounds = array<i64: 1, 256>}, {pipeline_mode = #tpu.pipeline_mode<synchronous>, transform_indices = @transform_7, window_bounds = array<i64: 1, 256>}, {pipeline_mode = #tpu.pipeline_mode<synchronous>, transform_indices = @transform_8, window_bounds = array<i64: 1, 1>}, {transform_indices = @transform_9, window_bounds = array<i64: 256, 1>}]} {
    %c0 = arith.constant 0 : index
    %c0_0 = arith.constant 0 : index
    %0 = vector.load %arg1[%c0, %c0_0] : memref<256x128xf32, #tpu.memory_space<vmem>>, vector<256x128xf32>
    %1 = arith.truncf %0 : vector<256x128xf32> to vector<256x128xbf16>
    %c0_1 = arith.constant 0 : index
    %c0_2 = arith.constant 0 : index
    %2 = vector.load %arg2[%c0_1, %c0_2] : memref<128x256xbf16, #tpu.memory_space<vmem>>, vector<128x256xbf16>
    %cst = arith.constant dense<0.000000e+00> : vector<256x256xf32>
    %3 = tpu.matmul %1, %2, %cst {dimension_numbers = #tpu.dot_dimension_numbers<[1], [0], [0], [1], [0, 0, 1, 1], [], []>} : vector<256x128xbf16>, vector<128x256xbf16>, vector<256x256xf32> -> vector<256x256xf32>
    %c0_3 = arith.constant 0 : index
    %c0_4 = arith.constant 0 : index
    %4 = vector.load %arg3[%c0_3, %c0_4] : memref<1x256xf32, #tpu.memory_space<vmem>>, vector<1x256xf32>
    %5 = vector.broadcast %4 : vector<1x256xf32> to vector<256x256xf32>
    %6 = arith.addf %3, %5 : vector<256x256xf32>
    %cst_5 = arith.constant 0.000000e+00 : f32
    %7 = vector.broadcast %cst_5 : f32 to vector<256x256xf32>
    %8 = arith.maximumf %6, %7 : vector<256x256xf32>
    %9 = arith.truncf %8 : vector<256x256xf32> to vector<256x256xbf16>
    %c0_6 = arith.constant 0 : index
    %c0_7 = arith.constant 0 : index
    %10 = vector.load %arg4[%c0_6, %c0_7] : memref<256x1024xbf16, #tpu.memory_space<vmem>>, vector<256x1024xbf16>
    %cst_8 = arith.constant dense<0.000000e+00> : vector<256x1024xf32>
    %11 = tpu.matmul %9, %10, %cst_8 {dimension_numbers = #tpu.dot_dimension_numbers<[1], [0], [0], [1], [0, 0, 1, 1], [], []>} : vector<256x256xbf16>, vector<256x1024xbf16>, vector<256x1024xf32> -> vector<256x1024xf32>
    %c0_9 = arith.constant 0 : index
    %c0_10 = arith.constant 0 : index
    %12 = vector.load %arg5[%c0_9, %c0_10] : memref<1x1024xf32, #tpu.memory_space<vmem>>, vector<1x1024xf32>
    %13 = vector.broadcast %12 : vector<1x1024xf32> to vector<256x1024xf32>
    %14 = arith.addf %11, %13 : vector<256x1024xf32>
    %15 = math.tanh %14 : vector<256x1024xf32>
    %16 = arith.truncf %15 : vector<256x1024xf32> to vector<256x1024xbf16>
    %c0_11 = arith.constant 0 : index
    %c0_12 = arith.constant 0 : index
    %17 = vector.load %arg6[%c0_11, %c0_12] : memref<1024x256xbf16, #tpu.memory_space<vmem>>, vector<1024x256xbf16>
    %cst_13 = arith.constant dense<0.000000e+00> : vector<256x256xf32>
    %18 = tpu.matmul %16, %17, %cst_13 {dimension_numbers = #tpu.dot_dimension_numbers<[1], [0], [0], [1], [0, 0, 1, 1], [], []>} : vector<256x1024xbf16>, vector<1024x256xbf16>, vector<256x256xf32> -> vector<256x256xf32>
    %c0_14 = arith.constant 0 : index
    %c0_15 = arith.constant 0 : index
    %19 = vector.load %arg7[%c0_14, %c0_15] : memref<1x256xf32, #tpu.memory_space<vmem>>, vector<1x256xf32>
    %20 = vector.broadcast %19 : vector<1x256xf32> to vector<256x256xf32>
    %21 = arith.addf %18, %20 : vector<256x256xf32>
    %cst_16 = arith.constant 2.000000e-01 : f32
    %22 = vector.broadcast %cst_16 : f32 to vector<256x256xf32>
    %23 = arith.mulf %22, %21 : vector<256x256xf32>
    %24 = arith.maximumf %21, %23 : vector<256x256xf32>
    %c0_17 = arith.constant 0 : index
    %c0_18 = arith.constant 0 : index
    %25 = vector.load %arg8[%c0_17, %c0_18] : memref<1x256xf32, #tpu.memory_space<vmem>>, vector<1x256xf32>
    %26 = vector.broadcast %25 : vector<1x256xf32> to vector<256x256xf32>
    %27 = arith.mulf %24, %26 : vector<256x256xf32>
    %cst_19 = arith.constant dense<0.000000e+00> : vector<256xf32>
    %28 = vector.multi_reduction <add>, %27, %cst_19 [1] : vector<256x256xf32> to vector<256xf32>
    %29 = vector.shape_cast %28 : vector<256xf32> to vector<256x1xf32>
    %c0_20 = arith.constant 0 : index
    %c0_21 = arith.constant 0 : index
    %30 = vector.load %arg9[%c0_20, %c0_21] : memref<1x1xf32, #tpu.memory_space<vmem>>, vector<1x1xf32>
    %31 = vector.broadcast %30 : vector<1x1xf32> to vector<256x1xf32>
    %32 = arith.addf %29, %31 : vector<256x1xf32>
    %33 = arith.negf %32 : vector<256x1xf32>
    %34 = math.exp %33 : vector<256x1xf32>
    %cst_22 = arith.constant 1.000000e+00 : f32
    %35 = vector.broadcast %cst_22 : f32 to vector<256x1xf32>
    %36 = arith.addf %35, %34 : vector<256x1xf32>
    %37 = arith.divf %35, %36 : vector<256x1xf32>
    %c0_23 = arith.constant 0 : index
    %c0_24 = arith.constant 0 : index
    %38 = vector.load %arg10[%c0_23, %c0_24] : memref<256x1xf32, #tpu.memory_space<vmem>>, vector<256x1xf32>
    tpu.vector_store %arg10[%c0_23, %c0_24], %37 {strides = array<i32>} : memref<256x1xf32, #tpu.memory_space<vmem>>, vector<256x1xf32>,
    return
  }
  func.func @transform_0(%arg0: i32) -> (i32, i32) {
    %c0_i32 = arith.constant 0 : i32
    %c0_i32_0 = arith.constant 0 : i32
    return %arg0, %c0_i32 : i32, i32
  }
  func.func @transform_1(%arg0: i32) -> (i32, i32) {
    %c0_i32 = arith.constant 0 : i32
    %c0_i32_0 = arith.constant 0 : i32
    %c0_i32_1 = arith.constant 0 : i32
    return %c0_i32, %c0_i32_0 : i32, i32
  }
  func.func @transform_2(%arg0: i32) -> (i32, i32) {
    %c0_i32 = arith.constant 0 : i32
    %c0_i32_0 = arith.constant 0 : i32
    %c0_i32_1 = arith.constant 0 : i32
    return %c0_i32, %c0_i32_0 : i32, i32
  }
  func.func @transform_3(%arg0: i32) -> (i32, i32) {
    %c0_i32 = arith.constant 0 : i32
    %c0_i32_0 = arith.constant 0 : i32
    %c0_i32_1 = arith.constant 0 : i32
    return %c0_i32, %c0_i32_0 : i32, i32
  }
  func.func @transform_4(%arg0: i32) -> (i32, i32) {
    %c0_i32 = arith.constant 0 : i32
    %c0_i32_0 = arith.constant 0 : i32
    %c0_i32_1 = arith.constant 0 : i32
    return %c0_i32, %c0_i32_0 : i32, i32
  }
  func.func @transform_5(%arg0: i32) -> (i32, i32) {
    %c0_i32 = arith.constant 0 : i32
    %c0_i32_0 = arith.constant 0 : i32
    %c0_i32_1 = arith.constant 0 : i32
    return %c0_i32, %c0_i32_0 : i32, i32
  }
  func.func @transform_6(%arg0: i32) -> (i32, i32) {
    %c0_i32 = arith.constant 0 : i32
    %c0_i32_0 = arith.constant 0 : i32
    %c0_i32_1 = arith.constant 0 : i32
    return %c0_i32, %c0_i32_0 : i32, i32
  }
  func.func @transform_7(%arg0: i32) -> (i32, i32) {
    %c0_i32 = arith.constant 0 : i32
    %c0_i32_0 = arith.constant 0 : i32
    %c0_i32_1 = arith.constant 0 : i32
    return %c0_i32, %c0_i32_0 : i32, i32
  }
  func.func @transform_8(%arg0: i32) -> (i32, i32) {
    %c0_i32 = arith.constant 0 : i32
    %c0_i32_0 = arith.constant 0 : i32
    %c0_i32_1 = arith.constant 0 : i32
    return %c0_i32, %c0_i32_0 : i32, i32
  }
  func.func @transform_9(%arg0: i32) -> (i32, i32) {
    %c0_i32 = arith.constant 0 : i32
    %c0_i32_0 = arith.constant 0 : i32
    return %arg0, %c0_i32 : i32, i32
  }
}

</mosaic_0001>

<bundles_post_ra>
// kernel: tpu_custom_call.1
= control target key start
LH: loop header
LB: loop body
LE: loop exit
PB: predicated region body
PF: predicated region fallthrough
CT: control target
= control target key end

     0   :  { %s7565_s0 = inlined_call_operand.hbm [shape: f32[256,128], index: 0, kind: input, shape index: {}]   ;;  %s7566_s1 = inlined_call_operand.hbm [shape: bf16[128,256], index: 1, kind: input, shape index: {}]   ;;  %s7567_s2 = inlined_call_operand.vmem [shape: f32[1,256], index: 2, kind: input, shape index: {}]   ;;  %s7568_s3 = inlined_call_operand.hbm [shape: bf16[256,1024], index: 3, kind: input, shape index: {}]   ;;  %s7569_s4 = inlined_call_operand.vmem [shape: f32[1,1024], index: 4, kind: input, shape index: {}]   ;;  %s7570_s5 = inlined_call_operand.hbm [shape: bf16[1024,256], index: 5, kind: input, shape index: {}]   ;;  %s7571_s6 = inlined_call_operand.vmem [shape: f32[1,256], index: 6, kind: input, shape index: {}]   ;;  %s7572_s7 = inlined_call_operand.vmem [shape: f32[1,256], index: 7, kind: input, shape index: {}]   ;;  %s7573_s8 = inlined_call_operand.<no memory space> [shape: f32[1,1], index: 8, kind: input, shape index: {}]   ;;  %s7574_s9 = inlined_call_operand.vmem [shape: f32[256,1], index: 9, kind: output, shape index: {}]  }
   0x1   :  { %v14_v0 = vstv %s7573_s8 }
   0x2   :  { %15 = vst [vmem:[#allocation2] sm:$0x1] %v14_v0 }
   0x3   :  { %16 = vsyncpa [#allocation4], 0 }
   0x4   :  { %17 = vsyncpa [#allocation6], 0 }
   0x5   :  { %18 = vsyncpa [#allocation9], 0  ;;  %s6209_s11 = smov [#allocation5]   ;;  %s6210_s13 = smov [#allocation3]  }
   0x6   :  { %s36_s12 = sshll.u32 %s6209_s11, 4  ;;  %s24_s14 = sshll.u32 %s6210_s13, 4  ;;  %s37_s12 = int_to_ptr.vmem [resolvable:$true] %s36_s12  ;;  %s6271_s14 = int_to_ptr.vmem [resolvable:$true] %s24_s14 }
   0x7   :  { %s6115_s17 = scalar_lea.hbm %s7566_s1, 2048 }
   0x8   :  { %p6116_p0 = scmp.ne.s32.totalorder %s7566_s1, %s6115_s17  ;;  %p6119_p1 = scmp.lt.u32.totalorder %s6115_s17, %s7566_s1 }
   0xa   :  { %p6121_p2 = pnand %p6119_p1, %p6116_p0 }
   0xc   :  { %6124 = shalt.err (!%p6121_p2)
}
   0xd   :  { %s6125_s21 = scalar_lea.vmem %s37_s12, 2048  ;;  %p6130_p4 = scmp.lt.s32.totalorder %s37_s12, %s37_s12 }
   0xe   :  { %p6126_p3 = scmp.ne.s32.totalorder %s37_s12, %s6125_s21  ;;  %p6131_p5 = scmp.lt.s32.totalorder %s6125_s21, %s6125_s21 }
  0x10   :  { %p6132_p6 = por %p6131_p5, %p6130_p4 }
  0x12   :  { %p6133_p7 = pnand %p6132_p6, %p6126_p3 }
  0x14   :  { %6136 = shalt.err (!%p6133_p7)
}
  0x15   :  { %s6211_s22 = smov 128   ;;  %s6212_s23 = smov 8  }
  0x16   :  { %42 = dma.hbm_to_vmem [thread:$0]  %s7566_s1, 2048, %s37_s12, [#allocation6], %s6211_s22, %s6211_s22, %s6212_s23  }
  0x17   :  { %s6137_s28 = scalar_lea.hbm %s7565_s0, 4096 }
  0x18   :  { %p6138_p8 = scmp.ne.s32.totalorder %s7565_s0, %s6137_s28  ;;  %p6141_p9 = scmp.lt.u32.totalorder %s6137_s28, %s7565_s0 }
  0x1a   :  { %p6143_p10 = pnand %p6141_p9, %p6138_p8 }
  0x1c   :  { %6146 = shalt.err (!%p6143_p10)
}
  0x1d   :  { %s6147_s13 = scalar_lea.vmem %s6271_s14, 4096  ;;  %p6152_p12 = scmp.lt.s32.totalorder %s6271_s14, %s6271_s14 }
  0x1e   :  { %p6148_p11 = scmp.ne.s32.totalorder %s6271_s14, %s6147_s13  ;;  %p6153_p13 = scmp.lt.s32.totalorder %s6147_s13, %s6147_s13 }
  0x20   :  { %p6154_p0 = por %p6153_p13, %p6152_p12 }
  0x22   :  { %p6155_p1 = pnand %p6154_p0, %p6148_p11 }
  0x24   :  { %6158 = shalt.err (!%p6155_p1)
}
  0x25   :  { %30 = dma.hbm_to_vmem [thread:$0]  %s7565_s0, 4096, %s6271_s14, [#allocation4], %s6211_s22, %s6211_s22, %s6212_s23  }
  0x26   :  { %s6213_s15 = smov [#allocation7]   ;;  %s6159_s19 = scalar_lea.hbm %s7568_s3, 16384 }
  0x27   :  { %s50_s16 = sshll.u32 %s6213_s15, 4  ;;  %p6160_p2 = scmp.ne.s32.totalorder %s7568_s3, %s6159_s19  ;;  %s51_s16 = int_to_ptr.vmem [resolvable:$true] %s50_s16 }
  0x28   :  { %p6163_p3 = scmp.lt.u32.totalorder %s6159_s19, %s7568_s3 }
  0x2a   :  { %p6165_p4 = pnand %p6163_p3, %p6160_p2 }
  0x2c   :  { %6168 = shalt.err (!%p6165_p4)
}
  0x2d   :  { %s6169_s25 = scalar_lea.vmem %s51_s16, 16384  ;;  %p6174_p6 = scmp.lt.s32.totalorder %s51_s16, %s51_s16 }
  0x2e   :  { %p6170_p5 = scmp.ne.s32.totalorder %s51_s16, %s6169_s25  ;;  %p6175_p7 = scmp.lt.s32.totalorder %s6169_s25, %s6169_s25 }
  0x30   :  { %p6176_p8 = por %p6175_p7, %p6174_p6 }
  0x32   :  { %p6177_p9 = pnand %p6176_p8, %p6170_p5 }
  0x34   :  { %6180 = shalt.err (!%p6177_p9)
}
  0x35   :  { %s6214_s0 = smov 512   ;;  %s6215_s14 = smov 32  }
  0x36   :  { %56 = dma.hbm_to_vmem [thread:$0]  %s7568_s3, 16384, %s51_s16, [#allocation6], %s6214_s0, %s6214_s0, %s6215_s14  }
  0x37   :  { %s6216_s28 = smov [#allocation8]   ;;  %s6181_s11 = scalar_lea.hbm %s7570_s5, 16384 }
  0x38   :  { %s64_s29 = sshll.u32 %s6216_s28, 4  ;;  %p6182_p10 = scmp.ne.s32.totalorder %s7570_s5, %s6181_s11  ;;  %s65_s29 = int_to_ptr.vmem [resolvable:$true] %s64_s29 }
  0x39   :  { %p6185_p11 = scmp.lt.u32.totalorder %s6181_s11, %s7570_s5 }
  0x3b   :  { %p6187_p12 = pnand %p6185_p11, %p6182_p10 }
  0x3d   :  { %6190 = shalt.err (!%p6187_p12)
}
  0x3e   :  { %s6191_s17 = scalar_lea.vmem %s65_s29, 16384  ;;  %p6196_p0 = scmp.lt.s32.totalorder %s65_s29, %s65_s29 }
  0x3f   :  { %p6192_p13 = scmp.ne.s32.totalorder %s65_s29, %s6191_s17  ;;  %p6197_p1 = scmp.lt.s32.totalorder %s6191_s17, %s6191_s17 }
  0x41   :  { %p6198_p2 = por %p6197_p1, %p6196_p0 }
  0x43   :  { %p6199_p3 = pnand %p6198_p2, %p6192_p13 }
  0x45   :  { %6202 = shalt.err (!%p6199_p3)
}
  0x46   :  { %70 = dma.hbm_to_vmem [thread:$0]  %s7570_s5, 16384, %s65_s29, [#allocation9], %s6211_s22, %s6211_s22, %s6212_s23  }
  0x47   :  { %6203 = dma.done.wait [#allocation4], 4096  }
  0x48   :  { %6204 = vsyncadd [#allocation4], 4294963200 }
  0x49   :  { %6205 = dma.done.wait [#allocation6], 18432  }
  0x4a   :  { %6206 = vsyncadd [#allocation6], 4294948864 }
  0x4b   :  { %6207 = dma.done.wait [#allocation9], 16384  }
  0x4c   :  { %6208 = vsyncadd [#allocation9], 4294950912  ;;  %v6217_v1 = vmov 0   ;;  %v5226_v2 = vld [vmem:[#allocation5 + $0x4] ss:$8 sps:$4 sm:$0xff]   ;;  %v537_v25 = vld [vmem:[#allocation7 + $0x10] sm:$0xff] }
  0x4d   :  { %278 = vmatprep.mubr.bf16.mxu0 %v6217_v1  ;;  %v5228_v3 = vld [vmem:[#allocation5] ss:$8 sps:$4 sm:$0xff]   ;;  %246 = vmatprep.subr.bf16.mxu0 %v5226_v2  ;;  %v5229_v4 = vld [vmem:[#allocation5 + $0x14] ss:$8 sps:$4 sm:$0xff]   ;;  %v5231_v5 = vld [vmem:[#allocation5 + $0x10] ss:$8 sps:$4 sm:$0xff]  }
  0x4e   :  { %247 = vmatpush1.bf16.msra.mxu0 %v5228_v3  ;;  %v5232_v6 = vld [vmem:[#allocation5 + $0x24] ss:$8 sps:$4 sm:$0xff]   ;;  %v5234_v7 = vld [vmem:[#allocation5 + $0x20] ss:$8 sps:$4 sm:$0xff]   ;;  %v5235_v8 = vld [vmem:[#allocation5 + $0x34] ss:$8 sps:$4 sm:$0xff]  }
  0x4f   :  { %248 = vmatprep.subr.bf16.mxu0 %v5229_v4  ;;  %v5237_v9 = vld [vmem:[#allocation5 + $0x30] ss:$8 sps:$4 sm:$0xff]   ;;  %v5238_v10 = vld [vmem:[#allocation5 + $0x44] ss:$8 sps:$4 sm:$0xff]   ;;  %v5240_v11 = vld [vmem:[#allocation5 + $0x40] ss:$8 sps:$4 sm:$0xff]  }
  0x50   :  { %v5241_v12 = vld [vmem:[#allocation5 + $0x54] ss:$8 sps:$4 sm:$0xff]   ;;  %v5243_v13 = vld [vmem:[#allocation5 + $0x50] ss:$8 sps:$4 sm:$0xff]   ;;  %v5244_v14 = vld [vmem:[#allocation5 + $0x64] ss:$8 sps:$4 sm:$0xff]  }
  0x51   :  { %v5246_v15 = vld [vmem:[#allocation5 + $0x60] ss:$8 sps:$4 sm:$0xff]   ;;  %v5247_v16 = vld [vmem:[#allocation5 + $0x74] ss:$8 sps:$4 sm:$0xff]   ;;  %v5249_v19 = vld [vmem:[#allocation5 + $0x70] ss:$8 sps:$4 sm:$0xff]  }
  0x52   :  { %249 = vmatpush1.bf16.msra.mxu0 %v5231_v5  ;;  %v535_v17 = vld [vmem:[#allocation7] sm:$0xff]  ;;  %v91_v21 = vld [vmem:[#allocation3 + $0x8] sm:$0xff]  ;;  %v541_v26 = vld [vmem:[#allocation7 + $0x30] sm:$0xff]  ;;  %vm4584_vm0 = vcmask 7168  }
  0x53   :  { %250 = vmatprep.subr.bf16.mxu0 %v5232_v6  ;;  %v539_v18 = vld [vmem:[#allocation7 + $0x20] sm:$0xff]  ;;  %v4645_v28 = vcombine.high %v537_v25, %v541_v26  ;;  %v4644_v29 = vcombine.low %v537_v25, %v541_v26  ;;  %v545_v30 = vld [vmem:[#allocation7 + $0x50] sm:$0xff]  ;;  %v93_v42 = vld [vmem:[#allocation3 + $0x18] sm:$0xff] }
  0x54   :  { %v90_v20 = vld [vmem:[#allocation3] sm:$0xff]  ;;  %v4641_v22 = vcombine.high %v535_v17, %v539_v18  ;;  %v549_v31 = vld [vmem:[#allocation7 + $0x70] sm:$0xff]  ;;  %v4640_v32 = vcombine.low %v535_v17, %v539_v18  ;;  %v95_v60 = vld [vmem:[#allocation3 + $0x28] sm:$0xff] }
  0x55   :  { %v543_v23 = vld [vmem:[#allocation7 + $0x40] sm:$0xff]  ;;  %v122_v27 = vpack.c.bf16 %v91_v21, %v90_v20  ;;  %v4653_v33 = vcombine.high %v545_v30, %v549_v31  ;;  %v553_v34 = vld [vmem:[#allocation7 + $0x90] sm:$0xff]  ;;  %1731 = vmatprep.subr.bf16.mxu1 %v4645_v28  ;;  %v4652_v39 = vcombine.low %v545_v30, %v549_v31 }
  0x56   :  { %251 = vmatpush1.bf16.msra.mxu0 %v5234_v7  ;;  %v547_v24 = vld [vmem:[#allocation7 + $0x60] sm:$0xff]  ;;  %v557_v35 = vld [vmem:[#allocation7 + $0xb0] sm:$0xff]  ;;  %1732 = vmatpush1.bf16.msra.mxu1 %v4644_v29 }
  0x57   :  { %252 = vmatprep.subr.bf16.mxu0 %v5235_v8  ;;  %v4649_v36 = vcombine.high %v543_v23, %v547_v24  ;;  %v551_v37 = vld [vmem:[#allocation7 + $0x80] sm:$0xff]  ;;  %v92_v40 = vld [vmem:[#allocation3 + $0x10] sm:$0xff]  ;;  %1733 = vmatprep.subr.bf16.mxu1 %v4653_v33  ;;  %v4661_v41 = vcombine.high %v553_v34, %v557_v35  ;;  %v4648_v43 = vcombine.low %v543_v23, %v547_v24 }
  0x58   :  { %v555_v38 = vld [vmem:[#allocation7 + $0xa0] sm:$0xff]  ;;  %v561_v44 = vld [vmem:[#allocation7 + $0xd0] sm:$0xff]  ;;  %v4660_v49 = vcombine.low %v553_v34, %v557_v35  ;;  %v123_v50 = vpack.c.bf16 %v93_v42, %v92_v40  ;;  %v99_v34 = vld [vmem:[#allocation3 + $0x48] sm:$0xff] }
  0x59   :  { %v565_v45 = vld [vmem:[#allocation7 + $0xf0] sm:$0xff]  ;;  %v4657_v46 = vcombine.high %v551_v37, %v555_v38  ;;  %v559_v47 = vld [vmem:[#allocation7 + $0xc0] sm:$0xff]  ;;  %v4656_v52 = vcombine.low %v551_v37, %v555_v38 }
  0x5a   :  { %253 = vmatpush1.bf16.msra.mxu0 %v5237_v9  ;;  %v563_v48 = vld [vmem:[#allocation7 + $0xe0] sm:$0xff]  ;;  %1734 = vmatpush1.bf16.msra.mxu1 %v4652_v39  ;;  %v4669_v51 = vcombine.high %v561_v44, %v565_v45  ;;  %v569_v53 = vld [vmem:[#allocation7 + $0x110] sm:$0xff]  ;;  %v4668_v59 = vcombine.low %v561_v44, %v565_v45 }
  0x5b   :  { %254 = vmatprep.subr.bf16.mxu0 %v5238_v10  ;;  %1735 = vmatprep.subr.bf16.mxu1 %v4661_v41  ;;  %v573_v54 = vld [vmem:[#allocation7 + $0x130] sm:$0xff]  ;;  %v4665_v55 = vcombine.high %v559_v47, %v563_v48  ;;  %v94_v56 = vld [vmem:[#allocation3 + $0x20] sm:$0xff]  ;;  %v4664_v0 = vcombine.low %v559_v47, %v563_v48 }
  0x5c   :  { %v567_v57 = vld [vmem:[#allocation7 + $0x100] sm:$0xff]  ;;  %v4677_v61 = vcombine.high %v569_v53, %v573_v54  ;;  %v577_v62 = vld [vmem:[#allocation7 + $0x150] sm:$0xff]  ;;  %v4676_v5 = vcombine.low %v569_v53, %v573_v54  ;;  %v124_v8 = vpack.c.bf16 %v95_v60, %v94_v56  ;;  %v101_v53 = vld [vmem:[#allocation3 + $0x58] sm:$0xff] }
  0x5d   :  { %v571_v58 = vld [vmem:[#allocation7 + $0x120] sm:$0xff]  ;;  %v581_v63 = vld [vmem:[#allocation7 + $0x170] sm:$0xff] }
  0x5e   :  { %255 = vmatpush1.bf16.msra.mxu0 %v5240_v11  ;;  %1736 = vmatpush1.bf16.msra.mxu1 %v4660_v49  ;;  %v575_v2 = vld [vmem:[#allocation7 + $0x140] sm:$0xff]  ;;  %v4673_v4 = vcombine.high %v567_v57, %v571_v58  ;;  %v585_v6 = vld [vmem:[#allocation7 + $0x190] sm:$0xff]  ;;  %v4685_v9 = vcombine.high %v577_v62, %v581_v63  ;;  %v4672_v10 = vcombine.low %v567_v57, %v571_v58 }
  0x5f   :  { %256 = vmatprep.subr.bf16.mxu0 %v5241_v12  ;;  %1737 = vmatprep.subr.bf16.mxu1 %v4669_v51  ;;  %v579_v3 = vld [vmem:[#allocation7 + $0x160] sm:$0xff]  ;;  %v589_v7 = vld [vmem:[#allocation7 + $0x1b0] sm:$0xff] }
  0x60   :  { %v583_v11 = vld [vmem:[#allocation7 + $0x180] sm:$0xff]  ;;  %v593_v17 = vld [vmem:[#allocation7 + $0x1d0] sm:$0xff]  ;;  %v4680_v20 = vcombine.low %v575_v2, %v579_v3  ;;  %v4692_v24 = vcombine.low %v585_v6, %v589_v7 }
  0x61   :  { %v587_v12 = vld [vmem:[#allocation7 + $0x1a0] sm:$0xff]  ;;  %v597_v18 = vld [vmem:[#allocation7 + $0x1f0] sm:$0xff] }
  0x62   :  { %257 = vmatpush1.bf16.msra.mxu0 %v5243_v13  ;;  %1738 = vmatpush1.bf16.msra.mxu1 %v4668_v59  ;;  %v4681_v13 = vcombine.high %v575_v2, %v579_v3  ;;  %v591_v21 = vld [vmem:[#allocation7 + $0x1c0] sm:$0xff]  ;;  %v4689_v23 = vcombine.high %v583_v11, %v587_v12  ;;  %v601_v25 = vld [vmem:[#allocation7 + $0x210] sm:$0xff]  ;;  %v4701_v28 = vcombine.high %v593_v17, %v597_v18 }
  0x63   :  { %258 = vmatprep.subr.bf16.mxu0 %v5244_v14  ;;  %1739 = vmatprep.subr.bf16.mxu1 %v4677_v61  ;;  %v96_v14 = vld [vmem:[#allocation3 + $0x30] sm:$0xff]  ;;  %v4688_v29 = vcombine.low %v583_v11, %v587_v12  ;;  %v599_v30 = vld [vmem:[#allocation7 + $0x200] sm:$0xff]  ;;  %v4700_v35 = vcombine.low %v593_v17, %v597_v18 }
  0x64   :  { %v605_v26 = vld [vmem:[#allocation7 + $0x230] sm:$0xff]  ;;  %v603_v31 = vld [vmem:[#allocation7 + $0x220] sm:$0xff] }
  0x65   :  { %v98_v33 = vld [vmem:[#allocation3 + $0x40] sm:$0xff]  ;;  %v613_v37 = vld [vmem:[#allocation7 + $0x270] sm:$0xff]  ;;  %v4709_v38 = vcombine.high %v601_v25, %v605_v26  ;;  %v4705_v42 = vcombine.high %v599_v30, %v603_v31  ;;  %v4704_v48 = vcombine.low %v599_v30, %v603_v31 }
  0x66   :  { %259 = vmatpush1.bf16.msra.mxu0 %v5246_v15  ;;  %v97_v15 = vld [vmem:[#allocation3 + $0x38] sm:$0xff]  ;;  %1740 = vmatpush1.bf16.msra.mxu1 %v4676_v5  ;;  %v607_v40 = vld [vmem:[#allocation7 + $0x240] sm:$0xff]  ;;  %v617_v44 = vld [vmem:[#allocation7 + $0x290] sm:$0xff] }
  0x67   :  { %260 = vmatprep.subr.bf16.mxu0 %v5247_v16  ;;  %v4684_v16 = vcombine.low %v577_v62, %v581_v63  ;;  %1741 = vmatprep.subr.bf16.mxu1 %v4685_v9  ;;  %v611_v41 = vld [vmem:[#allocation7 + $0x260] sm:$0xff]  ;;  %v621_v45 = vld [vmem:[#allocation7 + $0x2b0] sm:$0xff]  ;;  %v103_v9 = vld [vmem:[#allocation3 + $0x68] sm:$0xff] }
  0x68   :  { %v615_v49 = vld [vmem:[#allocation7 + $0x280] sm:$0xff]  ;;  %v4713_v51 = vcombine.high %v607_v40, %v611_v41  ;;  %v629_v56 = vld [vmem:[#allocation7 + $0x2f0] sm:$0xff]  ;;  %v4725_v57 = vcombine.high %v617_v44, %v621_v45  ;;  %v4712_v58 = vcombine.low %v607_v40, %v611_v41  ;;  %v4724_v62 = vcombine.low %v617_v44, %v621_v45  ;;  %v113_v41 = vld [vmem:[#allocation3 + $0xb8] sm:$0xff] }
  0x69   :  { %v623_v59 = vld [vmem:[#allocation7 + $0x2c0] sm:$0xff]  ;;  %v633_v63 = vld [vmem:[#allocation7 + $0x310] sm:$0xff] }
  0x6a   :  { %261 = vmatpush1.bf16.msra.mxu0 %v5249_v19  ;;  %v4693_v19 = vcombine.high %v585_v6, %v589_v7  ;;  %1742 = vmatpush1.bf16.msra.mxu1 %v4684_v16  ;;  %v627_v60 = vld [vmem:[#allocation7 + $0x2e0] sm:$0xff]  ;;  %v641_v11 = vld [vmem:[#allocation7 + $0x350] sm:$0xff] }
  0x6b   :  { %1345 = vmatprep.subr.bf16.mxu0 %v4641_v22  ;;  %v595_v22 = vld [vmem:[#allocation7 + $0x1e0] sm:$0xff]  ;;  %v4729_v7 = vcombine.high %v623_v59, %v627_v60  ;;  %v645_v12 = vld [vmem:[#allocation7 + $0x370] sm:$0xff] }
  0x6c   :  { %1743 = vmatprep.subr.bf16.mxu1 %v4693_v19  ;;  %v4696_v39 = vcombine.low %v591_v21, %v595_v22  ;;  %v631_v5 = vld [vmem:[#allocation7 + $0x300] sm:$0xff]  ;;  %v112_v40 = vld [vmem:[#allocation3 + $0xb0] sm:$0xff] }
  0x6d   :  { %279 = vmatmul.mubr.bf16.vlgmr.msra.gmra.mrb[0].mxu0 %v122_v27  ;;  %v125_v27 = vpack.c.bf16 %v97_v15, %v96_v14  ;;  %v635_v6 = vld [vmem:[#allocation7 + $0x320] sm:$0xff]  ;;  %v4728_v14 = vcombine.low %v623_v59, %v627_v60  ;;  %v653_v44 = vld [vmem:[#allocation7 + $0x3b0] sm:$0xff]  ;;  %v133_v45 = vpack.c.bf16 %v113_v41, %v112_v40  ;;  %v117_v60 = vld [vmem:[#allocation3 + $0xd8] sm:$0xff] }
  0x6e   :  { %288 = vmatprep.mubr.bf16.mxu0 %v6217_v1  ;;  %1346 = vmatpush1.bf16.msra.mxu0 %v4640_v32  ;;  %v4697_v32 = vcombine.high %v591_v21, %v595_v22  ;;  %v639_v15 = vld [vmem:[#allocation7 + $0x340] sm:$0xff]  ;;  %v4737_v17 = vcombine.high %v631_v5, %v635_v6  ;;  %v4736_v21 = vcombine.low %v631_v5, %v635_v6  ;;  %v116_v59 = vld [vmem:[#allocation3 + $0xd0] sm:$0xff]  ;;  %v552_v40 = vld [vmem:[#allocation7 + $0x88] sm:$0xff] }
  0x6f   :  { %1347 = vmatprep.subr.bf16.mxu0 %v4649_v36  ;;  %1744 = vmatpush1.bf16.msra.mxu1 %v4692_v24  ;;  %v609_v36 = vld [vmem:[#allocation7 + $0x250] sm:$0xff]  ;;  %v643_v16 = vld [vmem:[#allocation7 + $0x360] sm:$0xff]  ;;  %v556_v41 = vld [vmem:[#allocation7 + $0xa8] sm:$0xff] }
  0x70   :  { %1745 = vmatprep.subr.bf16.mxu1 %v4701_v28  ;;  %v4717_v47 = vcombine.high %v609_v36, %v613_v37  ;;  %v4716_v54 = vcombine.low %v609_v36, %v613_v37  ;;  %v647_v22 = vld [vmem:[#allocation7 + $0x380] sm:$0xff]  ;;  %v4745_v24 = vcombine.high %v639_v15, %v643_v16  ;;  %v120_v6 = vld [vmem:[#allocation3 + $0xf0] sm:$0xff] }
  0x71   :  { %v106_v31 = vld [vmem:[#allocation3 + $0x80] sm:$0xff] }
  0x72   :  { %1348 = vmatpush1.bf16.msra.mxu0 %v4648_v43  ;;  %v4708_v43 = vcombine.low %v601_v25, %v605_v26  ;;  %v104_v25 = vld [vmem:[#allocation3 + $0x70] sm:$0xff]  ;;  %v105_v26 = vld [vmem:[#allocation3 + $0x78] sm:$0xff]  ;;  %v110_v37 = vld [vmem:[#allocation3 + $0xa0] sm:$0xff] }
  0x73   :  { %1349 = vmatprep.subr.bf16.mxu0 %v4657_v46  ;;  %1746 = vmatpush1.bf16.msra.mxu1 %v4700_v35  ;;  %v126_v46 = vpack.c.bf16 %v99_v34, %v98_v33  ;;  %v108_v34 = vld [vmem:[#allocation3 + $0x90] sm:$0xff]  ;;  %v109_v35 = vld [vmem:[#allocation3 + $0x98] sm:$0xff] }
  0x74   :  { %1747 = vmatprep.subr.bf16.mxu1 %v4709_v38  ;;  %v131_v36 = vpack.c.bf16 %v109_v35, %v108_v34  ;;  %v111_v38 = vld [vmem:[#allocation3 + $0xa8] sm:$0xff] }
  0x75   :  { %289 = vmatmul.mubr.bf16.gmra.mrb[4].mxu0 %v123_v50  ;;  %v619_v50 = vld [vmem:[#allocation7 + $0x2a0] sm:$0xff] }
  0x76   :  { %298 = vmatprep.mubr.bf16.mxu0 %v6217_v1  ;;  %1350 = vmatpush1.bf16.msra.mxu0 %v4656_v52  ;;  %v100_v52 = vld [vmem:[#allocation3 + $0x50] sm:$0xff]  ;;  %v4721_v61 = vcombine.high %v615_v49, %v619_v50 }
  0x77   :  { %1351 = vmatprep.subr.bf16.mxu0 %v4665_v55  ;;  %1748 = vmatpush1.bf16.msra.mxu1 %v4708_v43  ;;  %v625_v55 = vld [vmem:[#allocation7 + $0x2d0] sm:$0xff]  ;;  %v127_v2 = vpack.c.bf16 %v101_v53, %v100_v52  ;;  %v114_v53 = vld [vmem:[#allocation3 + $0xc0] sm:$0xff] }
  0x78   :  { %1749 = vmatprep.subr.bf16.mxu1 %v4717_v47  ;;  %v4733_v3 = vcombine.high %v625_v55, %v629_v56  ;;  %v649_v43 = vld [vmem:[#allocation7 + $0x390] sm:$0xff] }
  0x79   :  { %v4756_v47 = vcombine.low %v649_v43, %v653_v44  ;;  %v661_v52 = vld [vmem:[#allocation7 + $0x3f0] sm:$0xff] }
  0x7a   :  { %1352 = vmatpush1.bf16.msra.mxu0 %v4664_v0  ;;  %v637_v0 = vld [vmem:[#allocation7 + $0x330] sm:$0xff] }
  0x7b   :  { %1353 = vmatprep.subr.bf16.mxu0 %v4673_v4  ;;  %1750 = vmatpush1.bf16.msra.mxu1 %v4716_v54  ;;  %v4720_v4 = vcombine.low %v615_v49, %v619_v50  ;;  %v4740_v18 = vcombine.low %v633_v63, %v637_v0  ;;  %v659_v49 = vld [vmem:[#allocation7 + $0x3e0] sm:$0xff]  ;;  %v657_v50 = vld [vmem:[#allocation7 + $0x3d0] sm:$0xff]  ;;  %v115_v54 = vld [vmem:[#allocation3 + $0xc8] sm:$0xff] }
  0x7c   :  { %1751 = vmatprep.subr.bf16.mxu1 %v4725_v57  ;;  %v4764_v57 = vcombine.low %v657_v50, %v661_v52 }
  0x7d   :  { %299 = vmatmul.mubr.bf16.gmra.mrb[8].mxu0 %v124_v8  ;;  %v102_v8 = vld [vmem:[#allocation3 + $0x60] sm:$0xff] }
  0x7e   :  { %308 = vmatprep.mubr.bf16.mxu0 %v6217_v1  ;;  %1354 = vmatpush1.bf16.msra.mxu0 %v4672_v10  ;;  %v4732_v10 = vcombine.low %v625_v55, %v629_v56  ;;  %v128_v19 = vpack.c.bf16 %v103_v9, %v102_v8  ;;  %v4765_v56 = vcombine.high %v657_v50, %v661_v52  ;;  %v156_v9 = vlaneseq  ;;  %v5258_v50 = vld [vmem:[#allocation8 + $0x24] ss:$8 sps:$4 sm:$0xff]  }
  0x7f   :  { %1355 = vmatprep.subr.bf16.mxu0 %v4681_v13  ;;  %1752 = vmatpush1.bf16.msra.mxu1 %v4724_v62  ;;  %v4741_v13 = vcombine.high %v633_v63, %v637_v0  ;;  %v540_v62 = vld [vmem:[#allocation7 + $0x28] sm:$0xff] }
  0x80   :  { %1753 = vmatprep.subr.bf16.mxu1 %v4733_v3  ;;  %v118_v3 = vld [vmem:[#allocation3 + $0xe0] sm:$0xff] }
  0x82   :  { %1356 = vmatpush1.bf16.msra.mxu0 %v4680_v20  ;;  %v4749_v20 = vcombine.high %v641_v11, %v645_v12 }
  0x83   :  { %1357 = vmatprep.subr.bf16.mxu0 %v4689_v23  ;;  %1754 = vmatpush1.bf16.msra.mxu1 %v4732_v10  ;;  %v651_v23 = vld [vmem:[#allocation7 + $0x3a0] sm:$0xff] }
  0x84   :  { %1755 = vmatprep.subr.bf16.mxu1 %v4741_v13  ;;  %v4753_v28 = vcombine.high %v647_v22, %v651_v23  ;;  %v4752_v30 = vcombine.low %v647_v22, %v651_v23  ;;  %v5252_v10 = vld [vmem:[#allocation8 + $0x4] ss:$8 sps:$4 sm:$0xff]   ;;  %v154_v13 = vld [vmem:[%s7567_s2] sm:$0x3] }
  0x85   :  { %309 = vmatmul.mubr.bf16.gmra.mrb[12].mxu0 %v125_v27  ;;  %v4744_v27 = vcombine.low %v639_v15, %v643_v16 }
  0x86   :  { %318 = vmatprep.mubr.bf16.mxu0 %v6217_v1  ;;  %1358 = vmatpush1.bf16.msra.mxu0 %v4688_v29  ;;  %v129_v29 = vpack.c.bf16 %v105_v26, %v104_v25 }
  0x87   :  { %1359 = vmatprep.subr.bf16.mxu0 %v4697_v32  ;;  %1756 = vmatpush1.bf16.msra.mxu1 %v4740_v18  ;;  %v107_v32 = vld [vmem:[#allocation3 + $0x88] sm:$0xff] }
  0x88   :  { %1757 = vmatprep.subr.bf16.mxu1 %v4749_v20  ;;  %v130_v33 = vpack.c.bf16 %v107_v32, %v106_v31 }
  0x8a   :  { %1360 = vmatpush1.bf16.msra.mxu0 %v4696_v39  ;;  %v132_v39 = vpack.c.bf16 %v111_v38, %v110_v37  ;;  %v5255_v37 = vld [vmem:[#allocation8 + $0x14] ss:$8 sps:$4 sm:$0xff]  }
  0x8b   :  { %1361 = vmatprep.subr.bf16.mxu0 %v4705_v42  ;;  %v4748_v42 = vcombine.low %v641_v11, %v645_v12  ;;  %v6351_v11 = vshrl.u32 %v156_v9, 7  ;;  %v5259_v9 = vld [vmem:[#allocation8 + $0x30] ss:$8 sps:$4 sm:$0xff]  }
  0x8d   :  { %319 = vmatmul.mubr.bf16.gmra.mrb[16].mxu0 %v126_v46  ;;  %1758 = vmatpush1.bf16.msra.mxu1 %v4748_v42  ;;  %v4757_v46 = vcombine.high %v649_v43, %v653_v44  ;;  %v6354_v12 = vsub.s32 0, %v6351_v11 }
  0x8e   :  { %328 = vmatprep.mubr.bf16.mxu0 %v6217_v1  ;;  %1362 = vmatpush1.bf16.msra.mxu0 %v4704_v48  ;;  %v655_v48 = vld [vmem:[#allocation7 + $0x3c0] sm:$0xff] }
  0x8f   :  { %1363 = vmatprep.subr.bf16.mxu0 %v4713_v51  ;;  %1759 = vmatprep.subr.bf16.mxu1 %v4757_v46  ;;  %v4761_v51 = vcombine.high %v655_v48, %v659_v49  ;;  %v4760_v55 = vcombine.low %v655_v48, %v659_v49  ;;  %7609 = vst [vmem:[#allocation13_spill] sm:$0xff] %v6354_v12  ;;  %v5253_v46 = vld [vmem:[#allocation8 + $0x10] ss:$8 sps:$4 sm:$0xff]  }
  0x90   :  { %v4659_v49 = vcombine.high %v552_v40, %v556_v41 }
  0x91   :  { %1760 = vmatpush1.bf16.msra.mxu1 %v4756_v47 }
  0x92   :  { %1364 = vmatpush1.bf16.msra.mxu0 %v4712_v58  ;;  %1761 = vmatprep.subr.bf16.mxu1 %v4765_v56  ;;  %v134_v58 = vpack.c.bf16 %v115_v54, %v114_v53  ;;  %v560_v53 = vld [vmem:[#allocation7 + $0xc8] sm:$0xff] }
  0x93   :  { %1365 = vmatprep.subr.bf16.mxu0 %v4721_v61  ;;  %v536_v61 = vld [vmem:[#allocation7 + $0x8] sm:$0xff] }
  0x94   :  { %v4642_v63 = vcombine.low %v536_v61, %v540_v62  ;;  %v4643_v0 = vcombine.high %v536_v61, %v540_v62  ;;  %v564_v54 = vld [vmem:[#allocation7 + $0xe8] sm:$0xff] }
  0x95   :  { %329 = vmatmul.mubr.bf16.gmra.mrb[20].mxu0 %v127_v2  ;;  %1762 = vmatpush1.bf16.msra.mxu1 %v4764_v57  ;;  %v135_v2 = vpack.c.bf16 %v117_v60, %v116_v59  ;;  %v5256_v59 = vld [vmem:[#allocation8 + $0x20] ss:$8 sps:$4 sm:$0xff]   ;;  %v4667_v62 = vcombine.high %v560_v53, %v564_v54 }
  0x96   :  { %338 = vmatprep.mubr.bf16.mxu0 %v6217_v1  ;;  %1366 = vmatpush1.bf16.msra.mxu0 %v4720_v4  ;;  %v119_v4 = vld [vmem:[#allocation3 + $0xe8] sm:$0xff] }
  0x97   :  { %1367 = vmatprep.subr.bf16.mxu0 %v4729_v7  ;;  %v136_v5 = vpack.c.bf16 %v119_v4, %v118_v3  ;;  %v121_v7 = vld [vmem:[#allocation3 + $0xf8] sm:$0xff]  ;;  %3281 = vmatprep.subr.bf16.mxu1 %v5252_v10  ;;  %v568_v3 = vld [vmem:[#allocation7 + $0x108] sm:$0xff] }
  0x98   :  { %v137_v8 = vpack.c.bf16 %v121_v7, %v120_v6  ;;  %v572_v4 = vld [vmem:[#allocation7 + $0x128] sm:$0xff] }
  0x9a   :  { %1368 = vmatpush1.bf16.msra.mxu0 %v4728_v14  ;;  %v6360_v14 = vsub.s32 1, %v6351_v11 }
  0x9b   :  { %1369 = vmatprep.subr.bf16.mxu0 %v4737_v17 }
  0x9c   :  { %7610 = vst [vmem:[#allocation14_spill] sm:$0xff] %v6360_v14  ;;  %v6366_v15 = vrot.slane %v154_v13, %v6360_v14 }
  0x9d   :  { %339 = vmatmul.mubr.bf16.gmra.mrb[24].mxu0 %v128_v19 }
  0x9e   :  { %348 = vmatprep.mubr.bf16.mxu0 %v6217_v1  ;;  %1370 = vmatpush1.bf16.msra.mxu0 %v4736_v21 }
  0x9f   :  { %1371 = vmatprep.subr.bf16.mxu0 %v4745_v24 }
  0xa2   :  { %1372 = vmatpush1.bf16.msra.mxu0 %v4744_v27 }
  0xa3   :  { %1373 = vmatprep.subr.bf16.mxu0 %v4753_v28  ;;  %v544_v28 = vld [vmem:[#allocation7 + $0x48] sm:$0xff] }
  0xa5   :  { %349 = vmatmul.mubr.bf16.gmra.mrb[28].mxu0 %v129_v29  ;;  %v548_v29 = vld [vmem:[#allocation7 + $0x68] sm:$0xff] }
  0xa6   :  { %358 = vmatprep.mubr.bf16.mxu0 %v6217_v1  ;;  %1374 = vmatpush1.bf16.msra.mxu0 %v4752_v30 }
  0xa7   :  { %1375 = vmatprep.subr.bf16.mxu0 %v4761_v51 }
  0xaa   :  { %1376 = vmatpush1.bf16.msra.mxu0 %v4760_v55 }
  0xab   :  { %1538 = vmatprep.subr.bf16.mxu0 %v4643_v0 }
  0xad   :  { %359 = vmatmul.mubr.bf16.gmra.mrb[32].mxu0 %v130_v33  ;;  %v5250_v33 = vld [vmem:[#allocation8] ss:$8 sps:$4 sm:$0xff]  }
  0xae   :  { %368 = vmatprep.mubr.bf16.mxu0 %v6217_v1 }
  0xb5   :  { %369 = vmatmul.mubr.bf16.gmra.mrb[36].mxu0 %v131_v36  ;;  %v4651_v36 = vcombine.high %v544_v28, %v548_v29 }
  0xb6   :  { %378 = vmatprep.mubr.bf16.mxu0 %v6217_v1 }
  0xbd   :  { %379 = vmatmul.mubr.bf16.gmra.mrb[40].mxu0 %v132_v39 }
  0xbe   :  { %388 = vmatprep.mubr.bf16.mxu0 %v6217_v1 }
  0xc5   :  { %389 = vmatmul.mubr.bf16.gmra.mrb[44].mxu0 %v133_v45  ;;  %v4650_v45 = vcombine.low %v544_v28, %v548_v29 }
  0xc6   :  { %398 = vmatprep.mubr.bf16.mxu0 %v6217_v1 }
  0xcd   :  { %399 = vmatmul.mubr.bf16.gmra.mrb[48].mxu0 %v134_v58  ;;  %v4658_v58 = vcombine.low %v552_v40, %v556_v41  ;;  %v5265_v41 = vld [vmem:[#allocation8 + $0x50] ss:$8 sps:$4 sm:$0xff]  }
  0xce   :  { %408 = vmatprep.mubr.bf16.mxu0 %v6217_v1 }
  0xd5   :  { %409 = vmatmul.mubr.bf16.gmra.mrb[52].mxu0 %v135_v2 }
  0xd6   :  { %418 = vmatprep.mubr.bf16.mxu0 %v6217_v1 }
  0xdd   :  { %419 = vmatmul.mubr.bf16.gmra.mrb[56].mxu0 %v136_v5 }
  0xde   :  { %428 = vmatprep.mubr.bf16.mxu0 %v6217_v1  ;;  %v6363_v1 = vrot.slane %v154_v13, %v6354_v12 }
  0xe5   :  { %429 = vmatmul.mubr.bf16.gmra.mrb[60].mxu0 %v137_v8  ;;  %v4666_v8 = vcombine.low %v560_v53, %v564_v54  ;;  %v5268_v54 = vld [vmem:[#allocation8 + $0x60] ss:$8 sps:$4 sm:$0xff]  }
 0x140   :  { %v280_v16 = vpop.f32.mrb[0].mxu0 }
 0x141   :  { %v281_v17 = vadd.f32 %v280_v16, %v6363_v1  ;;  %v282_v18 = vpop.f32.mrb[1].mxu0  ;;  %v4675_v16 = vcombine.high %v568_v3, %v572_v4 }
 0x142   :  { %v283_v19 = vadd.f32 %v282_v18, %v6366_v15  ;;  %v284_v20 = vpop.f32.mrb[2].mxu0 }
 0x143   :  { %v285_v21 = vadd.f32 %v284_v20, %v6363_v1  ;;  %v286_v22 = vpop.f32.mrb[3].mxu0  ;;  %v439_v24 = vmax.f32 %v281_v17, 0.0  ;;  %v5264_v17 = vld [vmem:[#allocation8 + $0x44] ss:$8 sps:$4 sm:$0xff]  }
 0x144   :  { %v287_v23 = vadd.f32 %v286_v22, %v6366_v15  ;;  %v440_v26 = vmax.f32 %v283_v19, 0.0  ;;  %v576_v20 = vld [vmem:[#allocation7 + $0x148] sm:$0xff] }
 0x145   :  { %v441_v25 = vmax.f32 %v285_v21, 0.0  ;;  %v580_v21 = vld [vmem:[#allocation7 + $0x168] sm:$0xff] }
 0x146   :  { %v442_v27 = vmax.f32 %v287_v23, 0.0  ;;  %v4683_v29 = vcombine.high %v576_v20, %v580_v21  ;;  %v4682_v40 = vcombine.low %v576_v20, %v580_v21 }
 0x147   :  { %v6372_v30 = vpack.c.bf16 %v441_v25, %v439_v24  ;;  %v4674_v25 = vcombine.low %v568_v3, %v572_v4 }
 0x148   :  { %v6374_v31 = vpack.c.bf16 %v442_v27, %v440_v26  ;;  %v290_v32 = vpop.f32.mrb[4].mxu0  ;;  %v5262_v26 = vld [vmem:[#allocation8 + $0x40] ss:$8 sps:$4 sm:$0xff]  }
 0x149   :  { %v291_v34 = vadd.f32 %v290_v32, %v6363_v1  ;;  %v292_v35 = vpop.f32.mrb[5].mxu0  ;;  %v5267_v32 = vld [vmem:[#allocation8 + $0x54] ss:$8 sps:$4 sm:$0xff]  }
 0x14a   :  { %v293_v38 = vadd.f32 %v292_v35, %v6366_v15  ;;  %v294_v39 = vpop.f32.mrb[6].mxu0  ;;  %1377 = vmatprep.mubr.bf16.mxu0 %v6374_v31  ;;  %1763 = vmatprep.mubr.bf16.mxu1 %v6374_v31  ;;  %v584_v35 = vld [vmem:[#allocation7 + $0x188] sm:$0xff] }
 0x14b   :  { %v295_v42 = vadd.f32 %v294_v39, %v6363_v1  ;;  %v296_v43 = vpop.f32.mrb[7].mxu0  ;;  %1378 = vmatmul.mubr.bf16.vlgmr.msra.gmra.mrb[64].mxu0 %v6372_v30  ;;  %1764 = vmatmul.mubr.bf16.vlgmr.msra.gmra.mrb[0].mxu1 %v6372_v30  ;;  %v443_v47 = vmax.f32 %v291_v34, 0.0 }
 0x14c   :  { %v297_v44 = vadd.f32 %v296_v43, %v6366_v15  ;;  %1539 = vmatpush1.bf16.msra.mxu0 %v4642_v63  ;;  %3282 = vmatpush1.bf16.msra.mxu1 %v5250_v33  ;;  %v444_v51 = vmax.f32 %v293_v38, 0.0  ;;  %v5261_v63 = vld [vmem:[#allocation8 + $0x34] ss:$8 sps:$4 sm:$0xff]  }
 0x14d   :  { %v445_v48 = vmax.f32 %v295_v42, 0.0  ;;  %1540 = vmatprep.subr.bf16.mxu0 %v4651_v36  ;;  %3283 = vmatprep.subr.bf16.mxu1 %v5255_v37  ;;  %v588_v36 = vld [vmem:[#allocation7 + $0x1a8] sm:$0xff] }
 0x14e   :  { %v446_v52 = vmax.f32 %v297_v44, 0.0  ;;  %v4691_v44 = vcombine.high %v584_v35, %v588_v36  ;;  %v4690_v53 = vcombine.low %v584_v35, %v588_v36 }
 0x14f   :  { %v6384_v55 = vpack.c.bf16 %v445_v48, %v443_v47  ;;  %v592_v48 = vld [vmem:[#allocation7 + $0x1c8] sm:$0xff] }
 0x150   :  { %v6386_v56 = vpack.c.bf16 %v446_v52, %v444_v51  ;;  %v300_v57 = vpop.f32.mrb[8].mxu0  ;;  %1541 = vmatpush1.bf16.msra.mxu0 %v4650_v45  ;;  %3284 = vmatpush1.bf16.msra.mxu1 %v5253_v46  ;;  %v5270_v45 = vld [vmem:[#allocation8 + $0x64] ss:$8 sps:$4 sm:$0xff]  }
 0x151   :  { %v301_v60 = vadd.f32 %v300_v57, %v6363_v1  ;;  %v302_v61 = vpop.f32.mrb[9].mxu0  ;;  %1542 = vmatprep.subr.bf16.mxu0 %v4659_v49  ;;  %3285 = vmatprep.subr.bf16.mxu1 %v5258_v50  ;;  %v596_v49 = vld [vmem:[#allocation7 + $0x1e8] sm:$0xff] }
 0x152   :  { %v303_v0 = vadd.f32 %v302_v61, %v6366_v15  ;;  %v304_v2 = vpop.f32.mrb[10].mxu0  ;;  %1387 = vmatprep.mubr.bf16.mxu0 %v6386_v56  ;;  %1773 = vmatprep.mubr.bf16.mxu1 %v6386_v56  ;;  %v4698_v4 = vcombine.low %v592_v48, %v596_v49 }
 0x153   :  { %v305_v5 = vadd.f32 %v304_v2, %v6363_v1  ;;  %v306_v6 = vpop.f32.mrb[11].mxu0  ;;  %1388 = vmatmul.mubr.bf16.gmra.mrb[68].mxu0 %v6384_v55  ;;  %1774 = vmatmul.mubr.bf16.gmra.mrb[4].mxu1 %v6384_v55  ;;  %v447_v10 = vmax.f32 %v301_v60, 0.0 }
 0x154   :  { %v307_v7 = vadd.f32 %v306_v6, %v6366_v15  ;;  %1543 = vmatpush1.bf16.msra.mxu0 %v4658_v58  ;;  %3286 = vmatpush1.bf16.msra.mxu1 %v5256_v59  ;;  %v448_v18 = vmax.f32 %v303_v0, 0.0  ;;  %v4699_v59 = vcombine.high %v592_v48, %v596_v49  ;;  %v5273_v6 = vld [vmem:[#allocation8 + $0x74] ss:$8 sps:$4 sm:$0xff]  }
 0x155   :  { %v449_v13 = vmax.f32 %v305_v5, 0.0  ;;  %1544 = vmatprep.subr.bf16.mxu0 %v4667_v62  ;;  %3287 = vmatprep.subr.bf16.mxu1 %v5261_v63  ;;  %v600_v62 = vld [vmem:[#allocation7 + $0x208] sm:$0xff]  ;;  %v5271_v5 = vld [vmem:[#allocation8 + $0x70] ss:$8 sps:$4 sm:$0xff]  }
 0x156   :  { %v450_v19 = vmax.f32 %v307_v7, 0.0  ;;  %v604_v63 = vld [vmem:[#allocation7 + $0x228] sm:$0xff] }
 0x157   :  { %v6396_v22 = vpack.c.bf16 %v449_v13, %v447_v10  ;;  %v4706_v21 = vcombine.low %v600_v62, %v604_v63 }
 0x158   :  { %v6398_v23 = vpack.c.bf16 %v450_v19, %v448_v18  ;;  %v310_v24 = vpop.f32.mrb[12].mxu0  ;;  %1545 = vmatpush1.bf16.msra.mxu0 %v4666_v8  ;;  %3288 = vmatpush1.bf16.msra.mxu1 %v5259_v9  ;;  %v4707_v9 = vcombine.high %v600_v62, %v604_v63 }
 0x159   :  { %v311_v27 = vadd.f32 %v310_v24, %v6363_v1  ;;  %v312_v28 = vpop.f32.mrb[13].mxu0  ;;  %1546 = vmatprep.subr.bf16.mxu0 %v4675_v16  ;;  %3289 = vmatprep.subr.bf16.mxu1 %v5264_v17  ;;  %v608_v16 = vld [vmem:[#allocation7 + $0x248] sm:$0xff] }
 0x15a   :  { %v313_v33 = vadd.f32 %v312_v28, %v6366_v15  ;;  %v314_v34 = vpop.f32.mrb[14].mxu0  ;;  %1397 = vmatprep.mubr.bf16.mxu0 %v6398_v23  ;;  %1783 = vmatprep.mubr.bf16.mxu1 %v6398_v23  ;;  %v612_v17 = vld [vmem:[#allocation7 + $0x268] sm:$0xff] }
 0x15b   :  { %v315_v37 = vadd.f32 %v314_v34, %v6363_v1  ;;  %v316_v38 = vpop.f32.mrb[15].mxu0  ;;  %1398 = vmatmul.mubr.bf16.gmra.mrb[72].mxu0 %v6396_v22  ;;  %1784 = vmatmul.mubr.bf16.gmra.mrb[8].mxu1 %v6396_v22  ;;  %v451_v42 = vmax.f32 %v311_v27, 0.0  ;;  %v4714_v36 = vcombine.low %v608_v16, %v612_v17 }
 0x15c   :  { %v317_v39 = vadd.f32 %v316_v38, %v6366_v15  ;;  %1547 = vmatpush1.bf16.msra.mxu0 %v4674_v25  ;;  %3290 = vmatpush1.bf16.msra.mxu1 %v5262_v26  ;;  %v452_v46 = vmax.f32 %v313_v33, 0.0  ;;  %v4715_v26 = vcombine.high %v608_v16, %v612_v17  ;;  %v5276_v38 = vld [vmem:[#allocation8 + $0x84] ss:$8 sps:$4 sm:$0xff]  }
 0x15d   :  { %v453_v43 = vmax.f32 %v315_v37, 0.0  ;;  %1548 = vmatprep.subr.bf16.mxu0 %v4683_v29  ;;  %3291 = vmatprep.subr.bf16.mxu1 %v5267_v32  ;;  %v616_v29 = vld [vmem:[#allocation7 + $0x288] sm:$0xff] }
 0x15e   :  { %v454_v47 = vmax.f32 %v317_v39, 0.0  ;;  %v620_v32 = vld [vmem:[#allocation7 + $0x2a8] sm:$0xff] }
 0x15f   :  { %v6408_v50 = vpack.c.bf16 %v453_v43, %v451_v42  ;;  %v5274_v37 = vld [vmem:[#allocation8 + $0x80] ss:$8 sps:$4 sm:$0xff]   ;;  %v4722_v49 = vcombine.low %v616_v29, %v620_v32 }
 0x160   :  { %v6410_v51 = vpack.c.bf16 %v454_v47, %v452_v46  ;;  %v320_v52 = vpop.f32.mrb[16].mxu0  ;;  %1549 = vmatpush1.bf16.msra.mxu0 %v4682_v40  ;;  %3292 = vmatpush1.bf16.msra.mxu1 %v5265_v41  ;;  %v4723_v41 = vcombine.high %v616_v29, %v620_v32  ;;  %v644_v16 = vld [vmem:[#allocation7 + $0x368] sm:$0xff] }
 0x161   :  { %v321_v57 = vadd.f32 %v320_v52, %v6363_v1  ;;  %v322_v58 = vpop.f32.mrb[17].mxu0  ;;  %1550 = vmatprep.subr.bf16.mxu0 %v4691_v44  ;;  %3293 = vmatprep.subr.bf16.mxu1 %v5270_v45  ;;  %v624_v44 = vld [vmem:[#allocation7 + $0x2c8] sm:$0xff] }
 0x162   :  { %v323_v60 = vadd.f32 %v322_v58, %v6366_v15  ;;  %v324_v61 = vpop.f32.mrb[18].mxu0  ;;  %1407 = vmatprep.mubr.bf16.mxu0 %v6410_v51  ;;  %1793 = vmatprep.mubr.bf16.mxu1 %v6410_v51  ;;  %v628_v45 = vld [vmem:[#allocation7 + $0x2e8] sm:$0xff] }
 0x163   :  { %v325_v0 = vadd.f32 %v324_v61, %v6363_v1  ;;  %v326_v2 = vpop.f32.mrb[19].mxu0  ;;  %1408 = vmatmul.mubr.bf16.gmra.mrb[76].mxu0 %v6408_v50  ;;  %1794 = vmatmul.mubr.bf16.gmra.mrb[12].mxu1 %v6408_v50  ;;  %v455_v7 = vmax.f32 %v321_v57, 0.0 }
 0x164   :  { %v327_v3 = vadd.f32 %v326_v2, %v6366_v15  ;;  %1551 = vmatpush1.bf16.msra.mxu0 %v4690_v53  ;;  %3294 = vmatpush1.bf16.msra.mxu1 %v5268_v54  ;;  %v456_v10 = vmax.f32 %v323_v60, 0.0  ;;  %v4731_v54 = vcombine.high %v624_v44, %v628_v45  ;;  %v636_v60 = vld [vmem:[#allocation7 + $0x328] sm:$0xff]  ;;  %v5277_v2 = vld [vmem:[#allocation8 + $0x90] ss:$8 sps:$4 sm:$0xff]  }
 0x165   :  { %v457_v8 = vmax.f32 %v325_v0, 0.0  ;;  %1552 = vmatprep.subr.bf16.mxu0 %v4699_v59  ;;  %3295 = vmatprep.subr.bf16.mxu1 %v5273_v6  ;;  %v632_v59 = vld [vmem:[#allocation7 + $0x308] sm:$0xff]  ;;  %v4730_v0 = vcombine.low %v624_v44, %v628_v45 }
 0x166   :  { %v458_v13 = vmax.f32 %v327_v3, 0.0  ;;  %v5279_v3 = vld [vmem:[#allocation8 + $0x94] ss:$8 sps:$4 sm:$0xff]  }
 0x167   :  { %v6420_v18 = vpack.c.bf16 %v457_v8, %v455_v7  ;;  %v4739_v7 = vcombine.high %v632_v59, %v636_v60  ;;  %v6446_v8 = vld [vmem:[#allocation7 + $0x38] sm:$0xff] }
 0x168   :  { %v6422_v19 = vpack.c.bf16 %v458_v13, %v456_v10  ;;  %v330_v20 = vpop.f32.mrb[20].mxu0  ;;  %1553 = vmatpush1.bf16.msra.mxu0 %v4698_v4  ;;  %3296 = vmatpush1.bf16.msra.mxu1 %v5271_v5  ;;  %v6444_v4 = vld [vmem:[#allocation7 + $0x18] sm:$0xff]  ;;  %v640_v13 = vld [vmem:[#allocation7 + $0x348] sm:$0xff] }
 0x169   :  { %v331_v24 = vadd.f32 %v330_v20, %v6363_v1  ;;  %v332_v25 = vpop.f32.mrb[21].mxu0  ;;  %1554 = vmatprep.subr.bf16.mxu0 %v4707_v9  ;;  %3297 = vmatprep.subr.bf16.mxu1 %v5276_v38  ;;  %v4646_v17 = vcombine.low %v6444_v4, %v6446_v8  ;;  %v4746_v38 = vcombine.low %v640_v13, %v644_v16 }
 0x16a   :  { %v333_v27 = vadd.f32 %v332_v25, %v6366_v15  ;;  %v334_v28 = vpop.f32.mrb[22].mxu0  ;;  %1417 = vmatprep.mubr.bf16.mxu0 %v6422_v19  ;;  %1803 = vmatprep.mubr.bf16.mxu1 %v6422_v19  ;;  %v4738_v25 = vcombine.low %v632_v59, %v636_v60 }
 0x16b   :  { %v335_v33 = vadd.f32 %v334_v28, %v6363_v1  ;;  %v336_v34 = vpop.f32.mrb[23].mxu0  ;;  %1418 = vmatmul.mubr.bf16.gmra.mrb[80].mxu0 %v6420_v18  ;;  %1804 = vmatmul.mubr.bf16.gmra.mrb[16].mxu1 %v6420_v18  ;;  %v459_v39 = vmax.f32 %v331_v24, 0.0  ;;  %v4747_v28 = vcombine.high %v640_v13, %v644_v16 }
 0x16c   :  { %v337_v35 = vadd.f32 %v336_v34, %v6366_v15  ;;  %1555 = vmatpush1.bf16.msra.mxu0 %v4706_v21  ;;  %v460_v42 = vmax.f32 %v333_v27, 0.0  ;;  %3298 = vmatpush1.bf16.msra.mxu1 %v5274_v37  ;;  %v652_v34 = vld [vmem:[#allocation7 + $0x3a8] sm:$0xff] }
 0x16d   :  { %v461_v40 = vmax.f32 %v335_v33, 0.0  ;;  %1556 = vmatprep.subr.bf16.mxu0 %v4715_v26  ;;  %3299 = vmatprep.subr.bf16.mxu1 %v5279_v3  ;;  %v648_v33 = vld [vmem:[#allocation7 + $0x388] sm:$0xff] }
 0x16e   :  { %v462_v43 = vmax.f32 %v337_v35, 0.0 }
 0x16f   :  { %v6432_v46 = vpack.c.bf16 %v461_v40, %v459_v39  ;;  %v5280_v39 = vld [vmem:[#allocation8 + $0xa0] ss:$8 sps:$4 sm:$0xff]   ;;  %v5282_v40 = vld [vmem:[#allocation8 + $0xa4] ss:$8 sps:$4 sm:$0xff]  }
 0x170   :  { %v6434_v47 = vpack.c.bf16 %v462_v43, %v460_v42  ;;  %v340_v48 = vpop.f32.mrb[24].mxu0  ;;  %1557 = vmatpush1.bf16.msra.mxu0 %v4714_v36  ;;  %3300 = vmatpush1.bf16.msra.mxu1 %v5277_v2  ;;  %v4755_v43 = vcombine.high %v648_v33, %v652_v34 }
 0x171   :  { %v341_v52 = vadd.f32 %v340_v48, %v6363_v1  ;;  %v342_v53 = vpop.f32.mrb[25].mxu0  ;;  %1558 = vmatprep.subr.bf16.mxu0 %v4723_v41  ;;  %v656_v48 = vld [vmem:[#allocation7 + $0x3c8] sm:$0xff]  ;;  %3301 = vmatprep.subr.bf16.mxu1 %v5282_v40 }
 0x172   :  { %v343_v57 = vadd.f32 %v342_v53, %v6366_v15  ;;  %v344_v58 = vpop.f32.mrb[26].mxu0  ;;  %1427 = vmatprep.mubr.bf16.mxu0 %v6434_v47  ;;  %1813 = vmatprep.mubr.bf16.mxu1 %v6434_v47 }
 0x173   :  { %v345_v61 = vadd.f32 %v344_v58, %v6363_v1  ;;  %v346_v62 = vpop.f32.mrb[27].mxu0  ;;  %1428 = vmatmul.mubr.bf16.gmra.mrb[84].mxu0 %v6432_v46  ;;  %1814 = vmatmul.mubr.bf16.gmra.mrb[20].mxu1 %v6432_v46  ;;  %v463_v5 = vmax.f32 %v341_v52, 0.0 }
 0x174   :  { %v347_v63 = vadd.f32 %v346_v62, %v6366_v15  ;;  %1559 = vmatpush1.bf16.msra.mxu0 %v4722_v49  ;;  %v464_v9 = vmax.f32 %v343_v57, 0.0  ;;  %v660_v49 = vld [vmem:[#allocation7 + $0x3e8] sm:$0xff]  ;;  %3302 = vmatpush1.bf16.msra.mxu1 %v5280_v39  ;;  %v4754_v57 = vcombine.low %v648_v33, %v652_v34 }
 0x175   :  { %v465_v6 = vmax.f32 %v345_v61, 0.0  ;;  %1560 = vmatprep.subr.bf16.mxu0 %v4731_v54  ;;  %v4763_v60 = vcombine.high %v656_v48, %v660_v49  ;;  %v4762_v3 = vcombine.low %v656_v48, %v660_v49 }
 0x176   :  { %v466_v10 = vmax.f32 %v347_v63, 0.0 }
 0x177   :  { %v6450_v20 = vpack.c.bf16 %v465_v6, %v463_v5  ;;  %v5283_v5 = vld [vmem:[#allocation8 + $0xb0] ss:$8 sps:$4 sm:$0xff]   ;;  %v5285_v6 = vld [vmem:[#allocation8 + $0xb4] ss:$8 sps:$4 sm:$0xff]  }
 0x178   :  { %v6452_v21 = vpack.c.bf16 %v466_v10, %v464_v9  ;;  %v350_v24 = vpop.f32.mrb[28].mxu0  ;;  %1561 = vmatpush1.bf16.msra.mxu0 %v4730_v0  ;;  %v4647_v10 = vcombine.high %v6444_v4, %v6446_v8  ;;  %3303 = vmatprep.subr.bf16.mxu1 %v5285_v6  ;;  %v578_v8 = vld [vmem:[#allocation7 + $0x158] sm:$0xff] }
 0x179   :  { %v351_v26 = vadd.f32 %v350_v24, %v6363_v1  ;;  %v352_v27 = vpop.f32.mrb[29].mxu0  ;;  %1562 = vmatprep.subr.bf16.mxu0 %v4739_v7  ;;  %3304 = vmatpush1.bf16.msra.mxu1 %v5283_v5 }
 0x17a   :  { %v353_v29 = vadd.f32 %v352_v27, %v6366_v15  ;;  %v354_v32 = vpop.f32.mrb[30].mxu0  ;;  %1437 = vmatprep.mubr.bf16.mxu0 %v6452_v21  ;;  %1823 = vmatprep.mubr.bf16.mxu1 %v6452_v21 }
 0x17b   :  { %v355_v35 = vadd.f32 %v354_v32, %v6363_v1  ;;  %v356_v36 = vpop.f32.mrb[31].mxu0  ;;  %1438 = vmatmul.mubr.bf16.gmra.mrb[88].mxu0 %v6450_v20  ;;  %1824 = vmatmul.mubr.bf16.gmra.mrb[24].mxu1 %v6450_v20  ;;  %v467_v41 = vmax.f32 %v351_v26, 0.0 }
 0x17c   :  { %v357_v37 = vadd.f32 %v356_v36, %v6366_v15  ;;  %1563 = vmatpush1.bf16.msra.mxu0 %v4738_v25  ;;  %v468_v44 = vmax.f32 %v353_v29, 0.0  ;;  %v5286_v36 = vld [vmem:[#allocation8 + $0xc0] ss:$8 sps:$4 sm:$0xff]  }
 0x17d   :  { %v469_v42 = vmax.f32 %v355_v35, 0.0  ;;  %1564 = vmatprep.subr.bf16.mxu0 %v4747_v28 }
 0x17e   :  { %v470_v45 = vmax.f32 %v357_v37, 0.0  ;;  %v5288_v37 = vld [vmem:[#allocation8 + $0xc4] ss:$8 sps:$4 sm:$0xff]  }
 0x17f   :  { %v6462_v52 = vpack.c.bf16 %v469_v42, %v467_v41  ;;  %3305 = vmatprep.subr.bf16.mxu1 %v5288_v37 }
 0x180   :  { %v6464_v53 = vpack.c.bf16 %v470_v45, %v468_v44  ;;  %v360_v54 = vpop.f32.mrb[32].mxu0  ;;  %1565 = vmatpush1.bf16.msra.mxu0 %v4746_v38  ;;  %3306 = vmatpush1.bf16.msra.mxu1 %v5286_v36 }
 0x181   :  { %v361_v58 = vadd.f32 %v360_v54, %v6363_v1  ;;  %v362_v59 = vpop.f32.mrb[33].mxu0  ;;  %1566 = vmatprep.subr.bf16.mxu0 %v4755_v43 }
 0x182   :  { %v363_v61 = vadd.f32 %v362_v59, %v6366_v15  ;;  %v364_v62 = vpop.f32.mrb[34].mxu0  ;;  %1447 = vmatprep.mubr.bf16.mxu0 %v6464_v53  ;;  %1833 = vmatprep.mubr.bf16.mxu1 %v6464_v53 }
 0x183   :  { %v365_v63 = vadd.f32 %v364_v62, %v6363_v1  ;;  %v366_v0 = vpop.f32.mrb[35].mxu0  ;;  %1448 = vmatmul.mubr.bf16.gmra.mrb[92].mxu0 %v6462_v52  ;;  %1834 = vmatmul.mubr.bf16.gmra.mrb[28].mxu1 %v6462_v52  ;;  %v471_v7 = vmax.f32 %v361_v58, 0.0 }
 0x184   :  { %v367_v2 = vadd.f32 %v366_v0, %v6366_v15  ;;  %1567 = vmatpush1.bf16.msra.mxu0 %v4754_v57  ;;  %v472_v13 = vmax.f32 %v363_v61, 0.0  ;;  %v5291_v61 = vld [vmem:[#allocation8 + $0xd4] ss:$8 sps:$4 sm:$0xff]  }
 0x185   :  { %v473_v9 = vmax.f32 %v365_v63, 0.0  ;;  %1568 = vmatprep.subr.bf16.mxu0 %v4763_v60  ;;  %v5289_v60 = vld [vmem:[#allocation8 + $0xd0] ss:$8 sps:$4 sm:$0xff]   ;;  %3307 = vmatprep.subr.bf16.mxu1 %v5291_v61  ;;  %v5294_v61 = vld [vmem:[#allocation8 + $0xe4] ss:$8 sps:$4 sm:$0xff]  }
 0x186   :  { %v474_v16 = vmax.f32 %v367_v2, 0.0  ;;  %3308 = vmatpush1.bf16.msra.mxu1 %v5289_v60 }
 0x187   :  { %v6476_v24 = vpack.c.bf16 %v473_v9, %v471_v7  ;;  %3309 = vmatprep.subr.bf16.mxu1 %v5294_v61 }
 0x188   :  { %v6478_v25 = vpack.c.bf16 %v474_v16, %v472_v13  ;;  %v370_v26 = vpop.f32.mrb[36].mxu0  ;;  %1569 = vmatpush1.bf16.msra.mxu0 %v4762_v3 }
 0x189   :  { %v371_v27 = vadd.f32 %v370_v26, %v6363_v1  ;;  %v372_v28 = vpop.f32.mrb[37].mxu0  ;;  %1924 = vmatprep.subr.bf16.mxu0 %v4647_v10 }
 0x18a   :  { %v373_v29 = vadd.f32 %v372_v28, %v6366_v15  ;;  %v374_v32 = vpop.f32.mrb[38].mxu0  ;;  %1457 = vmatprep.mubr.bf16.mxu0 %v6478_v25  ;;  %1843 = vmatprep.mubr.bf16.mxu1 %v6478_v25 }
 0x18b   :  { %v375_v33 = vadd.f32 %v374_v32, %v6363_v1  ;;  %v376_v34 = vpop.f32.mrb[39].mxu0  ;;  %1458 = vmatmul.mubr.bf16.gmra.mrb[96].mxu0 %v6476_v24  ;;  %1844 = vmatmul.mubr.bf16.gmra.mrb[32].mxu1 %v6476_v24  ;;  %v475_v38 = vmax.f32 %v371_v27, 0.0 }
 0x18c   :  { %v377_v35 = vadd.f32 %v376_v34, %v6366_v15  ;;  %v476_v40 = vmax.f32 %v373_v29, 0.0 }
 0x18d   :  { %v477_v39 = vmax.f32 %v375_v33, 0.0 }
 0x18e   :  { %v478_v41 = vmax.f32 %v377_v35, 0.0 }
 0x18f   :  { %v6488_v42 = vpack.c.bf16 %v477_v39, %v475_v38 }
 0x190   :  { %v6490_v43 = vpack.c.bf16 %v478_v41, %v476_v40  ;;  %v380_v44 = vpop.f32.mrb[40].mxu0 }
 0x191   :  { %v381_v45 = vadd.f32 %v380_v44, %v6363_v1  ;;  %v382_v48 = vpop.f32.mrb[41].mxu0 }
 0x192   :  { %v383_v49 = vadd.f32 %v382_v48, %v6366_v15  ;;  %v384_v54 = vpop.f32.mrb[42].mxu0  ;;  %1467 = vmatprep.mubr.bf16.mxu0 %v6490_v43  ;;  %1853 = vmatprep.mubr.bf16.mxu1 %v6490_v43 }
 0x193   :  { %v385_v57 = vadd.f32 %v384_v54, %v6363_v1  ;;  %v386_v58 = vpop.f32.mrb[43].mxu0  ;;  %1468 = vmatmul.mubr.bf16.gmra.mrb[100].mxu0 %v6488_v42  ;;  %1854 = vmatmul.mubr.bf16.gmra.mrb[36].mxu1 %v6488_v42  ;;  %v479_v62 = vmax.f32 %v381_v45, 0.0 }
 0x194   :  { %v387_v59 = vadd.f32 %v386_v58, %v6366_v15  ;;  %v480_v0 = vmax.f32 %v383_v49, 0.0 }
 0x195   :  { %v481_v63 = vmax.f32 %v385_v57, 0.0 }
 0x196   :  { %v482_v2 = vmax.f32 %v387_v59, 0.0 }
 0x197   :  { %v6500_v3 = vpack.c.bf16 %v481_v63, %v479_v62 }
 0x198   :  { %v6502_v5 = vpack.c.bf16 %v482_v2, %v480_v0  ;;  %v390_v6 = vpop.f32.mrb[44].mxu0  ;;  %v5292_v0 = vld [vmem:[#allocation8 + $0xe0] ss:$8 sps:$4 sm:$0xff]  }
 0x199   :  { %v391_v7 = vadd.f32 %v390_v6, %v6363_v1  ;;  %v392_v9 = vpop.f32.mrb[45].mxu0  ;;  %3310 = vmatpush1.bf16.msra.mxu1 %v5292_v0 }
 0x19a   :  { %v393_v10 = vadd.f32 %v392_v9, %v6366_v15  ;;  %v394_v13 = vpop.f32.mrb[46].mxu0  ;;  %1477 = vmatprep.mubr.bf16.mxu0 %v6502_v5  ;;  %1863 = vmatprep.mubr.bf16.mxu1 %v6502_v5 }
 0x19b   :  { %v395_v16 = vadd.f32 %v394_v13, %v6363_v1  ;;  %v396_v26 = vpop.f32.mrb[47].mxu0  ;;  %1478 = vmatmul.mubr.bf16.gmra.mrb[104].mxu0 %v6500_v3  ;;  %1864 = vmatmul.mubr.bf16.gmra.mrb[40].mxu1 %v6500_v3  ;;  %v483_v28 = vmax.f32 %v391_v7, 0.0 }
 0x19c   :  { %v397_v27 = vadd.f32 %v396_v26, %v6366_v15  ;;  %v484_v32 = vmax.f32 %v393_v10, 0.0 }
 0x19d   :  { %v485_v29 = vmax.f32 %v395_v16, 0.0 }
 0x19e   :  { %v486_v33 = vmax.f32 %v397_v27, 0.0 }
 0x19f   :  { %v6512_v34 = vpack.c.bf16 %v485_v29, %v483_v28 }
 0x1a0   :  { %v6514_v35 = vpack.c.bf16 %v486_v33, %v484_v32  ;;  %v400_v36 = vpop.f32.mrb[48].mxu0  ;;  %v5297_v33 = vld [vmem:[#allocation8 + $0xf4] ss:$8 sps:$4 sm:$0xff]  }
 0x1a1   :  { %v401_v37 = vadd.f32 %v400_v36, %v6363_v1  ;;  %v402_v38 = vpop.f32.mrb[49].mxu0  ;;  %3311 = vmatprep.subr.bf16.mxu1 %v5297_v33 }
 0x1a2   :  { %v403_v39 = vadd.f32 %v402_v38, %v6366_v15  ;;  %v404_v40 = vpop.f32.mrb[50].mxu0  ;;  %1487 = vmatprep.mubr.bf16.mxu0 %v6514_v35  ;;  %1873 = vmatprep.mubr.bf16.mxu1 %v6514_v35  ;;  %v5295_v38 = vld [vmem:[#allocation8 + $0xf0] ss:$8 sps:$4 sm:$0xff]  }
 0x1a3   :  { %v405_v41 = vadd.f32 %v404_v40, %v6363_v1  ;;  %v406_v44 = vpop.f32.mrb[51].mxu0  ;;  %1488 = vmatmul.mubr.bf16.gmra.mrb[108].mxu0 %v6512_v34  ;;  %1874 = vmatmul.mubr.bf16.gmra.mrb[44].mxu1 %v6512_v34  ;;  %v487_v48 = vmax.f32 %v401_v37, 0.0 }
 0x1a4   :  { %v407_v45 = vadd.f32 %v406_v44, %v6366_v15  ;;  %v488_v54 = vmax.f32 %v403_v39, 0.0  ;;  %3312 = vmatpush1.bf16.msra.mxu1 %v5295_v38  ;;  %v554_v38 = vld [vmem:[#allocation7 + $0x98] sm:$0xff] }
 0x1a5   :  { %v489_v49 = vmax.f32 %v405_v41, 0.0 }
 0x1a6   :  { %v490_v57 = vmax.f32 %v407_v45, 0.0 }
 0x1a7   :  { %v6524_v58 = vpack.c.bf16 %v489_v49, %v487_v48 }
 0x1a8   :  { %v6526_v59 = vpack.c.bf16 %v490_v57, %v488_v54  ;;  %v410_v60 = vpop.f32.mrb[52].mxu0 }
 0x1a9   :  { %v411_v62 = vadd.f32 %v410_v60, %v6363_v1  ;;  %v412_v63 = vpop.f32.mrb[53].mxu0 }
 0x1aa   :  { %v413_v2 = vadd.f32 %v412_v63, %v6366_v15  ;;  %v414_v6 = vpop.f32.mrb[54].mxu0  ;;  %1497 = vmatprep.mubr.bf16.mxu0 %v6526_v59  ;;  %1883 = vmatprep.mubr.bf16.mxu1 %v6526_v59  ;;  %v5300_v63 = vld [vmem:[#allocation8 + $0x104] ss:$8 sps:$4 sm:$0xff]  }
 0x1ab   :  { %v415_v7 = vadd.f32 %v414_v6, %v6363_v1  ;;  %v416_v9 = vpop.f32.mrb[55].mxu0  ;;  %1498 = vmatmul.mubr.bf16.gmra.mrb[112].mxu0 %v6524_v58  ;;  %1884 = vmatmul.mubr.bf16.gmra.mrb[48].mxu1 %v6524_v58  ;;  %v491_v13 = vmax.f32 %v411_v62, 0.0 }
 0x1ac   :  { %v417_v10 = vadd.f32 %v416_v9, %v6366_v15  ;;  %v492_v26 = vmax.f32 %v413_v2, 0.0  ;;  %3474 = vmatprep.subr.bf16.mxu1 %v5300_v63 }
 0x1ad   :  { %v493_v16 = vmax.f32 %v415_v7, 0.0 }
 0x1ae   :  { %v494_v27 = vmax.f32 %v417_v10, 0.0 }
 0x1af   :  { %v6536_v28 = vpack.c.bf16 %v493_v16, %v491_v13 }
 0x1b0   :  { %v6538_v29 = vpack.c.bf16 %v494_v27, %v492_v26  ;;  %v420_v32 = vpop.f32.mrb[56].mxu0 }
 0x1b1   :  { %v421_v36 = vadd.f32 %v420_v32, %v6363_v1  ;;  %v422_v37 = vpop.f32.mrb[57].mxu0 }
 0x1b2   :  { %v423_v39 = vadd.f32 %v422_v37, %v6366_v15  ;;  %v424_v40 = vpop.f32.mrb[58].mxu0  ;;  %1507 = vmatprep.mubr.bf16.mxu0 %v6538_v29  ;;  %1893 = vmatprep.mubr.bf16.mxu1 %v6538_v29 }
 0x1b3   :  { %v425_v41 = vadd.f32 %v424_v40, %v6363_v1  ;;  %v426_v44 = vpop.f32.mrb[59].mxu0  ;;  %1508 = vmatmul.mubr.bf16.gmra.mrb[116].mxu0 %v6536_v28  ;;  %1894 = vmatmul.mubr.bf16.gmra.mrb[52].mxu1 %v6536_v28  ;;  %v495_v48 = vmax.f32 %v421_v36, 0.0 }
 0x1b4   :  { %v427_v45 = vadd.f32 %v426_v44, %v6366_v15  ;;  %v496_v54 = vmax.f32 %v423_v39, 0.0  ;;  %v558_v39 = vld [vmem:[#allocation7 + $0xb8] sm:$0xff] }
 0x1b5   :  { %v497_v49 = vmax.f32 %v425_v41, 0.0  ;;  %v4663_v41 = vcombine.high %v554_v38, %v558_v39  ;;  %v562_v44 = vld [vmem:[#allocation7 + $0xd8] sm:$0xff] }
 0x1b6   :  { %v498_v57 = vmax.f32 %v427_v45, 0.0  ;;  %v566_v45 = vld [vmem:[#allocation7 + $0xf8] sm:$0xff] }
 0x1b7   :  { %v6548_v60 = vpack.c.bf16 %v497_v49, %v495_v48  ;;  %v4662_v48 = vcombine.low %v554_v38, %v558_v39  ;;  %v4671_v49 = vcombine.high %v562_v44, %v566_v45  ;;  %v614_v38 = vld [vmem:[#allocation7 + $0x278] sm:$0xff] }
 0x1b8   :  { %v6550_v61 = vpack.c.bf16 %v498_v57, %v496_v54  ;;  %v430_v62 = vpop.f32.mrb[60].mxu0  ;;  %v570_v54 = vld [vmem:[#allocation7 + $0x118] sm:$0xff] }
 0x1b9   :  { %v431_v0 = vadd.f32 %v430_v62, %v6363_v1  ;;  %v432_v2 = vpop.f32.mrb[61].mxu0  ;;  %v574_v57 = vld [vmem:[#allocation7 + $0x138] sm:$0xff]  ;;  %v4670_v62 = vcombine.low %v562_v44, %v566_v45 }
 0x1ba   :  { %v433_v6 = vadd.f32 %v432_v2, %v6366_v15  ;;  %v434_v7 = vpop.f32.mrb[62].mxu0  ;;  %1517 = vmatprep.mubr.bf16.mxu0 %v6550_v61  ;;  %1903 = vmatprep.mubr.bf16.mxu1 %v6550_v61  ;;  %v4679_v4 = vcombine.high %v570_v54, %v574_v57  ;;  %v4678_v63 = vcombine.low %v570_v54, %v574_v57  ;;  %v586_v2 = vld [vmem:[#allocation7 + $0x198] sm:$0xff] }
 0x1bb   :  { %v435_v9 = vadd.f32 %v434_v7, %v6363_v1  ;;  %v436_v10 = vpop.f32.mrb[63].mxu0  ;;  %1518 = vmatmul.mubr.bf16.gmra.mrb[120].mxu0 %v6548_v60  ;;  %1904 = vmatmul.mubr.bf16.gmra.mrb[56].mxu1 %v6548_v60  ;;  %v499_v16 = vmax.f32 %v431_v0, 0.0  ;;  %v546_v1 = vld [vmem:[#allocation7 + $0x58] sm:$0xff] }
 0x1bc   :  { %v437_v13 = vadd.f32 %v436_v10, %v6366_v15  ;;  %v500_v27 = vmax.f32 %v433_v6, 0.0  ;;  %v550_v15 = vld [vmem:[#allocation7 + $0x78] sm:$0xff] }
 0x1bd   :  { %v501_v26 = vmax.f32 %v435_v9, 0.0  ;;  %v4655_v37 = vcombine.high %v546_v1, %v550_v15  ;;  %v4654_v40 = vcombine.low %v546_v1, %v550_v15  ;;  %v590_v6 = vld [vmem:[#allocation7 + $0x1b8] sm:$0xff] }
 0x1be   :  { %v502_v32 = vmax.f32 %v437_v13, 0.0  ;;  %v4695_v9 = vcombine.high %v586_v2, %v590_v6  ;;  %v594_v10 = vld [vmem:[#allocation7 + $0x1d8] sm:$0xff] }
 0x1bf   :  { %v6560_v33 = vpack.c.bf16 %v501_v26, %v499_v16  ;;  %v598_v13 = vld [vmem:[#allocation7 + $0x1f8] sm:$0xff]  ;;  %v4694_v16 = vcombine.low %v586_v2, %v590_v6 }
 0x1c0   :  { %v6562_v36 = vpack.c.bf16 %v502_v32, %v500_v27  ;;  %v4703_v26 = vcombine.high %v594_v10, %v598_v13  ;;  %v602_v27 = vld [vmem:[#allocation7 + $0x218] sm:$0xff]  ;;  %v4702_v1 = vcombine.low %v594_v10, %v598_v13 }
 0x1c1   :  { %v606_v32 = vld [vmem:[#allocation7 + $0x238] sm:$0xff] }
 0x1c2   :  { %1527 = vmatprep.mubr.bf16.mxu0 %v6562_v36  ;;  %1913 = vmatprep.mubr.bf16.mxu1 %v6562_v36  ;;  %v4711_v15 = vcombine.high %v602_v27, %v606_v32  ;;  %v4710_v39 = vcombine.low %v602_v27, %v606_v32  ;;  %v622_v44 = vld [vmem:[#allocation7 + $0x2b8] sm:$0xff] }
 0x1c3   :  { %1528 = vmatmul.mubr.bf16.gmra.mrb[124].mxu0 %v6560_v33  ;;  %1914 = vmatmul.mubr.bf16.gmra.mrb[60].mxu1 %v6560_v33  ;;  %v630_v54 = vld [vmem:[#allocation7 + $0x2f8] sm:$0xff] }
 0x1c4   :  { %1570 = vmatprep.mubr.bf16.mxu0 %v6374_v31  ;;  %v646_v2 = vld [vmem:[#allocation7 + $0x378] sm:$0xff] }
 0x1c5   :  { %v654_v10 = vld [vmem:[#allocation7 + $0x3b8] sm:$0xff] }
 0x1c6   :  { %v662_v27 = vld [vmem:[#allocation7 + $0x3f8] sm:$0xff] }
 0x1cb   :  { %1571 = vmatmul.mubr.bf16.vlgmr.msra.gmra.mrb[128].mxu0 %v6372_v30 }
 0x1cc   :  { %1580 = vmatprep.mubr.bf16.mxu0 %v6386_v56  ;;  %1925 = vmatpush1.bf16.msra.mxu0 %v4646_v17  ;;  %v582_v17 = vld [vmem:[#allocation7 + $0x178] sm:$0xff] }
 0x1cd   :  { %1926 = vmatprep.subr.bf16.mxu0 %v4655_v37  ;;  %v4687_v0 = vcombine.high %v578_v8, %v582_v17  ;;  %v4686_v7 = vcombine.low %v578_v8, %v582_v17  ;;  %v610_v37 = vld [vmem:[#allocation7 + $0x258] sm:$0xff] }
 0x1ce   :  { %v4718_v45 = vcombine.low %v610_v37, %v614_v38  ;;  %v638_v8 = vld [vmem:[#allocation7 + $0x338] sm:$0xff] }
 0x1d0   :  { %1927 = vmatpush1.bf16.msra.mxu0 %v4654_v40  ;;  %v4719_v40 = vcombine.high %v610_v37, %v614_v38  ;;  %v683_v37 = vsub.s32 4, %v6351_v11  ;;  %v663_v38 = vld [vmem:[%s7569_s4] sm:$0xff] }
 0x1d1   :  { %1928 = vmatprep.subr.bf16.mxu0 %v4663_v41  ;;  %v618_v41 = vld [vmem:[#allocation7 + $0x298] sm:$0xff] }
 0x1d2   :  { %v4726_v57 = vcombine.low %v618_v41, %v622_v44 }
 0x1d3   :  { %1581 = vmatmul.mubr.bf16.gmra.mrb[132].mxu0 %v6384_v55 }
 0x1d4   :  { %1590 = vmatprep.mubr.bf16.mxu0 %v6398_v23  ;;  %1929 = vmatpush1.bf16.msra.mxu0 %v4662_v48  ;;  %v4727_v48 = vcombine.high %v618_v41, %v622_v44  ;;  %v6601_v41 = vrot.slane %v663_v38, %v683_v37  ;;  %v6605_v44 = vrot.slane %v663_v38, %v6360_v14 }
 0x1d5   :  { %1930 = vmatprep.subr.bf16.mxu0 %v4671_v49  ;;  %v626_v49 = vld [vmem:[#allocation7 + $0x2d8] sm:$0xff] }
 0x1d6   :  { %v4734_v17 = vcombine.low %v626_v49, %v630_v54 }
 0x1d8   :  { %1931 = vmatpush1.bf16.msra.mxu0 %v4670_v62  ;;  %v4735_v62 = vcombine.high %v626_v49, %v630_v54 }
 0x1d9   :  { %1932 = vmatprep.subr.bf16.mxu0 %v4679_v4  ;;  %v634_v4 = vld [vmem:[#allocation7 + $0x318] sm:$0xff] }
 0x1da   :  { %v4742_v6 = vcombine.low %v634_v4, %v638_v8 }
 0x1db   :  { %1591 = vmatmul.mubr.bf16.gmra.mrb[136].mxu0 %v6396_v22 }
 0x1dc   :  { %1600 = vmatprep.mubr.bf16.mxu0 %v6410_v51  ;;  %1933 = vmatpush1.bf16.msra.mxu0 %v4678_v63  ;;  %v4743_v63 = vcombine.high %v634_v4, %v638_v8 }
 0x1dd   :  { %1934 = vmatprep.subr.bf16.mxu0 %v4687_v0  ;;  %v642_v0 = vld [vmem:[#allocation7 + $0x358] sm:$0xff] }
 0x1de   :  { %v4750_v13 = vcombine.low %v642_v0, %v646_v2 }
 0x1e0   :  { %1935 = vmatpush1.bf16.msra.mxu0 %v4686_v7  ;;  %v4751_v7 = vcombine.high %v642_v0, %v646_v2 }
 0x1e1   :  { %1936 = vmatprep.subr.bf16.mxu0 %v4695_v9  ;;  %v650_v9 = vld [vmem:[#allocation7 + $0x398] sm:$0xff] }
 0x1e2   :  { %v4758_v32 = vcombine.low %v650_v9, %v654_v10 }
 0x1e3   :  { %1601 = vmatmul.mubr.bf16.gmra.mrb[140].mxu0 %v6408_v50 }
 0x1e4   :  { %1610 = vmatprep.mubr.bf16.mxu0 %v6422_v19  ;;  %1937 = vmatpush1.bf16.msra.mxu0 %v4694_v16  ;;  %v4759_v16 = vcombine.high %v650_v9, %v654_v10 }
 0x1e5   :  { %1938 = vmatprep.subr.bf16.mxu0 %v4703_v26  ;;  %v658_v26 = vld [vmem:[#allocation7 + $0x3d8] sm:$0xff] }
 0x1e8   :  { %1939 = vmatpush1.bf16.msra.mxu0 %v4702_v1  ;;  %v4767_v1 = vcombine.high %v658_v26, %v662_v27 }
 0x1e9   :  { %1940 = vmatprep.subr.bf16.mxu0 %v4711_v15  ;;  %v4766_v15 = vcombine.low %v658_v26, %v662_v27 }
 0x1eb   :  { %1611 = vmatmul.mubr.bf16.gmra.mrb[144].mxu0 %v6420_v18 }
 0x1ec   :  { %1620 = vmatprep.mubr.bf16.mxu0 %v6434_v47  ;;  %1941 = vmatpush1.bf16.msra.mxu0 %v4710_v39  ;;  %v687_v39 = vsub.s32 5, %v6351_v11 }
 0x1ed   :  { %1942 = vmatprep.subr.bf16.mxu0 %v4719_v40  ;;  %v6599_v40 = vrot.slane %v663_v38, %v6354_v12 }
 0x1f0   :  { %1943 = vmatpush1.bf16.msra.mxu0 %v4718_v45  ;;  %v6607_v45 = vrot.slane %v663_v38, %v687_v39 }
 0x1f1   :  { %1944 = vmatprep.subr.bf16.mxu0 %v4727_v48 }
 0x1f3   :  { %1621 = vmatmul.mubr.bf16.gmra.mrb[148].mxu0 %v6432_v46 }
 0x1f4   :  { %1630 = vmatprep.mubr.bf16.mxu0 %v6452_v21  ;;  %1945 = vmatpush1.bf16.msra.mxu0 %v4726_v57 }
 0x1f5   :  { %1946 = vmatprep.subr.bf16.mxu0 %v4735_v62 }
 0x1f8   :  { %1947 = vmatpush1.bf16.msra.mxu0 %v4734_v17 }
 0x1f9   :  { %1948 = vmatprep.subr.bf16.mxu0 %v4743_v63 }
 0x1fb   :  { %1631 = vmatmul.mubr.bf16.gmra.mrb[152].mxu0 %v6450_v20 }
 0x1fc   :  { %1640 = vmatprep.mubr.bf16.mxu0 %v6464_v53  ;;  %1949 = vmatpush1.bf16.msra.mxu0 %v4742_v6 }
 0x1fd   :  { %1950 = vmatprep.subr.bf16.mxu0 %v4751_v7 }
 0x200   :  { %1951 = vmatpush1.bf16.msra.mxu0 %v4750_v13 }
 0x201   :  { %1952 = vmatprep.subr.bf16.mxu0 %v4759_v16 }
 0x203   :  { %1641 = vmatmul.mubr.bf16.gmra.mrb[156].mxu0 %v6462_v52 }
 0x204   :  { %1650 = vmatprep.mubr.bf16.mxu0 %v6478_v25  ;;  %1953 = vmatpush1.bf16.msra.mxu0 %v4758_v32 }
 0x205   :  { %1954 = vmatprep.subr.bf16.mxu0 %v4767_v1 }
 0x208   :  { %1955 = vmatpush1.bf16.msra.mxu0 %v4766_v15 }
 0x20b   :  { %1651 = vmatmul.mubr.bf16.gmra.mrb[160].mxu0 %v6476_v24 }
 0x20c   :  { %1660 = vmatprep.mubr.bf16.mxu0 %v6490_v43 }
 0x213   :  { %1661 = vmatmul.mubr.bf16.gmra.mrb[164].mxu0 %v6488_v42 }
 0x214   :  { %1670 = vmatprep.mubr.bf16.mxu0 %v6502_v5 }
 0x21b   :  { %1671 = vmatmul.mubr.bf16.gmra.mrb[168].mxu0 %v6500_v3 }
 0x21c   :  { %1680 = vmatprep.mubr.bf16.mxu0 %v6514_v35 }
 0x21e   :  { %v1379_v48 = vpop.f32.mrb[64].mxu0  ;;  %v1765_v49 = vpop.f32.mrb[0].mxu1 }
 0x21f   :  { %v1380_v54 = vadd.f32 %v1379_v48, %v6599_v40  ;;  %v1766_v57 = vadd.f32 %v1765_v49, %v6601_v41  ;;  %v1381_v62 = vpop.f32.mrb[65].mxu0  ;;  %v1767_v4 = vpop.f32.mrb[1].mxu1 }
 0x220   :  { %v1382_v8 = vadd.f32 %v1381_v62, %v6605_v44  ;;  %v1768_v17 = vadd.f32 %v1767_v4, %v6607_v45  ;;  %v1383_v63 = vpop.f32.mrb[66].mxu0  ;;  %v1769_v0 = vpop.f32.mrb[2].mxu1 }
 0x221   :  { %5442 = vtanh.f32 %v1380_v54  ;;  %v1384_v2 = vadd.f32 %v1383_v63, %v6599_v40  ;;  %v1385_v6 = vpop.f32.mrb[67].mxu0  ;;  %v1771_v7 = vpop.f32.mrb[3].mxu1  ;;  %v1770_v9 = vadd.f32 %v1769_v0, %v6601_v41 }
 0x222   :  { %5444 = vtanh.f32 %v1766_v57  ;;  %v1386_v10 = vadd.f32 %v1385_v6, %v6605_v44  ;;  %v1772_v13 = vadd.f32 %v1771_v7, %v6607_v45 }
 0x223   :  { %5446 = vtanh.f32 %v1382_v8  ;;  %1681 = vmatmul.mubr.bf16.gmra.mrb[172].mxu0 %v6512_v34 }
 0x224   :  { %5448 = vtanh.f32 %v1768_v17  ;;  %1690 = vmatprep.mubr.bf16.mxu0 %v6526_v59 }
 0x225   :  { %5450 = vtanh.f32 %v1384_v2 }
 0x226   :  { %5452 = vtanh.f32 %v1770_v9  ;;  %v1389_v16 = vpop.f32.mrb[68].mxu0  ;;  %v1775_v26 = vpop.f32.mrb[4].mxu1 }
 0x227   :  { %5454 = vtanh.f32 %v1386_v10  ;;  %v1390_v27 = vadd.f32 %v1389_v16, %v6599_v40  ;;  %v1776_v32 = vadd.f32 %v1775_v26, %v6601_v41  ;;  %v1391_v1 = vpop.f32.mrb[69].mxu0  ;;  %v1777_v15 = vpop.f32.mrb[5].mxu1 }
 0x228   :  { %5456 = vtanh.f32 %v1772_v13  ;;  %v1392_v37 = vadd.f32 %v1391_v1, %v6605_v44  ;;  %v1778_v38 = vadd.f32 %v1777_v15, %v6607_v45  ;;  %v1393_v39 = vpop.f32.mrb[70].mxu0  ;;  %v1779_v48 = vpop.f32.mrb[6].mxu1 }
 0x229   :  { %5458 = vtanh.f32 %v1390_v27  ;;  %v1394_v49 = vadd.f32 %v1393_v39, %v6599_v40  ;;  %v1395_v54 = vpop.f32.mrb[71].mxu0  ;;  %v1781_v57 = vpop.f32.mrb[7].mxu1  ;;  %v1780_v62 = vadd.f32 %v1779_v48, %v6601_v41 }
 0x22a   :  { %5460 = vtanh.f32 %v1776_v32  ;;  %v1396_v8 = vadd.f32 %v1395_v54, %v6605_v44  ;;  %v1782_v63 = vadd.f32 %v1781_v57, %v6607_v45  ;;  %v5306_v57 = vld [vmem:[#allocation8 + $0x124] ss:$8 sps:$4 sm:$0xff]  }
 0x22b   :  { %v5443_v4 = vpop.eup %5442  ;;  %5462 = vtanh.f32 %v1392_v37  ;;  %1691 = vmatmul.mubr.bf16.gmra.mrb[176].mxu0 %v6524_v58 }
 0x22c   :  { %v6627_v17 = vpop.eup %5444  ;;  %5464 = vtanh.f32 %v1778_v38  ;;  %1700 = vmatprep.mubr.bf16.mxu0 %v6538_v29 }
 0x22d   :  { %7611 = vst [vmem:[#allocation15_spill] sm:$0xff] %v6627_v17  ;;  %v5447_v0 = vpop.eup %5446  ;;  %5466 = vtanh.f32 %v1394_v49 }
 0x22e   :  { %v6631_v2 = vpop.eup %5448  ;;  %5468 = vtanh.f32 %v1780_v62  ;;  %v1399_v6 = vpop.f32.mrb[72].mxu0 }
 0x22f   :  { %v1785_v7 = vpop.f32.mrb[8].mxu1  ;;  %v5451_v9 = vpop.eup %5450  ;;  %5470 = vtanh.f32 %v1396_v8  ;;  %v1400_v10 = vadd.f32 %v1399_v6, %v6599_v40  ;;  %v5298_v6 = vld [vmem:[#allocation8 + $0x100] ss:$8 sps:$4 sm:$0xff]  }
 0x230   :  { %v1786_v13 = vadd.f32 %v1785_v7, %v6601_v41  ;;  %v1401_v16 = vpop.f32.mrb[73].mxu0  ;;  %v1787_v26 = vpop.f32.mrb[9].mxu1  ;;  %5472 = vtanh.f32 %v1782_v63  ;;  %v2373_v38 = vpack.c.bf16 %v5451_v9, %v5443_v4  ;;  %v5303_v9 = vld [vmem:[#allocation8 + $0x114] ss:$8 sps:$4 sm:$0xff]  }
 0x231   :  { %v6635_v27 = vpop.eup %5452  ;;  %v1402_v32 = vadd.f32 %v1401_v16, %v6605_v44  ;;  %v1788_v1 = vadd.f32 %v1787_v26, %v6607_v45  ;;  %v1403_v15 = vpop.f32.mrb[74].mxu0  ;;  %5474 = vtanh.f32 %v1400_v10 }
 0x232   :  { %7612 = vst [vmem:[#allocation16_spill] sm:$0xff] %v6635_v27  ;;  %v1789_v37 = vpop.f32.mrb[10].mxu1  ;;  %v5455_v39 = vpop.eup %5454  ;;  %v1404_v48 = vadd.f32 %v1403_v15, %v6599_v40  ;;  %5476 = vtanh.f32 %v1786_v13 }
 0x233   :  { %v1405_v49 = vpop.f32.mrb[75].mxu0  ;;  %v1791_v54 = vpop.f32.mrb[11].mxu1  ;;  %v1790_v8 = vadd.f32 %v1789_v37, %v6601_v41  ;;  %v2374_v63 = vpack.c.bf16 %v5455_v39, %v5447_v0  ;;  %5478 = vtanh.f32 %v1402_v32  ;;  %1701 = vmatmul.mubr.bf16.gmra.mrb[180].mxu0 %v6536_v28  ;;  %v5301_v37 = vld [vmem:[#allocation8 + $0x110] ss:$8 sps:$4 sm:$0xff]  }
 0x234   :  { %v6642_v62 = vpop.eup %5456  ;;  %v1406_v4 = vadd.f32 %v1405_v49, %v6605_v44  ;;  %5480 = vtanh.f32 %v1788_v1  ;;  %v1792_v26 = vadd.f32 %v1791_v54, %v6607_v45  ;;  %1710 = vmatprep.mubr.bf16.mxu0 %v6550_v61 }
 0x235   :  { %v5459_v7 = vpop.eup %5458  ;;  %3313 = vmatprep.mubr.bf16.mxu1 %v2374_v63  ;;  %5482 = vtanh.f32 %v1404_v48 }
 0x236   :  { %v6649_v16 = vpop.eup %5460  ;;  %3314 = vmatmul.mubr.bf16.vlgmr.msra.gmra.mrb[64].mxu1 %v2373_v38  ;;  %5484 = vtanh.f32 %v1790_v8  ;;  %v1409_v32 = vpop.f32.mrb[76].mxu0 }
 0x237   :  { %7613 = vst [vmem:[#allocation17_spill] sm:$0xff] %v6649_v16  ;;  %v5463_v0 = vpop.eup %5462  ;;  %3475 = vmatpush1.bf16.msra.mxu1 %v5298_v6  ;;  %v1795_v15 = vpop.f32.mrb[12].mxu1  ;;  %5486 = vtanh.f32 %v1406_v4  ;;  %v1410_v49 = vadd.f32 %v1409_v32, %v6599_v40 }
 0x238   :  { %v6653_v13 = vpop.eup %5464  ;;  %v1796_v1 = vadd.f32 %v1795_v15, %v6601_v41  ;;  %v1411_v54 = vpop.f32.mrb[77].mxu0  ;;  %3476 = vmatprep.subr.bf16.mxu1 %v5303_v9  ;;  %5488 = vtanh.f32 %v1792_v26  ;;  %v5312_v9 = vld [vmem:[#allocation8 + $0x144] ss:$8 sps:$4 sm:$0xff]  }
 0x239   :  { %7614 = vst [vmem:[#allocation18_spill] sm:$0xff] %v6653_v13  ;;  %v5467_v39 = vpop.eup %5466  ;;  %v1797_v63 = vpop.f32.mrb[13].mxu1  ;;  %v1412_v38 = vadd.f32 %v1411_v54, %v6605_v44  ;;  %5490 = vtanh.f32 %v1410_v49 }
 0x23a   :  { %v6657_v10 = vpop.eup %5468  ;;  %v1798_v48 = vadd.f32 %v1797_v63, %v6607_v45  ;;  %v1413_v8 = vpop.f32.mrb[78].mxu0  ;;  %v2381_v14 = vpack.c.bf16 %v5467_v39, %v5459_v7  ;;  %5492 = vtanh.f32 %v1796_v1  ;;  %v5304_v63 = vld [vmem:[#allocation8 + $0x120] ss:$8 sps:$4 sm:$0xff]   ;;  %v5309_v39 = vld [vmem:[#allocation8 + $0x134] ss:$8 sps:$4 sm:$0xff]  }
 0x23b   :  { %7615 = vst [vmem:[#allocation19_spill] sm:$0xff] %v6657_v10  ;;  %v1799_v6 = vpop.f32.mrb[14].mxu1  ;;  %v5471_v12 = vpop.eup %5470  ;;  %v1414_v4 = vadd.f32 %v1413_v8, %v6599_v40  ;;  %3477 = vmatpush1.bf16.msra.mxu1 %v5301_v37  ;;  %5494 = vtanh.f32 %v1412_v38  ;;  %1711 = vmatmul.mubr.bf16.gmra.mrb[184].mxu0 %v6548_v60  ;;  %v5307_v38 = vld [vmem:[#allocation8 + $0x130] ss:$8 sps:$4 sm:$0xff]  }
 0x23c   :  { %v1415_v32 = vpop.f32.mrb[79].mxu0  ;;  %v1801_v15 = vpop.f32.mrb[15].mxu1  ;;  %v1800_v26 = vadd.f32 %v1799_v6, %v6601_v41  ;;  %v2382_v54 = vpack.c.bf16 %v5471_v12, %v5463_v0  ;;  %3478 = vmatprep.subr.bf16.mxu1 %v5306_v57  ;;  %5496 = vtanh.f32 %v1798_v48  ;;  %1720 = vmatprep.mubr.bf16.mxu0 %v6562_v36 }
 0x23d   :  { %v6664_v17 = vpop.eup %5472  ;;  %v1416_v7 = vadd.f32 %v1415_v32, %v6605_v44  ;;  %v1802_v1 = vadd.f32 %v1801_v15, %v6607_v45  ;;  %5498 = vtanh.f32 %v1414_v4 }
 0x23e   :  { %7616 = vst [vmem:[#allocation20_spill] sm:$0xff] %v6664_v17  ;;  %v5475_v27 = vpop.eup %5474  ;;  %3323 = vmatprep.mubr.bf16.mxu1 %v2382_v54  ;;  %5500 = vtanh.f32 %v1800_v26  ;;  %v1419_v37 = vpop.f32.mrb[80].mxu0 }
 0x23f   :  { %v6671_v8 = vpop.eup %5476  ;;  %3324 = vmatmul.mubr.bf16.gmra.mrb[68].mxu1 %v2381_v14  ;;  %v1805_v57 = vpop.f32.mrb[16].mxu1  ;;  %5502 = vtanh.f32 %v1416_v7  ;;  %v1420_v32 = vadd.f32 %v1419_v37, %v6599_v40 }
 0x240   :  { %7617 = vst [vmem:[#allocation21_spill] sm:$0xff] %v6671_v8  ;;  %v5479_v12 = vpop.eup %5478  ;;  %3479 = vmatpush1.bf16.msra.mxu1 %v5304_v63  ;;  %v1806_v48 = vadd.f32 %v1805_v57, %v6601_v41  ;;  %v1421_v15 = vpop.f32.mrb[81].mxu0  ;;  %5504 = vtanh.f32 %v1802_v1 }
 0x241   :  { %v6675_v0 = vpop.eup %5480  ;;  %v1807_v54 = vpop.f32.mrb[17].mxu1  ;;  %3480 = vmatprep.subr.bf16.mxu1 %v5309_v39  ;;  %v1422_v14 = vadd.f32 %v1421_v15, %v6605_v44  ;;  %5506 = vtanh.f32 %v1420_v32 }
 0x242   :  { %7618 = vst [vmem:[#allocation22_spill] sm:$0xff] %v6675_v0  ;;  %v5483_v6 = vpop.eup %5482  ;;  %v1808_v4 = vadd.f32 %v1807_v54, %v6607_v45  ;;  %v1423_v26 = vpop.f32.mrb[82].mxu0  ;;  %5508 = vtanh.f32 %v1806_v48  ;;  %v5310_v54 = vld [vmem:[#allocation8 + $0x140] ss:$8 sps:$4 sm:$0xff]  }
 0x243   :  { %v6679_v49 = vpop.eup %5484  ;;  %v1809_v63 = vpop.f32.mrb[18].mxu1  ;;  %v2389_v16 = vpack.c.bf16 %v5483_v6, %v5475_v27  ;;  %v1424_v7 = vadd.f32 %v1423_v26, %v6599_v40  ;;  %5510 = vtanh.f32 %v1422_v14  ;;  %1721 = vmatmul.mubr.bf16.gmra.mrb[188].mxu0 %v6560_v33  ;;  %v5315_v6 = vld [vmem:[#allocation8 + $0x154] ss:$8 sps:$4 sm:$0xff]   ;;  %v5313_v14 = vld [vmem:[#allocation8 + $0x150] ss:$8 sps:$4 sm:$0xff]  }
 0x244   :  { %7619 = vst [vmem:[#allocation23_spill] sm:$0xff] %v6679_v49  ;;  %v5487_v10 = vpop.eup %5486  ;;  %v1425_v37 = vpop.f32.mrb[83].mxu0  ;;  %v1810_v1 = vadd.f32 %v1809_v63, %v6601_v41  ;;  %3481 = vmatpush1.bf16.msra.mxu1 %v5307_v38  ;;  %5512 = vtanh.f32 %v1808_v4  ;;  %1956 = vmatprep.mubr.bf16.mxu0 %v6374_v31  ;;  %v5318_v31 = vld [vmem:[#allocation8 + $0x164] ss:$8 sps:$4 sm:$0xff]  }
 0x245   :  { %v1811_v57 = vpop.f32.mrb[19].mxu1  ;;  %v6686_v13 = vpop.eup %5488  ;;  %v2390_v15 = vpack.c.bf16 %v5487_v10, %v5479_v12  ;;  %v1426_v27 = vadd.f32 %v1425_v37, %v6605_v44  ;;  %3482 = vmatprep.subr.bf16.mxu1 %v5312_v9  ;;  %5514 = vtanh.f32 %v1424_v7 }
 0x246   :  { %v5491_v17 = vpop.eup %5490  ;;  %v1812_v48 = vadd.f32 %v1811_v57, %v6607_v45  ;;  %5516 = vtanh.f32 %v1810_v1  ;;  %v1429_v38 = vpop.f32.mrb[84].mxu0 }
 0x247   :  { %v6693_v26 = vpop.eup %5492  ;;  %3333 = vmatprep.mubr.bf16.mxu1 %v2390_v15  ;;  %v1815_v9 = vpop.f32.mrb[20].mxu1  ;;  %5518 = vtanh.f32 %v1426_v27  ;;  %v1430_v37 = vadd.f32 %v1429_v38, %v6599_v40 }
 0x248   :  { %7620 = vst [vmem:[#allocation24_spill] sm:$0xff] %v6693_v26  ;;  %v5495_v10 = vpop.eup %5494  ;;  %3334 = vmatmul.mubr.bf16.gmra.mrb[72].mxu1 %v2389_v16  ;;  %v1816_v4 = vadd.f32 %v1815_v9, %v6601_v41  ;;  %v1431_v57 = vpop.f32.mrb[85].mxu0  ;;  %5520 = vtanh.f32 %v1812_v48 }
 0x249   :  { %v6697_v12 = vpop.eup %5496  ;;  %3483 = vmatpush1.bf16.msra.mxu1 %v5310_v54  ;;  %v1817_v15 = vpop.f32.mrb[21].mxu1  ;;  %v1432_v16 = vadd.f32 %v1431_v57, %v6605_v44  ;;  %5522 = vtanh.f32 %v1430_v37 }
 0x24a   :  { %v5499_v63 = vpop.eup %5498  ;;  %3484 = vmatprep.subr.bf16.mxu1 %v5315_v6  ;;  %v1818_v7 = vadd.f32 %v1817_v15, %v6607_v45  ;;  %v1433_v1 = vpop.f32.mrb[86].mxu0  ;;  %5524 = vtanh.f32 %v1816_v4  ;;  %v5316_v15 = vld [vmem:[#allocation8 + $0x160] ss:$8 sps:$4 sm:$0xff]  }
 0x24b   :  { %v6701_v39 = vpop.eup %5500  ;;  %v1819_v54 = vpop.f32.mrb[22].mxu1  ;;  %v2397_v32 = vpack.c.bf16 %v5499_v63, %v5491_v17  ;;  %v1434_v27 = vadd.f32 %v1433_v1, %v6599_v40  ;;  %5526 = vtanh.f32 %v1432_v16  ;;  %1957 = vmatmul.mubr.bf16.vlgmr.msra.gmra.mrb[192].mxu0 %v6372_v30  ;;  %v5321_v63 = vld [vmem:[#allocation8 + $0x174] ss:$8 sps:$4 sm:$0xff]  }
 0x24c   :  { %7621 = vst [vmem:[#allocation25_spill] sm:$0xff] %v6701_v39  ;;  %v5503_v8 = vpop.eup %5502  ;;  %v1435_v38 = vpop.f32.mrb[87].mxu0  ;;  %v1820_v48 = vadd.f32 %v1819_v54, %v6601_v41  ;;  %5528 = vtanh.f32 %v1818_v7  ;;  %1966 = vmatprep.mubr.bf16.mxu0 %v6386_v56  ;;  %v5324_v56 = vld [vmem:[#allocation8 + $0x184] ss:$8 sps:$4 sm:$0xff]  }
 0x24d   :  { %v1821_v9 = vpop.f32.mrb[23].mxu1  ;;  %v6708_v49 = vpop.eup %5504  ;;  %v2398_v57 = vpack.c.bf16 %v5503_v8, %v5495_v10  ;;  %3485 = vmatpush1.bf16.msra.mxu1 %v5313_v14  ;;  %v1436_v17 = vadd.f32 %v1435_v38, %v6605_v44  ;;  %5530 = vtanh.f32 %v1434_v27 }
 0x24e   :  { %v5507_v0 = vpop.eup %5506  ;;  %3486 = vmatprep.subr.bf16.mxu1 %v5318_v31  ;;  %v1822_v4 = vadd.f32 %v1821_v9, %v6607_v45  ;;  %5532 = vtanh.f32 %v1820_v48  ;;  %v1439_v30 = vpop.f32.mrb[88].mxu0  ;;  %v5319_v31 = vld [vmem:[#allocation8 + $0x170] ss:$8 sps:$4 sm:$0xff]  }
 0x24f   :  { %v6715_v1 = vpop.eup %5508  ;;  %3343 = vmatprep.mubr.bf16.mxu1 %v2398_v57  ;;  %v1825_v14 = vpop.f32.mrb[24].mxu1  ;;  %5534 = vtanh.f32 %v1436_v17  ;;  %v1440_v54 = vadd.f32 %v1439_v30, %v6599_v40 }
 0x250   :  { %7622 = vst [vmem:[#allocation26_spill] sm:$0xff] %v6715_v1  ;;  %v5511_v8 = vpop.eup %5510  ;;  %3344 = vmatmul.mubr.bf16.gmra.mrb[76].mxu1 %v2397_v32  ;;  %v1826_v7 = vadd.f32 %v1825_v14, %v6601_v41  ;;  %v1441_v38 = vpop.f32.mrb[89].mxu0  ;;  %5536 = vtanh.f32 %v1822_v4 }
 0x251   :  { %v6719_v10 = vpop.eup %5512  ;;  %3487 = vmatpush1.bf16.msra.mxu1 %v5316_v15  ;;  %v1827_v9 = vpop.f32.mrb[25].mxu1  ;;  %v1442_v32 = vadd.f32 %v1441_v38, %v6605_v44  ;;  %5538 = vtanh.f32 %v1440_v54 }
 0x252   :  { %v5515_v16 = vpop.eup %5514  ;;  %3488 = vmatprep.subr.bf16.mxu1 %v5321_v63  ;;  %v1828_v27 = vadd.f32 %v1827_v9, %v6607_v45  ;;  %v1443_v48 = vpop.f32.mrb[90].mxu0  ;;  %5540 = vtanh.f32 %v1826_v7  ;;  %v5322_v9 = vld [vmem:[#allocation8 + $0x180] ss:$8 sps:$4 sm:$0xff]  }
 0x253   :  { %v6723_v57 = vpop.eup %5516  ;;  %v1829_v15 = vpop.f32.mrb[26].mxu1  ;;  %v2405_v6 = vpack.c.bf16 %v5515_v16, %v5507_v0  ;;  %v1444_v17 = vadd.f32 %v1443_v48, %v6599_v40  ;;  %5542 = vtanh.f32 %v1442_v32  ;;  %1967 = vmatmul.mubr.bf16.gmra.mrb[196].mxu0 %v6384_v55  ;;  %v5327_v16 = vld [vmem:[#allocation8 + $0x194] ss:$8 sps:$4 sm:$0xff]  }
 0x254   :  { %7623 = vst [vmem:[#allocation27_spill] sm:$0xff] %v6723_v57  ;;  %v5519_v37 = vpop.eup %5518  ;;  %v1445_v30 = vpop.f32.mrb[91].mxu0  ;;  %v1830_v4 = vadd.f32 %v1829_v15, %v6601_v41  ;;  %5544 = vtanh.f32 %v1828_v27  ;;  %1976 = vmatprep.mubr.bf16.mxu0 %v6398_v23  ;;  %v5330_v23 = vld [vmem:[#allocation8 + $0x1a4] ss:$8 sps:$4 sm:$0xff]  }
 0x255   :  { %v1831_v14 = vpop.f32.mrb[27].mxu1  ;;  %v6730_v26 = vpop.eup %5520  ;;  %v2406_v38 = vpack.c.bf16 %v5519_v37, %v5511_v8  ;;  %3489 = vmatpush1.bf16.msra.mxu1 %v5319_v31  ;;  %v1446_v0 = vadd.f32 %v1445_v30, %v6605_v44  ;;  %5546 = vtanh.f32 %v1444_v17 }
 0x256   :  { %v5523_v39 = vpop.eup %5522  ;;  %3490 = vmatprep.subr.bf16.mxu1 %v5324_v56  ;;  %v1832_v7 = vadd.f32 %v1831_v14, %v6607_v45  ;;  %5548 = vtanh.f32 %v1830_v4  ;;  %v1449_v55 = vpop.f32.mrb[92].mxu0  ;;  %v5325_v56 = vld [vmem:[#allocation8 + $0x190] ss:$8 sps:$4 sm:$0xff]  }
 0x257   :  { %v6737_v48 = vpop.eup %5524  ;;  %3353 = vmatprep.mubr.bf16.mxu1 %v2406_v38  ;;  %v1835_v31 = vpop.f32.mrb[28].mxu1  ;;  %5550 = vtanh.f32 %v1446_v0  ;;  %v1450_v15 = vadd.f32 %v1449_v55, %v6599_v40 }
 0x258   :  { %7624 = vst [vmem:[#allocation28_spill] sm:$0xff] %v6737_v48  ;;  %v5527_v37 = vpop.eup %5526  ;;  %3354 = vmatmul.mubr.bf16.gmra.mrb[80].mxu1 %v2405_v6  ;;  %v1836_v27 = vadd.f32 %v1835_v31, %v6601_v41  ;;  %v1451_v30 = vpop.f32.mrb[93].mxu0  ;;  %5552 = vtanh.f32 %v1832_v7 }
 0x259   :  { %v6741_v8 = vpop.eup %5528  ;;  %3491 = vmatpush1.bf16.msra.mxu1 %v5322_v9  ;;  %v1837_v14 = vpop.f32.mrb[29].mxu1  ;;  %v1452_v6 = vadd.f32 %v1451_v30, %v6605_v44  ;;  %5554 = vtanh.f32 %v1450_v15 }
 0x25a   :  { %v5531_v32 = vpop.eup %5530  ;;  %3492 = vmatprep.subr.bf16.mxu1 %v5327_v16  ;;  %v1838_v17 = vadd.f32 %v1837_v14, %v6607_v45  ;;  %v1453_v4 = vpop.f32.mrb[94].mxu0  ;;  %5556 = vtanh.f32 %v1836_v27  ;;  %v5328_v14 = vld [vmem:[#allocation8 + $0x1a0] ss:$8 sps:$4 sm:$0xff]  }
 0x25b   :  { %v6745_v38 = vpop.eup %5532  ;;  %v1839_v9 = vpop.f32.mrb[30].mxu1  ;;  %v2413_v63 = vpack.c.bf16 %v5531_v32, %v5523_v39  ;;  %v1454_v0 = vadd.f32 %v1453_v4, %v6599_v40  ;;  %5558 = vtanh.f32 %v1452_v6  ;;  %1977 = vmatmul.mubr.bf16.gmra.mrb[200].mxu0 %v6396_v22  ;;  %v5333_v32 = vld [vmem:[#allocation8 + $0x1b4] ss:$8 sps:$4 sm:$0xff]  }
 0x25c   :  { %7625 = vst [vmem:[#allocation29_spill] sm:$0xff] %v6745_v38  ;;  %v5535_v54 = vpop.eup %5534  ;;  %v1455_v55 = vpop.f32.mrb[95].mxu0  ;;  %v1840_v7 = vadd.f32 %v1839_v9, %v6601_v41  ;;  %5560 = vtanh.f32 %v1838_v17  ;;  %1986 = vmatprep.mubr.bf16.mxu0 %v6410_v51  ;;  %v5336_v51 = vld [vmem:[#allocation8 + $0x1c4] ss:$8 sps:$4 sm:$0xff]  }
 0x25d   :  { %v1841_v31 = vpop.f32.mrb[31].mxu1  ;;  %v6752_v1 = vpop.eup %5536  ;;  %v2414_v30 = vpack.c.bf16 %v5535_v54, %v5527_v37  ;;  %3493 = vmatpush1.bf16.msra.mxu1 %v5325_v56  ;;  %v1456_v39 = vadd.f32 %v1455_v55, %v6605_v44  ;;  %5562 = vtanh.f32 %v1454_v0 }
 0x25e   :  { %v5539_v57 = vpop.eup %5538  ;;  %3494 = vmatprep.subr.bf16.mxu1 %v5330_v23  ;;  %v1842_v27 = vadd.f32 %v1841_v31, %v6607_v45  ;;  %5564 = vtanh.f32 %v1840_v7  ;;  %v1459_v22 = vpop.f32.mrb[96].mxu0  ;;  %v5331_v23 = vld [vmem:[#allocation8 + $0x1b0] ss:$8 sps:$4 sm:$0xff]  }
 0x25f   :  { %v6759_v4 = vpop.eup %5540  ;;  %3363 = vmatprep.mubr.bf16.mxu1 %v2414_v30  ;;  %v1845_v56 = vpop.f32.mrb[32].mxu1  ;;  %5566 = vtanh.f32 %v1456_v39  ;;  %v1460_v9 = vadd.f32 %v1459_v22, %v6599_v40 }
 0x260   :  { %7626 = vst [vmem:[#allocation30_spill] sm:$0xff] %v6759_v4  ;;  %v5543_v54 = vpop.eup %5542  ;;  %3364 = vmatmul.mubr.bf16.gmra.mrb[84].mxu1 %v2413_v63  ;;  %v1846_v17 = vadd.f32 %v1845_v56, %v6601_v41  ;;  %v1461_v55 = vpop.f32.mrb[97].mxu0  ;;  %5568 = vtanh.f32 %v1842_v27 }
 0x261   :  { %v6763_v37 = vpop.eup %5544  ;;  %3495 = vmatpush1.bf16.msra.mxu1 %v5328_v14  ;;  %v1847_v31 = vpop.f32.mrb[33].mxu1  ;;  %v1462_v63 = vadd.f32 %v1461_v55, %v6605_v44  ;;  %5570 = vtanh.f32 %v1460_v9 }
 0x262   :  { %v5547_v6 = vpop.eup %5546  ;;  %3496 = vmatprep.subr.bf16.mxu1 %v5333_v32  ;;  %v1848_v0 = vadd.f32 %v1847_v31, %v6607_v45  ;;  %v1463_v7 = vpop.f32.mrb[98].mxu0  ;;  %5572 = vtanh.f32 %v1846_v17  ;;  %v5334_v31 = vld [vmem:[#allocation8 + $0x1c0] ss:$8 sps:$4 sm:$0xff]  }
 0x263   :  { %v6767_v30 = vpop.eup %5548  ;;  %v1849_v14 = vpop.f32.mrb[34].mxu1  ;;  %v2421_v16 = vpack.c.bf16 %v5547_v6, %v5539_v57  ;;  %v1464_v39 = vadd.f32 %v1463_v7, %v6599_v40  ;;  %5574 = vtanh.f32 %v1462_v63  ;;  %1987 = vmatmul.mubr.bf16.gmra.mrb[204].mxu0 %v6408_v50  ;;  %v5339_v6 = vld [vmem:[#allocation8 + $0x1d4] ss:$8 sps:$4 sm:$0xff]  }
 0x264   :  { %7627 = vst [vmem:[#allocation31_spill] sm:$0xff] %v6767_v30  ;;  %v5551_v15 = vpop.eup %5550  ;;  %v1465_v22 = vpop.f32.mrb[99].mxu0  ;;  %v1850_v27 = vadd.f32 %v1849_v14, %v6601_v41  ;;  %5576 = vtanh.f32 %v1848_v0  ;;  %1996 = vmatprep.mubr.bf16.mxu0 %v6422_v19  ;;  %v5342_v19 = vld [vmem:[#allocation8 + $0x1e4] ss:$8 sps:$4 sm:$0xff]  }
 0x265   :  { %v1851_v56 = vpop.f32.mrb[35].mxu1  ;;  %v6774_v48 = vpop.eup %5552  ;;  %v2422_v55 = vpack.c.bf16 %v5551_v15, %v5543_v54  ;;  %3497 = vmatpush1.bf16.msra.mxu1 %v5331_v23  ;;  %v1466_v57 = vadd.f32 %v1465_v22, %v6605_v44  ;;  %5578 = vtanh.f32 %v1464_v39 }
 0x266   :  { %v5555_v38 = vpop.eup %5554  ;;  %3498 = vmatprep.subr.bf16.mxu1 %v5336_v51  ;;  %v1852_v17 = vadd.f32 %v1851_v56, %v6607_v45  ;;  %5580 = vtanh.f32 %v1850_v27  ;;  %v1469_v50 = vpop.f32.mrb[100].mxu0  ;;  %v5337_v51 = vld [vmem:[#allocation8 + $0x1d0] ss:$8 sps:$4 sm:$0xff]  }
 0x267   :  { %v6781_v7 = vpop.eup %5556  ;;  %3373 = vmatprep.mubr.bf16.mxu1 %v2422_v55  ;;  %v1855_v23 = vpop.f32.mrb[36].mxu1  ;;  %5582 = vtanh.f32 %v1466_v57  ;;  %v1470_v14 = vadd.f32 %v1469_v50, %v6599_v40 }
 0x268   :  { %7628 = vst [vmem:[#allocation32_spill] sm:$0xff] %v6781_v7  ;;  %v5559_v15 = vpop.eup %5558  ;;  %3374 = vmatmul.mubr.bf16.gmra.mrb[88].mxu1 %v2421_v16  ;;  %v1856_v0 = vadd.f32 %v1855_v23, %v6601_v41  ;;  %v1471_v22 = vpop.f32.mrb[101].mxu0  ;;  %5584 = vtanh.f32 %v1852_v17 }
 0x269   :  { %v6785_v54 = vpop.eup %5560  ;;  %3499 = vmatpush1.bf16.msra.mxu1 %v5334_v31  ;;  %v1857_v56 = vpop.f32.mrb[37].mxu1  ;;  %v1472_v16 = vadd.f32 %v1471_v22, %v6605_v44  ;;  %5586 = vtanh.f32 %v1470_v14 }
 0x26a   :  { %v5563_v63 = vpop.eup %5562  ;;  %3500 = vmatprep.subr.bf16.mxu1 %v5339_v6  ;;  %v1858_v39 = vadd.f32 %v1857_v56, %v6607_v45  ;;  %v1473_v27 = vpop.f32.mrb[102].mxu0  ;;  %5588 = vtanh.f32 %v1856_v0  ;;  %v5340_v56 = vld [vmem:[#allocation8 + $0x1e0] ss:$8 sps:$4 sm:$0xff]  }
 0x26b   :  { %v6789_v55 = vpop.eup %5564  ;;  %v1859_v31 = vpop.f32.mrb[38].mxu1  ;;  %v2429_v32 = vpack.c.bf16 %v5563_v63, %v5555_v38  ;;  %v1474_v57 = vadd.f32 %v1473_v27, %v6599_v40  ;;  %5590 = vtanh.f32 %v1472_v16  ;;  %1997 = vmatmul.mubr.bf16.gmra.mrb[208].mxu0 %v6420_v18  ;;  %v5345_v63 = vld [vmem:[#allocation8 + $0x1f4] ss:$8 sps:$4 sm:$0xff]  }
 0x26c   :  { %v5567_v9 = vpop.eup %5566  ;;  %v1475_v50 = vpop.f32.mrb[103].mxu0  ;;  %v1860_v17 = vadd.f32 %v1859_v31, %v6601_v41  ;;  %5592 = vtanh.f32 %v1858_v39  ;;  %2006 = vmatprep.mubr.bf16.mxu0 %v6434_v47  ;;  %v5348_v47 = vld [vmem:[#allocation8 + $0x204] ss:$8 sps:$4 sm:$0xff]  }
 0x26d   :  { %v1861_v23 = vpop.f32.mrb[39].mxu1  ;;  %v6796_v4 = vpop.eup %5568  ;;  %v2430_v22 = vpack.c.bf16 %v5567_v9, %v5559_v15  ;;  %3501 = vmatpush1.bf16.msra.mxu1 %v5337_v51  ;;  %v1476_v38 = vadd.f32 %v1475_v50, %v6605_v44  ;;  %5594 = vtanh.f32 %v1474_v57 }
 0x26e   :  { %v5571_v30 = vpop.eup %5570  ;;  %3502 = vmatprep.subr.bf16.mxu1 %v5342_v19  ;;  %v1862_v0 = vadd.f32 %v1861_v23, %v6607_v45  ;;  %5596 = vtanh.f32 %v1860_v17  ;;  %v1479_v18 = vpop.f32.mrb[104].mxu0  ;;  %v5343_v19 = vld [vmem:[#allocation8 + $0x1f0] ss:$8 sps:$4 sm:$0xff]  }
 0x26f   :  { %v6803_v27 = vpop.eup %5572  ;;  %3383 = vmatprep.mubr.bf16.mxu1 %v2430_v22  ;;  %v1865_v51 = vpop.f32.mrb[40].mxu1  ;;  %5598 = vtanh.f32 %v1476_v38  ;;  %v1480_v31 = vadd.f32 %v1479_v18, %v6599_v40 }
 0x270   :  { %7629 = vst [vmem:[#allocation33_spill] sm:$0xff] %v6803_v27  ;;  %v5575_v9 = vpop.eup %5574  ;;  %3384 = vmatmul.mubr.bf16.gmra.mrb[92].mxu1 %v2429_v32  ;;  %v1866_v39 = vadd.f32 %v1865_v51, %v6601_v41  ;;  %v1481_v50 = vpop.f32.mrb[105].mxu0  ;;  %5600 = vtanh.f32 %v1862_v0  ;;  %v5376_v27 = vld [vmem:[#allocation8 + $0x310] ss:$8 sps:$4 sm:$0xff]  }
 0x271   :  { %v6807_v15 = vpop.eup %5576  ;;  %3503 = vmatpush1.bf16.msra.mxu1 %v5340_v56  ;;  %v1867_v23 = vpop.f32.mrb[41].mxu1  ;;  %v1482_v32 = vadd.f32 %v1481_v50, %v6605_v44  ;;  %5602 = vtanh.f32 %v1480_v31 }
 0x272   :  { %v5579_v16 = vpop.eup %5578  ;;  %3504 = vmatprep.subr.bf16.mxu1 %v5345_v63  ;;  %v1868_v57 = vadd.f32 %v1867_v23, %v6607_v45  ;;  %v1483_v17 = vpop.f32.mrb[106].mxu0  ;;  %5604 = vtanh.f32 %v1866_v39 }
 0x273   :  { %v6811_v22 = vpop.eup %5580  ;;  %v1869_v56 = vpop.f32.mrb[42].mxu1  ;;  %v2437_v6 = vpack.c.bf16 %v5579_v16, %v5571_v30  ;;  %v1484_v38 = vadd.f32 %v1483_v17, %v6599_v40  ;;  %5606 = vtanh.f32 %v1482_v32  ;;  %2007 = vmatmul.mubr.bf16.gmra.mrb[212].mxu0 %v6432_v46 }
 0x274   :  { %7630 = vst [vmem:[#allocation34_spill] sm:$0xff] %v6811_v22  ;;  %v5583_v14 = vpop.eup %5582  ;;  %v1485_v18 = vpop.f32.mrb[107].mxu0  ;;  %v1870_v0 = vadd.f32 %v1869_v56, %v6601_v41  ;;  %5608 = vtanh.f32 %v1868_v57  ;;  %2016 = vmatprep.mubr.bf16.mxu0 %v6452_v21 }
 0x275   :  { %v1871_v51 = vpop.f32.mrb[43].mxu1  ;;  %v6818_v7 = vpop.eup %5584  ;;  %v2438_v50 = vpack.c.bf16 %v5583_v14, %v5575_v9  ;;  %3505 = vmatpush1.bf16.msra.mxu1 %v5343_v19  ;;  %v1486_v30 = vadd.f32 %v1485_v18, %v6605_v44  ;;  %v5375_v14 = vld [vmem:[#allocation8 + $0x304] ss:$8 sps:$4 sm:$0xff]   ;;  %5610 = vtanh.f32 %v1484_v38  ;;  %v5373_v19 = vld [vmem:[#allocation8 + $0x300] ss:$8 sps:$4 sm:$0xff]  }
 0x276   :  { %v5587_v23 = vpop.eup %5586  ;;  %3667 = vmatprep.subr.bf16.mxu1 %v5348_v47  ;;  %v1872_v17 = vadd.f32 %v1871_v51, %v6607_v45  ;;  %5612 = vtanh.f32 %v1870_v0  ;;  %v1489_v46 = vpop.f32.mrb[108].mxu0  ;;  %3860 = vmatprep.subr.bf16.mxu0 %v5375_v14  ;;  %v5378_v14 = vld [vmem:[#allocation8 + $0x314] ss:$8 sps:$4 sm:$0xff]  }
 0x277   :  { %v6825_v31 = vpop.eup %5588  ;;  %3393 = vmatprep.mubr.bf16.mxu1 %v2438_v50  ;;  %v1875_v47 = vpop.f32.mrb[44].mxu1  ;;  %5614 = vtanh.f32 %v1486_v30  ;;  %v1490_v57 = vadd.f32 %v1489_v46, %v6599_v40  ;;  %3861 = vmatpush1.bf16.msra.mxu0 %v5373_v19 }
 0x278   :  { %7631 = vst [vmem:[#allocation35_spill] sm:$0xff] %v6825_v31  ;;  %v5591_v9 = vpop.eup %5590  ;;  %3394 = vmatmul.mubr.bf16.gmra.mrb[96].mxu1 %v2437_v6  ;;  %v1876_v56 = vadd.f32 %v1875_v47, %v6601_v41  ;;  %v1491_v18 = vpop.f32.mrb[109].mxu0  ;;  %5616 = vtanh.f32 %v1872_v17  ;;  %3862 = vmatprep.subr.bf16.mxu0 %v5378_v14 }
 0x279   :  { %v6829_v39 = vpop.eup %5592  ;;  %v1877_v51 = vpop.f32.mrb[45].mxu1  ;;  %v1492_v6 = vadd.f32 %v1491_v18, %v6605_v44  ;;  %5618 = vtanh.f32 %v1490_v57 }
 0x27a   :  { %v5595_v32 = vpop.eup %5594  ;;  %v1878_v38 = vadd.f32 %v1877_v51, %v6607_v45  ;;  %v1493_v0 = vpop.f32.mrb[110].mxu0  ;;  %5620 = vtanh.f32 %v1876_v56  ;;  %v5384_v56 = vld [vmem:[#allocation8 + $0x324] ss:$8 sps:$4 sm:$0xff]  }
 0x27b   :  { %v6833_v21 = vpop.eup %5596  ;;  %v1879_v50 = vpop.f32.mrb[46].mxu1  ;;  %v2445_v63 = vpack.c.bf16 %v5595_v32, %v5587_v23  ;;  %v1494_v30 = vadd.f32 %v1493_v0, %v6599_v40  ;;  %5622 = vtanh.f32 %v1492_v6  ;;  %2017 = vmatmul.mubr.bf16.gmra.mrb[216].mxu0 %v6450_v20  ;;  %v5387_v32 = vld [vmem:[#allocation8 + $0x334] ss:$8 sps:$4 sm:$0xff]  }
 0x27c   :  { %7632 = vst [vmem:[#allocation36_spill] sm:$0xff] %v6833_v21  ;;  %v5599_v16 = vpop.eup %5598  ;;  %v1495_v46 = vpop.f32.mrb[111].mxu0  ;;  %v1880_v17 = vadd.f32 %v1879_v50, %v6601_v41  ;;  %5624 = vtanh.f32 %v1878_v38  ;;  %2026 = vmatprep.mubr.bf16.mxu0 %v6464_v53  ;;  %3863 = vmatpush1.bf16.msra.mxu0 %v5376_v27 }
 0x27d   :  { %v1881_v47 = vpop.f32.mrb[47].mxu1  ;;  %v6840_v22 = vpop.eup %5600  ;;  %v2446_v18 = vpack.c.bf16 %v5599_v16, %v5591_v9  ;;  %v1496_v23 = vadd.f32 %v1495_v46, %v6605_v44  ;;  %5626 = vtanh.f32 %v1494_v30  ;;  %v5382_v9 = vld [vmem:[#allocation8 + $0x320] ss:$8 sps:$4 sm:$0xff]   ;;  %3864 = vmatprep.subr.bf16.mxu0 %v5384_v56 }
 0x27e   :  { %v5603_v51 = vpop.eup %5602  ;;  %v1882_v0 = vadd.f32 %v1881_v47, %v6607_v45  ;;  %5628 = vtanh.f32 %v1880_v17  ;;  %v1499_v20 = vpop.f32.mrb[112].mxu0 }
 0x27f   :  { %v6847_v57 = vpop.eup %5604  ;;  %3403 = vmatprep.mubr.bf16.mxu1 %v2446_v18  ;;  %v1885_v50 = vpop.f32.mrb[48].mxu1  ;;  %5630 = vtanh.f32 %v1496_v23  ;;  %v1500_v38 = vadd.f32 %v1499_v20, %v6599_v40 }
 0x280   :  { %7633 = vst [vmem:[#allocation37_spill] sm:$0xff] %v6847_v57  ;;  %v5607_v16 = vpop.eup %5606  ;;  %3404 = vmatmul.mubr.bf16.gmra.mrb[100].mxu1 %v2445_v63  ;;  %v1886_v46 = vadd.f32 %v1885_v50, %v6601_v41  ;;  %v1501_v47 = vpop.f32.mrb[113].mxu0  ;;  %5632 = vtanh.f32 %v1882_v0  ;;  %3865 = vmatpush1.bf16.msra.mxu0 %v5382_v9  ;;  %v5385_v50 = vld [vmem:[#allocation8 + $0x330] ss:$8 sps:$4 sm:$0xff]   ;;  %v5396_v9 = vld [vmem:[#allocation8 + $0x354] ss:$8 sps:$4 sm:$0xff]  }
 0x281   :  { %v6851_v6 = vpop.eup %5608  ;;  %v1887_v53 = vpop.f32.mrb[49].mxu1  ;;  %v1502_v27 = vadd.f32 %v1501_v47, %v6605_v44  ;;  %5634 = vtanh.f32 %v1500_v38  ;;  %3866 = vmatprep.subr.bf16.mxu0 %v5387_v32  ;;  %v5391_v32 = vld [vmem:[#allocation8 + $0x340] ss:$8 sps:$4 sm:$0xff]  }
 0x282   :  { %v5611_v14 = vpop.eup %5610  ;;  %v1888_v63 = vadd.f32 %v1887_v53, %v6607_v45  ;;  %v1503_v30 = vpop.f32.mrb[114].mxu0  ;;  %5636 = vtanh.f32 %v1886_v46  ;;  %v5393_v46 = vld [vmem:[#allocation8 + $0x344] ss:$8 sps:$4 sm:$0xff]  }
 0x283   :  { %v6855_v18 = vpop.eup %5612  ;;  %v1889_v17 = vpop.f32.mrb[50].mxu1  ;;  %v2453_v19 = vpack.c.bf16 %v5611_v14, %v5603_v51  ;;  %v1504_v23 = vadd.f32 %v1503_v30, %v6599_v40  ;;  %5638 = vtanh.f32 %v1502_v27  ;;  %2027 = vmatmul.mubr.bf16.gmra.mrb[220].mxu0 %v6462_v52 }
 0x284   :  { %7634 = vst [vmem:[#allocation38_spill] sm:$0xff] %v6855_v18  ;;  %v5615_v56 = vpop.eup %5614  ;;  %v1505_v20 = vpop.f32.mrb[115].mxu0  ;;  %v1890_v47 = vadd.f32 %v1889_v17, %v6601_v41  ;;  %5640 = vtanh.f32 %v1888_v63  ;;  %2036 = vmatprep.mubr.bf16.mxu0 %v6478_v25  ;;  %3867 = vmatpush1.bf16.msra.mxu0 %v5385_v50 }
 0x285   :  { %v1891_v31 = vpop.f32.mrb[51].mxu1  ;;  %v6862_v0 = vpop.eup %5616  ;;  %v2454_v53 = vpack.c.bf16 %v5615_v56, %v5607_v16  ;;  %v1506_v14 = vadd.f32 %v1505_v20, %v6605_v44  ;;  %5642 = vtanh.f32 %v1504_v23  ;;  %3868 = vmatprep.subr.bf16.mxu0 %v5393_v46 }
 0x286   :  { %v5619_v51 = vpop.eup %5618  ;;  %v1892_v30 = vadd.f32 %v1891_v31, %v6607_v45  ;;  %5644 = vtanh.f32 %v1890_v47  ;;  %v1509_v52 = vpop.f32.mrb[116].mxu0 }
 0x287   :  { %v6869_v38 = vpop.eup %5620  ;;  %3413 = vmatprep.mubr.bf16.mxu1 %v2454_v53  ;;  %v1895_v17 = vpop.f32.mrb[52].mxu1  ;;  %5646 = vtanh.f32 %v1506_v14  ;;  %v1510_v63 = vadd.f32 %v1509_v52, %v6599_v40 }
 0x288   :  { %7635 = vst [vmem:[#allocation39_spill] sm:$0xff] %v6869_v38  ;;  %v5623_v16 = vpop.eup %5622  ;;  %3414 = vmatmul.mubr.bf16.gmra.mrb[104].mxu1 %v2453_v19  ;;  %v1896_v31 = vadd.f32 %v1895_v17, %v6601_v41  ;;  %v1511_v20 = vpop.f32.mrb[117].mxu0  ;;  %5648 = vtanh.f32 %v1892_v30  ;;  %3869 = vmatpush1.bf16.msra.mxu0 %v5391_v32  ;;  %v5394_v17 = vld [vmem:[#allocation8 + $0x350] ss:$8 sps:$4 sm:$0xff]   ;;  %v5405_v32 = vld [vmem:[#allocation8 + $0x374] ss:$8 sps:$4 sm:$0xff]  }
 0x289   :  { %v6873_v27 = vpop.eup %5624  ;;  %v1897_v25 = vpop.f32.mrb[53].mxu1  ;;  %v1512_v19 = vadd.f32 %v1511_v20, %v6605_v44  ;;  %5650 = vtanh.f32 %v1510_v63  ;;  %3870 = vmatprep.subr.bf16.mxu0 %v5396_v9  ;;  %v5400_v9 = vld [vmem:[#allocation8 + $0x360] ss:$8 sps:$4 sm:$0xff]  }
 0x28a   :  { %v5627_v56 = vpop.eup %5626  ;;  %v1898_v23 = vadd.f32 %v1897_v25, %v6607_v45  ;;  %v1513_v50 = vpop.f32.mrb[118].mxu0  ;;  %5652 = vtanh.f32 %v1896_v31  ;;  %v5402_v31 = vld [vmem:[#allocation8 + $0x364] ss:$8 sps:$4 sm:$0xff]  }
 0x28b   :  { %v6877_v53 = vpop.eup %5628  ;;  %v1899_v47 = vpop.f32.mrb[54].mxu1  ;;  %v2461_v21 = vpack.c.bf16 %v5627_v56, %v5619_v51  ;;  %v1514_v14 = vadd.f32 %v1513_v50, %v6599_v40  ;;  %5654 = vtanh.f32 %v1512_v19  ;;  %2037 = vmatmul.mubr.bf16.gmra.mrb[224].mxu0 %v6476_v24 }
 0x28c   :  { %7636 = vst [vmem:[#allocation40_spill] sm:$0xff] %v6877_v53  ;;  %v5631_v46 = vpop.eup %5630  ;;  %v1515_v52 = vpop.f32.mrb[119].mxu0  ;;  %v1900_v20 = vadd.f32 %v1899_v47, %v6601_v41  ;;  %5656 = vtanh.f32 %v1898_v23  ;;  %2046 = vmatprep.mubr.bf16.mxu0 %v6490_v43  ;;  %3871 = vmatpush1.bf16.msra.mxu0 %v5394_v17 }
 0x28d   :  { %v1901_v57 = vpop.f32.mrb[55].mxu1  ;;  %v6884_v30 = vpop.eup %5632  ;;  %v2462_v25 = vpack.c.bf16 %v5631_v46, %v5623_v16  ;;  %v1516_v56 = vadd.f32 %v1515_v52, %v6605_v44  ;;  %5658 = vtanh.f32 %v1514_v14  ;;  %3872 = vmatprep.subr.bf16.mxu0 %v5402_v31 }
 0x28e   :  { %v5635_v51 = vpop.eup %5634  ;;  %v1902_v50 = vadd.f32 %v1901_v57, %v6607_v45  ;;  %5660 = vtanh.f32 %v1900_v20  ;;  %v1519_v24 = vpop.f32.mrb[120].mxu0 }
 0x28f   :  { %v6891_v63 = vpop.eup %5636  ;;  %3423 = vmatprep.mubr.bf16.mxu1 %v2462_v25  ;;  %v1905_v47 = vpop.f32.mrb[56].mxu1  ;;  %5662 = vtanh.f32 %v1516_v56  ;;  %v1520_v23 = vadd.f32 %v1519_v24, %v6599_v40 }
 0x290   :  { %7637 = vst [vmem:[#allocation41_spill] sm:$0xff] %v6891_v63  ;;  %v5639_v16 = vpop.eup %5638  ;;  %3424 = vmatmul.mubr.bf16.gmra.mrb[108].mxu1 %v2461_v21  ;;  %v1906_v57 = vadd.f32 %v1905_v47, %v6601_v41  ;;  %v1521_v52 = vpop.f32.mrb[121].mxu0  ;;  %5664 = vtanh.f32 %v1902_v50  ;;  %3873 = vmatpush1.bf16.msra.mxu0 %v5400_v9  ;;  %v5403_v47 = vld [vmem:[#allocation8 + $0x370] ss:$8 sps:$4 sm:$0xff]  }
 0x291   :  { %v6895_v19 = vpop.eup %5640  ;;  %v1907_v43 = vpop.f32.mrb[57].mxu1  ;;  %v1522_v21 = vadd.f32 %v1521_v52, %v6605_v44  ;;  %5666 = vtanh.f32 %v1520_v23  ;;  %3874 = vmatprep.subr.bf16.mxu0 %v5405_v32 }
 0x292   :  { %7638 = vst [vmem:[#allocation42_spill] sm:$0xff] %v6895_v19  ;;  %v5643_v46 = vpop.eup %5642  ;;  %v1908_v14 = vadd.f32 %v1907_v43, %v6607_v45  ;;  %v1523_v17 = vpop.f32.mrb[122].mxu0  ;;  %5668 = vtanh.f32 %v1906_v57  ;;  %v5409_v57 = vld [vmem:[#allocation8 + $0x380] ss:$8 sps:$4 sm:$0xff]   ;;  %v5412_v19 = vld [vmem:[#allocation8 + $0x390] ss:$8 sps:$4 sm:$0xff]  }
 0x293   :  { %v6899_v25 = vpop.eup %5644  ;;  %v1909_v20 = vpop.f32.mrb[58].mxu1  ;;  %v2469_v18 = vpack.c.bf16 %v5643_v46, %v5635_v51  ;;  %v1524_v56 = vadd.f32 %v1523_v17, %v6599_v40  ;;  %5670 = vtanh.f32 %v1522_v21  ;;  %2047 = vmatmul.mubr.bf16.gmra.mrb[228].mxu0 %v6488_v42 }
 0x294   :  { %7639 = vst [vmem:[#allocation43_spill] sm:$0xff] %v6899_v25  ;;  %v5647_v31 = vpop.eup %5646  ;;  %v1525_v24 = vpop.f32.mrb[123].mxu0  ;;  %v1910_v52 = vadd.f32 %v1909_v20, %v6601_v41  ;;  %5672 = vtanh.f32 %v1908_v14  ;;  %2056 = vmatprep.mubr.bf16.mxu0 %v6502_v5  ;;  %3875 = vmatpush1.bf16.msra.mxu0 %v5403_v47 }
 0x295   :  { %v1911_v38 = vpop.f32.mrb[59].mxu1  ;;  %v6906_v50 = vpop.eup %5648  ;;  %v2470_v43 = vpack.c.bf16 %v5647_v31, %v5639_v16  ;;  %v1526_v46 = vadd.f32 %v1525_v24, %v6605_v44  ;;  %v5411_v16 = vld [vmem:[#allocation8 + $0x384] ss:$8 sps:$4 sm:$0xff]   ;;  %5674 = vtanh.f32 %v1524_v56  ;;  %v675_v31 = vsub.s32 2, %v6351_v11 }
 0x296   :  { %7640 = vst [vmem:[#allocation44_spill] sm:$0xff] %v6906_v50  ;;  %v6909_v51 = vpop.eup %5650  ;;  %v1912_v17 = vadd.f32 %v1911_v38, %v6607_v45  ;;  %5676 = vtanh.f32 %v1910_v52  ;;  %v1529_v42 = vpop.f32.mrb[124].mxu0  ;;  %3876 = vmatprep.subr.bf16.mxu0 %v5411_v16 }
 0x297   :  { %v6915_v23 = vpop.eup %5652  ;;  %3433 = vmatprep.mubr.bf16.mxu1 %v2470_v43  ;;  %v1915_v20 = vpop.f32.mrb[60].mxu1  ;;  %5678 = vtanh.f32 %v1526_v46  ;;  %v1530_v38 = vadd.f32 %v1529_v42, %v6599_v40  ;;  %v5414_v46 = vld [vmem:[#allocation8 + $0x394] ss:$8 sps:$4 sm:$0xff]  }
 0x298   :  { %v5655_v32 = vpop.eup %5654  ;;  %3434 = vmatmul.mubr.bf16.gmra.mrb[112].mxu1 %v2469_v18  ;;  %v1916_v5 = vadd.f32 %v1915_v20, %v6601_v41  ;;  %v1531_v24 = vpop.f32.mrb[125].mxu0  ;;  %v679_v18 = vsub.s32 3, %v6351_v11  ;;  %5680 = vtanh.f32 %v1912_v17  ;;  %3877 = vmatpush1.bf16.msra.mxu0 %v5409_v57 }
 0x299   :  { %v6919_v21 = vpop.eup %5656  ;;  %v1917_v43 = vpop.f32.mrb[61].mxu1  ;;  %v1532_v47 = vadd.f32 %v1531_v24, %v6605_v44  ;;  %5682 = vtanh.f32 %v1530_v38  ;;  %3878 = vmatprep.subr.bf16.mxu0 %v5414_v46 }
 0x29a   :  { %v5659_v14 = vpop.eup %5658  ;;  %v1918_v52 = vadd.f32 %v1917_v43, %v6607_v45  ;;  %v1533_v53 = vpop.f32.mrb[126].mxu0  ;;  %5684 = vtanh.f32 %v1916_v5 }
 0x29b   :  { %v6925_v56 = vpop.eup %5660  ;;  %v1919_v9 = vpop.f32.mrb[62].mxu1  ;;  %v2477_v16 = vpack.c.bf16 %v5659_v14, %v6909_v51  ;;  %v1534_v42 = vadd.f32 %v1533_v53, %v6599_v40  ;;  %5686 = vtanh.f32 %v1532_v47  ;;  %2057 = vmatmul.mubr.bf16.gmra.mrb[232].mxu0 %v6500_v3  ;;  %v6941_v40 = vld [vmem:[%s7569_s4] sm:$0xff] }
 0x29c   :  { %v5663_v63 = vpop.eup %5662  ;;  %v1535_v20 = vpop.f32.mrb[127].mxu0  ;;  %v2481_v17 = vpack.c.bf16 %v6925_v56, %v6915_v23  ;;  %v1920_v24 = vadd.f32 %v1919_v9, %v6601_v41  ;;  %v6944_v53 = vrot.slane %v6941_v40, %v675_v31  ;;  %5688 = vtanh.f32 %v1918_v52  ;;  %2066 = vmatprep.mubr.bf16.mxu0 %v6514_v35  ;;  %3879 = vmatpush1.bf16.msra.mxu0 %v5412_v19 }
 0x29d   :  { %v1921_v25 = vpop.f32.mrb[63].mxu1  ;;  %v6933_v50 = vpop.eup %5664  ;;  %v2478_v43 = vpack.c.bf16 %v5663_v63, %v5655_v32  ;;  %v1536_v14 = vadd.f32 %v1535_v20, %v6605_v44  ;;  %v6953_v3 = vrot.slane %v6941_v40, %v679_v18  ;;  %v5420_v44 = vld [vmem:[#allocation8 + $0x3a4] ss:$8 sps:$4 sm:$0xff]   ;;  %5690 = vtanh.f32 %v1534_v42  ;;  %v5418_v32 = vld [vmem:[#allocation8 + $0x3a0] ss:$8 sps:$4 sm:$0xff]  }
 0x29e   :  { %v5667_v51 = vpop.eup %5666  ;;  %v2482_v57 = vpack.c.bf16 %v6933_v50, %v6919_v21  ;;  %v1922_v63 = vadd.f32 %v1921_v25, %v6607_v45  ;;  %5692 = vtanh.f32 %v1920_v24  ;;  %v1572_v38 = vpop.f32.mrb[128].mxu0  ;;  %3880 = vmatprep.subr.bf16.mxu0 %v5420_v44  ;;  %v5421_v20 = vld [vmem:[#allocation8 + $0x3b0] ss:$8 sps:$4 sm:$0xff]  }
 0x29f   :  { %v6948_v41 = vpop.eup %5668  ;;  %3443 = vmatprep.mubr.bf16.mxu1 %v2478_v43  ;;  %5694 = vtanh.f32 %v1536_v14  ;;  %v1573_v45 = vadd.f32 %v1572_v38, %v6944_v53  ;;  %v1574_v25 = vpop.f32.mrb[129].mxu0 }
 0x2a0   :  { %v5671_v9 = vpop.eup %5670  ;;  %3444 = vmatmul.mubr.bf16.gmra.mrb[116].mxu1 %v2477_v16  ;;  %5696 = vtanh.f32 %v1922_v63  ;;  %v1575_v18 = vadd.f32 %v1574_v25, %v6953_v3  ;;  %v1576_v47 = vpop.f32.mrb[130].mxu0  ;;  %v5423_v16 = vld [vmem:[#allocation8 + $0x3b4] ss:$8 sps:$4 sm:$0xff]   ;;  %3881 = vmatpush1.bf16.msra.mxu0 %v5418_v32  ;;  %v5429_v32 = vld [vmem:[#allocation8 + $0x3c4] ss:$8 sps:$4 sm:$0xff]  }
 0x2a1   :  { %v6955_v31 = vpop.eup %5672  ;;  %5698 = vtanh.f32 %v1573_v45  ;;  %v1577_v46 = vadd.f32 %v1576_v47, %v6944_v53  ;;  %v1578_v42 = vpop.f32.mrb[131].mxu0  ;;  %3882 = vmatprep.subr.bf16.mxu0 %v5423_v16  ;;  %v5427_v45 = vld [vmem:[#allocation8 + $0x3c0] ss:$8 sps:$4 sm:$0xff]  }
 0x2a2   :  { %v5675_v5 = vpop.eup %5674  ;;  %5700 = vtanh.f32 %v1575_v18  ;;  %v1579_v14 = vadd.f32 %v1578_v42, %v6953_v3 }
 0x2a3   :  { %v6958_v35 = vpop.eup %5676  ;;  %v2485_v52 = vpack.c.bf16 %v5675_v5, %v5667_v51  ;;  %5702 = vtanh.f32 %v1577_v46  ;;  %2067 = vmatmul.mubr.bf16.gmra.mrb[236].mxu0 %v6512_v34 }
 0x2a4   :  { %v5679_v19 = vpop.eup %5678  ;;  %5704 = vtanh.f32 %v1579_v14  ;;  %2076 = vmatprep.mubr.bf16.mxu0 %v6526_v59  ;;  %3883 = vmatpush1.bf16.msra.mxu0 %v5421_v20  ;;  %v5432_v59 = vld [vmem:[#allocation8 + $0x3d4] ss:$8 sps:$4 sm:$0xff]  }
 0x2a5   :  { %v6964_v43 = vpop.eup %5680  ;;  %v2486_v63 = vpack.c.bf16 %v5679_v19, %v5671_v9  ;;  %3884 = vmatprep.subr.bf16.mxu0 %v5429_v32 }
 0x2a6   :  { %v5683_v44 = vpop.eup %5682  ;;  %v1582_v25 = vpop.f32.mrb[132].mxu0 }
 0x2a7   :  { %v6970_v38 = vpop.eup %5684  ;;  %3453 = vmatprep.mubr.bf16.mxu1 %v2486_v63  ;;  %v1583_v34 = vadd.f32 %v1582_v25, %v6944_v53  ;;  %v1584_v47 = vpop.f32.mrb[133].mxu0  ;;  %v5430_v63 = vld [vmem:[#allocation8 + $0x3d0] ss:$8 sps:$4 sm:$0xff]  }
 0x2a8   :  { %v5687_v5 = vpop.eup %5686  ;;  %3454 = vmatmul.mubr.bf16.gmra.mrb[120].mxu1 %v2485_v52  ;;  %v1585_v19 = vadd.f32 %v1584_v47, %v6953_v3  ;;  %v1586_v46 = vpop.f32.mrb[134].mxu0  ;;  %3885 = vmatpush1.bf16.msra.mxu0 %v5427_v45  ;;  %v5438_v45 = vld [vmem:[#allocation8 + $0x3e4] ss:$8 sps:$4 sm:$0xff]  }
 0x2a9   :  { %v6973_v9 = vpop.eup %5688  ;;  %5706 = vtanh.f32 %v1583_v34  ;;  %v1587_v52 = vadd.f32 %v1586_v46, %v6944_v53  ;;  %v1588_v20 = vpop.f32.mrb[135].mxu0  ;;  %3886 = vmatprep.subr.bf16.mxu0 %v5432_v59 }
 0x2aa   :  { %v5691_v18 = vpop.eup %5690  ;;  %5708 = vtanh.f32 %v1585_v19  ;;  %v1589_v25 = vadd.f32 %v1588_v20, %v6953_v3  ;;  %v5436_v19 = vld [vmem:[#allocation8 + $0x3e0] ss:$8 sps:$4 sm:$0xff]  }
 0x2ab   :  { %v6976_v16 = vpop.eup %5692  ;;  %v2493_v42 = vpack.c.bf16 %v5691_v18, %v5683_v44  ;;  %5710 = vtanh.f32 %v1587_v52  ;;  %2077 = vmatmul.mubr.bf16.gmra.mrb[240].mxu0 %v6524_v58 }
 0x2ac   :  { %v5695_v14 = vpop.eup %5694  ;;  %5712 = vtanh.f32 %v1589_v25  ;;  %2086 = vmatprep.mubr.bf16.mxu0 %v6538_v29  ;;  %3887 = vmatpush1.bf16.msra.mxu0 %v5430_v63  ;;  %v5441_v25 = vld [vmem:[#allocation8 + $0x3f4] ss:$8 sps:$4 sm:$0xff]  }
 0x2ad   :  { %v6982_v24 = vpop.eup %5696  ;;  %v2494_v51 = vpack.c.bf16 %v5695_v14, %v5687_v5  ;;  %3888 = vmatprep.subr.bf16.mxu0 %v5438_v45 }
 0x2ae   :  { %v5699_v47 = vpop.eup %5698  ;;  %v2498_v44 = vpack.c.bf16 %v6982_v24, %v6973_v9  ;;  %v1592_v5 = vpop.f32.mrb[136].mxu0 }
 0x2af   :  { %v5701_v18 = vpop.eup %5700  ;;  %3463 = vmatprep.mubr.bf16.mxu1 %v2494_v51  ;;  %v1593_v14 = vadd.f32 %v1592_v5, %v6944_v53  ;;  %v1594_v58 = vpop.f32.mrb[137].mxu0  ;;  %v5349_v5 = vld [vmem:[#allocation8 + $0x210] ss:$8 sps:$4 sm:$0xff]  }
 0x2b0   :  { %v5703_v34 = vpop.eup %5702  ;;  %3464 = vmatmul.mubr.bf16.gmra.mrb[124].mxu1 %v2493_v42  ;;  %v1595_v20 = vadd.f32 %v1594_v58, %v6953_v3  ;;  %v1596_v32 = vpop.f32.mrb[138].mxu0  ;;  %3889 = vmatpush1.bf16.msra.mxu0 %v5436_v19  ;;  %v5439_v42 = vld [vmem:[#allocation8 + $0x3f0] ss:$8 sps:$4 sm:$0xff]  }
 0x2b1   :  { %v5705_v46 = vpop.eup %5704  ;;  %v2375_v59 = vpack.c.bf16 %v5703_v34, %v5699_v47  ;;  %5714 = vtanh.f32 %v1593_v14  ;;  %v1597_v29 = vadd.f32 %v1596_v32, %v6944_v53  ;;  %v1598_v51 = vpop.f32.mrb[139].mxu0  ;;  %v5346_v47 = vld [vmem:[#allocation8 + $0x200] ss:$8 sps:$4 sm:$0xff]   ;;  %3890 = vmatprep.subr.bf16.mxu0 %v5441_v25  ;;  %v5354_v25 = vld [vmem:[#allocation8 + $0x224] ss:$8 sps:$4 sm:$0xff]  }
 0x2b2   :  { %v2376_v52 = vpack.c.bf16 %v5705_v46, %v5701_v18  ;;  %5716 = vtanh.f32 %v1595_v20  ;;  %v1599_v63 = vadd.f32 %v1598_v51, %v6953_v3  ;;  %v5351_v18 = vld [vmem:[#allocation8 + $0x214] ss:$8 sps:$4 sm:$0xff]  }
 0x2b3   :  { %v5707_v45 = vpop.eup %5706  ;;  %5718 = vtanh.f32 %v1597_v29  ;;  %2087 = vmatmul.mubr.bf16.gmra.mrb[244].mxu0 %v6536_v28 }
 0x2b4   :  { %3506 = vmatprep.mubr.bf16.mxu1 %v2376_v52  ;;  %v5709_v34 = vpop.eup %5708  ;;  %5720 = vtanh.f32 %v1599_v63  ;;  %2096 = vmatprep.mubr.bf16.mxu0 %v6550_v61 }
 0x2b5   :  { %v5711_v46 = vpop.eup %5710  ;;  %3891 = vmatpush1.bf16.msra.mxu0 %v5439_v42  ;;  %v5352_v42 = vld [vmem:[#allocation8 + $0x220] ss:$8 sps:$4 sm:$0xff]  }
 0x2b6   :  { %v5713_v32 = vpop.eup %5712  ;;  %v1602_v19 = vpop.f32.mrb[140].mxu0  ;;  %v2383_v14 = vpack.c.bf16 %v5711_v46, %v5707_v45 }
 0x2b7   :  { %v1603_v58 = vadd.f32 %v1602_v19, %v6944_v53  ;;  %v1604_v52 = vpop.f32.mrb[141].mxu0  ;;  %v2384_v20 = vpack.c.bf16 %v5713_v32, %v5709_v34  ;;  %v5355_v19 = vld [vmem:[#allocation8 + $0x230] ss:$8 sps:$4 sm:$0xff]  }
 0x2b8   :  { %3507 = vmatmul.mubr.bf16.vlgmr.msra.gmra.mrb[64].mxu1 %v2375_v59  ;;  %v1605_v28 = vadd.f32 %v1604_v52, %v6953_v3  ;;  %v1606_v29 = vpop.f32.mrb[142].mxu0 }
 0x2b9   :  { %3668 = vmatpush1.bf16.msra.mxu1 %v5346_v47  ;;  %5722 = vtanh.f32 %v1603_v58  ;;  %v1607_v61 = vadd.f32 %v1606_v29, %v6944_v53  ;;  %v1608_v51 = vpop.f32.mrb[143].mxu0  ;;  %3516 = vmatprep.mubr.bf16.mxu1 %v2384_v20  ;;  %v5357_v47 = vld [vmem:[#allocation8 + $0x234] ss:$8 sps:$4 sm:$0xff]   ;;  %v5360_v20 = vld [vmem:[#allocation8 + $0x244] ss:$8 sps:$4 sm:$0xff]  }
 0x2ba   :  { %3669 = vmatprep.subr.bf16.mxu1 %v5351_v18  ;;  %5724 = vtanh.f32 %v1605_v28  ;;  %v1609_v59 = vadd.f32 %v1608_v51, %v6953_v3  ;;  %v5358_v29 = vld [vmem:[#allocation8 + $0x240] ss:$8 sps:$4 sm:$0xff]   ;;  %v5363_v51 = vld [vmem:[#allocation8 + $0x254] ss:$8 sps:$4 sm:$0xff]  }
 0x2bb   :  { %v5715_v63 = vpop.eup %5714  ;;  %5726 = vtanh.f32 %v1607_v61  ;;  %2097 = vmatmul.mubr.bf16.gmra.mrb[248].mxu0 %v6548_v60 }
 0x2bc   :  { %v5717_v45 = vpop.eup %5716  ;;  %5728 = vtanh.f32 %v1609_v59  ;;  %2106 = vmatprep.mubr.bf16.mxu0 %v6562_v36 }
 0x2bd   :  { %3670 = vmatpush1.bf16.msra.mxu1 %v5349_v5  ;;  %v5719_v18 = vpop.eup %5718 }
 0x2be   :  { %3671 = vmatprep.subr.bf16.mxu1 %v5354_v25  ;;  %v5721_v34 = vpop.eup %5720  ;;  %v1612_v46 = vpop.f32.mrb[144].mxu0  ;;  %v2391_v32 = vpack.c.bf16 %v5719_v18, %v5715_v63  ;;  %v5361_v18 = vld [vmem:[#allocation8 + $0x250] ss:$8 sps:$4 sm:$0xff]  }
 0x2bf   :  { %v1613_v5 = vadd.f32 %v1612_v46, %v6944_v53  ;;  %v1614_v58 = vpop.f32.mrb[145].mxu0  ;;  %v2392_v52 = vpack.c.bf16 %v5721_v34, %v5717_v45 }
 0x2c0   :  { %3517 = vmatmul.mubr.bf16.gmra.mrb[68].mxu1 %v2383_v14  ;;  %v1615_v60 = vadd.f32 %v1614_v58, %v6953_v3  ;;  %v1616_v25 = vpop.f32.mrb[146].mxu0 }
 0x2c1   :  { %3672 = vmatpush1.bf16.msra.mxu1 %v5352_v42  ;;  %5730 = vtanh.f32 %v1613_v5  ;;  %v1617_v28 = vadd.f32 %v1616_v25, %v6944_v53  ;;  %v1618_v36 = vpop.f32.mrb[147].mxu0  ;;  %3526 = vmatprep.mubr.bf16.mxu1 %v2392_v52  ;;  %v5366_v5 = vld [vmem:[#allocation8 + $0x264] ss:$8 sps:$4 sm:$0xff]  }
 0x2c2   :  { %3673 = vmatprep.subr.bf16.mxu1 %v5357_v47  ;;  %5732 = vtanh.f32 %v1615_v60  ;;  %v1619_v14 = vadd.f32 %v1618_v36, %v6953_v3  ;;  %v5364_v60 = vld [vmem:[#allocation8 + $0x260] ss:$8 sps:$4 sm:$0xff]  }
 0x2c3   :  { %v5723_v61 = vpop.eup %5722  ;;  %5734 = vtanh.f32 %v1617_v28  ;;  %2107 = vmatmul.mubr.bf16.gmra.mrb[252].mxu0 %v6560_v33  ;;  %v5369_v28 = vld [vmem:[#allocation8 + $0x274] ss:$8 sps:$4 sm:$0xff]  }
 0x2c4   :  { %v5725_v59 = vpop.eup %5724  ;;  %5736 = vtanh.f32 %v1619_v14 }
 0x2c5   :  { %3674 = vmatpush1.bf16.msra.mxu1 %v5355_v19  ;;  %v5727_v42 = vpop.eup %5726 }
 0x2c6   :  { %3675 = vmatprep.subr.bf16.mxu1 %v5360_v20  ;;  %v5729_v63 = vpop.eup %5728  ;;  %v1622_v47 = vpop.f32.mrb[148].mxu0  ;;  %v2399_v45 = vpack.c.bf16 %v5727_v42, %v5723_v61 }
 0x2c7   :  { %v1623_v34 = vadd.f32 %v1622_v47, %v6944_v53  ;;  %v1624_v46 = vpop.f32.mrb[149].mxu0  ;;  %v2400_v19 = vpack.c.bf16 %v5729_v63, %v5725_v59  ;;  %v5367_v59 = vld [vmem:[#allocation8 + $0x270] ss:$8 sps:$4 sm:$0xff]  }
 0x2c8   :  { %3527 = vmatmul.mubr.bf16.gmra.mrb[72].mxu1 %v2391_v32  ;;  %v1625_v58 = vadd.f32 %v1624_v46, %v6953_v3  ;;  %v1626_v33 = vpop.f32.mrb[150].mxu0 }
 0x2c9   :  { %3676 = vmatpush1.bf16.msra.mxu1 %v5358_v29  ;;  %5738 = vtanh.f32 %v1623_v34  ;;  %v1627_v52 = vadd.f32 %v1626_v33, %v6944_v53  ;;  %v1628_v20 = vpop.f32.mrb[151].mxu0  ;;  %3536 = vmatprep.mubr.bf16.mxu1 %v2400_v19 }
 0x2ca   :  { %3677 = vmatprep.subr.bf16.mxu1 %v5363_v51  ;;  %5740 = vtanh.f32 %v1625_v58  ;;  %v1629_v32 = vadd.f32 %v1628_v20, %v6953_v3  ;;  %v5370_v58 = vld [vmem:[#allocation8 + $0x280] ss:$8 sps:$4 sm:$0xff]  }
 0x2cb   :  { %v5731_v25 = vpop.eup %5730  ;;  %5742 = vtanh.f32 %v1627_v52  ;;  %v5381_v52 = vld [vmem:[#allocation8 + $0x294] ss:$8 sps:$4 sm:$0xff]  }
 0x2cc   :  { %v5733_v36 = vpop.eup %5732  ;;  %5744 = vtanh.f32 %v1629_v32 }
 0x2cd   :  { %3678 = vmatpush1.bf16.msra.mxu1 %v5361_v18  ;;  %v5735_v14 = vpop.eup %5734  ;;  %v5372_v18 = vld [vmem:[#allocation8 + $0x284] ss:$8 sps:$4 sm:$0xff]  }
 0x2ce   :  { %3679 = vmatprep.subr.bf16.mxu1 %v5366_v5  ;;  %v5737_v29 = vpop.eup %5736  ;;  %v1632_v61 = vpop.f32.mrb[152].mxu0  ;;  %v2407_v51 = vpack.c.bf16 %v5735_v14, %v5731_v25 }
 0x2cf   :  { %v1633_v42 = vadd.f32 %v1632_v61, %v6944_v53  ;;  %v1634_v63 = vpop.f32.mrb[153].mxu0  ;;  %v2408_v47 = vpack.c.bf16 %v5737_v29, %v5733_v36  ;;  %v5379_v36 = vld [vmem:[#allocation8 + $0x290] ss:$8 sps:$4 sm:$0xff]  }
 0x2d0   :  { %3537 = vmatmul.mubr.bf16.gmra.mrb[76].mxu1 %v2399_v45  ;;  %v1635_v34 = vadd.f32 %v1634_v63, %v6953_v3  ;;  %v1636_v46 = vpop.f32.mrb[154].mxu0 }
 0x2d1   :  { %3680 = vmatpush1.bf16.msra.mxu1 %v5364_v60  ;;  %5746 = vtanh.f32 %v1633_v42  ;;  %v1637_v19 = vadd.f32 %v1636_v46, %v6944_v53  ;;  %v1638_v5 = vpop.f32.mrb[155].mxu0  ;;  %3546 = vmatprep.mubr.bf16.mxu1 %v2408_v47 }
 0x2d2   :  { %3681 = vmatprep.subr.bf16.mxu1 %v5369_v28  ;;  %5748 = vtanh.f32 %v1635_v34  ;;  %v1639_v45 = vadd.f32 %v1638_v5, %v6953_v3  ;;  %v5388_v34 = vld [vmem:[#allocation8 + $0x2a0] ss:$8 sps:$4 sm:$0xff]  }
 0x2d3   :  { %v5739_v33 = vpop.eup %5738  ;;  %5750 = vtanh.f32 %v1637_v19  ;;  %v5399_v19 = vld [vmem:[#allocation8 + $0x2b4] ss:$8 sps:$4 sm:$0xff]  }
 0x2d4   :  { %v5741_v20 = vpop.eup %5740  ;;  %5752 = vtanh.f32 %v1639_v45 }
 0x2d5   :  { %3682 = vmatpush1.bf16.msra.mxu1 %v5367_v59  ;;  %v5743_v32 = vpop.eup %5742  ;;  %v5390_v59 = vld [vmem:[#allocation8 + $0x2a4] ss:$8 sps:$4 sm:$0xff]  }
 0x2d6   :  { %3683 = vmatprep.subr.bf16.mxu1 %v5372_v18  ;;  %v5745_v60 = vpop.eup %5744  ;;  %v1642_v25 = vpop.f32.mrb[156].mxu0  ;;  %v2415_v28 = vpack.c.bf16 %v5743_v32, %v5739_v33 }
 0x2d7   :  { %v1643_v14 = vadd.f32 %v1642_v25, %v6944_v53  ;;  %v1644_v29 = vpop.f32.mrb[157].mxu0  ;;  %v2416_v61 = vpack.c.bf16 %v5745_v60, %v5741_v20  ;;  %v5397_v20 = vld [vmem:[#allocation8 + $0x2b0] ss:$8 sps:$4 sm:$0xff]  }
 0x2d8   :  { %3547 = vmatmul.mubr.bf16.gmra.mrb[80].mxu1 %v2407_v51  ;;  %v1645_v42 = vadd.f32 %v1644_v29, %v6953_v3  ;;  %v1646_v63 = vpop.f32.mrb[158].mxu0 }
 0x2d9   :  { %3684 = vmatpush1.bf16.msra.mxu1 %v5370_v58  ;;  %5754 = vtanh.f32 %v1643_v14  ;;  %v1647_v47 = vadd.f32 %v1646_v63, %v6944_v53  ;;  %v1648_v18 = vpop.f32.mrb[159].mxu0  ;;  %3556 = vmatprep.mubr.bf16.mxu1 %v2416_v61 }
 0x2da   :  { %3685 = vmatprep.subr.bf16.mxu1 %v5381_v52  ;;  %5756 = vtanh.f32 %v1645_v42  ;;  %v1649_v51 = vadd.f32 %v1648_v18, %v6953_v3  ;;  %v5406_v42 = vld [vmem:[#allocation8 + $0x2c0] ss:$8 sps:$4 sm:$0xff]  }
 0x2db   :  { %v5747_v46 = vpop.eup %5746  ;;  %5758 = vtanh.f32 %v1647_v47  ;;  %v5417_v47 = vld [vmem:[#allocation8 + $0x2d4] ss:$8 sps:$4 sm:$0xff]  }
 0x2dc   :  { %v5749_v5 = vpop.eup %5748  ;;  %5760 = vtanh.f32 %v1649_v51 }
 0x2dd   :  { %3686 = vmatpush1.bf16.msra.mxu1 %v5379_v36  ;;  %v5751_v45 = vpop.eup %5750  ;;  %v5408_v36 = vld [vmem:[#allocation8 + $0x2c4] ss:$8 sps:$4 sm:$0xff]  }
 0x2de   :  { %3687 = vmatprep.subr.bf16.mxu1 %v5390_v59  ;;  %v5753_v58 = vpop.eup %5752  ;;  %v1652_v33 = vpop.f32.mrb[160].mxu0  ;;  %v2423_v52 = vpack.c.bf16 %v5751_v45, %v5747_v46 }
 0x2df   :  { %v1653_v32 = vadd.f32 %v1652_v33, %v6944_v53  ;;  %v1654_v60 = vpop.f32.mrb[161].mxu0  ;;  %v2424_v25 = vpack.c.bf16 %v5753_v58, %v5749_v5  ;;  %v5415_v5 = vld [vmem:[#allocation8 + $0x2d0] ss:$8 sps:$4 sm:$0xff]  }
 0x2e0   :  { %3557 = vmatmul.mubr.bf16.gmra.mrb[84].mxu1 %v2415_v28  ;;  %v1655_v14 = vadd.f32 %v1654_v60, %v6953_v3  ;;  %v1656_v29 = vpop.f32.mrb[162].mxu0 }
 0x2e1   :  { %3688 = vmatpush1.bf16.msra.mxu1 %v5388_v34  ;;  %5762 = vtanh.f32 %v1653_v32  ;;  %v1657_v61 = vadd.f32 %v1656_v29, %v6944_v53  ;;  %v1658_v59 = vpop.f32.mrb[163].mxu0  ;;  %3566 = vmatprep.mubr.bf16.mxu1 %v2424_v25 }
 0x2e2   :  { %3689 = vmatprep.subr.bf16.mxu1 %v5399_v19  ;;  %5764 = vtanh.f32 %v1655_v14  ;;  %v1659_v28 = vadd.f32 %v1658_v59, %v6953_v3  ;;  %v5424_v14 = vld [vmem:[#allocation8 + $0x2e0] ss:$8 sps:$4 sm:$0xff]  }
 0x2e3   :  { %v5755_v63 = vpop.eup %5754  ;;  %5766 = vtanh.f32 %v1657_v61  ;;  %v5435_v61 = vld [vmem:[#allocation8 + $0x2f4] ss:$8 sps:$4 sm:$0xff]  }
 0x2e4   :  { %v5757_v18 = vpop.eup %5756  ;;  %5768 = vtanh.f32 %v1659_v28 }
 0x2e5   :  { %3690 = vmatpush1.bf16.msra.mxu1 %v5397_v20  ;;  %v5759_v51 = vpop.eup %5758  ;;  %v5426_v20 = vld [vmem:[#allocation8 + $0x2e4] ss:$8 sps:$4 sm:$0xff]  }
 0x2e6   :  { %3691 = vmatprep.subr.bf16.mxu1 %v5408_v36  ;;  %v5761_v34 = vpop.eup %5760  ;;  %v1662_v46 = vpop.f32.mrb[164].mxu0  ;;  %v2431_v19 = vpack.c.bf16 %v5759_v51, %v5755_v63 }
 0x2e7   :  { %v1663_v45 = vadd.f32 %v1662_v46, %v6944_v53  ;;  %v1664_v58 = vpop.f32.mrb[165].mxu0  ;;  %v2432_v33 = vpack.c.bf16 %v5761_v34, %v5757_v18  ;;  %v5433_v18 = vld [vmem:[#allocation8 + $0x2f0] ss:$8 sps:$4 sm:$0xff]  }
 0x2e8   :  { %3567 = vmatmul.mubr.bf16.gmra.mrb[88].mxu1 %v2423_v52  ;;  %v1665_v32 = vadd.f32 %v1664_v58, %v6953_v3  ;;  %v1666_v60 = vpop.f32.mrb[166].mxu0 }
 0x2e9   :  { %3692 = vmatpush1.bf16.msra.mxu1 %v5406_v42  ;;  %5770 = vtanh.f32 %v1663_v45  ;;  %v1667_v25 = vadd.f32 %v1666_v60, %v6944_v53  ;;  %v1668_v36 = vpop.f32.mrb[167].mxu0  ;;  %3576 = vmatprep.mubr.bf16.mxu1 %v2432_v33 }
 0x2ea   :  { %3693 = vmatprep.subr.bf16.mxu1 %v5417_v47  ;;  %5772 = vtanh.f32 %v1665_v32  ;;  %v1669_v52 = vadd.f32 %v1668_v36, %v6953_v3  ;;  %v6083_v32 = vld [vmem:[#allocation8 + $0x304] ss:$8 sps:$4 sm:$0xff]  }
 0x2eb   :  { %v5763_v29 = vpop.eup %5762  ;;  %5774 = vtanh.f32 %v1667_v25 }
 0x2ec   :  { %v5765_v59 = vpop.eup %5764  ;;  %5776 = vtanh.f32 %v1669_v52 }
 0x2ed   :  { %3694 = vmatpush1.bf16.msra.mxu1 %v5415_v5  ;;  %v5767_v28 = vpop.eup %5766 }
 0x2ee   :  { %3695 = vmatprep.subr.bf16.mxu1 %v5426_v20  ;;  %v5769_v42 = vpop.eup %5768  ;;  %v1672_v63 = vpop.f32.mrb[168].mxu0  ;;  %v2439_v47 = vpack.c.bf16 %v5767_v28, %v5763_v29 }
 0x2ef   :  { %v1673_v51 = vadd.f32 %v1672_v63, %v6944_v53  ;;  %v1674_v34 = vpop.f32.mrb[169].mxu0  ;;  %v2440_v46 = vpack.c.bf16 %v5769_v42, %v5765_v59 }
 0x2f0   :  { %3577 = vmatmul.mubr.bf16.gmra.mrb[92].mxu1 %v2431_v19  ;;  %v1675_v5 = vadd.f32 %v1674_v34, %v6953_v3  ;;  %v1676_v45 = vpop.f32.mrb[170].mxu0 }
 0x2f1   :  { %3696 = vmatpush1.bf16.msra.mxu1 %v5424_v14  ;;  %5778 = vtanh.f32 %v1673_v51  ;;  %v1677_v58 = vadd.f32 %v1676_v45, %v6944_v53  ;;  %v1678_v33 = vpop.f32.mrb[171].mxu0  ;;  %3586 = vmatprep.mubr.bf16.mxu1 %v2440_v46 }
 0x2f2   :  { %3697 = vmatprep.subr.bf16.mxu1 %v5435_v61  ;;  %5780 = vtanh.f32 %v1675_v5  ;;  %v1679_v19 = vadd.f32 %v1678_v33, %v6953_v3 }
 0x2f3   :  { %v5771_v20 = vpop.eup %5770  ;;  %5782 = vtanh.f32 %v1677_v58 }
 0x2f4   :  { %v5773_v60 = vpop.eup %5772  ;;  %5784 = vtanh.f32 %v1679_v19 }
 0x2f5   :  { %3698 = vmatpush1.bf16.msra.mxu1 %v5433_v18  ;;  %v5775_v25 = vpop.eup %5774 }
 0x2f6   :  { %4929 = vmatprep.subr.bf16.mxu1 %v6083_v32  ;;  %v5777_v36 = vpop.eup %5776  ;;  %v1682_v52 = vpop.f32.mrb[172].mxu0  ;;  %v2447_v14 = vpack.c.bf16 %v5775_v25, %v5771_v20 }
 0x2f7   :  { %v1683_v29 = vadd.f32 %v1682_v52, %v6944_v53  ;;  %v1684_v61 = vpop.f32.mrb[173].mxu0  ;;  %v2448_v59 = vpack.c.bf16 %v5777_v36, %v5773_v60 }
 0x2f8   :  { %3587 = vmatmul.mubr.bf16.gmra.mrb[96].mxu1 %v2439_v47  ;;  %v1685_v28 = vadd.f32 %v1684_v61, %v6953_v3  ;;  %v1686_v42 = vpop.f32.mrb[174].mxu0 }
 0x2f9   :  { %5786 = vtanh.f32 %v1683_v29  ;;  %v1687_v63 = vadd.f32 %v1686_v42, %v6944_v53  ;;  %v1688_v18 = vpop.f32.mrb[175].mxu0  ;;  %3596 = vmatprep.mubr.bf16.mxu1 %v2448_v59 }
 0x2fa   :  { %5788 = vtanh.f32 %v1685_v28  ;;  %v1689_v51 = vadd.f32 %v1688_v18, %v6953_v3 }
 0x2fb   :  { %v5779_v34 = vpop.eup %5778  ;;  %5790 = vtanh.f32 %v1687_v63 }
 0x2fc   :  { %v5781_v47 = vpop.eup %5780  ;;  %5792 = vtanh.f32 %v1689_v51 }
 0x2fd   :  { %v5783_v46 = vpop.eup %5782 }
 0x2fe   :  { %v5785_v5 = vpop.eup %5784  ;;  %v1692_v45 = vpop.f32.mrb[176].mxu0  ;;  %v2455_v58 = vpack.c.bf16 %v5783_v46, %v5779_v34 }
 0x2ff   :  { %v1693_v33 = vadd.f32 %v1692_v45, %v6944_v53  ;;  %v1694_v19 = vpop.f32.mrb[177].mxu0  ;;  %v2456_v20 = vpack.c.bf16 %v5785_v5, %v5781_v47 }
 0x300   :  { %3597 = vmatmul.mubr.bf16.gmra.mrb[100].mxu1 %v2447_v14  ;;  %v1695_v32 = vadd.f32 %v1694_v19, %v6953_v3  ;;  %v1696_v60 = vpop.f32.mrb[178].mxu0 }
 0x301   :  { %5794 = vtanh.f32 %v1693_v33  ;;  %v1697_v25 = vadd.f32 %v1696_v60, %v6944_v53  ;;  %v1698_v36 = vpop.f32.mrb[179].mxu0  ;;  %3606 = vmatprep.mubr.bf16.mxu1 %v2456_v20 }
 0x302   :  { %5796 = vtanh.f32 %v1695_v32  ;;  %v1699_v52 = vadd.f32 %v1698_v36, %v6953_v3 }
 0x303   :  { %v5787_v29 = vpop.eup %5786  ;;  %5798 = vtanh.f32 %v1697_v25 }
 0x304   :  { %v5789_v14 = vpop.eup %5788  ;;  %5800 = vtanh.f32 %v1699_v52 }
 0x305   :  { %v5791_v61 = vpop.eup %5790 }
 0x306   :  { %v5793_v59 = vpop.eup %5792  ;;  %v1702_v28 = vpop.f32.mrb[180].mxu0  ;;  %v2463_v42 = vpack.c.bf16 %v5791_v61, %v5787_v29 }
 0x307   :  { %v1703_v63 = vadd.f32 %v1702_v28, %v6944_v53  ;;  %v1704_v18 = vpop.f32.mrb[181].mxu0  ;;  %v2464_v51 = vpack.c.bf16 %v5793_v59, %v5789_v14 }
 0x308   :  { %3607 = vmatmul.mubr.bf16.gmra.mrb[104].mxu1 %v2455_v58  ;;  %v1705_v34 = vadd.f32 %v1704_v18, %v6953_v3  ;;  %v1706_v47 = vpop.f32.mrb[182].mxu0 }
 0x309   :  { %5802 = vtanh.f32 %v1703_v63  ;;  %v1707_v46 = vadd.f32 %v1706_v47, %v6944_v53  ;;  %v1708_v5 = vpop.f32.mrb[183].mxu0  ;;  %3616 = vmatprep.mubr.bf16.mxu1 %v2464_v51 }
 0x30a   :  { %5804 = vtanh.f32 %v1705_v34  ;;  %v1709_v45 = vadd.f32 %v1708_v5, %v6953_v3 }
 0x30b   :  { %v5795_v33 = vpop.eup %5794  ;;  %5806 = vtanh.f32 %v1707_v46 }
 0x30c   :  { %v5797_v58 = vpop.eup %5796  ;;  %5808 = vtanh.f32 %v1709_v45 }
 0x30d   :  { %v5799_v19 = vpop.eup %5798 }
 0x30e   :  { %v5801_v20 = vpop.eup %5800  ;;  %v1712_v32 = vpop.f32.mrb[184].mxu0  ;;  %v2471_v60 = vpack.c.bf16 %v5799_v19, %v5795_v33  ;;  %v691_v33 = vsub.s32 6, %v6351_v11 }
 0x30f   :  { %v1713_v25 = vadd.f32 %v1712_v32, %v6944_v53  ;;  %v1714_v36 = vpop.f32.mrb[185].mxu0  ;;  %v2472_v52 = vpack.c.bf16 %v5801_v20, %v5797_v58  ;;  %v695_v20 = vsub.s32 7, %v6351_v11 }
 0x310   :  { %3617 = vmatmul.mubr.bf16.gmra.mrb[108].mxu1 %v2463_v42  ;;  %v1715_v29 = vadd.f32 %v1714_v36, %v6953_v3  ;;  %v1716_v14 = vpop.f32.mrb[186].mxu0 }
 0x311   :  { %5810 = vtanh.f32 %v1713_v25  ;;  %v1717_v61 = vadd.f32 %v1716_v14, %v6944_v53  ;;  %v1718_v59 = vpop.f32.mrb[187].mxu0  ;;  %3626 = vmatprep.mubr.bf16.mxu1 %v2472_v52  ;;  %v7053_v52 = vrot.slane %v6941_v40, %v691_v33  ;;  %v7056_v14 = vrot.slane %v6941_v40, %v695_v20 }
 0x312   :  { %5812 = vtanh.f32 %v1715_v29  ;;  %v1719_v28 = vadd.f32 %v1718_v59, %v6953_v3 }
 0x313   :  { %v5803_v63 = vpop.eup %5802  ;;  %5814 = vtanh.f32 %v1717_v61 }
 0x314   :  { %v5805_v42 = vpop.eup %5804  ;;  %5816 = vtanh.f32 %v1719_v28 }
 0x315   :  { %v5807_v18 = vpop.eup %5806 }
 0x316   :  { %v5809_v51 = vpop.eup %5808  ;;  %v1722_v34 = vpop.f32.mrb[188].mxu0  ;;  %v2479_v47 = vpack.c.bf16 %v5807_v18, %v5803_v63 }
 0x317   :  { %v1723_v46 = vadd.f32 %v1722_v34, %v6944_v53  ;;  %v1724_v5 = vpop.f32.mrb[189].mxu0  ;;  %v2480_v45 = vpack.c.bf16 %v5809_v51, %v5805_v42 }
 0x318   :  { %3627 = vmatmul.mubr.bf16.gmra.mrb[112].mxu1 %v2471_v60  ;;  %v1725_v58 = vadd.f32 %v1724_v5, %v6953_v3  ;;  %v1726_v19 = vpop.f32.mrb[190].mxu0 }
 0x319   :  { %5818 = vtanh.f32 %v1723_v46  ;;  %v1727_v32 = vadd.f32 %v1726_v19, %v6944_v53  ;;  %v1728_v25 = vpop.f32.mrb[191].mxu0  ;;  %3636 = vmatprep.mubr.bf16.mxu1 %v2480_v45 }
 0x31a   :  { %5820 = vtanh.f32 %v1725_v58  ;;  %v1729_v60 = vadd.f32 %v1728_v25, %v6953_v3 }
 0x31b   :  { %v5811_v36 = vpop.eup %5810  ;;  %5822 = vtanh.f32 %v1727_v32 }
 0x31c   :  { %v5813_v29 = vpop.eup %5812  ;;  %5824 = vtanh.f32 %v1729_v60 }
 0x31d   :  { %v5815_v61 = vpop.eup %5814 }
 0x31e   :  { %v5817_v11 = vpop.eup %5816  ;;  %v1958_v59 = vpop.f32.mrb[192].mxu0  ;;  %v2487_v53 = vpack.c.bf16 %v5815_v61, %v5811_v36 }
 0x31f   :  { %v1959_v28 = vadd.f32 %v1958_v59, %v7053_v52  ;;  %v1960_v63 = vpop.f32.mrb[193].mxu0  ;;  %v2488_v42 = vpack.c.bf16 %v5817_v11, %v5813_v29 }
 0x320   :  { %3637 = vmatmul.mubr.bf16.gmra.mrb[116].mxu1 %v2479_v47  ;;  %v1961_v3 = vadd.f32 %v1960_v63, %v7056_v14  ;;  %v1962_v18 = vpop.f32.mrb[194].mxu0 }
 0x321   :  { %5826 = vtanh.f32 %v1959_v28  ;;  %v1963_v51 = vadd.f32 %v1962_v18, %v7053_v52  ;;  %v1964_v34 = vpop.f32.mrb[195].mxu0  ;;  %3646 = vmatprep.mubr.bf16.mxu1 %v2488_v42  ;;  %v7641_v42 = vpack.c.bf16 %v6642_v62, %v6631_v2 }
 0x322   :  { %5828 = vtanh.f32 %v1961_v3  ;;  %v1965_v40 = vadd.f32 %v1964_v34, %v7056_v14 }
 0x323   :  { %v5819_v46 = vpop.eup %5818  ;;  %5830 = vtanh.f32 %v1963_v51 }
 0x324   :  { %v5821_v47 = vpop.eup %5820  ;;  %5832 = vtanh.f32 %v1965_v40 }
 0x325   :  { %v5823_v5 = vpop.eup %5822 }
 0x326   :  { %v5825_v45 = vpop.eup %5824  ;;  %v1968_v33 = vpop.f32.mrb[196].mxu0  ;;  %v2495_v58 = vpack.c.bf16 %v5823_v5, %v5819_v46 }
 0x327   :  { %v1969_v19 = vadd.f32 %v1968_v33, %v7053_v52  ;;  %v1970_v20 = vpop.f32.mrb[197].mxu0  ;;  %v2496_v32 = vpack.c.bf16 %v5825_v45, %v5821_v47 }
 0x328   :  { %3647 = vmatmul.mubr.bf16.gmra.mrb[120].mxu1 %v2487_v53  ;;  %v1971_v25 = vadd.f32 %v1970_v20, %v7056_v14  ;;  %v1972_v60 = vpop.f32.mrb[198].mxu0 }
 0x329   :  { %5834 = vtanh.f32 %v1969_v19  ;;  %v1973_v36 = vadd.f32 %v1972_v60, %v7053_v52  ;;  %v1974_v29 = vpop.f32.mrb[199].mxu0  ;;  %3656 = vmatprep.mubr.bf16.mxu1 %v2496_v32  ;;  %v7643_v19 = vld [vmem:[#allocation15_spill] sm:$0xff]  ;;  %v6084_v60 = vld [vmem:[#allocation8 + $0x300] ss:$8 sps:$4 sm:$0xff]  }
 0x32a   :  { %5836 = vtanh.f32 %v1971_v25  ;;  %v1975_v61 = vadd.f32 %v1974_v29, %v7056_v14  ;;  %v7646_v29 = vld [vmem:[#allocation18_spill] sm:$0xff] }
 0x32b   :  { %v5827_v11 = vpop.eup %5826  ;;  %5838 = vtanh.f32 %v1973_v36  ;;  %v7645_v36 = vld [vmem:[#allocation20_spill] sm:$0xff] }
 0x32c   :  { %v5829_v59 = vpop.eup %5828  ;;  %5840 = vtanh.f32 %v1975_v61  ;;  %v7647_v61 = vpack.c.bf16 %v7645_v36, %v7646_v29  ;;  %v6088_v36 = vld [vmem:[#allocation8 + $0x320] ss:$8 sps:$4 sm:$0xff]  }
 0x32d   :  { %v5831_v53 = vpop.eup %5830 }
 0x32e   :  { %v5833_v28 = vpop.eup %5832  ;;  %v2379_v63 = vpack.c.bf16 %v5831_v53, %v5827_v11  ;;  %v1978_v3 = vpop.f32.mrb[200].mxu0 }
 0x32f   :  { %v1979_v18 = vadd.f32 %v1978_v3, %v7053_v52  ;;  %v1980_v51 = vpop.f32.mrb[201].mxu0  ;;  %v2380_v34 = vpack.c.bf16 %v5833_v28, %v5829_v59  ;;  %v6085_v28 = vld [vmem:[#allocation8 + $0x314] ss:$8 sps:$4 sm:$0xff]  }
 0x330   :  { %3657 = vmatmul.mubr.bf16.gmra.mrb[124].mxu1 %v2495_v58  ;;  %v1981_v40 = vadd.f32 %v1980_v51, %v7056_v14  ;;  %v1982_v46 = vpop.f32.mrb[202].mxu0  ;;  %v7642_v58 = vld [vmem:[#allocation16_spill] sm:$0xff] }
 0x331   :  { %3699 = vmatprep.mubr.bf16.mxu1 %v7641_v42  ;;  %5842 = vtanh.f32 %v1979_v18  ;;  %v1983_v47 = vadd.f32 %v1982_v46, %v7053_v52  ;;  %v1984_v5 = vpop.f32.mrb[203].mxu0  ;;  %3892 = vmatprep.mubr.bf16.mxu0 %v2380_v34  ;;  %v7644_v20 = vpack.c.bf16 %v7642_v58, %v7643_v19 }
 0x332   :  { %5844 = vtanh.f32 %v1981_v40  ;;  %v1985_v45 = vadd.f32 %v1984_v5, %v7056_v14  ;;  %3893 = vmatmul.mubr.bf16.vlgmr.msra.gmra.mrb[0].mxu0 %v2379_v63  ;;  %v6086_v40 = vld [vmem:[#allocation8 + $0x310] ss:$8 sps:$4 sm:$0xff]  }
 0x333   :  { %v5835_v33 = vpop.eup %5834  ;;  %5846 = vtanh.f32 %v1983_v47  ;;  %v6087_v47 = vld [vmem:[#allocation8 + $0x324] ss:$8 sps:$4 sm:$0xff]  }
 0x334   :  { %v5837_v2 = vpop.eup %5836  ;;  %5848 = vtanh.f32 %v1985_v45 }
 0x335   :  { %v5839_v62 = vpop.eup %5838 }
 0x336   :  { %v5841_v32 = vpop.eup %5840  ;;  %v2387_v25 = vpack.c.bf16 %v5839_v62, %v5835_v33  ;;  %v1988_v11 = vpop.f32.mrb[204].mxu0  ;;  %v7648_v33 = vld [vmem:[#allocation19_spill] sm:$0xff] }
 0x337   :  { %v1989_v59 = vadd.f32 %v1988_v11, %v7053_v52  ;;  %v1990_v53 = vpop.f32.mrb[205].mxu0  ;;  %v2388_v63 = vpack.c.bf16 %v5841_v32, %v5837_v2  ;;  %v7649_v2 = vld [vmem:[#allocation17_spill] sm:$0xff]  ;;  %v6089_v11 = vld [vmem:[#allocation8 + $0x334] ss:$8 sps:$4 sm:$0xff]  }
 0x338   :  { %3700 = vmatmul.mubr.bf16.vlgmr.msra.gmra.mrb[64].mxu1 %v7644_v20  ;;  %v1991_v42 = vadd.f32 %v1990_v53, %v7056_v14  ;;  %v1992_v3 = vpop.f32.mrb[206].mxu0  ;;  %v7650_v62 = vpack.c.bf16 %v7648_v33, %v7649_v2  ;;  %v7651_v20 = vld [vmem:[#allocation22_spill] sm:$0xff]  ;;  %v7656_v33 = vpack.c.bf16 %v6708_v49, %v6697_v12  ;;  %v6094_v12 = vld [vmem:[#allocation8 + $0x350] ss:$8 sps:$4 sm:$0xff]  }
 0x339   :  { %4945 = vmatpush1.bf16.msra.mxu1 %v6084_v60  ;;  %3709 = vmatprep.mubr.bf16.mxu1 %v7647_v61  ;;  %5850 = vtanh.f32 %v1989_v59  ;;  %v1993_v18 = vadd.f32 %v1992_v3, %v7053_v52  ;;  %v1994_v51 = vpop.f32.mrb[207].mxu0  ;;  %v7652_v32 = vpack.c.bf16 %v6686_v13, %v7651_v20 }
 0x33a   :  { %4930 = vmatprep.subr.bf16.mxu1 %v6085_v28  ;;  %3902 = vmatprep.mubr.bf16.mxu0 %v2388_v63  ;;  %5852 = vtanh.f32 %v1991_v42  ;;  %v1995_v34 = vadd.f32 %v1994_v51, %v7056_v14  ;;  %v6090_v42 = vld [vmem:[#allocation8 + $0x330] ss:$8 sps:$4 sm:$0xff]  }
 0x33b   :  { %3903 = vmatmul.mubr.bf16.gmra.mrb[4].mxu0 %v2387_v25  ;;  %v5843_v46 = vpop.eup %5842  ;;  %5854 = vtanh.f32 %v1993_v18  ;;  %v6091_v18 = vld [vmem:[#allocation8 + $0x344] ss:$8 sps:$4 sm:$0xff]  }
 0x33c   :  { %v5845_v5 = vpop.eup %5844  ;;  %5856 = vtanh.f32 %v1995_v34 }
 0x33d   :  { %4946 = vmatpush1.bf16.msra.mxu1 %v6086_v40  ;;  %v5847_v45 = vpop.eup %5846  ;;  %v7653_v40 = vld [vmem:[#allocation23_spill] sm:$0xff] }
 0x33e   :  { %4931 = vmatprep.subr.bf16.mxu1 %v6087_v47  ;;  %v5849_v58 = vpop.eup %5848  ;;  %v2395_v19 = vpack.c.bf16 %v5847_v45, %v5843_v46  ;;  %v1998_v60 = vpop.f32.mrb[208].mxu0  ;;  %v7654_v46 = vld [vmem:[#allocation21_spill] sm:$0xff] }
 0x33f   :  { %v1999_v25 = vadd.f32 %v1998_v60, %v7053_v52  ;;  %v2000_v29 = vpop.f32.mrb[209].mxu0  ;;  %v2396_v61 = vpack.c.bf16 %v5849_v58, %v5845_v5  ;;  %v7655_v47 = vpack.c.bf16 %v7653_v40, %v7654_v46 }
 0x340   :  { %3710 = vmatmul.mubr.bf16.gmra.mrb[68].mxu1 %v7650_v62  ;;  %v2001_v59 = vadd.f32 %v2000_v29, %v7056_v14  ;;  %v2002_v53 = vpop.f32.mrb[210].mxu0  ;;  %v6092_v62 = vld [vmem:[#allocation8 + $0x340] ss:$8 sps:$4 sm:$0xff]  }
 0x341   :  { %3719 = vmatprep.mubr.bf16.mxu1 %v7652_v32  ;;  %4947 = vmatpush1.bf16.msra.mxu1 %v6088_v36  ;;  %5858 = vtanh.f32 %v1999_v25  ;;  %v2003_v28 = vadd.f32 %v2002_v53, %v7053_v52  ;;  %v2004_v63 = vpop.f32.mrb[211].mxu0  ;;  %v6093_v32 = vld [vmem:[#allocation8 + $0x354] ss:$8 sps:$4 sm:$0xff]  }
 0x342   :  { %4932 = vmatprep.subr.bf16.mxu1 %v6089_v11  ;;  %3912 = vmatprep.mubr.bf16.mxu0 %v2396_v61  ;;  %5860 = vtanh.f32 %v2001_v59  ;;  %v2005_v13 = vadd.f32 %v2004_v63, %v7056_v14  ;;  %v6095_v11 = vld [vmem:[#allocation8 + $0x364] ss:$8 sps:$4 sm:$0xff]   ;;  %v7658_v63 = vld [vmem:[#allocation24_spill] sm:$0xff] }
 0x343   :  { %3913 = vmatmul.mubr.bf16.gmra.mrb[8].mxu0 %v2395_v19  ;;  %v5851_v3 = vpop.eup %5850  ;;  %5862 = vtanh.f32 %v2003_v28  ;;  %v7657_v28 = vld [vmem:[#allocation25_spill] sm:$0xff] }
 0x344   :  { %v5853_v51 = vpop.eup %5852  ;;  %5864 = vtanh.f32 %v2005_v13  ;;  %v7659_v13 = vpack.c.bf16 %v7657_v28, %v7658_v63  ;;  %v6101_v63 = vld [vmem:[#allocation8 + $0x394] ss:$8 sps:$4 sm:$0xff]  }
 0x345   :  { %4948 = vmatpush1.bf16.msra.mxu1 %v6090_v42  ;;  %v5855_v34 = vpop.eup %5854 }
 0x346   :  { %4933 = vmatprep.subr.bf16.mxu1 %v6091_v18  ;;  %v5857_v5 = vpop.eup %5856  ;;  %v2403_v45 = vpack.c.bf16 %v5855_v34, %v5851_v3  ;;  %v2008_v2 = vpop.f32.mrb[212].mxu0  ;;  %v7660_v18 = vpack.c.bf16 %v6730_v26, %v6719_v10  ;;  %v6096_v34 = vld [vmem:[#allocation8 + $0x360] ss:$8 sps:$4 sm:$0xff]   ;;  %v6098_v10 = vld [vmem:[#allocation8 + $0x370] ss:$8 sps:$4 sm:$0xff]  }
 0x347   :  { %v2009_v58 = vadd.f32 %v2008_v2, %v7053_v52  ;;  %v2010_v19 = vpop.f32.mrb[213].mxu0  ;;  %v2404_v20 = vpack.c.bf16 %v5857_v5, %v5853_v51  ;;  %v6097_v5 = vld [vmem:[#allocation8 + $0x374] ss:$8 sps:$4 sm:$0xff]  }
 0x348   :  { %3720 = vmatmul.mubr.bf16.gmra.mrb[72].mxu1 %v7655_v47  ;;  %v2011_v60 = vadd.f32 %v2010_v19, %v7056_v14  ;;  %v2012_v36 = vpop.f32.mrb[214].mxu0  ;;  %v6099_v19 = vld [vmem:[#allocation8 + $0x384] ss:$8 sps:$4 sm:$0xff]  }
 0x349   :  { %3729 = vmatprep.mubr.bf16.mxu1 %v7656_v33  ;;  %4949 = vmatpush1.bf16.msra.mxu1 %v6092_v62  ;;  %5866 = vtanh.f32 %v2009_v58  ;;  %v2013_v25 = vadd.f32 %v2012_v36, %v7053_v52  ;;  %v2014_v29 = vpop.f32.mrb[215].mxu0  ;;  %v7662_v36 = vld [vmem:[#allocation26_spill] sm:$0xff] }
 0x34a   :  { %4934 = vmatprep.subr.bf16.mxu1 %v6093_v32  ;;  %3922 = vmatprep.mubr.bf16.mxu0 %v2404_v20  ;;  %5868 = vtanh.f32 %v2011_v60  ;;  %v2015_v49 = vadd.f32 %v2014_v29, %v7056_v14  ;;  %v7661_v60 = vld [vmem:[#allocation27_spill] sm:$0xff] }
 0x34b   :  { %3923 = vmatmul.mubr.bf16.gmra.mrb[12].mxu0 %v2403_v45  ;;  %v5859_v61 = vpop.eup %5858  ;;  %5870 = vtanh.f32 %v2013_v25  ;;  %v7663_v25 = vpack.c.bf16 %v7661_v60, %v7662_v36 }
 0x34c   :  { %v5861_v59 = vpop.eup %5860  ;;  %5872 = vtanh.f32 %v2015_v49 }
 0x34d   :  { %4950 = vmatpush1.bf16.msra.mxu1 %v6094_v12  ;;  %v5863_v53 = vpop.eup %5862  ;;  %v7664_v12 = vpack.c.bf16 %v6752_v1, %v6741_v8  ;;  %v6102_v8 = vld [vmem:[#allocation8 + $0x390] ss:$8 sps:$4 sm:$0xff]  }
 0x34e   :  { %4935 = vmatprep.subr.bf16.mxu1 %v6095_v11  ;;  %v5865_v42 = vpop.eup %5864  ;;  %v2411_v3 = vpack.c.bf16 %v5863_v53, %v5859_v61  ;;  %v2018_v51 = vpop.f32.mrb[216].mxu0  ;;  %v6100_v11 = vld [vmem:[#allocation8 + $0x380] ss:$8 sps:$4 sm:$0xff]  }
 0x34f   :  { %v2019_v40 = vadd.f32 %v2018_v51, %v7053_v52  ;;  %v2020_v46 = vpop.f32.mrb[217].mxu0  ;;  %v2412_v47 = vpack.c.bf16 %v5865_v42, %v5861_v59 }
 0x350   :  { %3730 = vmatmul.mubr.bf16.gmra.mrb[76].mxu1 %v7659_v13  ;;  %v2021_v45 = vadd.f32 %v2020_v46, %v7056_v14  ;;  %v2022_v33 = vpop.f32.mrb[218].mxu0 }
 0x351   :  { %3739 = vmatprep.mubr.bf16.mxu1 %v7660_v18  ;;  %4951 = vmatpush1.bf16.msra.mxu1 %v6096_v34  ;;  %5874 = vtanh.f32 %v2019_v40  ;;  %v2023_v2 = vadd.f32 %v2022_v33, %v7053_v52  ;;  %v2024_v62 = vpop.f32.mrb[219].mxu0  ;;  %v6103_v34 = vld [vmem:[#allocation8 + $0x3a4] ss:$8 sps:$4 sm:$0xff]  }
 0x352   :  { %4936 = vmatprep.subr.bf16.mxu1 %v6097_v5  ;;  %3932 = vmatprep.mubr.bf16.mxu0 %v2412_v47  ;;  %5876 = vtanh.f32 %v2021_v45  ;;  %v2025_v26 = vadd.f32 %v2024_v62, %v7056_v14  ;;  %v7665_v47 = vld [vmem:[#allocation29_spill] sm:$0xff]  ;;  %v7666_v5 = vld [vmem:[#allocation28_spill] sm:$0xff]  ;;  %v7668_v62 = vpack.c.bf16 %v6774_v48, %v6763_v37 }
 0x353   :  { %3933 = vmatmul.mubr.bf16.gmra.mrb[16].mxu0 %v2411_v3  ;;  %v5867_v58 = vpop.eup %5866  ;;  %5878 = vtanh.f32 %v2023_v2  ;;  %v7667_v45 = vpack.c.bf16 %v7665_v47, %v7666_v5  ;;  %v6106_v37 = vld [vmem:[#allocation8 + $0x3b0] ss:$8 sps:$4 sm:$0xff]  }
 0x354   :  { %v5869_v20 = vpop.eup %5868  ;;  %5880 = vtanh.f32 %v2025_v26 }
 0x355   :  { %4952 = vmatpush1.bf16.msra.mxu1 %v6098_v10  ;;  %v5871_v32 = vpop.eup %5870  ;;  %v6104_v10 = vld [vmem:[#allocation8 + $0x3a0] ss:$8 sps:$4 sm:$0xff]  }
 0x356   :  { %4937 = vmatprep.subr.bf16.mxu1 %v6099_v19  ;;  %v5873_v29 = vpop.eup %5872  ;;  %v2419_v49 = vpack.c.bf16 %v5871_v32, %v5867_v58  ;;  %v2028_v61 = vpop.f32.mrb[220].mxu0  ;;  %v6105_v32 = vld [vmem:[#allocation8 + $0x3b4] ss:$8 sps:$4 sm:$0xff]  }
 0x357   :  { %v2029_v59 = vadd.f32 %v2028_v61, %v7053_v52  ;;  %v2030_v53 = vpop.f32.mrb[221].mxu0  ;;  %v2420_v28 = vpack.c.bf16 %v5873_v29, %v5869_v20 }
 0x358   :  { %3740 = vmatmul.mubr.bf16.gmra.mrb[80].mxu1 %v7663_v25  ;;  %v2031_v13 = vadd.f32 %v2030_v53, %v7056_v14  ;;  %v2032_v42 = vpop.f32.mrb[222].mxu0  ;;  %v7670_v53 = vld [vmem:[#allocation30_spill] sm:$0xff] }
 0x359   :  { %3749 = vmatprep.mubr.bf16.mxu1 %v7664_v12  ;;  %4953 = vmatpush1.bf16.msra.mxu1 %v6100_v11  ;;  %5882 = vtanh.f32 %v2029_v59  ;;  %v2033_v3 = vadd.f32 %v2032_v42, %v7053_v52  ;;  %v2034_v18 = vpop.f32.mrb[223].mxu0  ;;  %v6107_v12 = vld [vmem:[#allocation8 + $0x3c4] ss:$8 sps:$4 sm:$0xff]   ;;  %v7669_v59 = vld [vmem:[#allocation31_spill] sm:$0xff]  ;;  %v7672_v42 = vpack.c.bf16 %v6796_v4, %v6785_v54 }
 0x35a   :  { %4938 = vmatprep.subr.bf16.mxu1 %v6101_v63  ;;  %3942 = vmatprep.mubr.bf16.mxu0 %v2420_v28  ;;  %5884 = vtanh.f32 %v2031_v13  ;;  %v2035_v1 = vadd.f32 %v2034_v18, %v7056_v14  ;;  %v7671_v28 = vpack.c.bf16 %v7669_v59, %v7670_v53  ;;  %v6108_v18 = vld [vmem:[#allocation8 + $0x3c0] ss:$8 sps:$4 sm:$0xff]   ;;  %v6110_v54 = vld [vmem:[#allocation8 + $0x3d0] ss:$8 sps:$4 sm:$0xff]  }
 0x35b   :  { %3943 = vmatmul.mubr.bf16.gmra.mrb[20].mxu0 %v2419_v49  ;;  %v5875_v51 = vpop.eup %5874  ;;  %5886 = vtanh.f32 %v2033_v3  ;;  %v7676_v53 = vld [vmem:[#allocation34_spill] sm:$0xff] }
 0x35c   :  { %v5877_v40 = vpop.eup %5876  ;;  %5888 = vtanh.f32 %v2035_v1 }
 0x35d   :  { %4954 = vmatpush1.bf16.msra.mxu1 %v6102_v8  ;;  %v5879_v46 = vpop.eup %5878 }
 0x35e   :  { %4939 = vmatprep.subr.bf16.mxu1 %v6103_v34  ;;  %v5881_v33 = vpop.eup %5880  ;;  %v2427_v2 = vpack.c.bf16 %v5879_v46, %v5875_v51  ;;  %v2038_v26 = vpop.f32.mrb[224].mxu0  ;;  %v6109_v34 = vld [vmem:[#allocation8 + $0x3d4] ss:$8 sps:$4 sm:$0xff]  }
 0x35f   :  { %v2039_v58 = vadd.f32 %v2038_v26, %v7053_v52  ;;  %v2040_v19 = vpop.f32.mrb[225].mxu0  ;;  %v2428_v20 = vpack.c.bf16 %v5881_v33, %v5877_v40  ;;  %v6111_v33 = vld [vmem:[#allocation8 + $0x3e4] ss:$8 sps:$4 sm:$0xff]   ;;  %v7673_v26 = vld [vmem:[#allocation32_spill] sm:$0xff] }
 0x360   :  { %3750 = vmatmul.mubr.bf16.gmra.mrb[84].mxu1 %v7667_v45  ;;  %v2041_v60 = vadd.f32 %v2040_v19, %v7056_v14  ;;  %v2042_v36 = vpop.f32.mrb[226].mxu0 }
 0x361   :  { %3759 = vmatprep.mubr.bf16.mxu1 %v7668_v62  ;;  %4955 = vmatpush1.bf16.msra.mxu1 %v6104_v10  ;;  %5890 = vtanh.f32 %v2039_v58  ;;  %v2043_v25 = vadd.f32 %v2042_v36, %v7053_v52  ;;  %v2044_v29 = vpop.f32.mrb[227].mxu0  ;;  %v7674_v10 = vpack.c.bf16 %v6789_v55, %v7673_v26 }
 0x362   :  { %4940 = vmatprep.subr.bf16.mxu1 %v6105_v32  ;;  %3952 = vmatprep.mubr.bf16.mxu0 %v2428_v20  ;;  %5892 = vtanh.f32 %v2041_v60  ;;  %v2045_v48 = vadd.f32 %v2044_v29, %v7056_v14  ;;  %v7675_v20 = vpack.c.bf16 %v6818_v7, %v6807_v15  ;;  %v6112_v60 = vld [vmem:[#allocation8 + $0x3e0] ss:$8 sps:$4 sm:$0xff]   ;;  %v6114_v15 = vld [vmem:[#allocation8 + $0x3f0] ss:$8 sps:$4 sm:$0xff]  }
 0x363   :  { %3953 = vmatmul.mubr.bf16.gmra.mrb[24].mxu0 %v2427_v2  ;;  %v5883_v49 = vpop.eup %5882  ;;  %5894 = vtanh.f32 %v2043_v25 }
 0x364   :  { %v5885_v61 = vpop.eup %5884  ;;  %5896 = vtanh.f32 %v2045_v48  ;;  %v6113_v48 = vld [vmem:[#allocation8 + $0x3f4] ss:$8 sps:$4 sm:$0xff]  }
 0x365   :  { %4956 = vmatpush1.bf16.msra.mxu1 %v6106_v37  ;;  %v5887_v11 = vpop.eup %5886 }
 0x366   :  { %4941 = vmatprep.subr.bf16.mxu1 %v6107_v12  ;;  %v5889_v63 = vpop.eup %5888  ;;  %v2435_v13 = vpack.c.bf16 %v5887_v11, %v5883_v49  ;;  %v2048_v3 = vpop.f32.mrb[228].mxu0 }
 0x367   :  { %v2049_v1 = vadd.f32 %v2048_v3, %v7053_v52  ;;  %v2050_v8 = vpop.f32.mrb[229].mxu0  ;;  %v2436_v51 = vpack.c.bf16 %v5889_v63, %v5885_v61  ;;  %v7679_v3 = vpack.c.bf16 %v6840_v22, %v6829_v39 }
 0x368   :  { %3760 = vmatmul.mubr.bf16.gmra.mrb[88].mxu1 %v7671_v28  ;;  %v2051_v40 = vadd.f32 %v2050_v8, %v7056_v14  ;;  %v2052_v46 = vpop.f32.mrb[230].mxu0  ;;  %v7677_v28 = vld [vmem:[#allocation33_spill] sm:$0xff] }
 0x369   :  { %3769 = vmatprep.mubr.bf16.mxu1 %v7672_v42  ;;  %4957 = vmatpush1.bf16.msra.mxu1 %v6108_v18  ;;  %5898 = vtanh.f32 %v2049_v1  ;;  %v2053_v47 = vadd.f32 %v2052_v46, %v7053_v52  ;;  %v2054_v5 = vpop.f32.mrb[231].mxu0  ;;  %v7678_v63 = vpack.c.bf16 %v7676_v53, %v7677_v28 }
 0x36a   :  { %4942 = vmatprep.subr.bf16.mxu1 %v6109_v34  ;;  %3962 = vmatprep.mubr.bf16.mxu0 %v2436_v51  ;;  %5900 = vtanh.f32 %v2051_v40  ;;  %v2055_v4 = vadd.f32 %v2054_v5, %v7056_v14 }
 0x36b   :  { %3963 = vmatmul.mubr.bf16.gmra.mrb[28].mxu0 %v2435_v13  ;;  %v5891_v45 = vpop.eup %5890  ;;  %5902 = vtanh.f32 %v2053_v47 }
 0x36c   :  { %v5893_v2 = vpop.eup %5892  ;;  %5904 = vtanh.f32 %v2055_v4 }
 0x36d   :  { %4958 = vmatpush1.bf16.msra.mxu1 %v6110_v54  ;;  %v5895_v62 = vpop.eup %5894  ;;  %v7680_v54 = vld [vmem:[#allocation36_spill] sm:$0xff] }
 0x36e   :  { %4943 = vmatprep.subr.bf16.mxu1 %v6111_v33  ;;  %v5897_v58 = vpop.eup %5896  ;;  %v2443_v19 = vpack.c.bf16 %v5895_v62, %v5891_v45  ;;  %v2058_v32 = vpop.f32.mrb[232].mxu0  ;;  %v7681_v45 = vld [vmem:[#allocation35_spill] sm:$0xff]  ;;  %v7683_v62 = vpack.c.bf16 %v6862_v0, %v6851_v6 }
 0x36f   :  { %v2059_v36 = vadd.f32 %v2058_v32, %v7053_v52  ;;  %v2060_v25 = vpop.f32.mrb[233].mxu0  ;;  %v2444_v29 = vpack.c.bf16 %v5897_v58, %v5893_v2  ;;  %v7682_v33 = vpack.c.bf16 %v7680_v54, %v7681_v45 }
 0x370   :  { %3770 = vmatmul.mubr.bf16.gmra.mrb[92].mxu1 %v7674_v10  ;;  %v2061_v37 = vadd.f32 %v2060_v25, %v7056_v14  ;;  %v2062_v49 = vpop.f32.mrb[234].mxu0 }
 0x371   :  { %3779 = vmatprep.mubr.bf16.mxu1 %v7675_v20  ;;  %4959 = vmatpush1.bf16.msra.mxu1 %v6112_v60  ;;  %5906 = vtanh.f32 %v2059_v36  ;;  %v2063_v55 = vadd.f32 %v2062_v49, %v7053_v52  ;;  %v2064_v12 = vpop.f32.mrb[235].mxu0  ;;  %v7685_v49 = vld [vmem:[#allocation37_spill] sm:$0xff] }
 0x372   :  { %4944 = vmatprep.subr.bf16.mxu1 %v6113_v48  ;;  %3972 = vmatprep.mubr.bf16.mxu0 %v2444_v29  ;;  %5908 = vtanh.f32 %v2061_v37  ;;  %v2065_v7 = vadd.f32 %v2064_v12, %v7056_v14  ;;  %v7684_v37 = vld [vmem:[#allocation38_spill] sm:$0xff] }
 0x373   :  { %3973 = vmatmul.mubr.bf16.gmra.mrb[32].mxu0 %v2443_v19  ;;  %v5899_v61 = vpop.eup %5898  ;;  %5910 = vtanh.f32 %v2063_v55  ;;  %v7686_v55 = vpack.c.bf16 %v7684_v37, %v7685_v49  ;;  %v7694_v37 = vld [vmem:[#allocation43_spill] sm:$0xff]  ;;  %v7695_v49 = vld [vmem:[#allocation41_spill] sm:$0xff] }
 0x374   :  { %v5901_v11 = vpop.eup %5900  ;;  %5912 = vtanh.f32 %v2065_v7  ;;  %v7687_v7 = vpack.c.bf16 %v6884_v30, %v6873_v27 }
 0x375   :  { %4960 = vmatpush1.bf16.msra.mxu1 %v6114_v15  ;;  %v5903_v59 = vpop.eup %5902 }
 0x376   :  { %v5905_v13 = vpop.eup %5904  ;;  %v2451_v42 = vpack.c.bf16 %v5903_v59, %v5899_v61  ;;  %v2068_v18 = vpop.f32.mrb[236].mxu0 }
 0x377   :  { %v2069_v1 = vadd.f32 %v2068_v18, %v7053_v52  ;;  %v2070_v8 = vpop.f32.mrb[237].mxu0  ;;  %v2452_v51 = vpack.c.bf16 %v5905_v13, %v5901_v11 }
 0x378   :  { %3780 = vmatmul.mubr.bf16.gmra.mrb[96].mxu1 %v7678_v63  ;;  %v2071_v34 = vadd.f32 %v2070_v8, %v7056_v14  ;;  %v2072_v40 = vpop.f32.mrb[238].mxu0  ;;  %v7689_v8 = vld [vmem:[#allocation39_spill] sm:$0xff] }
 0x379   :  { %3789 = vmatprep.mubr.bf16.mxu1 %v7679_v3  ;;  %5914 = vtanh.f32 %v2069_v1  ;;  %v2073_v46 = vadd.f32 %v2072_v40, %v7053_v52  ;;  %v2074_v47 = vpop.f32.mrb[239].mxu0  ;;  %3982 = vmatprep.mubr.bf16.mxu0 %v2452_v51  ;;  %v7688_v1 = vld [vmem:[#allocation40_spill] sm:$0xff] }
 0x37a   :  { %5916 = vtanh.f32 %v2071_v34  ;;  %v2075_v5 = vadd.f32 %v2074_v47, %v7056_v14  ;;  %v7690_v51 = vpack.c.bf16 %v7688_v1, %v7689_v8  ;;  %v7691_v40 = vld [vmem:[#allocation44_spill] sm:$0xff]  ;;  %v7697_v1 = vpack.c.bf16 %v6964_v43, %v6955_v31  ;;  %v7700_v31 = vld [vmem:[#allocation13_spill] sm:$0xff]  ;;  %v7701_v43 = vld [vmem:[#allocation14_spill] sm:$0xff] }
 0x37b   :  { %3983 = vmatmul.mubr.bf16.gmra.mrb[36].mxu0 %v2451_v42  ;;  %v7163_v4 = vpop.eup %5906  ;;  %5918 = vtanh.f32 %v2073_v46  ;;  %v7692_v46 = vld [vmem:[#allocation42_spill] sm:$0xff] }
 0x37c   :  { %v7165_v22 = vpop.eup %5908  ;;  %5920 = vtanh.f32 %v2075_v5  ;;  %v7693_v47 = vpack.c.bf16 %v7691_v40, %v7692_v46 }
 0x37d   :  { %v7167_v39 = vpop.eup %5910 }
 0x37e   :  { %v7172_v2 = vpop.eup %5912  ;;  %v2078_v26 = vpop.f32.mrb[240].mxu0  ;;  %v2459_v10 = vpack.c.bf16 %v7167_v39, %v7163_v4 }
 0x37f   :  { %v2079_v58 = vadd.f32 %v2078_v26, %v7053_v52  ;;  %v2080_v19 = vpop.f32.mrb[241].mxu0  ;;  %v2460_v20 = vpack.c.bf16 %v7172_v2, %v7165_v22 }
 0x380   :  { %3790 = vmatmul.mubr.bf16.gmra.mrb[100].mxu1 %v7682_v33  ;;  %v2081_v32 = vadd.f32 %v2080_v19, %v7056_v14  ;;  %v2082_v60 = vpop.f32.mrb[242].mxu0 }
 0x381   :  { %3799 = vmatprep.mubr.bf16.mxu1 %v7683_v62  ;;  %5922 = vtanh.f32 %v2079_v58  ;;  %v2083_v36 = vadd.f32 %v2082_v60, %v7053_v52  ;;  %v2084_v25 = vpop.f32.mrb[243].mxu0 }
 0x382   :  { %5924 = vtanh.f32 %v2081_v32  ;;  %v2085_v6 = vadd.f32 %v2084_v25, %v7056_v14 }
 0x383   :  { %v7185_v0 = vpop.eup %5914  ;;  %5926 = vtanh.f32 %v2083_v36 }
 0x384   :  { %v7187_v29 = vpop.eup %5916  ;;  %5928 = vtanh.f32 %v2085_v6 }
 0x385   :  { %v7189_v48 = vpop.eup %5918 }
 0x386   :  { %v7194_v12 = vpop.eup %5920  ;;  %v2088_v15 = vpop.f32.mrb[244].mxu0  ;;  %v2467_v61 = vpack.c.bf16 %v7189_v48, %v7185_v0 }
 0x387   :  { %v2089_v11 = vadd.f32 %v2088_v15, %v7053_v52  ;;  %v2090_v59 = vpop.f32.mrb[245].mxu0  ;;  %v2468_v53 = vpack.c.bf16 %v7194_v12, %v7187_v29 }
 0x388   :  { %3800 = vmatmul.mubr.bf16.gmra.mrb[104].mxu1 %v7686_v55  ;;  %v2091_v28 = vadd.f32 %v2090_v59, %v7056_v14  ;;  %v2092_v63 = vpop.f32.mrb[246].mxu0  ;;  %v7696_v55 = vpack.c.bf16 %v7694_v37, %v7695_v49 }
 0x389   :  { %3809 = vmatprep.mubr.bf16.mxu1 %v7687_v7  ;;  %5930 = vtanh.f32 %v2089_v11  ;;  %v2093_v13 = vadd.f32 %v2092_v63, %v7053_v52  ;;  %v2094_v42 = vpop.f32.mrb[247].mxu0 }
 0x38a   :  { %5932 = vtanh.f32 %v2091_v28  ;;  %v2095_v27 = vadd.f32 %v2094_v42, %v7056_v14 }
 0x38b   :  { %v7207_v30 = vpop.eup %5922  ;;  %5934 = vtanh.f32 %v2093_v13 }
 0x38c   :  { %v5925_v3 = vpop.eup %5924  ;;  %5936 = vtanh.f32 %v2095_v27 }
 0x38d   :  { %v5927_v18 = vpop.eup %5926 }
 0x38e   :  { %v5929_v34 = vpop.eup %5928  ;;  %v2098_v5 = vpop.f32.mrb[248].mxu0  ;;  %v2475_v54 = vpack.c.bf16 %v5927_v18, %v7207_v30 }
 0x38f   :  { %v2099_v45 = vadd.f32 %v2098_v5, %v7053_v52  ;;  %v2100_v33 = vpop.f32.mrb[249].mxu0  ;;  %v2476_v62 = vpack.c.bf16 %v5929_v34, %v5925_v3 }
 0x390   :  { %3810 = vmatmul.mubr.bf16.gmra.mrb[108].mxu1 %v7690_v51  ;;  %v2101_v26 = vadd.f32 %v2100_v33, %v7056_v14  ;;  %v2102_v58 = vpop.f32.mrb[250].mxu0 }
 0x391   :  { %3819 = vmatprep.mubr.bf16.mxu1 %v7693_v47  ;;  %5938 = vtanh.f32 %v2099_v45  ;;  %v2103_v19 = vadd.f32 %v2102_v58, %v7053_v52  ;;  %v2104_v32 = vpop.f32.mrb[251].mxu0 }
 0x392   :  { %5940 = vtanh.f32 %v2101_v26  ;;  %v2105_v60 = vadd.f32 %v2104_v32, %v7056_v14 }
 0x393   :  { %v5931_v36 = vpop.eup %5930  ;;  %5942 = vtanh.f32 %v2103_v19 }
 0x394   :  { %v5933_v25 = vpop.eup %5932  ;;  %5944 = vtanh.f32 %v2105_v60 }
 0x395   :  { %v5935_v6 = vpop.eup %5934 }
 0x396   :  { %v5937_v7 = vpop.eup %5936  ;;  %v2108_v15 = vpop.f32.mrb[252].mxu0  ;;  %v2483_v11 = vpack.c.bf16 %v5935_v6, %v5931_v36 }
 0x397   :  { %v2109_v59 = vadd.f32 %v2108_v15, %v7053_v52  ;;  %v2110_v28 = vpop.f32.mrb[253].mxu0  ;;  %v2484_v63 = vpack.c.bf16 %v5937_v7, %v5933_v25 }
 0x398   :  { %3820 = vmatmul.mubr.bf16.gmra.mrb[112].mxu1 %v7696_v55  ;;  %v2111_v13 = vadd.f32 %v2110_v28, %v7056_v14  ;;  %v2112_v42 = vpop.f32.mrb[254].mxu0 }
 0x399   :  { %3829 = vmatprep.mubr.bf16.mxu1 %v2482_v57  ;;  %5946 = vtanh.f32 %v2109_v59  ;;  %v2113_v27 = vadd.f32 %v2112_v42, %v7053_v52  ;;  %v2114_v30 = vpop.f32.mrb[255].mxu0 }
 0x39a   :  { %5948 = vtanh.f32 %v2111_v13  ;;  %v2115_v3 = vadd.f32 %v2114_v30, %v7056_v14  ;;  %v7698_v14 = vpack.c.bf16 %v6958_v35, %v6948_v41  ;;  %v2629_v41 = vld [vmem:[%s7571_s6] sm:$0x3] }
 0x39b   :  { %v5939_v18 = vpop.eup %5938  ;;  %5950 = vtanh.f32 %v2113_v27  ;;  %v7261_v35 = vrot.slane %v2629_v41, %v7700_v31 }
 0x39c   :  { %v5941_v50 = vpop.eup %5940  ;;  %5952 = vtanh.f32 %v2115_v3 }
 0x39d   :  { %v5943_v21 = vpop.eup %5942 }
 0x39e   :  { %v5945_v57 = vpop.eup %5944  ;;  %v2491_v8 = vpack.c.bf16 %v5943_v21, %v5939_v18 }
 0x39f   :  { %v2492_v52 = vpack.c.bf16 %v5945_v57, %v5941_v50 }
 0x3a0   :  { %3830 = vmatmul.mubr.bf16.gmra.mrb[116].mxu1 %v2481_v17  ;;  %v7699_v17 = vpack.c.bf16 %v6976_v16, %v6970_v38  ;;  %v7264_v38 = vrot.slane %v2629_v41, %v7701_v43 }
 0x3a1   :  { %3839 = vmatprep.mubr.bf16.mxu1 %v7697_v1 }
 0x3a3   :  { %v5947_v51 = vpop.eup %5946 }
 0x3a4   :  { %v5949_v34 = vpop.eup %5948 }
 0x3a5   :  { %v5951_v40 = vpop.eup %5950 }
 0x3a6   :  { %v5953_v46 = vpop.eup %5952  ;;  %v2499_v23 = vpack.c.bf16 %v5951_v40, %v5947_v51 }
 0x3a7   :  { %v2500_v56 = vpack.c.bf16 %v5953_v46, %v5949_v34 }
 0x3a8   :  { %3840 = vmatmul.mubr.bf16.gmra.mrb[120].mxu1 %v7698_v14 }
 0x3a9   :  { %3849 = vmatprep.mubr.bf16.mxu1 %v2498_v44 }
 0x3b0   :  { %3850 = vmatmul.mubr.bf16.gmra.mrb[124].mxu1 %v7699_v17 }
 0x3b1   :  { %3992 = vmatprep.mubr.bf16.mxu1 %v2460_v20  ;;  %v4181_v20 = vld [vmem:[%s7572_s7] sm:$0x3] }
 0x3b2   :  { %v7277_v26 = vrot.slane %v4181_v20, %v7701_v43 }
 0x3b8   :  { %3993 = vmatmul.mubr.bf16.vlgmr.msra.gmra.mrb[104].mxu1 %v2459_v10 }
 0x3b9   :  { %4002 = vmatprep.mubr.bf16.mxu1 %v2468_v53 }
 0x3c0   :  { %4003 = vmatmul.mubr.bf16.gmra.mrb[108].mxu1 %v2467_v61 }
 0x3c1   :  { %4012 = vmatprep.mubr.bf16.mxu1 %v2476_v62 }
 0x3c8   :  { %4013 = vmatmul.mubr.bf16.gmra.mrb[112].mxu1 %v2475_v54  ;;  %v7274_v54 = vrot.slane %v4181_v20, %v7700_v31 }
 0x3c9   :  { %4022 = vmatprep.mubr.bf16.mxu1 %v2484_v63 }
 0x3d0   :  { %4023 = vmatmul.mubr.bf16.gmra.mrb[116].mxu1 %v2483_v11 }
 0x3d1   :  { %4032 = vmatprep.mubr.bf16.mxu1 %v2492_v52 }
 0x3d8   :  { %4033 = vmatmul.mubr.bf16.gmra.mrb[120].mxu1 %v2491_v8 }
 0x3d9   :  { %4042 = vmatprep.mubr.bf16.mxu1 %v2500_v56 }
 0x3e0   :  { %4043 = vmatmul.mubr.bf16.gmra.mrb[124].mxu1 %v2499_v23 }
 0x405   :  { %v3894_v24 = vpop.f32.mrb[0].mxu0 }
 0x406   :  { %v3896_v9 = vpop.f32.mrb[1].mxu0 }
 0x407   :  { %v3898_v16 = vpop.f32.mrb[2].mxu0 }
 0x408   :  { %v3900_v4 = vpop.f32.mrb[3].mxu0 }
 0x40b   :  { %v3701_v44 = vpop.f32.mrb[64].mxu1 }
 0x40c   :  { %v4961_v22 = vadd.f32 %v3701_v44, %v7261_v35  ;;  %v3703_v39 = vpop.f32.mrb[65].mxu1 }
 0x40d   :  { %v4963_v2 = vadd.f32 %v3703_v39, %v7264_v38  ;;  %v3705_v10 = vpop.f32.mrb[66].mxu1 }
 0x40e   :  { %v4962_v0 = vadd.f32 %v4961_v22, %v3894_v24  ;;  %v4965_v29 = vadd.f32 %v3705_v10, %v7261_v35  ;;  %v3707_v48 = vpop.f32.mrb[67].mxu1  ;;  %v3904_v5 = vpop.f32.mrb[4].mxu0 }
 0x40f   :  { %v4964_v12 = vadd.f32 %v4963_v2, %v3896_v9  ;;  %v4967_v61 = vadd.f32 %v3707_v48, %v7264_v38  ;;  %v3906_v62 = vpop.f32.mrb[5].mxu0 }
 0x410   :  { %v4053_v53 = vmul.f32 0.2, %v4962_v0  ;;  %v4966_v47 = vadd.f32 %v4965_v29, %v3898_v16  ;;  %v3908_v32 = vpop.f32.mrb[6].mxu0 }
 0x411   :  { %v4054_v45 = vmul.f32 0.2, %v4964_v12  ;;  %v4968_v33 = vadd.f32 %v4967_v61, %v3900_v4  ;;  %v3910_v6 = vpop.f32.mrb[7].mxu0 }
 0x412   :  { %v4117_v58 = vmax.f32 %v4962_v0, %v4053_v53  ;;  %v4055_v19 = vmul.f32 0.2, %v4966_v47 }
 0x413   :  { %v4118_v60 = vmax.f32 %v4964_v12, %v4054_v45  ;;  %v4056_v36 = vmul.f32 0.2, %v4968_v33  ;;  %v3711_v25 = vpop.f32.mrb[68].mxu1 }
 0x414   :  { %v4119_v37 = vmax.f32 %v4966_v47, %v4055_v19  ;;  %v4969_v49 = vadd.f32 %v3711_v25, %v7261_v35  ;;  %v3713_v55 = vpop.f32.mrb[69].mxu1  ;;  %v4193_v7 = vmul.f32 %v7274_v54, %v4117_v58 }
 0x415   :  { %v4120_v15 = vmax.f32 %v4968_v33, %v4056_v36  ;;  %v4971_v11 = vadd.f32 %v3713_v55, %v7264_v38  ;;  %v3715_v59 = vpop.f32.mrb[70].mxu1  ;;  %v4194_v28 = vmul.f32 %v7277_v26, %v4118_v60 }
 0x416   :  { %v4970_v63 = vadd.f32 %v4969_v49, %v3904_v5  ;;  %v4973_v13 = vadd.f32 %v3715_v59, %v7261_v35  ;;  %v3717_v42 = vpop.f32.mrb[71].mxu1  ;;  %v4195_v27 = vmul.f32 %v7274_v54, %v4119_v37  ;;  %v3914_v1 = vpop.f32.mrb[8].mxu0 }
 0x417   :  { %v4972_v30 = vadd.f32 %v4971_v11, %v3906_v62  ;;  %v4975_v3 = vadd.f32 %v3717_v42, %v7264_v38  ;;  %v4257_v18 = vadd.f32 %v4194_v28, %v4193_v7  ;;  %v4196_v50 = vmul.f32 %v7277_v26, %v4120_v15  ;;  %v3916_v51 = vpop.f32.mrb[9].mxu0 }
 0x418   :  { %v4057_v21 = vmul.f32 0.2, %v4970_v63  ;;  %v4974_v57 = vadd.f32 %v4973_v13, %v3908_v32  ;;  %v3918_v46 = vpop.f32.mrb[10].mxu0 }
 0x419   :  { %v4058_v8 = vmul.f32 0.2, %v4972_v30  ;;  %v4976_v52 = vadd.f32 %v4975_v3, %v3910_v6  ;;  %4258 = vadd.xlane.f32.xlu0 %v4257_v18  ;;  %v4260_v34 = vadd.f32 %v4196_v50, %v4195_v27  ;;  %v3920_v41 = vpop.f32.mrb[11].mxu0 }
 0x41a   :  { %v4121_v40 = vmax.f32 %v4970_v63, %v4057_v21  ;;  %v4059_v14 = vmul.f32 0.2, %v4974_v57 }
 0x41b   :  { %v4122_v23 = vmax.f32 %v4972_v30, %v4058_v8  ;;  %v4060_v56 = vmul.f32 0.2, %v4976_v52  ;;  %v3721_v17 = vpop.f32.mrb[72].mxu1 }
 0x41c   :  { %v4123_v31 = vmax.f32 %v4974_v57, %v4059_v14  ;;  %v4977_v24 = vadd.f32 %v3721_v17, %v7261_v35  ;;  %v3723_v43 = vpop.f32.mrb[73].mxu1  ;;  %v4197_v9 = vmul.f32 %v7274_v54, %v4121_v40 }
 0x41d   :  { %v4124_v16 = vmax.f32 %v4976_v52, %v4060_v56  ;;  %v4979_v44 = vadd.f32 %v3723_v43, %v7264_v38  ;;  %4261 = vadd.xlane.f32.xlu0 %v4260_v34  ;;  %v3725_v4 = vpop.f32.mrb[74].mxu1  ;;  %v4198_v22 = vmul.f32 %v7277_v26, %v4122_v23 }
 0x41e   :  { %v4978_v39 = vadd.f32 %v4977_v24, %v3914_v1  ;;  %v4981_v2 = vadd.f32 %v3725_v4, %v7261_v35  ;;  %v3727_v10 = vpop.f32.mrb[75].mxu1  ;;  %v4199_v20 = vmul.f32 %v7274_v54, %v4123_v31  ;;  %v3924_v47 = vpop.f32.mrb[12].mxu0 }
 0x41f   :  { %v4980_v0 = vadd.f32 %v4979_v44, %v3916_v51  ;;  %v4983_v29 = vadd.f32 %v3727_v10, %v7264_v38  ;;  %v4263_v48 = vadd.f32 %v4198_v22, %v4197_v9  ;;  %v4200_v12 = vmul.f32 %v7277_v26, %v4124_v16  ;;  %v3926_v33 = vpop.f32.mrb[13].mxu0 }
 0x420   :  { %v4061_v61 = vmul.f32 0.2, %v4978_v39  ;;  %v4982_v53 = vadd.f32 %v4981_v2, %v3918_v46  ;;  %v3928_v32 = vpop.f32.mrb[14].mxu0 }
 0x421   :  { %v4062_v5 = vmul.f32 0.2, %v4980_v0  ;;  %v4984_v45 = vadd.f32 %v4983_v29, %v3920_v41  ;;  %4264 = vadd.xlane.f32.xlu1 %v4263_v48  ;;  %v4266_v62 = vadd.f32 %v4200_v12, %v4199_v20  ;;  %v3930_v6 = vpop.f32.mrb[15].mxu0 }
 0x422   :  { %v4125_v58 = vmax.f32 %v4978_v39, %v4061_v61  ;;  %v4063_v19 = vmul.f32 0.2, %v4982_v53 }
 0x423   :  { %v4126_v60 = vmax.f32 %v4980_v0, %v4062_v5  ;;  %v4064_v36 = vmul.f32 0.2, %v4984_v45  ;;  %v3731_v25 = vpop.f32.mrb[76].mxu1 }
 0x424   :  { %v4127_v37 = vmax.f32 %v4982_v53, %v4063_v19  ;;  %v4985_v49 = vadd.f32 %v3731_v25, %v7261_v35  ;;  %v3733_v55 = vpop.f32.mrb[77].mxu1  ;;  %v4201_v7 = vmul.f32 %v7274_v54, %v4125_v58 }
 0x425   :  { %v4128_v15 = vmax.f32 %v4984_v45, %v4064_v36  ;;  %v4987_v11 = vadd.f32 %v3733_v55, %v7264_v38  ;;  %4267 = vadd.xlane.f32.xlu1 %v4266_v62  ;;  %v3735_v59 = vpop.f32.mrb[78].mxu1  ;;  %v4202_v28 = vmul.f32 %v7277_v26, %v4126_v60 }
 0x426   :  { %v4986_v63 = vadd.f32 %v4985_v49, %v3924_v47  ;;  %v4989_v13 = vadd.f32 %v3735_v59, %v7261_v35  ;;  %v3737_v42 = vpop.f32.mrb[79].mxu1  ;;  %v4203_v27 = vmul.f32 %v7274_v54, %v4127_v37  ;;  %v3934_v1 = vpop.f32.mrb[16].mxu0 }
 0x427   :  { %v4988_v30 = vadd.f32 %v4987_v11, %v3926_v33  ;;  %v4991_v3 = vadd.f32 %v3737_v42, %v7264_v38  ;;  %v4269_v18 = vadd.f32 %v4202_v28, %v4201_v7  ;;  %v4204_v50 = vmul.f32 %v7277_v26, %v4128_v15  ;;  %v3936_v34 = vpop.f32.mrb[17].mxu0 }
 0x428   :  { %v4065_v21 = vmul.f32 0.2, %v4986_v63  ;;  %v4990_v57 = vadd.f32 %v4989_v13, %v3928_v32  ;;  %v3938_v46 = vpop.f32.mrb[18].mxu0 }
 0x429   :  { %v4066_v8 = vmul.f32 0.2, %v4988_v30  ;;  %v4992_v52 = vadd.f32 %v4991_v3, %v3930_v6  ;;  %4270 = vadd.xlane.f32.xlu0 %v4269_v18  ;;  %v4272_v51 = vadd.f32 %v4204_v50, %v4203_v27  ;;  %v3940_v41 = vpop.f32.mrb[19].mxu0 }
 0x42a   :  { %v4129_v40 = vmax.f32 %v4986_v63, %v4065_v21  ;;  %v4067_v14 = vmul.f32 0.2, %v4990_v57 }
 0x42b   :  { %v4130_v23 = vmax.f32 %v4988_v30, %v4066_v8  ;;  %v4068_v56 = vmul.f32 0.2, %v4992_v52  ;;  %4273 = vadd.xlane.f32.xlu1 %v4272_v51  ;;  %v3741_v17 = vpop.f32.mrb[80].mxu1 }
 0x42c   :  { %v4131_v31 = vmax.f32 %v4990_v57, %v4067_v14  ;;  %v4993_v24 = vadd.f32 %v3741_v17, %v7261_v35  ;;  %v3743_v43 = vpop.f32.mrb[81].mxu1  ;;  %v4205_v9 = vmul.f32 %v7274_v54, %v4129_v40 }
 0x42d   :  { %v4132_v16 = vmax.f32 %v4992_v52, %v4068_v56  ;;  %v4995_v44 = vadd.f32 %v3743_v43, %v7264_v38  ;;  %v3745_v4 = vpop.f32.mrb[82].mxu1  ;;  %v4206_v22 = vmul.f32 %v7277_v26, %v4130_v23 }
 0x42e   :  { %v4994_v39 = vadd.f32 %v4993_v24, %v3934_v1  ;;  %v4997_v2 = vadd.f32 %v3745_v4, %v7261_v35  ;;  %v3747_v10 = vpop.f32.mrb[83].mxu1  ;;  %v4207_v20 = vmul.f32 %v7274_v54, %v4131_v31  ;;  %v3944_v47 = vpop.f32.mrb[20].mxu0 }
 0x42f   :  { %v4996_v0 = vadd.f32 %v4995_v44, %v3936_v34  ;;  %v4999_v29 = vadd.f32 %v3747_v10, %v7264_v38  ;;  %v4275_v48 = vadd.f32 %v4206_v22, %v4205_v9  ;;  %v4208_v12 = vmul.f32 %v7277_v26, %v4132_v16  ;;  %v3946_v62 = vpop.f32.mrb[21].mxu0 }
 0x430   :  { %v4069_v61 = vmul.f32 0.2, %v4994_v39  ;;  %v4998_v53 = vadd.f32 %v4997_v2, %v3938_v46  ;;  %v3948_v32 = vpop.f32.mrb[22].mxu0 }
 0x431   :  { %v4070_v5 = vmul.f32 0.2, %v4996_v0  ;;  %v5000_v45 = vadd.f32 %v4999_v29, %v3940_v41  ;;  %4276 = vadd.xlane.f32.xlu0 %v4275_v48  ;;  %v4278_v33 = vadd.f32 %v4208_v12, %v4207_v20  ;;  %v3950_v6 = vpop.f32.mrb[23].mxu0 }
 0x432   :  { %v4133_v58 = vmax.f32 %v4994_v39, %v4069_v61  ;;  %v4071_v19 = vmul.f32 0.2, %v4998_v53 }
 0x433   :  { %v4134_v60 = vmax.f32 %v4996_v0, %v4070_v5  ;;  %v4072_v36 = vmul.f32 0.2, %v5000_v45  ;;  %4279 = vadd.xlane.f32.xlu1 %v4278_v33  ;;  %v3751_v25 = vpop.f32.mrb[84].mxu1 }
 0x434   :  { %v4135_v37 = vmax.f32 %v4998_v53, %v4071_v19  ;;  %v5001_v49 = vadd.f32 %v3751_v25, %v7261_v35  ;;  %v3753_v55 = vpop.f32.mrb[85].mxu1  ;;  %v4209_v7 = vmul.f32 %v7274_v54, %v4133_v58 }
 0x435   :  { %v4136_v15 = vmax.f32 %v5000_v45, %v4072_v36  ;;  %v5003_v11 = vadd.f32 %v3753_v55, %v7264_v38  ;;  %v3755_v59 = vpop.f32.mrb[86].mxu1  ;;  %v4210_v28 = vmul.f32 %v7277_v26, %v4134_v60 }
 0x436   :  { %v5002_v63 = vadd.f32 %v5001_v49, %v3944_v47  ;;  %v5005_v13 = vadd.f32 %v3755_v59, %v7261_v35  ;;  %v3757_v42 = vpop.f32.mrb[87].mxu1  ;;  %v4211_v27 = vmul.f32 %v7274_v54, %v4135_v37  ;;  %v3954_v1 = vpop.f32.mrb[24].mxu0 }
 0x437   :  { %v5004_v30 = vadd.f32 %v5003_v11, %v3946_v62  ;;  %v5007_v3 = vadd.f32 %v3757_v42, %v7264_v38  ;;  %v4281_v18 = vadd.f32 %v4210_v28, %v4209_v7  ;;  %v4212_v50 = vmul.f32 %v7277_v26, %v4136_v15  ;;  %v3956_v34 = vpop.f32.mrb[25].mxu0 }
 0x438   :  { %v4073_v21 = vmul.f32 0.2, %v5002_v63  ;;  %v5006_v57 = vadd.f32 %v5005_v13, %v3948_v32  ;;  %v3958_v46 = vpop.f32.mrb[26].mxu0 }
 0x439   :  { %v4074_v8 = vmul.f32 0.2, %v5004_v30  ;;  %v5008_v52 = vadd.f32 %v5007_v3, %v3950_v6  ;;  %4282 = vadd.xlane.f32.xlu0 %v4281_v18  ;;  %v4284_v51 = vadd.f32 %v4212_v50, %v4211_v27  ;;  %v3960_v41 = vpop.f32.mrb[27].mxu0 }
 0x43a   :  { %v4137_v40 = vmax.f32 %v5002_v63, %v4073_v21  ;;  %v4075_v14 = vmul.f32 0.2, %v5006_v57 }
 0x43b   :  { %v4138_v23 = vmax.f32 %v5004_v30, %v4074_v8  ;;  %v4076_v56 = vmul.f32 0.2, %v5008_v52  ;;  %4285 = vadd.xlane.f32.xlu1 %v4284_v51  ;;  %v3761_v17 = vpop.f32.mrb[88].mxu1 }
 0x43c   :  { %v4139_v31 = vmax.f32 %v5006_v57, %v4075_v14  ;;  %v5009_v24 = vadd.f32 %v3761_v17, %v7261_v35  ;;  %v3763_v43 = vpop.f32.mrb[89].mxu1  ;;  %v4213_v9 = vmul.f32 %v7274_v54, %v4137_v40 }
 0x43d   :  { %v4140_v16 = vmax.f32 %v5008_v52, %v4076_v56  ;;  %v5011_v44 = vadd.f32 %v3763_v43, %v7264_v38  ;;  %v3765_v4 = vpop.f32.mrb[90].mxu1  ;;  %v4214_v22 = vmul.f32 %v7277_v26, %v4138_v23 }
 0x43e   :  { %v5010_v39 = vadd.f32 %v5009_v24, %v3954_v1  ;;  %v5013_v2 = vadd.f32 %v3765_v4, %v7261_v35  ;;  %v3767_v10 = vpop.f32.mrb[91].mxu1  ;;  %v4215_v20 = vmul.f32 %v7274_v54, %v4139_v31  ;;  %v3964_v47 = vpop.f32.mrb[28].mxu0 }
 0x43f   :  { %v5012_v0 = vadd.f32 %v5011_v44, %v3956_v34  ;;  %v5015_v29 = vadd.f32 %v3767_v10, %v7264_v38  ;;  %v4287_v48 = vadd.f32 %v4214_v22, %v4213_v9  ;;  %v4216_v12 = vmul.f32 %v7277_v26, %v4140_v16  ;;  %v3966_v62 = vpop.f32.mrb[29].mxu0 }
 0x440   :  { %v4077_v61 = vmul.f32 0.2, %v5010_v39  ;;  %v5014_v53 = vadd.f32 %v5013_v2, %v3958_v46  ;;  %v3968_v32 = vpop.f32.mrb[30].mxu0 }
 0x441   :  { %v4078_v5 = vmul.f32 0.2, %v5012_v0  ;;  %v5016_v45 = vadd.f32 %v5015_v29, %v3960_v41  ;;  %4288 = vadd.xlane.f32.xlu0 %v4287_v48  ;;  %v4290_v33 = vadd.f32 %v4216_v12, %v4215_v20  ;;  %v3970_v6 = vpop.f32.mrb[31].mxu0 }
 0x442   :  { %v4141_v58 = vmax.f32 %v5010_v39, %v4077_v61  ;;  %v4079_v19 = vmul.f32 0.2, %v5014_v53 }
 0x443   :  { %v4142_v60 = vmax.f32 %v5012_v0, %v4078_v5  ;;  %v4080_v36 = vmul.f32 0.2, %v5016_v45  ;;  %4291 = vadd.xlane.f32.xlu1 %v4290_v33  ;;  %v3771_v25 = vpop.f32.mrb[92].mxu1 }
 0x444   :  { %v4143_v37 = vmax.f32 %v5014_v53, %v4079_v19  ;;  %v5017_v49 = vadd.f32 %v3771_v25, %v7261_v35  ;;  %v3773_v55 = vpop.f32.mrb[93].mxu1  ;;  %v4217_v7 = vmul.f32 %v7274_v54, %v4141_v58 }
 0x445   :  { %v4144_v15 = vmax.f32 %v5016_v45, %v4080_v36  ;;  %v5019_v11 = vadd.f32 %v3773_v55, %v7264_v38  ;;  %v3775_v59 = vpop.f32.mrb[94].mxu1  ;;  %v4218_v28 = vmul.f32 %v7277_v26, %v4142_v60 }
 0x446   :  { %v5018_v63 = vadd.f32 %v5017_v49, %v3964_v47  ;;  %v5021_v13 = vadd.f32 %v3775_v59, %v7261_v35  ;;  %v3777_v42 = vpop.f32.mrb[95].mxu1  ;;  %v4219_v27 = vmul.f32 %v7274_v54, %v4143_v37  ;;  %v3974_v1 = vpop.f32.mrb[32].mxu0 }
 0x447   :  { %v5020_v30 = vadd.f32 %v5019_v11, %v3966_v62  ;;  %v5023_v3 = vadd.f32 %v3777_v42, %v7264_v38  ;;  %v4293_v18 = vadd.f32 %v4218_v28, %v4217_v7  ;;  %v4220_v50 = vmul.f32 %v7277_v26, %v4144_v15  ;;  %v3976_v34 = vpop.f32.mrb[33].mxu0 }
 0x448   :  { %v4081_v21 = vmul.f32 0.2, %v5018_v63  ;;  %v5022_v57 = vadd.f32 %v5021_v13, %v3968_v32  ;;  %v3978_v46 = vpop.f32.mrb[34].mxu0 }
 0x449   :  { %v4082_v8 = vmul.f32 0.2, %v5020_v30  ;;  %v5024_v52 = vadd.f32 %v5023_v3, %v3970_v6  ;;  %4294 = vadd.xlane.f32.xlu0 %v4293_v18  ;;  %v4296_v51 = vadd.f32 %v4220_v50, %v4219_v27  ;;  %v3980_v41 = vpop.f32.mrb[35].mxu0 }
 0x44a   :  { %v4145_v40 = vmax.f32 %v5018_v63, %v4081_v21  ;;  %v4083_v14 = vmul.f32 0.2, %v5022_v57 }
 0x44b   :  { %v4146_v23 = vmax.f32 %v5020_v30, %v4082_v8  ;;  %v4084_v56 = vmul.f32 0.2, %v5024_v52  ;;  %4297 = vadd.xlane.f32.xlu1 %v4296_v51  ;;  %v3781_v17 = vpop.f32.mrb[96].mxu1 }
 0x44c   :  { %v4147_v31 = vmax.f32 %v5022_v57, %v4083_v14  ;;  %v5025_v24 = vadd.f32 %v3781_v17, %v7261_v35  ;;  %v3783_v43 = vpop.f32.mrb[97].mxu1  ;;  %v4221_v9 = vmul.f32 %v7274_v54, %v4145_v40 }
 0x44d   :  { %v4148_v16 = vmax.f32 %v5024_v52, %v4084_v56  ;;  %v5027_v44 = vadd.f32 %v3783_v43, %v7264_v38  ;;  %v3785_v4 = vpop.f32.mrb[98].mxu1  ;;  %v4222_v22 = vmul.f32 %v7277_v26, %v4146_v23 }
 0x44e   :  { %v5026_v39 = vadd.f32 %v5025_v24, %v3974_v1  ;;  %v5029_v2 = vadd.f32 %v3785_v4, %v7261_v35  ;;  %v3787_v10 = vpop.f32.mrb[99].mxu1  ;;  %v4223_v20 = vmul.f32 %v7274_v54, %v4147_v31  ;;  %v3984_v47 = vpop.f32.mrb[36].mxu0 }
 0x44f   :  { %v5028_v0 = vadd.f32 %v5027_v44, %v3976_v34  ;;  %v5031_v29 = vadd.f32 %v3787_v10, %v7264_v38  ;;  %v4299_v48 = vadd.f32 %v4222_v22, %v4221_v9  ;;  %v4224_v12 = vmul.f32 %v7277_v26, %v4148_v16  ;;  %v3986_v62 = vpop.f32.mrb[37].mxu0 }
 0x450   :  { %v4085_v61 = vmul.f32 0.2, %v5026_v39  ;;  %v5030_v53 = vadd.f32 %v5029_v2, %v3978_v46  ;;  %v3988_v32 = vpop.f32.mrb[38].mxu0 }
 0x451   :  { %v4086_v5 = vmul.f32 0.2, %v5028_v0  ;;  %v5032_v45 = vadd.f32 %v5031_v29, %v3980_v41  ;;  %4300 = vadd.xlane.f32.xlu0 %v4299_v48  ;;  %v4302_v33 = vadd.f32 %v4224_v12, %v4223_v20  ;;  %v3990_v6 = vpop.f32.mrb[39].mxu0 }
 0x452   :  { %v4149_v58 = vmax.f32 %v5026_v39, %v4085_v61  ;;  %v4087_v19 = vmul.f32 0.2, %v5030_v53 }
 0x453   :  { %v4150_v60 = vmax.f32 %v5028_v0, %v4086_v5  ;;  %v4088_v36 = vmul.f32 0.2, %v5032_v45  ;;  %4303 = vadd.xlane.f32.xlu1 %v4302_v33  ;;  %v3791_v25 = vpop.f32.mrb[100].mxu1 }
 0x454   :  { %v4151_v37 = vmax.f32 %v5030_v53, %v4087_v19  ;;  %v5033_v49 = vadd.f32 %v3791_v25, %v7261_v35  ;;  %v3793_v55 = vpop.f32.mrb[101].mxu1  ;;  %v4225_v7 = vmul.f32 %v7274_v54, %v4149_v58 }
 0x455   :  { %v4152_v15 = vmax.f32 %v5032_v45, %v4088_v36  ;;  %v5035_v11 = vadd.f32 %v3793_v55, %v7264_v38  ;;  %v3795_v59 = vpop.f32.mrb[102].mxu1  ;;  %v4226_v28 = vmul.f32 %v7277_v26, %v4150_v60 }
 0x456   :  { %v5034_v63 = vadd.f32 %v5033_v49, %v3984_v47  ;;  %v5037_v13 = vadd.f32 %v3795_v59, %v7261_v35  ;;  %v3797_v42 = vpop.f32.mrb[103].mxu1  ;;  %v4227_v27 = vmul.f32 %v7274_v54, %v4151_v37 }
 0x457   :  { %v5036_v30 = vadd.f32 %v5035_v11, %v3986_v62  ;;  %v5039_v3 = vadd.f32 %v3797_v42, %v7264_v38  ;;  %v4305_v18 = vadd.f32 %v4226_v28, %v4225_v7  ;;  %v4228_v50 = vmul.f32 %v7277_v26, %v4152_v15 }
 0x458   :  { %v4089_v21 = vmul.f32 0.2, %v5034_v63  ;;  %v5038_v57 = vadd.f32 %v5037_v13, %v3988_v32 }
 0x459   :  { %v4090_v1 = vmul.f32 0.2, %v5036_v30  ;;  %v5040_v8 = vadd.f32 %v5039_v3, %v3990_v6  ;;  %4306 = vadd.xlane.f32.xlu0 %v4305_v18  ;;  %v4308_v52 = vadd.f32 %v4228_v50, %v4227_v27 }
 0x45a   :  { %v4153_v51 = vmax.f32 %v5034_v63, %v4089_v21  ;;  %v4091_v34 = vmul.f32 0.2, %v5038_v57 }
 0x45b   :  { %v4154_v40 = vmax.f32 %v5036_v30, %v4090_v1  ;;  %v4092_v14 = vmul.f32 0.2, %v5040_v8  ;;  %4309 = vadd.xlane.f32.xlu1 %v4308_v52 }
 0x45c   :  { %v4155_v46 = vmax.f32 %v5038_v57, %v4091_v34  ;;  %v4229_v23 = vmul.f32 %v7274_v54, %v4153_v51 }
 0x45d   :  { %v4156_v56 = vmax.f32 %v5040_v8, %v4092_v14  ;;  %v4230_v17 = vmul.f32 %v7277_v26, %v4154_v40 }
 0x45e   :  { %v4231_v41 = vmul.f32 %v7274_v54, %v4155_v46 }
 0x45f   :  { %v4311_v31 = vadd.f32 %v4230_v17, %v4229_v23  ;;  %v4232_v24 = vmul.f32 %v7277_v26, %v4156_v56 }
 0x461   :  { %4312 = vadd.xlane.f32.xlu0 %v4311_v31  ;;  %v4314_v43 = vadd.f32 %v4232_v24, %v4231_v41 }
 0x463   :  { %4315 = vadd.xlane.f32.xlu1 %v4314_v43 }
 0x48b   :  { %v3994_v9 = vpop.f32.mrb[104].mxu1 }
 0x48c   :  { %v5041_v16 = vadd.f32 %v3994_v9, %v7261_v35  ;;  %v3996_v44 = vpop.f32.mrb[105].mxu1 }
 0x48d   :  { %v5042_v4 = vadd.f32 %v3996_v44, %v7264_v38  ;;  %v3998_v22 = vpop.f32.mrb[106].mxu1 }
 0x48e   :  { %v4093_v39 = vmul.f32 0.2, %v5041_v16  ;;  %v5043_v2 = vadd.f32 %v3998_v22, %v7261_v35  ;;  %v4000_v10 = vpop.f32.mrb[107].mxu1 }
 0x48f   :  { %v4094_v20 = vmul.f32 0.2, %v5042_v4  ;;  %v5044_v0 = vadd.f32 %v4000_v10, %v7264_v38 }
 0x490   :  { %v4157_v29 = vmax.f32 %v5041_v16, %v4093_v39  ;;  %v4095_v48 = vmul.f32 0.2, %v5043_v2  ;;  %v7378_v39 = vld [vmem:[#allocation2] ss:$0 sm:$0xff] }
 0x491   :  { %v4158_v12 = vmax.f32 %v5042_v4, %v4094_v20  ;;  %v4096_v61 = vmul.f32 0.2, %v5044_v0 }
 0x492   :  { %v4159_v53 = vmax.f32 %v5043_v2, %v4095_v48  ;;  %v4233_v47 = vmul.f32 %v7274_v54, %v4157_v29 }
 0x493   :  { %v4160_v5 = vmax.f32 %v5044_v0, %v4096_v61  ;;  %v4004_v45 = vpop.f32.mrb[108].mxu1  ;;  %v4234_v33 = vmul.f32 %v7277_v26, %v4158_v12 }
 0x494   :  { %v5045_v62 = vadd.f32 %v4004_v45, %v7261_v35  ;;  %v4006_v58 = vpop.f32.mrb[109].mxu1  ;;  %v4235_v19 = vmul.f32 %v7274_v54, %v4159_v53 }
 0x495   :  { %v5046_v32 = vadd.f32 %v4006_v58, %v7264_v38  ;;  %v4008_v60 = vpop.f32.mrb[110].mxu1  ;;  %v4317_v36 = vadd.f32 %v4234_v33, %v4233_v47  ;;  %v4236_v25 = vmul.f32 %v7277_v26, %v4160_v5 }
 0x496   :  { %v4097_v6 = vmul.f32 0.2, %v5045_v62  ;;  %v5047_v37 = vadd.f32 %v4008_v60, %v7261_v35  ;;  %v4010_v49 = vpop.f32.mrb[111].mxu1 }
 0x497   :  { %v4098_v55 = vmul.f32 0.2, %v5046_v32  ;;  %v5048_v7 = vadd.f32 %v4010_v49, %v7264_v38  ;;  %4318 = vadd.xlane.f32.xlu0 %v4317_v36  ;;  %v4320_v15 = vadd.f32 %v4236_v25, %v4235_v19 }
 0x498   :  { %v4161_v11 = vmax.f32 %v5045_v62, %v4097_v6  ;;  %v4099_v59 = vmul.f32 0.2, %v5047_v37 }
 0x499   :  { %v4162_v28 = vmax.f32 %v5046_v32, %v4098_v55  ;;  %v4100_v63 = vmul.f32 0.2, %v5048_v7  ;;  %4321 = vadd.xlane.f32.xlu1 %v4320_v15 }
 0x49a   :  { %v4163_v13 = vmax.f32 %v5047_v37, %v4099_v59  ;;  %v4237_v42 = vmul.f32 %v7274_v54, %v4161_v11 }
 0x49b   :  { %v4164_v27 = vmax.f32 %v5048_v7, %v4100_v63  ;;  %v4014_v30 = vpop.f32.mrb[112].mxu1  ;;  %v4238_v3 = vmul.f32 %v7277_v26, %v4162_v28 }
 0x49c   :  { %v5049_v18 = vadd.f32 %v4014_v30, %v7261_v35  ;;  %v4016_v50 = vpop.f32.mrb[113].mxu1  ;;  %v4239_v21 = vmul.f32 %v7274_v54, %v4163_v13 }
 0x49d   :  { %v5050_v57 = vadd.f32 %v4016_v50, %v7264_v38  ;;  %v4018_v1 = vpop.f32.mrb[114].mxu1  ;;  %v4323_v8 = vadd.f32 %v4238_v3, %v4237_v42  ;;  %v4240_v52 = vmul.f32 %v7277_v26, %v4164_v27 }
 0x49e   :  { %v4101_v51 = vmul.f32 0.2, %v5049_v18  ;;  %v5051_v34 = vadd.f32 %v4018_v1, %v7261_v35  ;;  %v4020_v40 = vpop.f32.mrb[115].mxu1 }
 0x49f   :  { %v4102_v14 = vmul.f32 0.2, %v5050_v57  ;;  %v5052_v46 = vadd.f32 %v4020_v40, %v7264_v38  ;;  %4324 = vadd.xlane.f32.xlu0 %v4323_v8  ;;  %v4326_v23 = vadd.f32 %v4240_v52, %v4239_v21 }
 0x4a0   :  { %v4165_v56 = vmax.f32 %v5049_v18, %v4101_v51  ;;  %v4103_v17 = vmul.f32 0.2, %v5051_v34 }
 0x4a1   :  { %v4166_v41 = vmax.f32 %v5050_v57, %v4102_v14  ;;  %v4104_v31 = vmul.f32 0.2, %v5052_v46  ;;  %4327 = vadd.xlane.f32.xlu1 %v4326_v23 }
 0x4a2   :  { %v4167_v24 = vmax.f32 %v5051_v34, %v4103_v17  ;;  %v4241_v43 = vmul.f32 %v7274_v54, %v4165_v56 }
 0x4a3   :  { %v4168_v9 = vmax.f32 %v5052_v46, %v4104_v31  ;;  %v4024_v16 = vpop.f32.mrb[116].mxu1  ;;  %v4242_v44 = vmul.f32 %v7277_v26, %v4166_v41 }
 0x4a4   :  { %v5053_v4 = vadd.f32 %v4024_v16, %v7261_v35  ;;  %v4026_v22 = vpop.f32.mrb[117].mxu1  ;;  %v4243_v2 = vmul.f32 %v7274_v54, %v4167_v24 }
 0x4a5   :  { %v5054_v10 = vadd.f32 %v4026_v22, %v7264_v38  ;;  %v4028_v20 = vpop.f32.mrb[118].mxu1  ;;  %v4329_v0 = vadd.f32 %v4242_v44, %v4241_v43  ;;  %v4244_v29 = vmul.f32 %v7277_v26, %v4168_v9 }
 0x4a6   :  { %v4105_v48 = vmul.f32 0.2, %v5053_v4  ;;  %v5055_v12 = vadd.f32 %v4028_v20, %v7261_v35  ;;  %v4259_v61 = vpop.xlane.xlu0 %4258  ;;  %v4030_v53 = vpop.f32.mrb[119].mxu1 }
 0x4a7   :  { %v4106_v47 = vmul.f32 0.2, %v5054_v10  ;;  %v4360_v5 = vadd.f32 %v7378_v39, %v4259_v61  ;;  %v5056_v45 = vadd.f32 %v4030_v53, %v7264_v38  ;;  %4330 = vadd.xlane.f32.xlu0 %v4329_v0  ;;  %v4332_v33 = vadd.f32 %v4244_v29, %v4243_v2 }
 0x4a8   :  { %v4169_v62 = vmax.f32 %v5053_v4, %v4105_v48  ;;  %v4107_v58 = vmul.f32 0.2, %v5055_v12 }
 0x4a9   :  { %v4170_v19 = vmax.f32 %v5054_v10, %v4106_v47  ;;  %v4897_v32 = vmul.f32 -1.442695, %v4360_v5  ;;  %v4108_v60 = vmul.f32 0.2, %v5056_v45  ;;  %4333 = vadd.xlane.f32.xlu1 %v4332_v33 }
 0x4aa   :  { %v4171_v36 = vmax.f32 %v5055_v12, %v4107_v58  ;;  %v4262_v25 = vpop.xlane.xlu0 %4261  ;;  %v4245_v6 = vmul.f32 %v7274_v54, %v4169_v62 }
 0x4ab   :  { %5954 = vpow2.f32 %v4897_v32  ;;  %v4172_v37 = vmax.f32 %v5056_v45, %v4108_v60  ;;  %v4361_v49 = vadd.f32 %v7378_v39, %v4262_v25  ;;  %v4034_v55 = vpop.f32.mrb[120].mxu1  ;;  %v4246_v7 = vmul.f32 %v7277_v26, %v4170_v19 }
 0x4ac   :  { %v5057_v15 = vadd.f32 %v4034_v55, %v7261_v35  ;;  %v4036_v11 = vpop.f32.mrb[121].mxu1  ;;  %v4247_v59 = vmul.f32 %v7274_v54, %v4171_v36 }
 0x4ad   :  { %v4898_v28 = vmul.f32 -1.442695, %v4361_v49  ;;  %v5058_v63 = vadd.f32 %v4036_v11, %v7264_v38  ;;  %v4038_v13 = vpop.f32.mrb[122].mxu1  ;;  %v4335_v42 = vadd.f32 %v4246_v7, %v4245_v6  ;;  %v4248_v27 = vmul.f32 %v7277_v26, %v4172_v37 }
 0x4ae   :  { %v4109_v30 = vmul.f32 0.2, %v5057_v15  ;;  %v5059_v3 = vadd.f32 %v4038_v13, %v7261_v35  ;;  %v4265_v18 = vpop.xlane.xlu1 %4264  ;;  %v4040_v50 = vpop.f32.mrb[123].mxu1 }
 0x4af   :  { %5956 = vpow2.f32 %v4898_v28  ;;  %v4110_v21 = vmul.f32 0.2, %v5058_v63  ;;  %v4362_v57 = vadd.f32 %v7378_v39, %v4265_v18  ;;  %v5060_v1 = vadd.f32 %v4040_v50, %v7264_v38  ;;  %4336 = vadd.xlane.f32.xlu0 %v4335_v42 }
 0x4b0   :  { %v4173_v8 = vmax.f32 %v5057_v15, %v4109_v30  ;;  %v4111_v52 = vmul.f32 0.2, %v5059_v3  ;;  %v4338_v51 = vadd.f32 %v4248_v27, %v4247_v59 }
 0x4b1   :  { %v4174_v34 = vmax.f32 %v5058_v63, %v4110_v21  ;;  %v4899_v40 = vmul.f32 -1.442695, %v4362_v57  ;;  %v4112_v14 = vmul.f32 0.2, %v5060_v1 }
 0x4b2   :  { %v4175_v46 = vmax.f32 %v5059_v3, %v4111_v52  ;;  %4339 = vadd.xlane.f32.xlu1 %v4338_v51  ;;  %v4268_v23 = vpop.xlane.xlu1 %4267  ;;  %v4249_v56 = vmul.f32 %v7274_v54, %v4173_v8 }
 0x4b3   :  { %5958 = vpow2.f32 %v4899_v40  ;;  %v4176_v17 = vmax.f32 %v5060_v1, %v4112_v14  ;;  %v4363_v41 = vadd.f32 %v7378_v39, %v4268_v23  ;;  %v4044_v31 = vpop.f32.mrb[124].mxu1  ;;  %v4250_v24 = vmul.f32 %v7277_v26, %v4174_v34 }
 0x4b4   :  { %v5061_v43 = vadd.f32 %v4044_v31, %v7261_v35  ;;  %v4046_v9 = vpop.f32.mrb[125].mxu1  ;;  %v4251_v16 = vmul.f32 %v7274_v54, %v4175_v46 }
 0x4b5   :  { %v5955_v44 = vpop.eup %5954  ;;  %v4900_v4 = vmul.f32 -1.442695, %v4363_v41  ;;  %v5062_v22 = vadd.f32 %v4046_v9, %v7264_v38  ;;  %v4048_v2 = vpop.f32.mrb[126].mxu1  ;;  %v4341_v10 = vadd.f32 %v4250_v24, %v4249_v56  ;;  %v4252_v20 = vmul.f32 %v7277_v26, %v4176_v17 }
 0x4b6   :  { %v4488_v0 = vadd.f32 1.0, %v5955_v44  ;;  %v4113_v29 = vmul.f32 0.2, %v5061_v43  ;;  %v5063_v48 = vadd.f32 %v4048_v2, %v7261_v35  ;;  %v4271_v12 = vpop.xlane.xlu0 %4270  ;;  %v4050_v61 = vpop.f32.mrb[127].mxu1 }
 0x4b7   :  { %5960 = vpow2.f32 %v4900_v4  ;;  %v4114_v53 = vmul.f32 0.2, %v5062_v22  ;;  %v4364_v47 = vadd.f32 %v7378_v39, %v4271_v12  ;;  %v5064_v5 = vadd.f32 %v4050_v61, %v7264_v38  ;;  %4342 = vadd.xlane.f32.xlu0 %v4341_v10 }
 0x4b8   :  { %5962 = vrcp.f32 %v4488_v0  ;;  %v4177_v45 = vmax.f32 %v5061_v43, %v4113_v29  ;;  %v4115_v33 = vmul.f32 0.2, %v5063_v48  ;;  %v4274_v62 = vpop.xlane.xlu1 %4273  ;;  %v4344_v58 = vadd.f32 %v4252_v20, %v4251_v16 }
 0x4b9   :  { %v5957_v19 = vpop.eup %5956  ;;  %v4178_v32 = vmax.f32 %v5062_v22, %v4114_v53  ;;  %v4901_v60 = vmul.f32 -1.442695, %v4364_v47  ;;  %v4116_v36 = vmul.f32 0.2, %v5064_v5  ;;  %v4365_v35 = vadd.f32 %v7378_v39, %v4274_v62 }
 0x4ba   :  { %v4489_v25 = vadd.f32 1.0, %v5957_v19  ;;  %v4179_v6 = vmax.f32 %v5063_v48, %v4115_v33  ;;  %4345 = vadd.xlane.f32.xlu1 %v4344_v58  ;;  %v4253_v37 = vmul.f32 %v7274_v54, %v4177_v45 }
 0x4bb   :  { %5964 = vpow2.f32 %v4901_v60  ;;  %v4180_v49 = vmax.f32 %v5064_v5, %v4116_v36  ;;  %v4902_v38 = vmul.f32 -1.442695, %v4365_v35  ;;  %v4254_v55 = vmul.f32 %v7277_v26, %v4178_v32 }
 0x4bc   :  { %5966 = vrcp.f32 %v4489_v25  ;;  %v4255_v7 = vmul.f32 %v7274_v54, %v4179_v6 }
 0x4bd   :  { %v5959_v15 = vpop.eup %5958  ;;  %5968 = vpow2.f32 %v4902_v38  ;;  %v4347_v11 = vadd.f32 %v4254_v55, %v4253_v37  ;;  %v4256_v59 = vmul.f32 %v7277_v26, %v4180_v49 }
 0x4be   :  { %v4490_v28 = vadd.f32 1.0, %v5959_v15  ;;  %v4277_v63 = vpop.xlane.xlu0 %4276 }
 0x4bf   :  { %v4366_v13 = vadd.f32 %v7378_v39, %v4277_v63  ;;  %4348 = vadd.xlane.f32.xlu0 %v4347_v11  ;;  %v4350_v42 = vadd.f32 %v4256_v59, %v4255_v7 }
 0x4c0   :  { %5970 = vrcp.f32 %v4490_v28  ;;  %v4280_v27 = vpop.xlane.xlu1 %4279 }
 0x4c1   :  { %v5961_v30 = vpop.eup %5960  ;;  %v4903_v3 = vmul.f32 -1.442695, %v4366_v13  ;;  %v4367_v18 = vadd.f32 %v7378_v39, %v4280_v27  ;;  %4351 = vadd.xlane.f32.xlu1 %v4350_v42 }
 0x4c2   :  { %v5963_v54 = vpop.eup %5962  ;;  %v4491_v50 = vadd.f32 1.0, %v5961_v30 }
 0x4c3   :  { %4585 = vst.msk [vmem:[%s7574_s9] sm:$0xff] %vm4584_vm0, %v5963_v54  ;;  %5972 = vpow2.f32 %v4903_v3  ;;  %v4904_v26 = vmul.f32 -1.442695, %v4367_v18 }
 0x4c4   :  { %5974 = vrcp.f32 %v4491_v50 }
 0x4c5   :  { %v5965_v21 = vpop.eup %5964  ;;  %5976 = vpow2.f32 %v4904_v26 }
 0x4c6   :  { %v5967_v57 = vpop.eup %5966  ;;  %v4492_v1 = vadd.f32 1.0, %v5965_v21  ;;  %v4283_v8 = vpop.xlane.xlu0 %4282 }
 0x4c7   :  { %v5969_v52 = vpop.eup %5968  ;;  %4586 = vst.msk [vmem:[%s7574_s9 + $0x8] sm:$0xff] %vm4584_vm0, %v5967_v57  ;;  %v4368_v51 = vadd.f32 %v7378_v39, %v4283_v8 }
 0x4c8   :  { %5978 = vrcp.f32 %v4492_v1  ;;  %v4493_v34 = vadd.f32 1.0, %v5969_v52  ;;  %v4286_v40 = vpop.xlane.xlu1 %4285 }
 0x4c9   :  { %v4905_v14 = vmul.f32 -1.442695, %v4368_v51  ;;  %v4369_v46 = vadd.f32 %v7378_v39, %v4286_v40 }
 0x4ca   :  { %v5971_v23 = vpop.eup %5970  ;;  %5980 = vrcp.f32 %v4493_v34 }
 0x4cb   :  { %4587 = vst.msk [vmem:[%s7574_s9 + $0x10] sm:$0xff] %vm4584_vm0, %v5971_v23  ;;  %5982 = vpow2.f32 %v4905_v14  ;;  %v4906_v56 = vmul.f32 -1.442695, %v4369_v46 }
 0x4cd   :  { %v5973_v17 = vpop.eup %5972  ;;  %5984 = vpow2.f32 %v4906_v56 }
 0x4ce   :  { %v5975_v41 = vpop.eup %5974  ;;  %v4494_v31 = vadd.f32 1.0, %v5973_v17  ;;  %v4289_v24 = vpop.xlane.xlu0 %4288 }
 0x4cf   :  { %v5977_v43 = vpop.eup %5976  ;;  %4588 = vst.msk [vmem:[%s7574_s9 + $0x18] sm:$0xff] %vm4584_vm0, %v5975_v41  ;;  %v4370_v9 = vadd.f32 %v7378_v39, %v4289_v24 }
 0x4d0   :  { %5986 = vrcp.f32 %v4494_v31  ;;  %v4495_v16 = vadd.f32 1.0, %v5977_v43  ;;  %v4292_v44 = vpop.xlane.xlu1 %4291 }
 0x4d1   :  { %v4907_v4 = vmul.f32 -1.442695, %v4370_v9  ;;  %v4371_v22 = vadd.f32 %v7378_v39, %v4292_v44 }
 0x4d2   :  { %v5979_v2 = vpop.eup %5978  ;;  %5988 = vrcp.f32 %v4495_v16 }
 0x4d3   :  { %4589 = vst.msk [vmem:[%s7574_s9 + $0x20] sm:$0xff] %vm4584_vm0, %v5979_v2  ;;  %5990 = vpow2.f32 %v4907_v4  ;;  %v4908_v10 = vmul.f32 -1.442695, %v4371_v22 }
 0x4d4   :  { %v5981_v20 = vpop.eup %5980 }
 0x4d5   :  { %v5983_v0 = vpop.eup %5982  ;;  %4590 = vst.msk [vmem:[%s7574_s9 + $0x28] sm:$0xff] %vm4584_vm0, %v5981_v20  ;;  %5992 = vpow2.f32 %v4908_v10 }
 0x4d6   :  { %v4496_v29 = vadd.f32 1.0, %v5983_v0  ;;  %v4295_v48 = vpop.xlane.xlu0 %4294 }
 0x4d7   :  { %v5985_v12 = vpop.eup %5984  ;;  %v4372_v61 = vadd.f32 %v7378_v39, %v4295_v48 }
 0x4d8   :  { %5994 = vrcp.f32 %v4496_v29  ;;  %v4497_v53 = vadd.f32 1.0, %v5985_v12  ;;  %v4298_v47 = vpop.xlane.xlu1 %4297 }
 0x4d9   :  { %v4909_v5 = vmul.f32 -1.442695, %v4372_v61  ;;  %v4373_v45 = vadd.f32 %v7378_v39, %v4298_v47 }
 0x4da   :  { %v5987_v33 = vpop.eup %5986  ;;  %5996 = vrcp.f32 %v4497_v53 }
 0x4db   :  { %4591 = vst.msk [vmem:[%s7574_s9 + $0x30] sm:$0xff] %vm4584_vm0, %v5987_v33  ;;  %5998 = vpow2.f32 %v4909_v5  ;;  %v4910_v62 = vmul.f32 -1.442695, %v4373_v45 }
 0x4dc   :  { %v5989_v58 = vpop.eup %5988 }
 0x4dd   :  { %v5991_v19 = vpop.eup %5990  ;;  %4592 = vst.msk [vmem:[%s7574_s9 + $0x38] sm:$0xff] %vm4584_vm0, %v5989_v58  ;;  %6000 = vpow2.f32 %v4910_v62 }
 0x4de   :  { %v4498_v32 = vadd.f32 1.0, %v5991_v19  ;;  %v4301_v60 = vpop.xlane.xlu0 %4300 }
 0x4df   :  { %v5993_v36 = vpop.eup %5992  ;;  %v4374_v35 = vadd.f32 %v7378_v39, %v4301_v60 }
 0x4e0   :  { %6002 = vrcp.f32 %v4498_v32  ;;  %v4499_v25 = vadd.f32 1.0, %v5993_v36  ;;  %v4304_v6 = vpop.xlane.xlu1 %4303 }
 0x4e1   :  { %v4911_v37 = vmul.f32 -1.442695, %v4374_v35  ;;  %v4375_v49 = vadd.f32 %v7378_v39, %v4304_v6 }
 0x4e2   :  { %v5995_v38 = vpop.eup %5994  ;;  %6004 = vrcp.f32 %v4499_v25 }
 0x4e3   :  { %4593 = vst.msk [vmem:[%s7574_s9 + $0x40] sm:$0xff] %vm4584_vm0, %v5995_v38  ;;  %6006 = vpow2.f32 %v4911_v37  ;;  %v4912_v55 = vmul.f32 -1.442695, %v4375_v49 }
 0x4e4   :  { %v5997_v7 = vpop.eup %5996 }
 0x4e5   :  { %v5999_v15 = vpop.eup %5998  ;;  %4594 = vst.msk [vmem:[%s7574_s9 + $0x48] sm:$0xff] %vm4584_vm0, %v5997_v7  ;;  %6008 = vpow2.f32 %v4912_v55 }
 0x4e6   :  { %v4500_v11 = vadd.f32 1.0, %v5999_v15  ;;  %v4307_v59 = vpop.xlane.xlu0 %4306 }
 0x4e7   :  { %v6001_v28 = vpop.eup %6000  ;;  %v4376_v63 = vadd.f32 %v7378_v39, %v4307_v59 }
 0x4e8   :  { %6010 = vrcp.f32 %v4500_v11  ;;  %v4501_v13 = vadd.f32 1.0, %v6001_v28  ;;  %v4310_v42 = vpop.xlane.xlu1 %4309 }
 0x4e9   :  { %v4913_v27 = vmul.f32 -1.442695, %v4376_v63  ;;  %v4377_v30 = vadd.f32 %v7378_v39, %v4310_v42 }
 0x4ea   :  { %v6003_v3 = vpop.eup %6002  ;;  %6012 = vrcp.f32 %v4501_v13 }
 0x4eb   :  { %4595 = vst.msk [vmem:[%s7574_s9 + $0x50] sm:$0xff] %vm4584_vm0, %v6003_v3  ;;  %6014 = vpow2.f32 %v4913_v27  ;;  %v4914_v18 = vmul.f32 -1.442695, %v4377_v30 }
 0x4ec   :  { %v6005_v54 = vpop.eup %6004 }
 0x4ed   :  { %v6007_v50 = vpop.eup %6006  ;;  %4596 = vst.msk [vmem:[%s7574_s9 + $0x58] sm:$0xff] %vm4584_vm0, %v6005_v54  ;;  %6016 = vpow2.f32 %v4914_v18 }
 0x4ee   :  { %v4502_v26 = vadd.f32 1.0, %v6007_v50  ;;  %v4313_v21 = vpop.xlane.xlu0 %4312 }
 0x4ef   :  { %v6009_v57 = vpop.eup %6008  ;;  %v4378_v1 = vadd.f32 %v7378_v39, %v4313_v21 }
 0x4f0   :  { %6018 = vrcp.f32 %v4502_v26  ;;  %v4503_v8 = vadd.f32 1.0, %v6009_v57  ;;  %v4316_v52 = vpop.xlane.xlu1 %4315 }
 0x4f1   :  { %v4915_v51 = vmul.f32 -1.442695, %v4378_v1  ;;  %v4379_v34 = vadd.f32 %v7378_v39, %v4316_v52 }
 0x4f2   :  { %v6011_v40 = vpop.eup %6010  ;;  %6020 = vrcp.f32 %v4503_v8 }
 0x4f3   :  { %4597 = vst.msk [vmem:[%s7574_s9 + $0x60] sm:$0xff] %vm4584_vm0, %v6011_v40  ;;  %6022 = vpow2.f32 %v4915_v51  ;;  %v4916_v14 = vmul.f32 -1.442695, %v4379_v34 }
 0x4f4   :  { %v6013_v46 = vpop.eup %6012 }
 0x4f5   :  { %v6015_v23 = vpop.eup %6014  ;;  %4598 = vst.msk [vmem:[%s7574_s9 + $0x68] sm:$0xff] %vm4584_vm0, %v6013_v46  ;;  %6024 = vpow2.f32 %v4916_v14 }
 0x4f6   :  { %v4504_v56 = vadd.f32 1.0, %v6015_v23 }
 0x4f7   :  { %v6017_v17 = vpop.eup %6016 }
 0x4f8   :  { %6026 = vrcp.f32 %v4504_v56  ;;  %v4505_v41 = vadd.f32 1.0, %v6017_v17 }
 0x4fa   :  { %v6019_v31 = vpop.eup %6018  ;;  %6028 = vrcp.f32 %v4505_v41 }
 0x4fb   :  { %4599 = vst.msk [vmem:[%s7574_s9 + $0x70] sm:$0xff] %vm4584_vm0, %v6019_v31 }
 0x4fc   :  { %v6021_v24 = vpop.eup %6020 }
 0x4fd   :  { %v6023_v43 = vpop.eup %6022  ;;  %4600 = vst.msk [vmem:[%s7574_s9 + $0x78] sm:$0xff] %vm4584_vm0, %v6021_v24 }
 0x4fe   :  { %v4506_v9 = vadd.f32 1.0, %v6023_v43 }
 0x4ff   :  { %v6025_v16 = vpop.eup %6024 }
 0x500   :  { %6030 = vrcp.f32 %v4506_v9  ;;  %v4507_v44 = vadd.f32 1.0, %v6025_v16 }
 0x502   :  { %v6027_v4 = vpop.eup %6026  ;;  %6032 = vrcp.f32 %v4507_v44 }
 0x503   :  { %4601 = vst.msk [vmem:[%s7574_s9 + $0x80] sm:$0xff] %vm4584_vm0, %v6027_v4 }
 0x504   :  { %v6029_v22 = vpop.eup %6028 }
 0x505   :  { %4602 = vst.msk [vmem:[%s7574_s9 + $0x88] sm:$0xff] %vm4584_vm0, %v6029_v22 }
 0x50a   :  { %v6031_v2 = vpop.eup %6030 }
 0x50b   :  { %4603 = vst.msk [vmem:[%s7574_s9 + $0x90] sm:$0xff] %vm4584_vm0, %v6031_v2 }
 0x50c   :  { %v6033_v10 = vpop.eup %6032 }
 0x50d   :  { %4604 = vst.msk [vmem:[%s7574_s9 + $0x98] sm:$0xff] %vm4584_vm0, %v6033_v10 }
 0x524   :  { %v4319_v20 = vpop.xlane.xlu0 %4318 }
 0x525   :  { %v4380_v0 = vadd.f32 %v7378_v39, %v4319_v20 }
 0x526   :  { %v4322_v29 = vpop.xlane.xlu1 %4321 }
 0x527   :  { %v4917_v48 = vmul.f32 -1.442695, %v4380_v0  ;;  %v4381_v12 = vadd.f32 %v7378_v39, %v4322_v29 }
 0x529   :  { %6034 = vpow2.f32 %v4917_v48  ;;  %v4918_v61 = vmul.f32 -1.442695, %v4381_v12 }
 0x52b   :  { %6036 = vpow2.f32 %v4918_v61 }
 0x52c   :  { %v4325_v53 = vpop.xlane.xlu0 %4324 }
 0x52d   :  { %v4382_v47 = vadd.f32 %v7378_v39, %v4325_v53 }
 0x52e   :  { %v4328_v5 = vpop.xlane.xlu1 %4327 }
 0x52f   :  { %v4919_v45 = vmul.f32 -1.442695, %v4382_v47  ;;  %v4383_v33 = vadd.f32 %v7378_v39, %v4328_v5 }
 0x531   :  { %6038 = vpow2.f32 %v4919_v45  ;;  %v4920_v62 = vmul.f32 -1.442695, %v4383_v33 }
 0x533   :  { %v6035_v58 = vpop.eup %6034  ;;  %6040 = vpow2.f32 %v4920_v62 }
 0x534   :  { %v4508_v19 = vadd.f32 1.0, %v6035_v58  ;;  %v4331_v32 = vpop.xlane.xlu0 %4330 }
 0x535   :  { %v6037_v60 = vpop.eup %6036  ;;  %v4384_v36 = vadd.f32 %v7378_v39, %v4331_v32 }
 0x536   :  { %6042 = vrcp.f32 %v4508_v19  ;;  %v4509_v35 = vadd.f32 1.0, %v6037_v60  ;;  %v4334_v25 = vpop.xlane.xlu1 %4333 }
 0x537   :  { %v4921_v6 = vmul.f32 -1.442695, %v4384_v36  ;;  %v4385_v37 = vadd.f32 %v7378_v39, %v4334_v25 }
 0x538   :  { %6044 = vrcp.f32 %v4509_v35 }
 0x539   :  { %6046 = vpow2.f32 %v4921_v6  ;;  %v4922_v49 = vmul.f32 -1.442695, %v4385_v37 }
 0x53b   :  { %v6039_v38 = vpop.eup %6038  ;;  %6048 = vpow2.f32 %v4922_v49 }
 0x53c   :  { %v4510_v55 = vadd.f32 1.0, %v6039_v38  ;;  %v4337_v7 = vpop.xlane.xlu0 %4336 }
 0x53d   :  { %v6041_v15 = vpop.eup %6040  ;;  %v4386_v11 = vadd.f32 %v7378_v39, %v4337_v7 }
 0x53e   :  { %6050 = vrcp.f32 %v4510_v55  ;;  %v4511_v59 = vadd.f32 1.0, %v6041_v15 }
 0x53f   :  { %v4923_v28 = vmul.f32 -1.442695, %v4386_v11  ;;  %v4340_v63 = vpop.xlane.xlu1 %4339 }
 0x540   :  { %v6043_v13 = vpop.eup %6042  ;;  %6052 = vrcp.f32 %v4511_v59  ;;  %v4387_v42 = vadd.f32 %v7378_v39, %v4340_v63 }
 0x541   :  { %4605 = vst.msk [vmem:[%s7574_s9 + $0xa0] sm:$0xff] %vm4584_vm0, %v6043_v13  ;;  %6054 = vpow2.f32 %v4923_v28 }
 0x542   :  { %v6045_v27 = vpop.eup %6044  ;;  %v4924_v30 = vmul.f32 -1.442695, %v4387_v42 }
 0x543   :  { %v6047_v3 = vpop.eup %6046  ;;  %4606 = vst.msk [vmem:[%s7574_s9 + $0xa8] sm:$0xff] %vm4584_vm0, %v6045_v27 }
 0x544   :  { %v4512_v18 = vadd.f32 1.0, %v6047_v3  ;;  %6056 = vpow2.f32 %v4924_v30  ;;  %v4343_v54 = vpop.xlane.xlu0 %4342 }
 0x545   :  { %v6049_v50 = vpop.eup %6048  ;;  %v4388_v26 = vadd.f32 %v7378_v39, %v4343_v54 }
 0x546   :  { %6058 = vrcp.f32 %v4512_v18  ;;  %v4513_v21 = vadd.f32 1.0, %v6049_v50 }
 0x547   :  { %v4925_v57 = vmul.f32 -1.442695, %v4388_v26  ;;  %v4346_v1 = vpop.xlane.xlu1 %4345 }
 0x548   :  { %v6051_v8 = vpop.eup %6050  ;;  %6060 = vrcp.f32 %v4513_v21  ;;  %v4389_v52 = vadd.f32 %v7378_v39, %v4346_v1 }
 0x549   :  { %4607 = vst.msk [vmem:[%s7574_s9 + $0xb0] sm:$0xff] %vm4584_vm0, %v6051_v8  ;;  %6062 = vpow2.f32 %v4925_v57 }
 0x54a   :  { %v6053_v51 = vpop.eup %6052  ;;  %v4926_v34 = vmul.f32 -1.442695, %v4389_v52 }
 0x54b   :  { %v6055_v40 = vpop.eup %6054  ;;  %4608 = vst.msk [vmem:[%s7574_s9 + $0xb8] sm:$0xff] %vm4584_vm0, %v6053_v51 }
 0x54c   :  { %v4514_v14 = vadd.f32 1.0, %v6055_v40  ;;  %6064 = vpow2.f32 %v4926_v34  ;;  %v4349_v46 = vpop.xlane.xlu0 %4348 }
 0x54d   :  { %v4390_v23 = vadd.f32 %v7378_v39, %v4349_v46 }
 0x54e   :  { %v6057_v56 = vpop.eup %6056  ;;  %6066 = vrcp.f32 %v4514_v14  ;;  %v4352_v17 = vpop.xlane.xlu1 %4351 }
 0x54f   :  { %v4515_v41 = vadd.f32 1.0, %v6057_v56  ;;  %v4927_v31 = vmul.f32 -1.442695, %v4390_v23  ;;  %v4391_v24 = vadd.f32 %v7378_v39, %v4352_v17 }
 0x550   :  { %v6059_v43 = vpop.eup %6058 }
 0x551   :  { %4609 = vst.msk [vmem:[%s7574_s9 + $0xc0] sm:$0xff] %vm4584_vm0, %v6059_v43  ;;  %6068 = vrcp.f32 %v4515_v41  ;;  %v4928_v9 = vmul.f32 -1.442695, %v4391_v24 }
 0x552   :  { %v6061_v16 = vpop.eup %6060  ;;  %6070 = vpow2.f32 %v4927_v31 }
 0x553   :  { %v6063_v44 = vpop.eup %6062  ;;  %4610 = vst.msk [vmem:[%s7574_s9 + $0xc8] sm:$0xff] %vm4584_vm0, %v6061_v16  ;;  %6072 = vpow2.f32 %v4928_v9 }
 0x554   :  { %v4516_v4 = vadd.f32 1.0, %v6063_v44 }
 0x556   :  { %v6065_v22 = vpop.eup %6064  ;;  %6074 = vrcp.f32 %v4516_v4 }
 0x557   :  { %v4517_v39 = vadd.f32 1.0, %v6065_v22 }
 0x558   :  { %v6067_v2 = vpop.eup %6066 }
 0x559   :  { %4611 = vst.msk [vmem:[%s7574_s9 + $0xd0] sm:$0xff] %vm4584_vm0, %v6067_v2  ;;  %6076 = vrcp.f32 %v4517_v39 }
 0x55b   :  { %v6069_v10 = vpop.eup %6068 }
 0x55c   :  { %v6071_v20 = vpop.eup %6070  ;;  %4612 = vst.msk [vmem:[%s7574_s9 + $0xd8] sm:$0xff] %vm4584_vm0, %v6069_v10 }
 0x55d   :  { %v6073_v0 = vpop.eup %6072  ;;  %v4518_v29 = vadd.f32 1.0, %v6071_v20 }
 0x55e   :  { %v4519_v48 = vadd.f32 1.0, %v6073_v0 }
 0x55f   :  { %6078 = vrcp.f32 %v4518_v29 }
 0x560   :  { %v6075_v12 = vpop.eup %6074  ;;  %6080 = vrcp.f32 %v4519_v48 }
 0x561   :  { %4613 = vst.msk [vmem:[%s7574_s9 + $0xe0] sm:$0xff] %vm4584_vm0, %v6075_v12 }
 0x563   :  { %v6077_v61 = vpop.eup %6076 }
 0x564   :  { %4614 = vst.msk [vmem:[%s7574_s9 + $0xe8] sm:$0xff] %vm4584_vm0, %v6077_v61 }
 0x569   :  { %v6079_v53 = vpop.eup %6078 }
 0x56a   :  { %v6081_v47 = vpop.eup %6080  ;;  %4615 = vst.msk [vmem:[%s7574_s9 + $0xf0] sm:$0xff] %vm4584_vm0, %v6079_v53 }
 0x56b   :  { %4616 = vst.msk [vmem:[%s7574_s9 + $0xf8] sm:$0xff] %vm4584_vm0, %v6081_v47 }
 0x56c   :  { %4621 = vsyncpa [#allocation4], 1 }
 0x56d   :  { %4622 = vsyncpa [#allocation6], 1 }
 0x56e   :  { %4623 = vsyncpa [#allocation9], 1 }

// kernel: tpu_custom_call.1
= control target key start
LH: loop header
LB: loop body
LE: loop exit
PB: predicated region body
PF: predicated region fallthrough
CT: control target
= control target key end

     0   :  { %s7565_s0 = inlined_call_operand.hbm [shape: f32[256,128], index: 0, kind: input, shape index: {}]   ;;  %s7566_s1 = inlined_call_operand.hbm [shape: bf16[128,256], index: 1, kind: input, shape index: {}]   ;;  %s7567_s2 = inlined_call_operand.vmem [shape: f32[1,256], index: 2, kind: input, shape index: {}]   ;;  %s7568_s3 = inlined_call_operand.hbm [shape: bf16[256,1024], index: 3, kind: input, shape index: {}]   ;;  %s7569_s4 = inlined_call_operand.vmem [shape: f32[1,1024], index: 4, kind: input, shape index: {}]   ;;  %s7570_s5 = inlined_call_operand.hbm [shape: bf16[1024,256], index: 5, kind: input, shape index: {}]   ;;  %s7571_s6 = inlined_call_operand.vmem [shape: f32[1,256], index: 6, kind: input, shape index: {}]   ;;  %s7572_s7 = inlined_call_operand.vmem [shape: f32[1,256], index: 7, kind: input, shape index: {}]   ;;  %s7573_s8 = inlined_call_operand.<no memory space> [shape: f32[1,1], index: 8, kind: input, shape index: {}]   ;;  %s7574_s9 = inlined_call_operand.vmem [shape: f32[256,1], index: 9, kind: output, shape index: {}]  }
   0x1   :  { %v14_v0 = vstv %s7573_s8 }
   0x2   :  { %15 = vst [vmem:[#allocation2] sm:$0x1] %v14_v0 }
   0x3   :  { %16 = vsyncpa [#allocation4], 0 }
   0x4   :  { %17 = vsyncpa [#allocation6], 0 }
   0x5   :  { %18 = vsyncpa [#allocation9], 0  ;;  %s6209_s11 = smov [#allocation5]   ;;  %s6210_s13 = smov [#allocation3]  }
   0x6   :  { %s36_s12 = sshll.u32 %s6209_s11, 4  ;;  %s24_s14 = sshll.u32 %s6210_s13, 4  ;;  %s37_s12 = int_to_ptr.vmem [resolvable:$true] %s36_s12  ;;  %s6271_s14 = int_to_ptr.vmem [resolvable:$true] %s24_s14 }
   0x7   :  { %s6115_s17 = scalar_lea.hbm %s7566_s1, 2048 }
   0x8   :  { %p6116_p0 = scmp.ne.s32.totalorder %s7566_s1, %s6115_s17  ;;  %p6119_p1 = scmp.lt.u32.totalorder %s6115_s17, %s7566_s1 }
   0xa   :  { %p6121_p2 = pnand %p6119_p1, %p6116_p0 }
   0xc   :  { %6124 = shalt.err (!%p6121_p2)
}
   0xd   :  { %s6125_s21 = scalar_lea.vmem %s37_s12, 2048  ;;  %p6130_p4 = scmp.lt.s32.totalorder %s37_s12, %s37_s12 }
   0xe   :  { %p6126_p3 = scmp.ne.s32.totalorder %s37_s12, %s6125_s21  ;;  %p6131_p5 = scmp.lt.s32.totalorder %s6125_s21, %s6125_s21 }
  0x10   :  { %p6132_p6 = por %p6131_p5, %p6130_p4 }
  0x12   :  { %p6133_p7 = pnand %p6132_p6, %p6126_p3 }
  0x14   :  { %6136 = shalt.err (!%p6133_p7)
}
  0x15   :  { %s6211_s22 = smov 128   ;;  %s6212_s23 = smov 8  }
  0x16   :  { %42 = dma.hbm_to_vmem [thread:$0]  %s7566_s1, 2048, %s37_s12, [#allocation6], %s6211_s22, %s6211_s22, %s6212_s23  }
  0x17   :  { %s6137_s28 = scalar_lea.hbm %s7565_s0, 4096 }
  0x18   :  { %p6138_p8 = scmp.ne.s32.totalorder %s7565_s0, %s6137_s28  ;;  %p6141_p9 = scmp.lt.u32.totalorder %s6137_s28, %s7565_s0 }
  0x1a   :  { %p6143_p10 = pnand %p6141_p9, %p6138_p8 }
  0x1c   :  { %6146 = shalt.err (!%p6143_p10)
}
  0x1d   :  { %s6147_s13 = scalar_lea.vmem %s6271_s14, 4096  ;;  %p6152_p12 = scmp.lt.s32.totalorder %s6271_s14, %s6271_s14 }
  0x1e   :  { %p6148_p11 = scmp.ne.s32.totalorder %s6271_s14, %s6147_s13  ;;  %p6153_p13 = scmp.lt.s32.totalorder %s6147_s13, %s6147_s13 }
  0x20   :  { %p6154_p0 = por %p6153_p13, %p6152_p12 }
  0x22   :  { %p6155_p1 = pnand %p6154_p0, %p6148_p11 }
  0x24   :  { %6158 = shalt.err (!%p6155_p1)
}
  0x25   :  { %30 = dma.hbm_to_vmem [thread:$0]  %s7565_s0, 4096, %s6271_s14, [#allocation4], %s6211_s22, %s6211_s22, %s6212_s23  }
  0x26   :  { %s6213_s15 = smov [#allocation7]   ;;  %s6159_s19 = scalar_lea.hbm %s7568_s3, 16384 }
  0x27   :  { %s50_s16 = sshll.u32 %s6213_s15, 4  ;;  %p6160_p2 = scmp.ne.s32.totalorder %s7568_s3, %s6159_s19  ;;  %s51_s16 = int_to_ptr.vmem [resolvable:$true] %s50_s16 }
  0x28   :  { %p6163_p3 = scmp.lt.u32.totalorder %s6159_s19, %s7568_s3 }
  0x2a   :  { %p6165_p4 = pnand %p6163_p3, %p6160_p2 }
  0x2c   :  { %6168 = shalt.err (!%p6165_p4)
}
  0x2d   :  { %s6169_s25 = scalar_lea.vmem %s51_s16, 16384  ;;  %p6174_p6 = scmp.lt.s32.totalorder %s51_s16, %s51_s16 }
  0x2e   :  { %p6170_p5 = scmp.ne.s32.totalorder %s51_s16, %s6169_s25  ;;  %p6175_p7 = scmp.lt.s32.totalorder %s6169_s25, %s6169_s25 }
  0x30   :  { %p6176_p8 = por %p6175_p7, %p6174_p6 }
  0x32   :  { %p6177_p9 = pnand %p6176_p8, %p6170_p5 }
  0x34   :  { %6180 = shalt.err (!%p6177_p9)
}
  0x35   :  { %s6214_s0 = smov 512   ;;  %s6215_s14 = smov 32  }
  0x36   :  { %56 = dma.hbm_to_vmem [thread:$0]  %s7568_s3, 16384, %s51_s16, [#allocation6], %s6214_s0, %s6214_s0, %s6215_s14  }
  0x37   :  { %s6216_s28 = smov [#allocation8]   ;;  %s6181_s11 = scalar_lea.hbm %s7570_s5, 16384 }
  0x38   :  { %s64_s29 = sshll.u32 %s6216_s28, 4  ;;  %p6182_p10 = scmp.ne.s32.totalorder %s7570_s5, %s6181_s11  ;;  %s65_s29 = int_to_ptr.vmem [resolvable:$true] %s64_s29 }
  0x39   :  { %p6185_p11 = scmp.lt.u32.totalorder %s6181_s11, %s7570_s5 }
  0x3b   :  { %p6187_p12 = pnand %p6185_p11, %p6182_p10 }
  0x3d   :  { %6190 = shalt.err (!%p6187_p12)
}
  0x3e   :  { %s6191_s17 = scalar_lea.vmem %s65_s29, 16384  ;;  %p6196_p0 = scmp.lt.s32.totalorder %s65_s29, %s65_s29 }
  0x3f   :  { %p6192_p13 = scmp.ne.s32.totalorder %s65_s29, %s6191_s17  ;;  %p6197_p1 = scmp.lt.s32.totalorder %s6191_s17, %s6191_s17 }
  0x41   :  { %p6198_p2 = por %p6197_p1, %p6196_p0 }
  0x43   :  { %p6199_p3 = pnand %p6198_p2, %p6192_p13 }
  0x45   :  { %6202 = shalt.err (!%p6199_p3)
}
  0x46   :  { %70 = dma.hbm_to_vmem [thread:$0]  %s7570_s5, 16384, %s65_s29, [#allocation9], %s6211_s22, %s6211_s22, %s6212_s23  }
  0x47   :  { %6203 = dma.done.wait [#allocation4], 4096  }
  0x48   :  { %6204 = vsyncadd [#allocation4], 4294963200 }
  0x49   :  { %6205 = dma.done.wait [#allocation6], 18432  }
  0x4a   :  { %6206 = vsyncadd [#allocation6], 4294948864 }
  0x4b   :  { %6207 = dma.done.wait [#allocation9], 16384  }
  0x4c   :  { %6208 = vsyncadd [#allocation9], 4294950912  ;;  %v6217_v1 = vmov 0   ;;  %v5226_v2 = vld [vmem:[#allocation5 + $0x4] ss:$8 sps:$4 sm:$0xff]   ;;  %v537_v25 = vld [vmem:[#allocation7 + $0x10] sm:$0xff] }
  0x4d   :  { %278 = vmatprep.mubr.bf16.mxu0 %v6217_v1  ;;  %v5228_v3 = vld [vmem:[#allocation5] ss:$8 sps:$4 sm:$0xff]   ;;  %246 = vmatprep.subr.bf16.mxu0 %v5226_v2  ;;  %v5229_v4 = vld [vmem:[#allocation5 + $0x14] ss:$8 sps:$4 sm:$0xff]   ;;  %v5231_v5 = vld [vmem:[#allocation5 + $0x10] ss:$8 sps:$4 sm:$0xff]  }
  0x4e   :  { %247 = vmatpush1.bf16.msra.mxu0 %v5228_v3  ;;  %v5232_v6 = vld [vmem:[#allocation5 + $0x24] ss:$8 sps:$4 sm:$0xff]   ;;  %v5234_v7 = vld [vmem:[#allocation5 + $0x20] ss:$8 sps:$4 sm:$0xff]   ;;  %v5235_v8 = vld [vmem:[#allocation5 + $0x34] ss:$8 sps:$4 sm:$0xff]  }
  0x4f   :  { %248 = vmatprep.subr.bf16.mxu0 %v5229_v4  ;;  %v5237_v9 = vld [vmem:[#allocation5 + $0x30] ss:$8 sps:$4 sm:$0xff]   ;;  %v5238_v10 = vld [vmem:[#allocation5 + $0x44] ss:$8 sps:$4 sm:$0xff]   ;;  %v5240_v11 = vld [vmem:[#allocation5 + $0x40] ss:$8 sps:$4 sm:$0xff]  }
  0x50   :  { %v5241_v12 = vld [vmem:[#allocation5 + $0x54] ss:$8 sps:$4 sm:$0xff]   ;;  %v5243_v13 = vld [vmem:[#allocation5 + $0x50] ss:$8 sps:$4 sm:$0xff]   ;;  %v5244_v14 = vld [vmem:[#allocation5 + $0x64] ss:$8 sps:$4 sm:$0xff]  }
  0x51   :  { %v5246_v15 = vld [vmem:[#allocation5 + $0x60] ss:$8 sps:$4 sm:$0xff]   ;;  %v5247_v16 = vld [vmem:[#allocation5 + $0x74] ss:$8 sps:$4 sm:$0xff]   ;;  %v5249_v19 = vld [vmem:[#allocation5 + $0x70] ss:$8 sps:$4 sm:$0xff]  }
  0x52   :  { %249 = vmatpush1.bf16.msra.mxu0 %v5231_v5  ;;  %v535_v17 = vld [vmem:[#allocation7] sm:$0xff]  ;;  %v91_v21 = vld [vmem:[#allocation3 + $0x8] sm:$0xff]  ;;  %v541_v26 = vld [vmem:[#allocation7 + $0x30] sm:$0xff]  ;;  %vm4584_vm0 = vcmask 7168  }
  0x53   :  { %250 = vmatprep.subr.bf16.mxu0 %v5232_v6  ;;  %v539_v18 = vld [vmem:[#allocation7 + $0x20] sm:$0xff]  ;;  %v4645_v28 = vcombine.high %v537_v25, %v541_v26  ;;  %v4644_v29 = vcombine.low %v537_v25, %v541_v26  ;;  %v545_v30 = vld [vmem:[#allocation7 + $0x50] sm:$0xff]  ;;  %v93_v42 = vld [vmem:[#allocation3 + $0x18] sm:$0xff] }
  0x54   :  { %v90_v20 = vld [vmem:[#allocation3] sm:$0xff]  ;;  %v4641_v22 = vcombine.high %v535_v17, %v539_v18  ;;  %v549_v31 = vld [vmem:[#allocation7 + $0x70] sm:$0xff]  ;;  %v4640_v32 = vcombine.low %v535_v17, %v539_v18  ;;  %v95_v60 = vld [vmem:[#allocation3 + $0x28] sm:$0xff] }
  0x55   :  { %v543_v23 = vld [vmem:[#allocation7 + $0x40] sm:$0xff]  ;;  %v122_v27 = vpack.c.bf16 %v91_v21, %v90_v20  ;;  %v4653_v33 = vcombine.high %v545_v30, %v549_v31  ;;  %v553_v34 = vld [vmem:[#allocation7 + $0x90] sm:$0xff]  ;;  %1731 = vmatprep.subr.bf16.mxu1 %v4645_v28  ;;  %v4652_v39 = vcombine.low %v545_v30, %v549_v31 }
  0x56   :  { %251 = vmatpush1.bf16.msra.mxu0 %v5234_v7  ;;  %v547_v24 = vld [vmem:[#allocation7 + $0x60] sm:$0xff]  ;;  %v557_v35 = vld [vmem:[#allocation7 + $0xb0] sm:$0xff]  ;;  %1732 = vmatpush1.bf16.msra.mxu1 %v4644_v29 }
  0x57   :  { %252 = vmatprep.subr.bf16.mxu0 %v5235_v8  ;;  %v4649_v36 = vcombine.high %v543_v23, %v547_v24  ;;  %v551_v37 = vld [vmem:[#allocation7 + $0x80] sm:$0xff]  ;;  %v92_v40 = vld [vmem:[#allocation3 + $0x10] sm:$0xff]  ;;  %1733 = vmatprep.subr.bf16.mxu1 %v4653_v33  ;;  %v4661_v41 = vcombine.high %v553_v34, %v557_v35  ;;  %v4648_v43 = vcombine.low %v543_v23, %v547_v24 }
  0x58   :  { %v555_v38 = vld [vmem:[#allocation7 + $0xa0] sm:$0xff]  ;;  %v561_v44 = vld [vmem:[#allocation7 + $0xd0] sm:$0xff]  ;;  %v4660_v49 = vcombine.low %v553_v34, %v557_v35  ;;  %v123_v50 = vpack.c.bf16 %v93_v42, %v92_v40  ;;  %v99_v34 = vld [vmem:[#allocation3 + $0x48] sm:$0xff] }
  0x59   :  { %v565_v45 = vld [vmem:[#allocation7 + $0xf0] sm:$0xff]  ;;  %v4657_v46 = vcombine.high %v551_v37, %v555_v38  ;;  %v559_v47 = vld [vmem:[#allocation7 + $0xc0] sm:$0xff]  ;;  %v4656_v52 = vcombine.low %v551_v37, %v555_v38 }
  0x5a   :  { %253 = vmatpush1.bf16.msra.mxu0 %v5237_v9  ;;  %v563_v48 = vld [vmem:[#allocation7 + $0xe0] sm:$0xff]  ;;  %1734 = vmatpush1.bf16.msra.mxu1 %v4652_v39  ;;  %v4669_v51 = vcombine.high %v561_v44, %v565_v45  ;;  %v569_v53 = vld [vmem:[#allocation7 + $0x110] sm:$0xff]  ;;  %v4668_v59 = vcombine.low %v561_v44, %v565_v45 }
  0x5b   :  { %254 = vmatprep.subr.bf16.mxu0 %v5238_v10  ;;  %1735 = vmatprep.subr.bf16.mxu1 %v4661_v41  ;;  %v573_v54 = vld [vmem:[#allocation7 + $0x130] sm:$0xff]  ;;  %v4665_v55 = vcombine.high %v559_v47, %v563_v48  ;;  %v94_v56 = vld [vmem:[#allocation3 + $0x20] sm:$0xff]  ;;  %v4664_v0 = vcombine.low %v559_v47, %v563_v48 }
  0x5c   :  { %v567_v57 = vld [vmem:[#allocation7 + $0x100] sm:$0xff]  ;;  %v4677_v61 = vcombine.high %v569_v53, %v573_v54  ;;  %v577_v62 = vld [vmem:[#allocation7 + $0x150] sm:$0xff]  ;;  %v4676_v5 = vcombine.low %v569_v53, %v573_v54  ;;  %v124_v8 = vpack.c.bf16 %v95_v60, %v94_v56  ;;  %v101_v53 = vld [vmem:[#allocation3 + $0x58] sm:$0xff] }
  0x5d   :  { %v571_v58 = vld [vmem:[#allocation7 + $0x120] sm:$0xff]  ;;  %v581_v63 = vld [vmem:[#allocation7 + $0x170] sm:$0xff] }
  0x5e   :  { %255 = vmatpush1.bf16.msra.mxu0 %v5240_v11  ;;  %1736 = vmatpush1.bf16.msra.mxu1 %v4660_v49  ;;  %v575_v2 = vld [vmem:[#allocation7 + $0x140] sm:$0xff]  ;;  %v4673_v4 = vcombine.high %v567_v57, %v571_v58  ;;  %v585_v6 = vld [vmem:[#allocation7 + $0x190] sm:$0xff]  ;;  %v4685_v9 = vcombine.high %v577_v62, %v581_v63  ;;  %v4672_v10 = vcombine.low %v567_v57, %v571_v58 }
  0x5f   :  { %256 = vmatprep.subr.bf16.mxu0 %v5241_v12  ;;  %1737 = vmatprep.subr.bf16.mxu1 %v4669_v51  ;;  %v579_v3 = vld [vmem:[#allocation7 + $0x160] sm:$0xff]  ;;  %v589_v7 = vld [vmem:[#allocation7 + $0x1b0] sm:$0xff] }
  0x60   :  { %v583_v11 = vld [vmem:[#allocation7 + $0x180] sm:$0xff]  ;;  %v593_v17 = vld [vmem:[#allocation7 + $0x1d0] sm:$0xff]  ;;  %v4680_v20 = vcombine.low %v575_v2, %v579_v3  ;;  %v4692_v24 = vcombine.low %v585_v6, %v589_v7 }
  0x61   :  { %v587_v12 = vld [vmem:[#allocation7 + $0x1a0] sm:$0xff]  ;;  %v597_v18 = vld [vmem:[#allocation7 + $0x1f0] sm:$0xff] }
  0x62   :  { %257 = vmatpush1.bf16.msra.mxu0 %v5243_v13  ;;  %1738 = vmatpush1.bf16.msra.mxu1 %v4668_v59  ;;  %v4681_v13 = vcombine.high %v575_v2, %v579_v3  ;;  %v591_v21 = vld [vmem:[#allocation7 + $0x1c0] sm:$0xff]  ;;  %v4689_v23 = vcombine.high %v583_v11, %v587_v12  ;;  %v601_v25 = vld [vmem:[#allocation7 + $0x210] sm:$0xff]  ;;  %v4701_v28 = vcombine.high %v593_v17, %v597_v18 }
  0x63   :  { %258 = vmatprep.subr.bf16.mxu0 %v5244_v14  ;;  %1739 = vmatprep.subr.bf16.mxu1 %v4677_v61  ;;  %v96_v14 = vld [vmem:[#allocation3 + $0x30] sm:$0xff]  ;;  %v4688_v29 = vcombine.low %v583_v11, %v587_v12  ;;  %v599_v30 = vld [vmem:[#allocation7 + $0x200] sm:$0xff]  ;;  %v4700_v35 = vcombine.low %v593_v17, %v597_v18 }
  0x64   :  { %v605_v26 = vld [vmem:[#allocation7 + $0x230] sm:$0xff]  ;;  %v603_v31 = vld [vmem:[#allocation7 + $0x220] sm:$0xff] }
  0x65   :  { %v98_v33 = vld [vmem:[#allocation3 + $0x40] sm:$0xff]  ;;  %v613_v37 = vld [vmem:[#allocation7 + $0x270] sm:$0xff]  ;;  %v4709_v38 = vcombine.high %v601_v25, %v605_v26  ;;  %v4705_v42 = vcombine.high %v599_v30, %v603_v31  ;;  %v4704_v48 = vcombine.low %v599_v30, %v603_v31 }
  0x66   :  { %259 = vmatpush1.bf16.msra.mxu0 %v5246_v15  ;;  %v97_v15 = vld [vmem:[#allocation3 + $0x38] sm:$0xff]  ;;  %1740 = vmatpush1.bf16.msra.mxu1 %v4676_v5  ;;  %v607_v40 = vld [vmem:[#allocation7 + $0x240] sm:$0xff]  ;;  %v617_v44 = vld [vmem:[#allocation7 + $0x290] sm:$0xff] }
  0x67   :  { %260 = vmatprep.subr.bf16.mxu0 %v5247_v16  ;;  %v4684_v16 = vcombine.low %v577_v62, %v581_v63  ;;  %1741 = vmatprep.subr.bf16.mxu1 %v4685_v9  ;;  %v611_v41 = vld [vmem:[#allocation7 + $0x260] sm:$0xff]  ;;  %v621_v45 = vld [vmem:[#allocation7 + $0x2b0] sm:$0xff]  ;;  %v103_v9 = vld [vmem:[#allocation3 + $0x68] sm:$0xff] }
  0x68   :  { %v615_v49 = vld [vmem:[#allocation7 + $0x280] sm:$0xff]  ;;  %v4713_v51 = vcombine.high %v607_v40, %v611_v41  ;;  %v629_v56 = vld [vmem:[#allocation7 + $0x2f0] sm:$0xff]  ;;  %v4725_v57 = vcombine.high %v617_v44, %v621_v45  ;;  %v4712_v58 = vcombine.low %v607_v40, %v611_v41  ;;  %v4724_v62 = vcombine.low %v617_v44, %v621_v45  ;;  %v113_v41 = vld [vmem:[#allocation3 + $0xb8] sm:$0xff] }
  0x69   :  { %v623_v59 = vld [vmem:[#allocation7 + $0x2c0] sm:$0xff]  ;;  %v633_v63 = vld [vmem:[#allocation7 + $0x310] sm:$0xff] }
  0x6a   :  { %261 = vmatpush1.bf16.msra.mxu0 %v5249_v19  ;;  %v4693_v19 = vcombine.high %v585_v6, %v589_v7  ;;  %1742 = vmatpush1.bf16.msra.mxu1 %v4684_v16  ;;  %v627_v60 = vld [vmem:[#allocation7 + $0x2e0] sm:$0xff]  ;;  %v641_v11 = vld [vmem:[#allocation7 + $0x350] sm:$0xff] }
  0x6b   :  { %1345 = vmatprep.subr.bf16.mxu0 %v4641_v22  ;;  %v595_v22 = vld [vmem:[#allocation7 + $0x1e0] sm:$0xff]  ;;  %v4729_v7 = vcombine.high %v623_v59, %v627_v60  ;;  %v645_v12 = vld [vmem:[#allocation7 + $0x370] sm:$0xff] }
  0x6c   :  { %1743 = vmatprep.subr.bf16.mxu1 %v4693_v19  ;;  %v4696_v39 = vcombine.low %v591_v21, %v595_v22  ;;  %v631_v5 = vld [vmem:[#allocation7 + $0x300] sm:$0xff]  ;;  %v112_v40 = vld [vmem:[#allocation3 + $0xb0] sm:$0xff] }
  0x6d   :  { %279 = vmatmul.mubr.bf16.vlgmr.msra.gmra.mrb[0].mxu0 %v122_v27  ;;  %v125_v27 = vpack.c.bf16 %v97_v15, %v96_v14  ;;  %v635_v6 = vld [vmem:[#allocation7 + $0x320] sm:$0xff]  ;;  %v4728_v14 = vcombine.low %v623_v59, %v627_v60  ;;  %v653_v44 = vld [vmem:[#allocation7 + $0x3b0] sm:$0xff]  ;;  %v133_v45 = vpack.c.bf16 %v113_v41, %v112_v40  ;;  %v117_v60 = vld [vmem:[#allocation3 + $0xd8] sm:$0xff] }
  0x6e   :  { %288 = vmatprep.mubr.bf16.mxu0 %v6217_v1  ;;  %1346 = vmatpush1.bf16.msra.mxu0 %v4640_v32  ;;  %v4697_v32 = vcombine.high %v591_v21, %v595_v22  ;;  %v639_v15 = vld [vmem:[#allocation7 + $0x340] sm:$0xff]  ;;  %v4737_v17 = vcombine.high %v631_v5, %v635_v6  ;;  %v4736_v21 = vcombine.low %v631_v5, %v635_v6  ;;  %v116_v59 = vld [vmem:[#allocation3 + $0xd0] sm:$0xff]  ;;  %v552_v40 = vld [vmem:[#allocation7 + $0x88] sm:$0xff] }
  0x6f   :  { %1347 = vmatprep.subr.bf16.mxu0 %v4649_v36  ;;  %1744 = vmatpush1.bf16.msra.mxu1 %v4692_v24  ;;  %v609_v36 = vld [vmem:[#allocation7 + $0x250] sm:$0xff]  ;;  %v643_v16 = vld [vmem:[#allocation7 + $0x360] sm:$0xff]  ;;  %v556_v41 = vld [vmem:[#allocation7 + $0xa8] sm:$0xff] }
  0x70   :  { %1745 = vmatprep.subr.bf16.mxu1 %v4701_v28  ;;  %v4717_v47 = vcombine.high %v609_v36, %v613_v37  ;;  %v4716_v54 = vcombine.low %v609_v36, %v613_v37  ;;  %v647_v22 = vld [vmem:[#allocation7 + $0x380] sm:$0xff]  ;;  %v4745_v24 = vcombine.high %v639_v15, %v643_v16  ;;  %v120_v6 = vld [vmem:[#allocation3 + $0xf0] sm:$0xff] }
  0x71   :  { %v106_v31 = vld [vmem:[#allocation3 + $0x80] sm:$0xff] }
  0x72   :  { %1348 = vmatpush1.bf16.msra.mxu0 %v4648_v43  ;;  %v4708_v43 = vcombine.low %v601_v25, %v605_v26  ;;  %v104_v25 = vld [vmem:[#allocation3 + $0x70] sm:$0xff]  ;;  %v105_v26 = vld [vmem:[#allocation3 + $0x78] sm:$0xff]  ;;  %v110_v37 = vld [vmem:[#allocation3 + $0xa0] sm:$0xff] }
  0x73   :  { %1349 = vmatprep.subr.bf16.mxu0 %v4657_v46  ;;  %1746 = vmatpush1.bf16.msra.mxu1 %v4700_v35  ;;  %v126_v46 = vpack.c.bf16 %v99_v34, %v98_v33  ;;  %v108_v34 = vld [vmem:[#allocation3 + $0x90] sm:$0xff]  ;;  %v109_v35 = vld [vmem:[#allocation3 + $0x98] sm:$0xff] }
  0x74   :  { %1747 = vmatprep.subr.bf16.mxu1 %v4709_v38  ;;  %v131_v36 = vpack.c.bf16 %v109_v35, %v108_v34  ;;  %v111_v38 = vld [vmem:[#allocation3 + $0xa8] sm:$0xff] }
  0x75   :  { %289 = vmatmul.mubr.bf16.gmra.mrb[4].mxu0 %v123_v50  ;;  %v619_v50 = vld [vmem:[#allocation7 + $0x2a0] sm:$0xff] }
  0x76   :  { %298 = vmatprep.mubr.bf16.mxu0 %v6217_v1  ;;  %1350 = vmatpush1.bf16.msra.mxu0 %v4656_v52  ;;  %v100_v52 = vld [vmem:[#allocation3 + $0x50] sm:$0xff]  ;;  %v4721_v61 = vcombine.high %v615_v49, %v619_v50 }
  0x77   :  { %1351 = vmatprep.subr.bf16.mxu0 %v4665_v55  ;;  %1748 = vmatpush1.bf16.msra.mxu1 %v4708_v43  ;;  %v625_v55 = vld [vmem:[#allocation7 + $0x2d0] sm:$0xff]  ;;  %v127_v2 = vpack.c.bf16 %v101_v53, %v100_v52  ;;  %v114_v53 = vld [vmem:[#allocation3 + $0xc0] sm:$0xff] }
  0x78   :  { %1749 = vmatprep.subr.bf16.mxu1 %v4717_v47  ;;  %v4733_v3 = vcombine.high %v625_v55, %v629_v56  ;;  %v649_v43 = vld [vmem:[#allocation7 + $0x390] sm:$0xff] }
  0x79   :  { %v4756_v47 = vcombine.low %v649_v43, %v653_v44  ;;  %v661_v52 = vld [vmem:[#allocation7 + $0x3f0] sm:$0xff] }
  0x7a   :  { %1352 = vmatpush1.bf16.msra.mxu0 %v4664_v0  ;;  %v637_v0 = vld [vmem:[#allocation7 + $0x330] sm:$0xff] }
  0x7b   :  { %1353 = vmatprep.subr.bf16.mxu0 %v4673_v4  ;;  %1750 = vmatpush1.bf16.msra.mxu1 %v4716_v54  ;;  %v4720_v4 = vcombine.low %v615_v49, %v619_v50  ;;  %v4740_v18 = vcombine.low %v633_v63, %v637_v0  ;;  %v659_v49 = vld [vmem:[#allocation7 + $0x3e0] sm:$0xff]  ;;  %v657_v50 = vld [vmem:[#allocation7 + $0x3d0] sm:$0xff]  ;;  %v115_v54 = vld [vmem:[#allocation3 + $0xc8] sm:$0xff] }
  0x7c   :  { %1751 = vmatprep.subr.bf16.mxu1 %v4725_v57  ;;  %v4764_v57 = vcombine.low %v657_v50, %v661_v52 }
  0x7d   :  { %299 = vmatmul.mubr.bf16.gmra.mrb[8].mxu0 %v124_v8  ;;  %v102_v8 = vld [vmem:[#allocation3 + $0x60] sm:$0xff] }
  0x7e   :  { %308 = vmatprep.mubr.bf16.mxu0 %v6217_v1  ;;  %1354 = vmatpush1.bf16.msra.mxu0 %v4672_v10  ;;  %v4732_v10 = vcombine.low %v625_v55, %v629_v56  ;;  %v128_v19 = vpack.c.bf16 %v103_v9, %v102_v8  ;;  %v4765_v56 = vcombine.high %v657_v50, %v661_v52  ;;  %v156_v9 = vlaneseq  ;;  %v5258_v50 = vld [vmem:[#allocation8 + $0x24] ss:$8 sps:$4 sm:$0xff]  }
  0x7f   :  { %1355 = vmatprep.subr.bf16.mxu0 %v4681_v13  ;;  %1752 = vmatpush1.bf16.msra.mxu1 %v4724_v62  ;;  %v4741_v13 = vcombine.high %v633_v63, %v637_v0  ;;  %v540_v62 = vld [vmem:[#allocation7 + $0x28] sm:$0xff] }
  0x80   :  { %1753 = vmatprep.subr.bf16.mxu1 %v4733_v3  ;;  %v118_v3 = vld [vmem:[#allocation3 + $0xe0] sm:$0xff] }
  0x82   :  { %1356 = vmatpush1.bf16.msra.mxu0 %v4680_v20  ;;  %v4749_v20 = vcombine.high %v641_v11, %v645_v12 }
  0x83   :  { %1357 = vmatprep.subr.bf16.mxu0 %v4689_v23  ;;  %1754 = vmatpush1.bf16.msra.mxu1 %v4732_v10  ;;  %v651_v23 = vld [vmem:[#allocation7 + $0x3a0] sm:$0xff] }
  0x84   :  { %1755 = vmatprep.subr.bf16.mxu1 %v4741_v13  ;;  %v4753_v28 = vcombine.high %v647_v22, %v651_v23  ;;  %v4752_v30 = vcombine.low %v647_v22, %v651_v23  ;;  %v5252_v10 = vld [vmem:[#allocation8 + $0x4] ss:$8 sps:$4 sm:$0xff]   ;;  %v154_v13 = vld [vmem:[%s7567_s2] sm:$0x3] }
  0x85   :  { %309 = vmatmul.mubr.bf16.gmra.mrb[12].mxu0 %v125_v27  ;;  %v4744_v27 = vcombine.low %v639_v15, %v643_v16 }
  0x86   :  { %318 = vmatprep.mubr.bf16.mxu0 %v6217_v1  ;;  %1358 = vmatpush1.bf16.msra.mxu0 %v4688_v29  ;;  %v129_v29 = vpack.c.bf16 %v105_v26, %v104_v25 }
  0x87   :  { %1359 = vmatprep.subr.bf16.mxu0 %v4697_v32  ;;  %1756 = vmatpush1.bf16.msra.mxu1 %v4740_v18  ;;  %v107_v32 = vld [vmem:[#allocation3 + $0x88] sm:$0xff] }
  0x88   :  { %1757 = vmatprep.subr.bf16.mxu1 %v4749_v20  ;;  %v130_v33 = vpack.c.bf16 %v107_v32, %v106_v31 }
  0x8a   :  { %1360 = vmatpush1.bf16.msra.mxu0 %v4696_v39  ;;  %v132_v39 = vpack.c.bf16 %v111_v38, %v110_v37  ;;  %v5255_v37 = vld [vmem:[#allocation8 + $0x14] ss:$8 sps:$4 sm:$0xff]  }
  0x8b   :  { %1361 = vmatprep.subr.bf16.mxu0 %v4705_v42  ;;  %v4748_v42 = vcombine.low %v641_v11, %v645_v12  ;;  %v6351_v11 = vshrl.u32 %v156_v9, 7  ;;  %v5259_v9 = vld [vmem:[#allocation8 + $0x30] ss:$8 sps:$4 sm:$0xff]  }
  0x8d   :  { %319 = vmatmul.mubr.bf16.gmra.mrb[16].mxu0 %v126_v46  ;;  %1758 = vmatpush1.bf16.msra.mxu1 %v4748_v42  ;;  %v4757_v46 = vcombine.high %v649_v43, %v653_v44  ;;  %v6354_v12 = vsub.s32 0, %v6351_v11 }
  0x8e   :  { %328 = vmatprep.mubr.bf16.mxu0 %v6217_v1  ;;  %1362 = vmatpush1.bf16.msra.mxu0 %v4704_v48  ;;  %v655_v48 = vld [vmem:[#allocation7 + $0x3c0] sm:$0xff] }
  0x8f   :  { %1363 = vmatprep.subr.bf16.mxu0 %v4713_v51  ;;  %1759 = vmatprep.subr.bf16.mxu1 %v4757_v46  ;;  %v4761_v51 = vcombine.high %v655_v48, %v659_v49  ;;  %v4760_v55 = vcombine.low %v655_v48, %v659_v49  ;;  %7609 = vst [vmem:[#allocation13_spill] sm:$0xff] %v6354_v12  ;;  %v5253_v46 = vld [vmem:[#allocation8 + $0x10] ss:$8 sps:$4 sm:$0xff]  }
  0x90   :  { %v4659_v49 = vcombine.high %v552_v40, %v556_v41 }
  0x91   :  { %1760 = vmatpush1.bf16.msra.mxu1 %v4756_v47 }
  0x92   :  { %1364 = vmatpush1.bf16.msra.mxu0 %v4712_v58  ;;  %1761 = vmatprep.subr.bf16.mxu1 %v4765_v56  ;;  %v134_v58 = vpack.c.bf16 %v115_v54, %v114_v53  ;;  %v560_v53 = vld [vmem:[#allocation7 + $0xc8] sm:$0xff] }
  0x93   :  { %1365 = vmatprep.subr.bf16.mxu0 %v4721_v61  ;;  %v536_v61 = vld [vmem:[#allocation7 + $0x8] sm:$0xff] }
  0x94   :  { %v4642_v63 = vcombine.low %v536_v61, %v540_v62  ;;  %v4643_v0 = vcombine.high %v536_v61, %v540_v62  ;;  %v564_v54 = vld [vmem:[#allocation7 + $0xe8] sm:$0xff] }
  0x95   :  { %329 = vmatmul.mubr.bf16.gmra.mrb[20].mxu0 %v127_v2  ;;  %1762 = vmatpush1.bf16.msra.mxu1 %v4764_v57  ;;  %v135_v2 = vpack.c.bf16 %v117_v60, %v116_v59  ;;  %v5256_v59 = vld [vmem:[#allocation8 + $0x20] ss:$8 sps:$4 sm:$0xff]   ;;  %v4667_v62 = vcombine.high %v560_v53, %v564_v54 }
  0x96   :  { %338 = vmatprep.mubr.bf16.mxu0 %v6217_v1  ;;  %1366 = vmatpush1.bf16.msra.mxu0 %v4720_v4  ;;  %v119_v4 = vld [vmem:[#allocation3 + $0xe8] sm:$0xff] }
  0x97   :  { %1367 = vmatprep.subr.bf16.mxu0 %v4729_v7  ;;  %v136_v5 = vpack.c.bf16 %v119_v4, %v118_v3  ;;  %v121_v7 = vld [vmem:[#allocation3 + $0xf8] sm:$0xff]  ;;  %3281 = vmatprep.subr.bf16.mxu1 %v5252_v10  ;;  %v568_v3 = vld [vmem:[#allocation7 + $0x108] sm:$0xff] }
  0x98   :  { %v137_v8 = vpack.c.bf16 %v121_v7, %v120_v6  ;;  %v572_v4 = vld [vmem:[#allocation7 + $0x128] sm:$0xff] }
  0x9a   :  { %1368 = vmatpush1.bf16.msra.mxu0 %v4728_v14  ;;  %v6360_v14 = vsub.s32 1, %v6351_v11 }
  0x9b   :  { %1369 = vmatprep.subr.bf16.mxu0 %v4737_v17 }
  0x9c   :  { %7610 = vst [vmem:[#allocation14_spill] sm:$0xff] %v6360_v14  ;;  %v6366_v15 = vrot.slane %v154_v13, %v6360_v14 }
  0x9d   :  { %339 = vmatmul.mubr.bf16.gmra.mrb[24].mxu0 %v128_v19 }
  0x9e   :  { %348 = vmatprep.mubr.bf16.mxu0 %v6217_v1  ;;  %1370 = vmatpush1.bf16.msra.mxu0 %v4736_v21 }
  0x9f   :  { %1371 = vmatprep.subr.bf16.mxu0 %v4745_v24 }
  0xa2   :  { %1372 = vmatpush1.bf16.msra.mxu0 %v4744_v27 }
  0xa3   :  { %1373 = vmatprep.subr.bf16.mxu0 %v4753_v28  ;;  %v544_v28 = vld [vmem:[#allocation7 + $0x48] sm:$0xff] }
  0xa5   :  { %349 = vmatmul.mubr.bf16.gmra.mrb[28].mxu0 %v129_v29  ;;  %v548_v29 = vld [vmem:[#allocation7 + $0x68] sm:$0xff] }
  0xa6   :  { %358 = vmatprep.mubr.bf16.mxu0 %v6217_v1  ;;  %1374 = vmatpush1.bf16.msra.mxu0 %v4752_v30 }
  0xa7   :  { %1375 = vmatprep.subr.bf16.mxu0 %v4761_v51 }
  0xaa   :  { %1376 = vmatpush1.bf16.msra.mxu0 %v4760_v55 }
  0xab   :  { %1538 = vmatprep.subr.bf16.mxu0 %v4643_v0 }
  0xad   :  { %359 = vmatmul.mubr.bf16.gmra.mrb[32].mxu0 %v130_v33  ;;  %v5250_v33 = vld [vmem:[#allocation8] ss:$8 sps:$4 sm:$0xff]  }
  0xae   :  { %368 = vmatprep.mubr.bf16.mxu0 %v6217_v1 }
  0xb5   :  { %369 = vmatmul.mubr.bf16.gmra.mrb[36].mxu0 %v131_v36  ;;  %v4651_v36 = vcombine.high %v544_v28, %v548_v29 }
  0xb6   :  { %378 = vmatprep.mubr.bf16.mxu0 %v6217_v1 }
  0xbd   :  { %379 = vmatmul.mubr.bf16.gmra.mrb[40].mxu0 %v132_v39 }
  0xbe   :  { %388 = vmatprep.mubr.bf16.mxu0 %v6217_v1 }
  0xc5   :  { %389 = vmatmul.mubr.bf16.gmra.mrb[44].mxu0 %v133_v45  ;;  %v4650_v45 = vcombine.low %v544_v28, %v548_v29 }
  0xc6   :  { %398 = vmatprep.mubr.bf16.mxu0 %v6217_v1 }
  0xcd   :  { %399 = vmatmul.mubr.bf16.gmra.mrb[48].mxu0 %v134_v58  ;;  %v4658_v58 = vcombine.low %v552_v40, %v556_v41  ;;  %v5265_v41 = vld [vmem:[#allocation8 + $0x50] ss:$8 sps:$4 sm:$0xff]  }
  0xce   :  { %408 = vmatprep.mubr.bf16.mxu0 %v6217_v1 }
  0xd5   :  { %409 = vmatmul.mubr.bf16.gmra.mrb[52].mxu0 %v135_v2 }
  0xd6   :  { %418 = vmatprep.mubr.bf16.mxu0 %v6217_v1 }
  0xdd   :  { %419 = vmatmul.mubr.bf16.gmra.mrb[56].mxu0 %v136_v5 }
  0xde   :  { %428 = vmatprep.mubr.bf16.mxu0 %v6217_v1  ;;  %v6363_v1 = vrot.slane %v154_v13, %v6354_v12 }
  0xe5   :  { %429 = vmatmul.mubr.bf16.gmra.mrb[60].mxu0 %v137_v8  ;;  %v4666_v8 = vcombine.low %v560_v53, %v564_v54  ;;  %v5268_v54 = vld [vmem:[#allocation8 + $0x60] ss:$8 sps:$4 sm:$0xff]  }
 0x140   :  { %v280_v16 = vpop.f32.mrb[0].mxu0 }
 0x141   :  { %v281_v17 = vadd.f32 %v280_v16, %v6363_v1  ;;  %v282_v18 = vpop.f32.mrb[1].mxu0  ;;  %v4675_v16 = vcombine.high %v568_v3, %v572_v4 }
 0x142   :  { %v283_v19 = vadd.f32 %v282_v18, %v6366_v15  ;;  %v284_v20 = vpop.f32.mrb[2].mxu0 }
 0x143   :  { %v285_v21 = vadd.f32 %v284_v20, %v6363_v1  ;;  %v286_v22 = vpop.f32.mrb[3].mxu0  ;;  %v439_v24 = vmax.f32 %v281_v17, 0.0  ;;  %v5264_v17 = vld [vmem:[#allocation8 + $0x44] ss:$8 sps:$4 sm:$0xff]  }
 0x144   :  { %v287_v23 = vadd.f32 %v286_v22, %v6366_v15  ;;  %v440_v26 = vmax.f32 %v283_v19, 0.0  ;;  %v576_v20 = vld [vmem:[#allocation7 + $0x148] sm:$0xff] }
 0x145   :  { %v441_v25 = vmax.f32 %v285_v21, 0.0  ;;  %v580_v21 = vld [vmem:[#allocation7 + $0x168] sm:$0xff] }
 0x146   :  { %v442_v27 = vmax.f32 %v287_v23, 0.0  ;;  %v4683_v29 = vcombine.high %v576_v20, %v580_v21  ;;  %v4682_v40 = vcombine.low %v576_v20, %v580_v21 }
 0x147   :  { %v6372_v30 = vpack.c.bf16 %v441_v25, %v439_v24  ;;  %v4674_v25 = vcombine.low %v568_v3, %v572_v4 }
 0x148   :  { %v6374_v31 = vpack.c.bf16 %v442_v27, %v440_v26  ;;  %v290_v32 = vpop.f32.mrb[4].mxu0  ;;  %v5262_v26 = vld [vmem:[#allocation8 + $0x40] ss:$8 sps:$4 sm:$0xff]  }
 0x149   :  { %v291_v34 = vadd.f32 %v290_v32, %v6363_v1  ;;  %v292_v35 = vpop.f32.mrb[5].mxu0  ;;  %v5267_v32 = vld [vmem:[#allocation8 + $0x54] ss:$8 sps:$4 sm:$0xff]  }
 0x14a   :  { %v293_v38 = vadd.f32 %v292_v35, %v6366_v15  ;;  %v294_v39 = vpop.f32.mrb[6].mxu0  ;;  %1377 = vmatprep.mubr.bf16.mxu0 %v6374_v31  ;;  %1763 = vmatprep.mubr.bf16.mxu1 %v6374_v31  ;;  %v584_v35 = vld [vmem:[#allocation7 + $0x188] sm:$0xff] }
 0x14b   :  { %v295_v42 = vadd.f32 %v294_v39, %v6363_v1  ;;  %v296_v43 = vpop.f32.mrb[7].mxu0  ;;  %1378 = vmatmul.mubr.bf16.vlgmr.msra.gmra.mrb[64].mxu0 %v6372_v30  ;;  %1764 = vmatmul.mubr.bf16.vlgmr.msra.gmra.mrb[0].mxu1 %v6372_v30  ;;  %v443_v47 = vmax.f32 %v291_v34, 0.0 }
 0x14c   :  { %v297_v44 = vadd.f32 %v296_v43, %v6366_v15  ;;  %1539 = vmatpush1.bf16.msra.mxu0 %v4642_v63  ;;  %3282 = vmatpush1.bf16.msra.mxu1 %v5250_v33  ;;  %v444_v51 = vmax.f32 %v293_v38, 0.0  ;;  %v5261_v63 = vld [vmem:[#allocation8 + $0x34] ss:$8 sps:$4 sm:$0xff]  }
 0x14d   :  { %v445_v48 = vmax.f32 %v295_v42, 0.0  ;;  %1540 = vmatprep.subr.bf16.mxu0 %v4651_v36  ;;  %3283 = vmatprep.subr.bf16.mxu1 %v5255_v37  ;;  %v588_v36 = vld [vmem:[#allocation7 + $0x1a8] sm:$0xff] }
 0x14e   :  { %v446_v52 = vmax.f32 %v297_v44, 0.0  ;;  %v4691_v44 = vcombine.high %v584_v35, %v588_v36  ;;  %v4690_v53 = vcombine.low %v584_v35, %v588_v36 }
 0x14f   :  { %v6384_v55 = vpack.c.bf16 %v445_v48, %v443_v47  ;;  %v592_v48 = vld [vmem:[#allocation7 + $0x1c8] sm:$0xff] }
 0x150   :  { %v6386_v56 = vpack.c.bf16 %v446_v52, %v444_v51  ;;  %v300_v57 = vpop.f32.mrb[8].mxu0  ;;  %1541 = vmatpush1.bf16.msra.mxu0 %v4650_v45  ;;  %3284 = vmatpush1.bf16.msra.mxu1 %v5253_v46  ;;  %v5270_v45 = vld [vmem:[#allocation8 + $0x64] ss:$8 sps:$4 sm:$0xff]  }
 0x151   :  { %v301_v60 = vadd.f32 %v300_v57, %v6363_v1  ;;  %v302_v61 = vpop.f32.mrb[9].mxu0  ;;  %1542 = vmatprep.subr.bf16.mxu0 %v4659_v49  ;;  %3285 = vmatprep.subr.bf16.mxu1 %v5258_v50  ;;  %v596_v49 = vld [vmem:[#allocation7 + $0x1e8] sm:$0xff] }
 0x152   :  { %v303_v0 = vadd.f32 %v302_v61, %v6366_v15  ;;  %v304_v2 = vpop.f32.mrb[10].mxu0  ;;  %1387 = vmatprep.mubr.bf16.mxu0 %v6386_v56  ;;  %1773 = vmatprep.mubr.bf16.mxu1 %v6386_v56  ;;  %v4698_v4 = vcombine.low %v592_v48, %v596_v49 }
 0x153   :  { %v305_v5 = vadd.f32 %v304_v2, %v6363_v1  ;;  %v306_v6 = vpop.f32.mrb[11].mxu0  ;;  %1388 = vmatmul.mubr.bf16.gmra.mrb[68].mxu0 %v6384_v55  ;;  %1774 = vmatmul.mubr.bf16.gmra.mrb[4].mxu1 %v6384_v55  ;;  %v447_v10 = vmax.f32 %v301_v60, 0.0 }
 0x154   :  { %v307_v7 = vadd.f32 %v306_v6, %v6366_v15  ;;  %1543 = vmatpush1.bf16.msra.mxu0 %v4658_v58  ;;  %3286 = vmatpush1.bf16.msra.mxu1 %v5256_v59  ;;  %v448_v18 = vmax.f32 %v303_v0, 0.0  ;;  %v4699_v59 = vcombine.high %v592_v48, %v596_v49  ;;  %v5273_v6 = vld [vmem:[#allocation8 + $0x74] ss:$8 sps:$4 sm:$0xff]  }
 0x155   :  { %v449_v13 = vmax.f32 %v305_v5, 0.0  ;;  %1544 = vmatprep.subr.bf16.mxu0 %v4667_v62  ;;  %3287 = vmatprep.subr.bf16.mxu1 %v5261_v63  ;;  %v600_v62 = vld [vmem:[#allocation7 + $0x208] sm:$0xff]  ;;  %v5271_v5 = vld [vmem:[#allocation8 + $0x70] ss:$8 sps:$4 sm:$0xff]  }
 0x156   :  { %v450_v19 = vmax.f32 %v307_v7, 0.0  ;;  %v604_v63 = vld [vmem:[#allocation7 + $0x228] sm:$0xff] }
 0x157   :  { %v6396_v22 = vpack.c.bf16 %v449_v13, %v447_v10  ;;  %v4706_v21 = vcombine.low %v600_v62, %v604_v63 }
 0x158   :  { %v6398_v23 = vpack.c.bf16 %v450_v19, %v448_v18  ;;  %v310_v24 = vpop.f32.mrb[12].mxu0  ;;  %1545 = vmatpush1.bf16.msra.mxu0 %v4666_v8  ;;  %3288 = vmatpush1.bf16.msra.mxu1 %v5259_v9  ;;  %v4707_v9 = vcombine.high %v600_v62, %v604_v63 }
 0x159   :  { %v311_v27 = vadd.f32 %v310_v24, %v6363_v1  ;;  %v312_v28 = vpop.f32.mrb[13].mxu0  ;;  %1546 = vmatprep.subr.bf16.mxu0 %v4675_v16  ;;  %3289 = vmatprep.subr.bf16.mxu1 %v5264_v17  ;;  %v608_v16 = vld [vmem:[#allocation7 + $0x248] sm:$0xff] }
 0x15a   :  { %v313_v33 = vadd.f32 %v312_v28, %v6366_v15  ;;  %v314_v34 = vpop.f32.mrb[14].mxu0  ;;  %1397 = vmatprep.mubr.bf16.mxu0 %v6398_v23  ;;  %1783 = vmatprep.mubr.bf16.mxu1 %v6398_v23  ;;  %v612_v17 = vld [vmem:[#allocation7 + $0x268] sm:$0xff] }
 0x15b   :  { %v315_v37 = vadd.f32 %v314_v34, %v6363_v1  ;;  %v316_v38 = vpop.f32.mrb[15].mxu0  ;;  %1398 = vmatmul.mubr.bf16.gmra.mrb[72].mxu0 %v6396_v22  ;;  %1784 = vmatmul.mubr.bf16.gmra.mrb[8].mxu1 %v6396_v22  ;;  %v451_v42 = vmax.f32 %v311_v27, 0.0  ;;  %v4714_v36 = vcombine.low %v608_v16, %v612_v17 }
 0x15c   :  { %v317_v39 = vadd.f32 %v316_v38, %v6366_v15  ;;  %1547 = vmatpush1.bf16.msra.mxu0 %v4674_v25  ;;  %3290 = vmatpush1.bf16.msra.mxu1 %v5262_v26  ;;  %v452_v46 = vmax.f32 %v313_v33, 0.0  ;;  %v4715_v26 = vcombine.high %v608_v16, %v612_v17  ;;  %v5276_v38 = vld [vmem:[#allocation8 + $0x84] ss:$8 sps:$4 sm:$0xff]  }
 0x15d   :  { %v453_v43 = vmax.f32 %v315_v37, 0.0  ;;  %1548 = vmatprep.subr.bf16.mxu0 %v4683_v29  ;;  %3291 = vmatprep.subr.bf16.mxu1 %v5267_v32  ;;  %v616_v29 = vld [vmem:[#allocation7 + $0x288] sm:$0xff] }
 0x15e   :  { %v454_v47 = vmax.f32 %v317_v39, 0.0  ;;  %v620_v32 = vld [vmem:[#allocation7 + $0x2a8] sm:$0xff] }
 0x15f   :  { %v6408_v50 = vpack.c.bf16 %v453_v43, %v451_v42  ;;  %v5274_v37 = vld [vmem:[#allocation8 + $0x80] ss:$8 sps:$4 sm:$0xff]   ;;  %v4722_v49 = vcombine.low %v616_v29, %v620_v32 }
 0x160   :  { %v6410_v51 = vpack.c.bf16 %v454_v47, %v452_v46  ;;  %v320_v52 = vpop.f32.mrb[16].mxu0  ;;  %1549 = vmatpush1.bf16.msra.mxu0 %v4682_v40  ;;  %3292 = vmatpush1.bf16.msra.mxu1 %v5265_v41  ;;  %v4723_v41 = vcombine.high %v616_v29, %v620_v32  ;;  %v644_v16 = vld [vmem:[#allocation7 + $0x368] sm:$0xff] }
 0x161   :  { %v321_v57 = vadd.f32 %v320_v52, %v6363_v1  ;;  %v322_v58 = vpop.f32.mrb[17].mxu0  ;;  %1550 = vmatprep.subr.bf16.mxu0 %v4691_v44  ;;  %3293 = vmatprep.subr.bf16.mxu1 %v5270_v45  ;;  %v624_v44 = vld [vmem:[#allocation7 + $0x2c8] sm:$0xff] }
 0x162   :  { %v323_v60 = vadd.f32 %v322_v58, %v6366_v15  ;;  %v324_v61 = vpop.f32.mrb[18].mxu0  ;;  %1407 = vmatprep.mubr.bf16.mxu0 %v6410_v51  ;;  %1793 = vmatprep.mubr.bf16.mxu1 %v6410_v51  ;;  %v628_v45 = vld [vmem:[#allocation7 + $0x2e8] sm:$0xff] }
 0x163   :  { %v325_v0 = vadd.f32 %v324_v61, %v6363_v1  ;;  %v326_v2 = vpop.f32.mrb[19].mxu0  ;;  %1408 = vmatmul.mubr.bf16.gmra.mrb[76].mxu0 %v6408_v50  ;;  %1794 = vmatmul.mubr.bf16.gmra.mrb[12].mxu1 %v6408_v50  ;;  %v455_v7 = vmax.f32 %v321_v57, 0.0 }
 0x164   :  { %v327_v3 = vadd.f32 %v326_v2, %v6366_v15  ;;  %1551 = vmatpush1.bf16.msra.mxu0 %v4690_v53  ;;  %3294 = vmatpush1.bf16.msra.mxu1 %v5268_v54  ;;  %v456_v10 = vmax.f32 %v323_v60, 0.0  ;;  %v4731_v54 = vcombine.high %v624_v44, %v628_v45  ;;  %v636_v60 = vld [vmem:[#allocation7 + $0x328] sm:$0xff]  ;;  %v5277_v2 = vld [vmem:[#allocation8 + $0x90] ss:$8 sps:$4 sm:$0xff]  }
 0x165   :  { %v457_v8 = vmax.f32 %v325_v0, 0.0  ;;  %1552 = vmatprep.subr.bf16.mxu0 %v4699_v59  ;;  %3295 = vmatprep.subr.bf16.mxu1 %v5273_v6  ;;  %v632_v59 = vld [vmem:[#allocation7 + $0x308] sm:$0xff]  ;;  %v4730_v0 = vcombine.low %v624_v44, %v628_v45 }
 0x166   :  { %v458_v13 = vmax.f32 %v327_v3, 0.0  ;;  %v5279_v3 = vld [vmem:[#allocation8 + $0x94] ss:$8 sps:$4 sm:$0xff]  }
 0x167   :  { %v6420_v18 = vpack.c.bf16 %v457_v8, %v455_v7  ;;  %v4739_v7 = vcombine.high %v632_v59, %v636_v60  ;;  %v6446_v8 = vld [vmem:[#allocation7 + $0x38] sm:$0xff] }
 0x168   :  { %v6422_v19 = vpack.c.bf16 %v458_v13, %v456_v10  ;;  %v330_v20 = vpop.f32.mrb[20].mxu0  ;;  %1553 = vmatpush1.bf16.msra.mxu0 %v4698_v4  ;;  %3296 = vmatpush1.bf16.msra.mxu1 %v5271_v5  ;;  %v6444_v4 = vld [vmem:[#allocation7 + $0x18] sm:$0xff]  ;;  %v640_v13 = vld [vmem:[#allocation7 + $0x348] sm:$0xff] }
 0x169   :  { %v331_v24 = vadd.f32 %v330_v20, %v6363_v1  ;;  %v332_v25 = vpop.f32.mrb[21].mxu0  ;;  %1554 = vmatprep.subr.bf16.mxu0 %v4707_v9  ;;  %3297 = vmatprep.subr.bf16.mxu1 %v5276_v38  ;;  %v4646_v17 = vcombine.low %v6444_v4, %v6446_v8  ;;  %v4746_v38 = vcombine.low %v640_v13, %v644_v16 }
 0x16a   :  { %v333_v27 = vadd.f32 %v332_v25, %v6366_v15  ;;  %v334_v28 = vpop.f32.mrb[22].mxu0  ;;  %1417 = vmatprep.mubr.bf16.mxu0 %v6422_v19  ;;  %1803 = vmatprep.mubr.bf16.mxu1 %v6422_v19  ;;  %v4738_v25 = vcombine.low %v632_v59, %v636_v60 }
 0x16b   :  { %v335_v33 = vadd.f32 %v334_v28, %v6363_v1  ;;  %v336_v34 = vpop.f32.mrb[23].mxu0  ;;  %1418 = vmatmul.mubr.bf16.gmra.mrb[80].mxu0 %v6420_v18  ;;  %1804 = vmatmul.mubr.bf16.gmra.mrb[16].mxu1 %v6420_v18  ;;  %v459_v39 = vmax.f32 %v331_v24, 0.0  ;;  %v4747_v28 = vcombine.high %v640_v13, %v644_v16 }
 0x16c   :  { %v337_v35 = vadd.f32 %v336_v34, %v6366_v15  ;;  %1555 = vmatpush1.bf16.msra.mxu0 %v4706_v21  ;;  %v460_v42 = vmax.f32 %v333_v27, 0.0  ;;  %3298 = vmatpush1.bf16.msra.mxu1 %v5274_v37  ;;  %v652_v34 = vld [vmem:[#allocation7 + $0x3a8] sm:$0xff] }
 0x16d   :  { %v461_v40 = vmax.f32 %v335_v33, 0.0  ;;  %1556 = vmatprep.subr.bf16.mxu0 %v4715_v26  ;;  %3299 = vmatprep.subr.bf16.mxu1 %v5279_v3  ;;  %v648_v33 = vld [vmem:[#allocation7 + $0x388] sm:$0xff] }
 0x16e   :  { %v462_v43 = vmax.f32 %v337_v35, 0.0 }
 0x16f   :  { %v6432_v46 = vpack.c.bf16 %v461_v40, %v459_v39  ;;  %v5280_v39 = vld [vmem:[#allocation8 + $0xa0] ss:$8 sps:$4 sm:$0xff]   ;;  %v5282_v40 = vld [vmem:[#allocation8 + $0xa4] ss:$8 sps:$4 sm:$0xff]  }
 0x170   :  { %v6434_v47 = vpack.c.bf16 %v462_v43, %v460_v42  ;;  %v340_v48 = vpop.f32.mrb[24].mxu0  ;;  %1557 = vmatpush1.bf16.msra.mxu0 %v4714_v36  ;;  %3300 = vmatpush1.bf16.msra.mxu1 %v5277_v2  ;;  %v4755_v43 = vcombine.high %v648_v33, %v652_v34 }
 0x171   :  { %v341_v52 = vadd.f32 %v340_v48, %v6363_v1  ;;  %v342_v53 = vpop.f32.mrb[25].mxu0  ;;  %1558 = vmatprep.subr.bf16.mxu0 %v4723_v41  ;;  %v656_v48 = vld [vmem:[#allocation7 + $0x3c8] sm:$0xff]  ;;  %3301 = vmatprep.subr.bf16.mxu1 %v5282_v40 }
 0x172   :  { %v343_v57 = vadd.f32 %v342_v53, %v6366_v15  ;;  %v344_v58 = vpop.f32.mrb[26].mxu0  ;;  %1427 = vmatprep.mubr.bf16.mxu0 %v6434_v47  ;;  %1813 = vmatprep.mubr.bf16.mxu1 %v6434_v47 }
 0x173   :  { %v345_v61 = vadd.f32 %v344_v58, %v6363_v1  ;;  %v346_v62 = vpop.f32.mrb[27].mxu0  ;;  %1428 = vmatmul.mubr.bf16.gmra.mrb[84].mxu0 %v6432_v46  ;;  %1814 = vmatmul.mubr.bf16.gmra.mrb[20].mxu1 %v6432_v46  ;;  %v463_v5 = vmax.f32 %v341_v52, 0.0 }
 0x174   :  { %v347_v63 = vadd.f32 %v346_v62, %v6366_v15  ;;  %1559 = vmatpush1.bf16.msra.mxu0 %v4722_v49  ;;  %v464_v9 = vmax.f32 %v343_v57, 0.0  ;;  %v660_v49 = vld [vmem:[#allocation7 + $0x3e8] sm:$0xff]  ;;  %3302 = vmatpush1.bf16.msra.mxu1 %v5280_v39  ;;  %v4754_v57 = vcombine.low %v648_v33, %v652_v34 }
 0x175   :  { %v465_v6 = vmax.f32 %v345_v61, 0.0  ;;  %1560 = vmatprep.subr.bf16.mxu0 %v4731_v54  ;;  %v4763_v60 = vcombine.high %v656_v48, %v660_v49  ;;  %v4762_v3 = vcombine.low %v656_v48, %v660_v49 }
 0x176   :  { %v466_v10 = vmax.f32 %v347_v63, 0.0 }
 0x177   :  { %v6450_v20 = vpack.c.bf16 %v465_v6, %v463_v5  ;;  %v5283_v5 = vld [vmem:[#allocation8 + $0xb0] ss:$8 sps:$4 sm:$0xff]   ;;  %v5285_v6 = vld [vmem:[#allocation8 + $0xb4] ss:$8 sps:$4 sm:$0xff]  }
 0x178   :  { %v6452_v21 = vpack.c.bf16 %v466_v10, %v464_v9  ;;  %v350_v24 = vpop.f32.mrb[28].mxu0  ;;  %1561 = vmatpush1.bf16.msra.mxu0 %v4730_v0  ;;  %v4647_v10 = vcombine.high %v6444_v4, %v6446_v8  ;;  %3303 = vmatprep.subr.bf16.mxu1 %v5285_v6  ;;  %v578_v8 = vld [vmem:[#allocation7 + $0x158] sm:$0xff] }
 0x179   :  { %v351_v26 = vadd.f32 %v350_v24, %v6363_v1  ;;  %v352_v27 = vpop.f32.mrb[29].mxu0  ;;  %1562 = vmatprep.subr.bf16.mxu0 %v4739_v7  ;;  %3304 = vmatpush1.bf16.msra.mxu1 %v5283_v5 }
 0x17a   :  { %v353_v29 = vadd.f32 %v352_v27, %v6366_v15  ;;  %v354_v32 = vpop.f32.mrb[30].mxu0  ;;  %1437 = vmatprep.mubr.bf16.mxu0 %v6452_v21  ;;  %1823 = vmatprep.mubr.bf16.mxu1 %v6452_v21 }
 0x17b   :  { %v355_v35 = vadd.f32 %v354_v32, %v6363_v1  ;;  %v356_v36 = vpop.f32.mrb[31].mxu0  ;;  %1438 = vmatmul.mubr.bf16.gmra.mrb[88].mxu0 %v6450_v20  ;;  %1824 = vmatmul.mubr.bf16.gmra.mrb[24].mxu1 %v6450_v20  ;;  %v467_v41 = vmax.f32 %v351_v26, 0.0 }
 0x17c   :  { %v357_v37 = vadd.f32 %v356_v36, %v6366_v15  ;;  %1563 = vmatpush1.bf16.msra.mxu0 %v4738_v25  ;;  %v468_v44 = vmax.f32 %v353_v29, 0.0  ;;  %v5286_v36 = vld [vmem:[#allocation8 + $0xc0] ss:$8 sps:$4 sm:$0xff]  }
 0x17d   :  { %v469_v42 = vmax.f32 %v355_v35, 0.0  ;;  %1564 = vmatprep.subr.bf16.mxu0 %v4747_v28 }
 0x17e   :  { %v470_v45 = vmax.f32 %v357_v37, 0.0  ;;  %v5288_v37 = vld [vmem:[#allocation8 + $0xc4] ss:$8 sps:$4 sm:$0xff]  }
 0x17f   :  { %v6462_v52 = vpack.c.bf16 %v469_v42, %v467_v41  ;;  %3305 = vmatprep.subr.bf16.mxu1 %v5288_v37 }
 0x180   :  { %v6464_v53 = vpack.c.bf16 %v470_v45, %v468_v44  ;;  %v360_v54 = vpop.f32.mrb[32].mxu0  ;;  %1565 = vmatpush1.bf16.msra.mxu0 %v4746_v38  ;;  %3306 = vmatpush1.bf16.msra.mxu1 %v5286_v36 }
 0x181   :  { %v361_v58 = vadd.f32 %v360_v54, %v6363_v1  ;;  %v362_v59 = vpop.f32.mrb[33].mxu0  ;;  %1566 = vmatprep.subr.bf16.mxu0 %v4755_v43 }
 0x182   :  { %v363_v61 = vadd.f32 %v362_v59, %v6366_v15  ;;  %v364_v62 = vpop.f32.mrb[34].mxu0  ;;  %1447 = vmatprep.mubr.bf16.mxu0 %v6464_v53  ;;  %1833 = vmatprep.mubr.bf16.mxu1 %v6464_v53 }
 0x183   :  { %v365_v63 = vadd.f32 %v364_v62, %v6363_v1  ;;  %v366_v0 = vpop.f32.mrb[35].mxu0  ;;  %1448 = vmatmul.mubr.bf16.gmra.mrb[92].mxu0 %v6462_v52  ;;  %1834 = vmatmul.mubr.bf16.gmra.mrb[28].mxu1 %v6462_v52  ;;  %v471_v7 = vmax.f32 %v361_v58, 0.0 }
 0x184   :  { %v367_v2 = vadd.f32 %v366_v0, %v6366_v15  ;;  %1567 = vmatpush1.bf16.msra.mxu0 %v4754_v57  ;;  %v472_v13 = vmax.f32 %v363_v61, 0.0  ;;  %v5291_v61 = vld [vmem:[#allocation8 + $0xd4] ss:$8 sps:$4 sm:$0xff]  }
 0x185   :  { %v473_v9 = vmax.f32 %v365_v63, 0.0  ;;  %1568 = vmatprep.subr.bf16.mxu0 %v4763_v60  ;;  %v5289_v60 = vld [vmem:[#allocation8 + $0xd0] ss:$8 sps:$4 sm:$0xff]   ;;  %3307 = vmatprep.subr.bf16.mxu1 %v5291_v61  ;;  %v5294_v61 = vld [vmem:[#allocation8 + $0xe4] ss:$8 sps:$4 sm:$0xff]  }
 0x186   :  { %v474_v16 = vmax.f32 %v367_v2, 0.0  ;;  %3308 = vmatpush1.bf16.msra.mxu1 %v5289_v60 }
 0x187   :  { %v6476_v24 = vpack.c.bf16 %v473_v9, %v471_v7  ;;  %3309 = vmatprep.subr.bf16.mxu1 %v5294_v61 }
 0x188   :  { %v6478_v25 = vpack.c.bf16 %v474_v16, %v472_v13  ;;  %v370_v26 = vpop.f32.mrb[36].mxu0  ;;  %1569 = vmatpush1.bf16.msra.mxu0 %v4762_v3 }
 0x189   :  { %v371_v27 = vadd.f32 %v370_v26, %v6363_v1  ;;  %v372_v28 = vpop.f32.mrb[37].mxu0  ;;  %1924 = vmatprep.subr.bf16.mxu0 %v4647_v10 }
 0x18a   :  { %v373_v29 = vadd.f32 %v372_v28, %v6366_v15  ;;  %v374_v32 = vpop.f32.mrb[38].mxu0  ;;  %1457 = vmatprep.mubr.bf16.mxu0 %v6478_v25  ;;  %1843 = vmatprep.mubr.bf16.mxu1 %v6478_v25 }
 0x18b   :  { %v375_v33 = vadd.f32 %v374_v32, %v6363_v1  ;;  %v376_v34 = vpop.f32.mrb[39].mxu0  ;;  %1458 = vmatmul.mubr.bf16.gmra.mrb[96].mxu0 %v6476_v24  ;;  %1844 = vmatmul.mubr.bf16.gmra.mrb[32].mxu1 %v6476_v24  ;;  %v475_v38 = vmax.f32 %v371_v27, 0.0 }
 0x18c   :  { %v377_v35 = vadd.f32 %v376_v34, %v6366_v15  ;;  %v476_v40 = vmax.f32 %v373_v29, 0.0 }
 0x18d   :  { %v477_v39 = vmax.f32 %v375_v33, 0.0 }
 0x18e   :  { %v478_v41 = vmax.f32 %v377_v35, 0.0 }
 0x18f   :  { %v6488_v42 = vpack.c.bf16 %v477_v39, %v475_v38 }
 0x190   :  { %v6490_v43 = vpack.c.bf16 %v478_v41, %v476_v40  ;;  %v380_v44 = vpop.f32.mrb[40].mxu0 }
 0x191   :  { %v381_v45 = vadd.f32 %v380_v44, %v6363_v1  ;;  %v382_v48 = vpop.f32.mrb[41].mxu0 }
 0x192   :  { %v383_v49 = vadd.f32 %v382_v48, %v6366_v15  ;;  %v384_v54 = vpop.f32.mrb[42].mxu0  ;;  %1467 = vmatprep.mubr.bf16.mxu0 %v6490_v43  ;;  %1853 = vmatprep.mubr.bf16.mxu1 %v6490_v43 }
 0x193   :  { %v385_v57 = vadd.f32 %v384_v54, %v6363_v1  ;;  %v386_v58 = vpop.f32.mrb[43].mxu0  ;;  %1468 = vmatmul.mubr.bf16.gmra.mrb[100].mxu0 %v6488_v42  ;;  %1854 = vmatmul.mubr.bf16.gmra.mrb[36].mxu1 %v6488_v42  ;;  %v479_v62 = vmax.f32 %v381_v45, 0.0 }
 0x194   :  { %v387_v59 = vadd.f32 %v386_v58, %v6366_v15  ;;  %v480_v0 = vmax.f32 %v383_v49, 0.0 }
 0x195   :  { %v481_v63 = vmax.f32 %v385_v57, 0.0 }
 0x196   :  { %v482_v2 = vmax.f32 %v387_v59, 0.0 }
 0x197   :  { %v6500_v3 = vpack.c.bf16 %v481_v63, %v479_v62 }
 0x198   :  { %v6502_v5 = vpack.c.bf16 %v482_v2, %v480_v0  ;;  %v390_v6 = vpop.f32.mrb[44].mxu0  ;;  %v5292_v0 = vld [vmem:[#allocation8 + $0xe0] ss:$8 sps:$4 sm:$0xff]  }
 0x199   :  { %v391_v7 = vadd.f32 %v390_v6, %v6363_v1  ;;  %v392_v9 = vpop.f32.mrb[45].mxu0  ;;  %3310 = vmatpush1.bf16.msra.mxu1 %v5292_v0 }
 0x19a   :  { %v393_v10 = vadd.f32 %v392_v9, %v6366_v15  ;;  %v394_v13 = vpop.f32.mrb[46].mxu0  ;;  %1477 = vmatprep.mubr.bf16.mxu0 %v6502_v5  ;;  %1863 = vmatprep.mubr.bf16.mxu1 %v6502_v5 }
 0x19b   :  { %v395_v16 = vadd.f32 %v394_v13, %v6363_v1  ;;  %v396_v26 = vpop.f32.mrb[47].mxu0  ;;  %1478 = vmatmul.mubr.bf16.gmra.mrb[104].mxu0 %v6500_v3  ;;  %1864 = vmatmul.mubr.bf16.gmra.mrb[40].mxu1 %v6500_v3  ;;  %v483_v28 = vmax.f32 %v391_v7, 0.0 }
 0x19c   :  { %v397_v27 = vadd.f32 %v396_v26, %v6366_v15  ;;  %v484_v32 = vmax.f32 %v393_v10, 0.0 }
 0x19d   :  { %v485_v29 = vmax.f32 %v395_v16, 0.0 }
 0x19e   :  { %v486_v33 = vmax.f32 %v397_v27, 0.0 }
 0x19f   :  { %v6512_v34 = vpack.c.bf16 %v485_v29, %v483_v28 }
 0x1a0   :  { %v6514_v35 = vpack.c.bf16 %v486_v33, %v484_v32  ;;  %v400_v36 = vpop.f32.mrb[48].mxu0  ;;  %v5297_v33 = vld [vmem:[#allocation8 + $0xf4] ss:$8 sps:$4 sm:$0xff]  }
 0x1a1   :  { %v401_v37 = vadd.f32 %v400_v36, %v6363_v1  ;;  %v402_v38 = vpop.f32.mrb[49].mxu0  ;;  %3311 = vmatprep.subr.bf16.mxu1 %v5297_v33 }
 0x1a2   :  { %v403_v39 = vadd.f32 %v402_v38, %v6366_v15  ;;  %v404_v40 = vpop.f32.mrb[50].mxu0  ;;  %1487 = vmatprep.mubr.bf16.mxu0 %v6514_v35  ;;  %1873 = vmatprep.mubr.bf16.mxu1 %v6514_v35  ;;  %v5295_v38 = vld [vmem:[#allocation8 + $0xf0] ss:$8 sps:$4 sm:$0xff]  }
 0x1a3   :  { %v405_v41 = vadd.f32 %v404_v40, %v6363_v1  ;;  %v406_v44 = vpop.f32.mrb[51].mxu0  ;;  %1488 = vmatmul.mubr.bf16.gmra.mrb[108].mxu0 %v6512_v34  ;;  %1874 = vmatmul.mubr.bf16.gmra.mrb[44].mxu1 %v6512_v34  ;;  %v487_v48 = vmax.f32 %v401_v37, 0.0 }
 0x1a4   :  { %v407_v45 = vadd.f32 %v406_v44, %v6366_v15  ;;  %v488_v54 = vmax.f32 %v403_v39, 0.0  ;;  %3312 = vmatpush1.bf16.msra.mxu1 %v5295_v38  ;;  %v554_v38 = vld [vmem:[#allocation7 + $0x98] sm:$0xff] }
 0x1a5   :  { %v489_v49 = vmax.f32 %v405_v41, 0.0 }
 0x1a6   :  { %v490_v57 = vmax.f32 %v407_v45, 0.0 }
 0x1a7   :  { %v6524_v58 = vpack.c.bf16 %v489_v49, %v487_v48 }
 0x1a8   :  { %v6526_v59 = vpack.c.bf16 %v490_v57, %v488_v54  ;;  %v410_v60 = vpop.f32.mrb[52].mxu0 }
 0x1a9   :  { %v411_v62 = vadd.f32 %v410_v60, %v6363_v1  ;;  %v412_v63 = vpop.f32.mrb[53].mxu0 }
 0x1aa   :  { %v413_v2 = vadd.f32 %v412_v63, %v6366_v15  ;;  %v414_v6 = vpop.f32.mrb[54].mxu0  ;;  %1497 = vmatprep.mubr.bf16.mxu0 %v6526_v59  ;;  %1883 = vmatprep.mubr.bf16.mxu1 %v6526_v59  ;;  %v5300_v63 = vld [vmem:[#allocation8 + $0x104] ss:$8 sps:$4 sm:$0xff]  }
 0x1ab   :  { %v415_v7 = vadd.f32 %v414_v6, %v6363_v1  ;;  %v416_v9 = vpop.f32.mrb[55].mxu0  ;;  %1498 = vmatmul.mubr.bf16.gmra.mrb[112].mxu0 %v6524_v58  ;;  %1884 = vmatmul.mubr.bf16.gmra.mrb[48].mxu1 %v6524_v58  ;;  %v491_v13 = vmax.f32 %v411_v62, 0.0 }
 0x1ac   :  { %v417_v10 = vadd.f32 %v416_v9, %v6366_v15  ;;  %v492_v26 = vmax.f32 %v413_v2, 0.0  ;;  %3474 = vmatprep.subr.bf16.mxu1 %v5300_v63 }
 0x1ad   :  { %v493_v16 = vmax.f32 %v415_v7, 0.0 }
 0x1ae   :  { %v494_v27 = vmax.f32 %v417_v10, 0.0 }
 0x1af   :  { %v6536_v28 = vpack.c.bf16 %v493_v16, %v491_v13 }
 0x1b0   :  { %v6538_v29 = vpack.c.bf16 %v494_v27, %v492_v26  ;;  %v420_v32 = vpop.f32.mrb[56].mxu0 }
 0x1b1   :  { %v421_v36 = vadd.f32 %v420_v32, %v6363_v1  ;;  %v422_v37 = vpop.f32.mrb[57].mxu0 }
 0x1b2   :  { %v423_v39 = vadd.f32 %v422_v37, %v6366_v15  ;;  %v424_v40 = vpop.f32.mrb[58].mxu0  ;;  %1507 = vmatprep.mubr.bf16.mxu0 %v6538_v29  ;;  %1893 = vmatprep.mubr.bf16.mxu1 %v6538_v29 }
 0x1b3   :  { %v425_v41 = vadd.f32 %v424_v40, %v6363_v1  ;;  %v426_v44 = vpop.f32.mrb[59].mxu0  ;;  %1508 = vmatmul.mubr.bf16.gmra.mrb[116].mxu0 %v6536_v28  ;;  %1894 = vmatmul.mubr.bf16.gmra.mrb[52].mxu1 %v6536_v28  ;;  %v495_v48 = vmax.f32 %v421_v36, 0.0 }
 0x1b4   :  { %v427_v45 = vadd.f32 %v426_v44, %v6366_v15  ;;  %v496_v54 = vmax.f32 %v423_v39, 0.0  ;;  %v558_v39 = vld [vmem:[#allocation7 + $0xb8] sm:$0xff] }
 0x1b5   :  { %v497_v49 = vmax.f32 %v425_v41, 0.0  ;;  %v4663_v41 = vcombine.high %v554_v38, %v558_v39  ;;  %v562_v44 = vld [vmem:[#allocation7 + $0xd8] sm:$0xff] }
 0x1b6   :  { %v498_v57 = vmax.f32 %v427_v45, 0.0  ;;  %v566_v45 = vld [vmem:[#allocation7 + $0xf8] sm:$0xff] }
 0x1b7   :  { %v6548_v60 = vpack.c.bf16 %v497_v49, %v495_v48  ;;  %v4662_v48 = vcombine.low %v554_v38, %v558_v39  ;;  %v4671_v49 = vcombine.high %v562_v44, %v566_v45  ;;  %v614_v38 = vld [vmem:[#allocation7 + $0x278] sm:$0xff] }
 0x1b8   :  { %v6550_v61 = vpack.c.bf16 %v498_v57, %v496_v54  ;;  %v430_v62 = vpop.f32.mrb[60].mxu0  ;;  %v570_v54 = vld [vmem:[#allocation7 + $0x118] sm:$0xff] }
 0x1b9   :  { %v431_v0 = vadd.f32 %v430_v62, %v6363_v1  ;;  %v432_v2 = vpop.f32.mrb[61].mxu0  ;;  %v574_v57 = vld [vmem:[#allocation7 + $0x138] sm:$0xff]  ;;  %v4670_v62 = vcombine.low %v562_v44, %v566_v45 }
 0x1ba   :  { %v433_v6 = vadd.f32 %v432_v2, %v6366_v15  ;;  %v434_v7 = vpop.f32.mrb[62].mxu0  ;;  %1517 = vmatprep.mubr.bf16.mxu0 %v6550_v61  ;;  %1903 = vmatprep.mubr.bf16.mxu1 %v6550_v61  ;;  %v4679_v4 = vcombine.high %v570_v54, %v574_v57  ;;  %v4678_v63 = vcombine.low %v570_v54, %v574_v57  ;;  %v586_v2 = vld [vmem:[#allocation7 + $0x198] sm:$0xff] }
 0x1bb   :  { %v435_v9 = vadd.f32 %v434_v7, %v6363_v1  ;;  %v436_v10 = vpop.f32.mrb[63].mxu0  ;;  %1518 = vmatmul.mubr.bf16.gmra.mrb[120].mxu0 %v6548_v60  ;;  %1904 = vmatmul.mubr.bf16.gmra.mrb[56].mxu1 %v6548_v60  ;;  %v499_v16 = vmax.f32 %v431_v0, 0.0  ;;  %v546_v1 = vld [vmem:[#allocation7 + $0x58] sm:$0xff] }
 0x1bc   :  { %v437_v13 = vadd.f32 %v436_v10, %v6366_v15  ;;  %v500_v27 = vmax.f32 %v433_v6, 0.0  ;;  %v550_v15 = vld [vmem:[#allocation7 + $0x78] sm:$0xff] }
 0x1bd   :  { %v501_v26 = vmax.f32 %v435_v9, 0.0  ;;  %v4655_v37 = vcombine.high %v546_v1, %v550_v15  ;;  %v4654_v40 = vcombine.low %v546_v1, %v550_v15  ;;  %v590_v6 = vld [vmem:[#allocation7 + $0x1b8] sm:$0xff] }
 0x1be   :  { %v502_v32 = vmax.f32 %v437_v13, 0.0  ;;  %v4695_v9 = vcombine.high %v586_v2, %v590_v6  ;;  %v594_v10 = vld [vmem:[#allocation7 + $0x1d8] sm:$0xff] }
 0x1bf   :  { %v6560_v33 = vpack.c.bf16 %v501_v26, %v499_v16  ;;  %v598_v13 = vld [vmem:[#allocation7 + $0x1f8] sm:$0xff]  ;;  %v4694_v16 = vcombine.low %v586_v2, %v590_v6 }
 0x1c0   :  { %v6562_v36 = vpack.c.bf16 %v502_v32, %v500_v27  ;;  %v4703_v26 = vcombine.high %v594_v10, %v598_v13  ;;  %v602_v27 = vld [vmem:[#allocation7 + $0x218] sm:$0xff]  ;;  %v4702_v1 = vcombine.low %v594_v10, %v598_v13 }
 0x1c1   :  { %v606_v32 = vld [vmem:[#allocation7 + $0x238] sm:$0xff] }
 0x1c2   :  { %1527 = vmatprep.mubr.bf16.mxu0 %v6562_v36  ;;  %1913 = vmatprep.mubr.bf16.mxu1 %v6562_v36  ;;  %v4711_v15 = vcombine.high %v602_v27, %v606_v32  ;;  %v4710_v39 = vcombine.low %v602_v27, %v606_v32  ;;  %v622_v44 = vld [vmem:[#allocation7 + $0x2b8] sm:$0xff] }
 0x1c3   :  { %1528 = vmatmul.mubr.bf16.gmra.mrb[124].mxu0 %v6560_v33  ;;  %1914 = vmatmul.mubr.bf16.gmra.mrb[60].mxu1 %v6560_v33  ;;  %v630_v54 = vld [vmem:[#allocation7 + $0x2f8] sm:$0xff] }
 0x1c4   :  { %1570 = vmatprep.mubr.bf16.mxu0 %v6374_v31  ;;  %v646_v2 = vld [vmem:[#allocation7 + $0x378] sm:$0xff] }
 0x1c5   :  { %v654_v10 = vld [vmem:[#allocation7 + $0x3b8] sm:$0xff] }
 0x1c6   :  { %v662_v27 = vld [vmem:[#allocation7 + $0x3f8] sm:$0xff] }
 0x1cb   :  { %1571 = vmatmul.mubr.bf16.vlgmr.msra.gmra.mrb[128].mxu0 %v6372_v30 }
 0x1cc   :  { %1580 = vmatprep.mubr.bf16.mxu0 %v6386_v56  ;;  %1925 = vmatpush1.bf16.msra.mxu0 %v4646_v17  ;;  %v582_v17 = vld [vmem:[#allocation7 + $0x178] sm:$0xff] }
 0x1cd   :  { %1926 = vmatprep.subr.bf16.mxu0 %v4655_v37  ;;  %v4687_v0 = vcombine.high %v578_v8, %v582_v17  ;;  %v4686_v7 = vcombine.low %v578_v8, %v582_v17  ;;  %v610_v37 = vld [vmem:[#allocation7 + $0x258] sm:$0xff] }
 0x1ce   :  { %v4718_v45 = vcombine.low %v610_v37, %v614_v38  ;;  %v638_v8 = vld [vmem:[#allocation7 + $0x338] sm:$0xff] }
 0x1d0   :  { %1927 = vmatpush1.bf16.msra.mxu0 %v4654_v40  ;;  %v4719_v40 = vcombine.high %v610_v37, %v614_v38  ;;  %v683_v37 = vsub.s32 4, %v6351_v11  ;;  %v663_v38 = vld [vmem:[%s7569_s4] sm:$0xff] }
 0x1d1   :  { %1928 = vmatprep.subr.bf16.mxu0 %v4663_v41  ;;  %v618_v41 = vld [vmem:[#allocation7 + $0x298] sm:$0xff] }
 0x1d2   :  { %v4726_v57 = vcombine.low %v618_v41, %v622_v44 }
 0x1d3   :  { %1581 = vmatmul.mubr.bf16.gmra.mrb[132].mxu0 %v6384_v55 }
 0x1d4   :  { %1590 = vmatprep.mubr.bf16.mxu0 %v6398_v23  ;;  %1929 = vmatpush1.bf16.msra.mxu0 %v4662_v48  ;;  %v4727_v48 = vcombine.high %v618_v41, %v622_v44  ;;  %v6601_v41 = vrot.slane %v663_v38, %v683_v37  ;;  %v6605_v44 = vrot.slane %v663_v38, %v6360_v14 }
 0x1d5   :  { %1930 = vmatprep.subr.bf16.mxu0 %v4671_v49  ;;  %v626_v49 = vld [vmem:[#allocation7 + $0x2d8] sm:$0xff] }
 0x1d6   :  { %v4734_v17 = vcombine.low %v626_v49, %v630_v54 }
 0x1d8   :  { %1931 = vmatpush1.bf16.msra.mxu0 %v4670_v62  ;;  %v4735_v62 = vcombine.high %v626_v49, %v630_v54 }
 0x1d9   :  { %1932 = vmatprep.subr.bf16.mxu0 %v4679_v4  ;;  %v634_v4 = vld [vmem:[#allocation7 + $0x318] sm:$0xff] }
 0x1da   :  { %v4742_v6 = vcombine.low %v634_v4, %v638_v8 }
 0x1db   :  { %1591 = vmatmul.mubr.bf16.gmra.mrb[136].mxu0 %v6396_v22 }
 0x1dc   :  { %1600 = vmatprep.mubr.bf16.mxu0 %v6410_v51  ;;  %1933 = vmatpush1.bf16.msra.mxu0 %v4678_v63  ;;  %v4743_v63 = vcombine.high %v634_v4, %v638_v8 }
 0x1dd   :  { %1934 = vmatprep.subr.bf16.mxu0 %v4687_v0  ;;  %v642_v0 = vld [vmem:[#allocation7 + $0x358] sm:$0xff] }
 0x1de   :  { %v4750_v13 = vcombine.low %v642_v0, %v646_v2 }
 0x1e0   :  { %1935 = vmatpush1.bf16.msra.mxu0 %v4686_v7  ;;  %v4751_v7 = vcombine.high %v642_v0, %v646_v2 }
 0x1e1   :  { %1936 = vmatprep.subr.bf16.mxu0 %v4695_v9  ;;  %v650_v9 = vld [vmem:[#allocation7 + $0x398] sm:$0xff] }
 0x1e2   :  { %v4758_v32 = vcombine.low %v650_v9, %v654_v10 }
 0x1e3   :  { %1601 = vmatmul.mubr.bf16.gmra.mrb[140].mxu0 %v6408_v50 }
 0x1e4   :  { %1610 = vmatprep.mubr.bf16.mxu0 %v6422_v19  ;;  %1937 = vmatpush1.bf16.msra.mxu0 %v4694_v16  ;;  %v4759_v16 = vcombine.high %v650_v9, %v654_v10 }
 0x1e5   :  { %1938 = vmatprep.subr.bf16.mxu0 %v4703_v26  ;;  %v658_v26 = vld [vmem:[#allocation7 + $0x3d8] sm:$0xff] }
 0x1e8   :  { %1939 = vmatpush1.bf16.msra.mxu0 %v4702_v1  ;;  %v4767_v1 = vcombine.high %v658_v26, %v662_v27 }
 0x1e9   :  { %1940 = vmatprep.subr.bf16.mxu0 %v4711_v15  ;;  %v4766_v15 = vcombine.low %v658_v26, %v662_v27 }
 0x1eb   :  { %1611 = vmatmul.mubr.bf16.gmra.mrb[144].mxu0 %v6420_v18 }
 0x1ec   :  { %1620 = vmatprep.mubr.bf16.mxu0 %v6434_v47  ;;  %1941 = vmatpush1.bf16.msra.mxu0 %v4710_v39  ;;  %v687_v39 = vsub.s32 5, %v6351_v11 }
 0x1ed   :  { %1942 = vmatprep.subr.bf16.mxu0 %v4719_v40  ;;  %v6599_v40 = vrot.slane %v663_v38, %v6354_v12 }
 0x1f0   :  { %1943 = vmatpush1.bf16.msra.mxu0 %v4718_v45  ;;  %v6607_v45 = vrot.slane %v663_v38, %v687_v39 }
 0x1f1   :  { %1944 = vmatprep.subr.bf16.mxu0 %v4727_v48 }
 0x1f3   :  { %1621 = vmatmul.mubr.bf16.gmra.mrb[148].mxu0 %v6432_v46 }
 0x1f4   :  { %1630 = vmatprep.mubr.bf16.mxu0 %v6452_v21  ;;  %1945 = vmatpush1.bf16.msra.mxu0 %v4726_v57 }
 0x1f5   :  { %1946 = vmatprep.subr.bf16.mxu0 %v4735_v62 }
 0x1f8   :  { %1947 = vmatpush1.bf16.msra.mxu0 %v4734_v17 }
 0x1f9   :  { %1948 = vmatprep.subr.bf16.mxu0 %v4743_v63 }
 0x1fb   :  { %1631 = vmatmul.mubr.bf16.gmra.mrb[152].mxu0 %v6450_v20 }
 0x1fc   :  { %1640 = vmatprep.mubr.bf16.mxu0 %v6464_v53  ;;  %1949 = vmatpush1.bf16.msra.mxu0 %v4742_v6 }
 0x1fd   :  { %1950 = vmatprep.subr.bf16.mxu0 %v4751_v7 }
 0x200   :  { %1951 = vmatpush1.bf16.msra.mxu0 %v4750_v13 }
 0x201   :  { %1952 = vmatprep.subr.bf16.mxu0 %v4759_v16 }
 0x203   :  { %1641 = vmatmul.mubr.bf16.gmra.mrb[156].mxu0 %v6462_v52 }
 0x204   :  { %1650 = vmatprep.mubr.bf16.mxu0 %v6478_v25  ;;  %1953 = vmatpush1.bf16.msra.mxu0 %v4758_v32 }
 0x205   :  { %1954 = vmatprep.subr.bf16.mxu0 %v4767_v1 }
 0x208   :  { %1955 = vmatpush1.bf16.msra.mxu0 %v4766_v15 }
 0x20b   :  { %1651 = vmatmul.mubr.bf16.gmra.mrb[160].mxu0 %v6476_v24 }
 0x20c   :  { %1660 = vmatprep.mubr.bf16.mxu0 %v6490_v43 }
 0x213   :  { %1661 = vmatmul.mubr.bf16.gmra.mrb[164].mxu0 %v6488_v42 }
 0x214   :  { %1670 = vmatprep.mubr.bf16.mxu0 %v6502_v5 }
 0x21b   :  { %1671 = vmatmul.mubr.bf16.gmra.mrb[168].mxu0 %v6500_v3 }
 0x21c   :  { %1680 = vmatprep.mubr.bf16.mxu0 %v6514_v35 }
 0x21e   :  { %v1379_v48 = vpop.f32.mrb[64].mxu0  ;;  %v1765_v49 = vpop.f32.mrb[0].mxu1 }
 0x21f   :  { %v1380_v54 = vadd.f32 %v1379_v48, %v6599_v40  ;;  %v1766_v57 = vadd.f32 %v1765_v49, %v6601_v41  ;;  %v1381_v62 = vpop.f32.mrb[65].mxu0  ;;  %v1767_v4 = vpop.f32.mrb[1].mxu1 }
 0x220   :  { %v1382_v8 = vadd.f32 %v1381_v62, %v6605_v44  ;;  %v1768_v17 = vadd.f32 %v1767_v4, %v6607_v45  ;;  %v1383_v63 = vpop.f32.mrb[66].mxu0  ;;  %v1769_v0 = vpop.f32.mrb[2].mxu1 }
 0x221   :  { %5442 = vtanh.f32 %v1380_v54  ;;  %v1384_v2 = vadd.f32 %v1383_v63, %v6599_v40  ;;  %v1385_v6 = vpop.f32.mrb[67].mxu0  ;;  %v1771_v7 = vpop.f32.mrb[3].mxu1  ;;  %v1770_v9 = vadd.f32 %v1769_v0, %v6601_v41 }
 0x222   :  { %5444 = vtanh.f32 %v1766_v57  ;;  %v1386_v10 = vadd.f32 %v1385_v6, %v6605_v44  ;;  %v1772_v13 = vadd.f32 %v1771_v7, %v6607_v45 }
 0x223   :  { %5446 = vtanh.f32 %v1382_v8  ;;  %1681 = vmatmul.mubr.bf16.gmra.mrb[172].mxu0 %v6512_v34 }
 0x224   :  { %5448 = vtanh.f32 %v1768_v17  ;;  %1690 = vmatprep.mubr.bf16.mxu0 %v6526_v59 }
 0x225   :  { %5450 = vtanh.f32 %v1384_v2 }
 0x226   :  { %5452 = vtanh.f32 %v1770_v9  ;;  %v1389_v16 = vpop.f32.mrb[68].mxu0  ;;  %v1775_v26 = vpop.f32.mrb[4].mxu1 }
 0x227   :  { %5454 = vtanh.f32 %v1386_v10  ;;  %v1390_v27 = vadd.f32 %v1389_v16, %v6599_v40  ;;  %v1776_v32 = vadd.f32 %v1775_v26, %v6601_v41  ;;  %v1391_v1 = vpop.f32.mrb[69].mxu0  ;;  %v1777_v15 = vpop.f32.mrb[5].mxu1 }
 0x228   :  { %5456 = vtanh.f32 %v1772_v13  ;;  %v1392_v37 = vadd.f32 %v1391_v1, %v6605_v44  ;;  %v1778_v38 = vadd.f32 %v1777_v15, %v6607_v45  ;;  %v1393_v39 = vpop.f32.mrb[70].mxu0  ;;  %v1779_v48 = vpop.f32.mrb[6].mxu1 }
 0x229   :  { %5458 = vtanh.f32 %v1390_v27  ;;  %v1394_v49 = vadd.f32 %v1393_v39, %v6599_v40  ;;  %v1395_v54 = vpop.f32.mrb[71].mxu0  ;;  %v1781_v57 = vpop.f32.mrb[7].mxu1  ;;  %v1780_v62 = vadd.f32 %v1779_v48, %v6601_v41 }
 0x22a   :  { %5460 = vtanh.f32 %v1776_v32  ;;  %v1396_v8 = vadd.f32 %v1395_v54, %v6605_v44  ;;  %v1782_v63 = vadd.f32 %v1781_v57, %v6607_v45  ;;  %v5306_v57 = vld [vmem:[#allocation8 + $0x124] ss:$8 sps:$4 sm:$0xff]  }
 0x22b   :  { %v5443_v4 = vpop.eup %5442  ;;  %5462 = vtanh.f32 %v1392_v37  ;;  %1691 = vmatmul.mubr.bf16.gmra.mrb[176].mxu0 %v6524_v58 }
 0x22c   :  { %v6627_v17 = vpop.eup %5444  ;;  %5464 = vtanh.f32 %v1778_v38  ;;  %1700 = vmatprep.mubr.bf16.mxu0 %v6538_v29 }
 0x22d   :  { %7611 = vst [vmem:[#allocation15_spill] sm:$0xff] %v6627_v17  ;;  %v5447_v0 = vpop.eup %5446  ;;  %5466 = vtanh.f32 %v1394_v49 }
 0x22e   :  { %v6631_v2 = vpop.eup %5448  ;;  %5468 = vtanh.f32 %v1780_v62  ;;  %v1399_v6 = vpop.f32.mrb[72].mxu0 }
 0x22f   :  { %v1785_v7 = vpop.f32.mrb[8].mxu1  ;;  %v5451_v9 = vpop.eup %5450  ;;  %5470 = vtanh.f32 %v1396_v8  ;;  %v1400_v10 = vadd.f32 %v1399_v6, %v6599_v40  ;;  %v5298_v6 = vld [vmem:[#allocation8 + $0x100] ss:$8 sps:$4 sm:$0xff]  }
 0x230   :  { %v1786_v13 = vadd.f32 %v1785_v7, %v6601_v41  ;;  %v1401_v16 = vpop.f32.mrb[73].mxu0  ;;  %v1787_v26 = vpop.f32.mrb[9].mxu1  ;;  %5472 = vtanh.f32 %v1782_v63  ;;  %v2373_v38 = vpack.c.bf16 %v5451_v9, %v5443_v4  ;;  %v5303_v9 = vld [vmem:[#allocation8 + $0x114] ss:$8 sps:$4 sm:$0xff]  }
 0x231   :  { %v6635_v27 = vpop.eup %5452  ;;  %v1402_v32 = vadd.f32 %v1401_v16, %v6605_v44  ;;  %v1788_v1 = vadd.f32 %v1787_v26, %v6607_v45  ;;  %v1403_v15 = vpop.f32.mrb[74].mxu0  ;;  %5474 = vtanh.f32 %v1400_v10 }
 0x232   :  { %7612 = vst [vmem:[#allocation16_spill] sm:$0xff] %v6635_v27  ;;  %v1789_v37 = vpop.f32.mrb[10].mxu1  ;;  %v5455_v39 = vpop.eup %5454  ;;  %v1404_v48 = vadd.f32 %v1403_v15, %v6599_v40  ;;  %5476 = vtanh.f32 %v1786_v13 }
 0x233   :  { %v1405_v49 = vpop.f32.mrb[75].mxu0  ;;  %v1791_v54 = vpop.f32.mrb[11].mxu1  ;;  %v1790_v8 = vadd.f32 %v1789_v37, %v6601_v41  ;;  %v2374_v63 = vpack.c.bf16 %v5455_v39, %v5447_v0  ;;  %5478 = vtanh.f32 %v1402_v32  ;;  %1701 = vmatmul.mubr.bf16.gmra.mrb[180].mxu0 %v6536_v28  ;;  %v5301_v37 = vld [vmem:[#allocation8 + $0x110] ss:$8 sps:$4 sm:$0xff]  }
 0x234   :  { %v6642_v62 = vpop.eup %5456  ;;  %v1406_v4 = vadd.f32 %v1405_v49, %v6605_v44  ;;  %5480 = vtanh.f32 %v1788_v1  ;;  %v1792_v26 = vadd.f32 %v1791_v54, %v6607_v45  ;;  %1710 = vmatprep.mubr.bf16.mxu0 %v6550_v61 }
 0x235   :  { %v5459_v7 = vpop.eup %5458  ;;  %3313 = vmatprep.mubr.bf16.mxu1 %v2374_v63  ;;  %5482 = vtanh.f32 %v1404_v48 }
 0x236   :  { %v6649_v16 = vpop.eup %5460  ;;  %3314 = vmatmul.mubr.bf16.vlgmr.msra.gmra.mrb[64].mxu1 %v2373_v38  ;;  %5484 = vtanh.f32 %v1790_v8  ;;  %v1409_v32 = vpop.f32.mrb[76].mxu0 }
 0x237   :  { %7613 = vst [vmem:[#allocation17_spill] sm:$0xff] %v6649_v16  ;;  %v5463_v0 = vpop.eup %5462  ;;  %3475 = vmatpush1.bf16.msra.mxu1 %v5298_v6  ;;  %v1795_v15 = vpop.f32.mrb[12].mxu1  ;;  %5486 = vtanh.f32 %v1406_v4  ;;  %v1410_v49 = vadd.f32 %v1409_v32, %v6599_v40 }
 0x238   :  { %v6653_v13 = vpop.eup %5464  ;;  %v1796_v1 = vadd.f32 %v1795_v15, %v6601_v41  ;;  %v1411_v54 = vpop.f32.mrb[77].mxu0  ;;  %3476 = vmatprep.subr.bf16.mxu1 %v5303_v9  ;;  %5488 = vtanh.f32 %v1792_v26  ;;  %v5312_v9 = vld [vmem:[#allocation8 + $0x144] ss:$8 sps:$4 sm:$0xff]  }
 0x239   :  { %7614 = vst [vmem:[#allocation18_spill] sm:$0xff] %v6653_v13  ;;  %v5467_v39 = vpop.eup %5466  ;;  %v1797_v63 = vpop.f32.mrb[13].mxu1  ;;  %v1412_v38 = vadd.f32 %v1411_v54, %v6605_v44  ;;  %5490 = vtanh.f32 %v1410_v49 }
 0x23a   :  { %v6657_v10 = vpop.eup %5468  ;;  %v1798_v48 = vadd.f32 %v1797_v63, %v6607_v45  ;;  %v1413_v8 = vpop.f32.mrb[78].mxu0  ;;  %v2381_v14 = vpack.c.bf16 %v5467_v39, %v5459_v7  ;;  %5492 = vtanh.f32 %v1796_v1  ;;  %v5304_v63 = vld [vmem:[#allocation8 + $0x120] ss:$8 sps:$4 sm:$0xff]   ;;  %v5309_v39 = vld [vmem:[#allocation8 + $0x134] ss:$8 sps:$4 sm:$0xff]  }
 0x23b   :  { %7615 = vst [vmem:[#allocation19_spill] sm:$0xff] %v6657_v10  ;;  %v1799_v6 = vpop.f32.mrb[14].mxu1  ;;  %v5471_v12 = vpop.eup %5470  ;;  %v1414_v4 = vadd.f32 %v1413_v8, %v6599_v40  ;;  %3477 = vmatpush1.bf16.msra.mxu1 %v5301_v37  ;;  %5494 = vtanh.f32 %v1412_v38  ;;  %1711 = vmatmul.mubr.bf16.gmra.mrb[184].mxu0 %v6548_v60  ;;  %v5307_v38 = vld [vmem:[#allocation8 + $0x130] ss:$8 sps:$4 sm:$0xff]  }
 0x23c   :  { %v1415_v32 = vpop.f32.mrb[79].mxu0  ;;  %v1801_v15 = vpop.f32.mrb[15].mxu1  ;;  %v1800_v26 = vadd.f32 %v1799_v6, %v6601_v41  ;;  %v2382_v54 = vpack.c.bf16 %v5471_v12, %v5463_v0  ;;  %3478 = vmatprep.subr.bf16.mxu1 %v5306_v57  ;;  %5496 = vtanh.f32 %v1798_v48  ;;  %1720 = vmatprep.mubr.bf16.mxu0 %v6562_v36 }
 0x23d   :  { %v6664_v17 = vpop.eup %5472  ;;  %v1416_v7 = vadd.f32 %v1415_v32, %v6605_v44  ;;  %v1802_v1 = vadd.f32 %v1801_v15, %v6607_v45  ;;  %5498 = vtanh.f32 %v1414_v4 }
 0x23e   :  { %7616 = vst [vmem:[#allocation20_spill] sm:$0xff] %v6664_v17  ;;  %v5475_v27 = vpop.eup %5474  ;;  %3323 = vmatprep.mubr.bf16.mxu1 %v2382_v54  ;;  %5500 = vtanh.f32 %v1800_v26  ;;  %v1419_v37 = vpop.f32.mrb[80].mxu0 }
 0x23f   :  { %v6671_v8 = vpop.eup %5476  ;;  %3324 = vmatmul.mubr.bf16.gmra.mrb[68].mxu1 %v2381_v14  ;;  %v1805_v57 = vpop.f32.mrb[16].mxu1  ;;  %5502 = vtanh.f32 %v1416_v7  ;;  %v1420_v32 = vadd.f32 %v1419_v37, %v6599_v40 }
 0x240   :  { %7617 = vst [vmem:[#allocation21_spill] sm:$0xff] %v6671_v8  ;;  %v5479_v12 = vpop.eup %5478  ;;  %3479 = vmatpush1.bf16.msra.mxu1 %v5304_v63  ;;  %v1806_v48 = vadd.f32 %v1805_v57, %v6601_v41  ;;  %v1421_v15 = vpop.f32.mrb[81].mxu0  ;;  %5504 = vtanh.f32 %v1802_v1 }
 0x241   :  { %v6675_v0 = vpop.eup %5480  ;;  %v1807_v54 = vpop.f32.mrb[17].mxu1  ;;  %3480 = vmatprep.subr.bf16.mxu1 %v5309_v39  ;;  %v1422_v14 = vadd.f32 %v1421_v15, %v6605_v44  ;;  %5506 = vtanh.f32 %v1420_v32 }
 0x242   :  { %7618 = vst [vmem:[#allocation22_spill] sm:$0xff] %v6675_v0  ;;  %v5483_v6 = vpop.eup %5482  ;;  %v1808_v4 = vadd.f32 %v1807_v54, %v6607_v45  ;;  %v1423_v26 = vpop.f32.mrb[82].mxu0  ;;  %5508 = vtanh.f32 %v1806_v48  ;;  %v5310_v54 = vld [vmem:[#allocation8 + $0x140] ss:$8 sps:$4 sm:$0xff]  }
 0x243   :  { %v6679_v49 = vpop.eup %5484  ;;  %v1809_v63 = vpop.f32.mrb[18].mxu1  ;;  %v2389_v16 = vpack.c.bf16 %v5483_v6, %v5475_v27  ;;  %v1424_v7 = vadd.f32 %v1423_v26, %v6599_v40  ;;  %5510 = vtanh.f32 %v1422_v14  ;;  %1721 = vmatmul.mubr.bf16.gmra.mrb[188].mxu0 %v6560_v33  ;;  %v5315_v6 = vld [vmem:[#allocation8 + $0x154] ss:$8 sps:$4 sm:$0xff]   ;;  %v5313_v14 = vld [vmem:[#allocation8 + $0x150] ss:$8 sps:$4 sm:$0xff]  }
 0x244   :  { %7619 = vst [vmem:[#allocation23_spill] sm:$0xff] %v6679_v49  ;;  %v5487_v10 = vpop.eup %5486  ;;  %v1425_v37 = vpop.f32.mrb[83].mxu0  ;;  %v1810_v1 = vadd.f32 %v1809_v63, %v6601_v41  ;;  %3481 = vmatpush1.bf16.msra.mxu1 %v5307_v38  ;;  %5512 = vtanh.f32 %v1808_v4  ;;  %1956 = vmatprep.mubr.bf16.mxu0 %v6374_v31  ;;  %v5318_v31 = vld [vmem:[#allocation8 + $0x164] ss:$8 sps:$4 sm:$0xff]  }
 0x245   :  { %v1811_v57 = vpop.f32.mrb[19].mxu1  ;;  %v6686_v13 = vpop.eup %5488  ;;  %v2390_v15 = vpack.c.bf16 %v5487_v10, %v5479_v12  ;;  %v1426_v27 = vadd.f32 %v1425_v37, %v6605_v44  ;;  %3482 = vmatprep.subr.bf16.mxu1 %v5312_v9  ;;  %5514 = vtanh.f32 %v1424_v7 }
 0x246   :  { %v5491_v17 = vpop.eup %5490  ;;  %v1812_v48 = vadd.f32 %v1811_v57, %v6607_v45  ;;  %5516 = vtanh.f32 %v1810_v1  ;;  %v1429_v38 = vpop.f32.mrb[84].mxu0 }
 0x247   :  { %v6693_v26 = vpop.eup %5492  ;;  %3333 = vmatprep.mubr.bf16.mxu1 %v2390_v15  ;;  %v1815_v9 = vpop.f32.mrb[20].mxu1  ;;  %5518 = vtanh.f32 %v1426_v27  ;;  %v1430_v37 = vadd.f32 %v1429_v38, %v6599_v40 }
 0x248   :  { %7620 = vst [vmem:[#allocation24_spill] sm:$0xff] %v6693_v26  ;;  %v5495_v10 = vpop.eup %5494  ;;  %3334 = vmatmul.mubr.bf16.gmra.mrb[72].mxu1 %v2389_v16  ;;  %v1816_v4 = vadd.f32 %v1815_v9, %v6601_v41  ;;  %v1431_v57 = vpop.f32.mrb[85].mxu0  ;;  %5520 = vtanh.f32 %v1812_v48 }
 0x249   :  { %v6697_v12 = vpop.eup %5496  ;;  %3483 = vmatpush1.bf16.msra.mxu1 %v5310_v54  ;;  %v1817_v15 = vpop.f32.mrb[21].mxu1  ;;  %v1432_v16 = vadd.f32 %v1431_v57, %v6605_v44  ;;  %5522 = vtanh.f32 %v1430_v37 }
 0x24a   :  { %v5499_v63 = vpop.eup %5498  ;;  %3484 = vmatprep.subr.bf16.mxu1 %v5315_v6  ;;  %v1818_v7 = vadd.f32 %v1817_v15, %v6607_v45  ;;  %v1433_v1 = vpop.f32.mrb[86].mxu0  ;;  %5524 = vtanh.f32 %v1816_v4  ;;  %v5316_v15 = vld [vmem:[#allocation8 + $0x160] ss:$8 sps:$4 sm:$0xff]  }
 0x24b   :  { %v6701_v39 = vpop.eup %5500  ;;  %v1819_v54 = vpop.f32.mrb[22].mxu1  ;;  %v2397_v32 = vpack.c.bf16 %v5499_v63, %v5491_v17  ;;  %v1434_v27 = vadd.f32 %v1433_v1, %v6599_v40  ;;  %5526 = vtanh.f32 %v1432_v16  ;;  %1957 = vmatmul.mubr.bf16.vlgmr.msra.gmra.mrb[192].mxu0 %v6372_v30  ;;  %v5321_v63 = vld [vmem:[#allocation8 + $0x174] ss:$8 sps:$4 sm:$0xff]  }
 0x24c   :  { %7621 = vst [vmem:[#allocation25_spill] sm:$0xff] %v6701_v39  ;;  %v5503_v8 = vpop.eup %5502  ;;  %v1435_v38 = vpop.f32.mrb[87].mxu0  ;;  %v1820_v48 = vadd.f32 %v1819_v54, %v6601_v41  ;;  %5528 = vtanh.f32 %v1818_v7  ;;  %1966 = vmatprep.mubr.bf16.mxu0 %v6386_v56  ;;  %v5324_v56 = vld [vmem:[#allocation8 + $0x184] ss:$8 sps:$4 sm:$0xff]  }
 0x24d   :  { %v1821_v9 = vpop.f32.mrb[23].mxu1  ;;  %v6708_v49 = vpop.eup %5504  ;;  %v2398_v57 = vpack.c.bf16 %v5503_v8, %v5495_v10  ;;  %3485 = vmatpush1.bf16.msra.mxu1 %v5313_v14  ;;  %v1436_v17 = vadd.f32 %v1435_v38, %v6605_v44  ;;  %5530 = vtanh.f32 %v1434_v27 }
 0x24e   :  { %v5507_v0 = vpop.eup %5506  ;;  %3486 = vmatprep.subr.bf16.mxu1 %v5318_v31  ;;  %v1822_v4 = vadd.f32 %v1821_v9, %v6607_v45  ;;  %5532 = vtanh.f32 %v1820_v48  ;;  %v1439_v30 = vpop.f32.mrb[88].mxu0  ;;  %v5319_v31 = vld [vmem:[#allocation8 + $0x170] ss:$8 sps:$4 sm:$0xff]  }
 0x24f   :  { %v6715_v1 = vpop.eup %5508  ;;  %3343 = vmatprep.mubr.bf16.mxu1 %v2398_v57  ;;  %v1825_v14 = vpop.f32.mrb[24].mxu1  ;;  %5534 = vtanh.f32 %v1436_v17  ;;  %v1440_v54 = vadd.f32 %v1439_v30, %v6599_v40 }
 0x250   :  { %7622 = vst [vmem:[#allocation26_spill] sm:$0xff] %v6715_v1  ;;  %v5511_v8 = vpop.eup %5510  ;;  %3344 = vmatmul.mubr.bf16.gmra.mrb[76].mxu1 %v2397_v32  ;;  %v1826_v7 = vadd.f32 %v1825_v14, %v6601_v41  ;;  %v1441_v38 = vpop.f32.mrb[89].mxu0  ;;  %5536 = vtanh.f32 %v1822_v4 }
 0x251   :  { %v6719_v10 = vpop.eup %5512  ;;  %3487 = vmatpush1.bf16.msra.mxu1 %v5316_v15  ;;  %v1827_v9 = vpop.f32.mrb[25].mxu1  ;;  %v1442_v32 = vadd.f32 %v1441_v38, %v6605_v44  ;;  %5538 = vtanh.f32 %v1440_v54 }
 0x252   :  { %v5515_v16 = vpop.eup %5514  ;;  %3488 = vmatprep.subr.bf16.mxu1 %v5321_v63  ;;  %v1828_v27 = vadd.f32 %v1827_v9, %v6607_v45  ;;  %v1443_v48 = vpop.f32.mrb[90].mxu0  ;;  %5540 = vtanh.f32 %v1826_v7  ;;  %v5322_v9 = vld [vmem:[#allocation8 + $0x180] ss:$8 sps:$4 sm:$0xff]  }
 0x253   :  { %v6723_v57 = vpop.eup %5516  ;;  %v1829_v15 = vpop.f32.mrb[26].mxu1  ;;  %v2405_v6 = vpack.c.bf16 %v5515_v16, %v5507_v0  ;;  %v1444_v17 = vadd.f32 %v1443_v48, %v6599_v40  ;;  %5542 = vtanh.f32 %v1442_v32  ;;  %1967 = vmatmul.mubr.bf16.gmra.mrb[196].mxu0 %v6384_v55  ;;  %v5327_v16 = vld [vmem:[#allocation8 + $0x194] ss:$8 sps:$4 sm:$0xff]  }
 0x254   :  { %7623 = vst [vmem:[#allocation27_spill] sm:$0xff] %v6723_v57  ;;  %v5519_v37 = vpop.eup %5518  ;;  %v1445_v30 = vpop.f32.mrb[91].mxu0  ;;  %v1830_v4 = vadd.f32 %v1829_v15, %v6601_v41  ;;  %5544 = vtanh.f32 %v1828_v27  ;;  %1976 = vmatprep.mubr.bf16.mxu0 %v6398_v23  ;;  %v5330_v23 = vld [vmem:[#allocation8 + $0x1a4] ss:$8 sps:$4 sm:$0xff]  }
 0x255   :  { %v1831_v14 = vpop.f32.mrb[27].mxu1  ;;  %v6730_v26 = vpop.eup %5520  ;;  %v2406_v38 = vpack.c.bf16 %v5519_v37, %v5511_v8  ;;  %3489 = vmatpush1.bf16.msra.mxu1 %v5319_v31  ;;  %v1446_v0 = vadd.f32 %v1445_v30, %v6605_v44  ;;  %5546 = vtanh.f32 %v1444_v17 }
 0x256   :  { %v5523_v39 = vpop.eup %5522  ;;  %3490 = vmatprep.subr.bf16.mxu1 %v5324_v56  ;;  %v1832_v7 = vadd.f32 %v1831_v14, %v6607_v45  ;;  %5548 = vtanh.f32 %v1830_v4  ;;  %v1449_v55 = vpop.f32.mrb[92].mxu0  ;;  %v5325_v56 = vld [vmem:[#allocation8 + $0x190] ss:$8 sps:$4 sm:$0xff]  }
 0x257   :  { %v6737_v48 = vpop.eup %5524  ;;  %3353 = vmatprep.mubr.bf16.mxu1 %v2406_v38  ;;  %v1835_v31 = vpop.f32.mrb[28].mxu1  ;;  %5550 = vtanh.f32 %v1446_v0  ;;  %v1450_v15 = vadd.f32 %v1449_v55, %v6599_v40 }
 0x258   :  { %7624 = vst [vmem:[#allocation28_spill] sm:$0xff] %v6737_v48  ;;  %v5527_v37 = vpop.eup %5526  ;;  %3354 = vmatmul.mubr.bf16.gmra.mrb[80].mxu1 %v2405_v6  ;;  %v1836_v27 = vadd.f32 %v1835_v31, %v6601_v41  ;;  %v1451_v30 = vpop.f32.mrb[93].mxu0  ;;  %5552 = vtanh.f32 %v1832_v7 }
 0x259   :  { %v6741_v8 = vpop.eup %5528  ;;  %3491 = vmatpush1.bf16.msra.mxu1 %v5322_v9  ;;  %v1837_v14 = vpop.f32.mrb[29].mxu1  ;;  %v1452_v6 = vadd.f32 %v1451_v30, %v6605_v44  ;;  %5554 = vtanh.f32 %v1450_v15 }
 0x25a   :  { %v5531_v32 = vpop.eup %5530  ;;  %3492 = vmatprep.subr.bf16.mxu1 %v5327_v16  ;;  %v1838_v17 = vadd.f32 %v1837_v14, %v6607_v45  ;;  %v1453_v4 = vpop.f32.mrb[94].mxu0  ;;  %5556 = vtanh.f32 %v1836_v27  ;;  %v5328_v14 = vld [vmem:[#allocation8 + $0x1a0] ss:$8 sps:$4 sm:$0xff]  }
 0x25b   :  { %v6745_v38 = vpop.eup %5532  ;;  %v1839_v9 = vpop.f32.mrb[30].mxu1  ;;  %v2413_v63 = vpack.c.bf16 %v5531_v32, %v5523_v39  ;;  %v1454_v0 = vadd.f32 %v1453_v4, %v6599_v40  ;;  %5558 = vtanh.f32 %v1452_v6  ;;  %1977 = vmatmul.mubr.bf16.gmra.mrb[200].mxu0 %v6396_v22  ;;  %v5333_v32 = vld [vmem:[#allocation8 + $0x1b4] ss:$8 sps:$4 sm:$0xff]  }
 0x25c   :  { %7625 = vst [vmem:[#allocation29_spill] sm:$0xff] %v6745_v38  ;;  %v5535_v54 = vpop.eup %5534  ;;  %v1455_v55 = vpop.f32.mrb[95].mxu0  ;;  %v1840_v7 = vadd.f32 %v1839_v9, %v6601_v41  ;;  %5560 = vtanh.f32 %v1838_v17  ;;  %1986 = vmatprep.mubr.bf16.mxu0 %v6410_v51  ;;  %v5336_v51 = vld [vmem:[#allocation8 + $0x1c4] ss:$8 sps:$4 sm:$0xff]  }
 0x25d   :  { %v1841_v31 = vpop.f32.mrb[31].mxu1  ;;  %v6752_v1 = vpop.eup %5536  ;;  %v2414_v30 = vpack.c.bf16 %v5535_v54, %v5527_v37  ;;  %3493 = vmatpush1.bf16.msra.mxu1 %v5325_v56  ;;  %v1456_v39 = vadd.f32 %v1455_v55, %v6605_v44  ;;  %5562 = vtanh.f32 %v1454_v0 }
 0x25e   :  { %v5539_v57 = vpop.eup %5538  ;;  %3494 = vmatprep.subr.bf16.mxu1 %v5330_v23  ;;  %v1842_v27 = vadd.f32 %v1841_v31, %v6607_v45  ;;  %5564 = vtanh.f32 %v1840_v7  ;;  %v1459_v22 = vpop.f32.mrb[96].mxu0  ;;  %v5331_v23 = vld [vmem:[#allocation8 + $0x1b0] ss:$8 sps:$4 sm:$0xff]  }
 0x25f   :  { %v6759_v4 = vpop.eup %5540  ;;  %3363 = vmatprep.mubr.bf16.mxu1 %v2414_v30  ;;  %v1845_v56 = vpop.f32.mrb[32].mxu1  ;;  %5566 = vtanh.f32 %v1456_v39  ;;  %v1460_v9 = vadd.f32 %v1459_v22, %v6599_v40 }
 0x260   :  { %7626 = vst [vmem:[#allocation30_spill] sm:$0xff] %v6759_v4  ;;  %v5543_v54 = vpop.eup %5542  ;;  %3364 = vmatmul.mubr.bf16.gmra.mrb[84].mxu1 %v2413_v63  ;;  %v1846_v17 = vadd.f32 %v1845_v56, %v6601_v41  ;;  %v1461_v55 = vpop.f32.mrb[97].mxu0  ;;  %5568 = vtanh.f32 %v1842_v27 }
 0x261   :  { %v6763_v37 = vpop.eup %5544  ;;  %3495 = vmatpush1.bf16.msra.mxu1 %v5328_v14  ;;  %v1847_v31 = vpop.f32.mrb[33].mxu1  ;;  %v1462_v63 = vadd.f32 %v1461_v55, %v6605_v44  ;;  %5570 = vtanh.f32 %v1460_v9 }
 0x262   :  { %v5547_v6 = vpop.eup %5546  ;;  %3496 = vmatprep.subr.bf16.mxu1 %v5333_v32  ;;  %v1848_v0 = vadd.f32 %v1847_v31, %v6607_v45  ;;  %v1463_v7 = vpop.f32.mrb[98].mxu0  ;;  %5572 = vtanh.f32 %v1846_v17  ;;  %v5334_v31 = vld [vmem:[#allocation8 + $0x1c0] ss:$8 sps:$4 sm:$0xff]  }
 0x263   :  { %v6767_v30 = vpop.eup %5548  ;;  %v1849_v14 = vpop.f32.mrb[34].mxu1  ;;  %v2421_v16 = vpack.c.bf16 %v5547_v6, %v5539_v57  ;;  %v1464_v39 = vadd.f32 %v1463_v7, %v6599_v40  ;;  %5574 = vtanh.f32 %v1462_v63  ;;  %1987 = vmatmul.mubr.bf16.gmra.mrb[204].mxu0 %v6408_v50  ;;  %v5339_v6 = vld [vmem:[#allocation8 + $0x1d4] ss:$8 sps:$4 sm:$0xff]  }
 0x264   :  { %7627 = vst [vmem:[#allocation31_spill] sm:$0xff] %v6767_v30  ;;  %v5551_v15 = vpop.eup %5550  ;;  %v1465_v22 = vpop.f32.mrb[99].mxu0  ;;  %v1850_v27 = vadd.f32 %v1849_v14, %v6601_v41  ;;  %5576 = vtanh.f32 %v1848_v0  ;;  %1996 = vmatprep.mubr.bf16.mxu0 %v6422_v19  ;;  %v5342_v19 = vld [vmem:[#allocation8 + $0x1e4] ss:$8 sps:$4 sm:$0xff]  }
 0x265   :  { %v1851_v56 = vpop.f32.mrb[35].mxu1  ;;  %v6774_v48 = vpop.eup %5552  ;;  %v2422_v55 = vpack.c.bf16 %v5551_v15, %v5543_v54  ;;  %3497 = vmatpush1.bf16.msra.mxu1 %v5331_v23  ;;  %v1466_v57 = vadd.f32 %v1465_v22, %v6605_v44  ;;  %5578 = vtanh.f32 %v1464_v39 }
 0x266   :  { %v5555_v38 = vpop.eup %5554  ;;  %3498 = vmatprep.subr.bf16.mxu1 %v5336_v51  ;;  %v1852_v17 = vadd.f32 %v1851_v56, %v6607_v45  ;;  %5580 = vtanh.f32 %v1850_v27  ;;  %v1469_v50 = vpop.f32.mrb[100].mxu0  ;;  %v5337_v51 = vld [vmem:[#allocation8 + $0x1d0] ss:$8 sps:$4 sm:$0xff]  }
 0x267   :  { %v6781_v7 = vpop.eup %5556  ;;  %3373 = vmatprep.mubr.bf16.mxu1 %v2422_v55  ;;  %v1855_v23 = vpop.f32.mrb[36].mxu1  ;;  %5582 = vtanh.f32 %v1466_v57  ;;  %v1470_v14 = vadd.f32 %v1469_v50, %v6599_v40 }
 0x268   :  { %7628 = vst [vmem:[#allocation32_spill] sm:$0xff] %v6781_v7  ;;  %v5559_v15 = vpop.eup %5558  ;;  %3374 = vmatmul.mubr.bf16.gmra.mrb[88].mxu1 %v2421_v16  ;;  %v1856_v0 = vadd.f32 %v1855_v23, %v6601_v41  ;;  %v1471_v22 = vpop.f32.mrb[101].mxu0  ;;  %5584 = vtanh.f32 %v1852_v17 }
 0x269   :  { %v6785_v54 = vpop.eup %5560  ;;  %3499 = vmatpush1.bf16.msra.mxu1 %v5334_v31  ;;  %v1857_v56 = vpop.f32.mrb[37].mxu1  ;;  %v1472_v16 = vadd.f32 %v1471_v22, %v6605_v44  ;;  %5586 = vtanh.f32 %v1470_v14 }
 0x26a   :  { %v5563_v63 = vpop.eup %5562  ;;  %3500 = vmatprep.subr.bf16.mxu1 %v5339_v6  ;;  %v1858_v39 = vadd.f32 %v1857_v56, %v6607_v45  ;;  %v1473_v27 = vpop.f32.mrb[102].mxu0  ;;  %5588 = vtanh.f32 %v1856_v0  ;;  %v5340_v56 = vld [vmem:[#allocation8 + $0x1e0] ss:$8 sps:$4 sm:$0xff]  }
 0x26b   :  { %v6789_v55 = vpop.eup %5564  ;;  %v1859_v31 = vpop.f32.mrb[38].mxu1  ;;  %v2429_v32 = vpack.c.bf16 %v5563_v63, %v5555_v38  ;;  %v1474_v57 = vadd.f32 %v1473_v27, %v6599_v40  ;;  %5590 = vtanh.f32 %v1472_v16  ;;  %1997 = vmatmul.mubr.bf16.gmra.mrb[208].mxu0 %v6420_v18  ;;  %v5345_v63 = vld [vmem:[#allocation8 + $0x1f4] ss:$8 sps:$4 sm:$0xff]  }
 0x26c   :  { %v5567_v9 = vpop.eup %5566  ;;  %v1475_v50 = vpop.f32.mrb[103].mxu0  ;;  %v1860_v17 = vadd.f32 %v1859_v31, %v6601_v41  ;;  %5592 = vtanh.f32 %v1858_v39  ;;  %2006 = vmatprep.mubr.bf16.mxu0 %v6434_v47  ;;  %v5348_v47 = vld [vmem:[#allocation8 + $0x204] ss:$8 sps:$4 sm:$0xff]  }
 0x26d   :  { %v1861_v23 = vpop.f32.mrb[39].mxu1  ;;  %v6796_v4 = vpop.eup %5568  ;;  %v2430_v22 = vpack.c.bf16 %v5567_v9, %v5559_v15  ;;  %3501 = vmatpush1.bf16.msra.mxu1 %v5337_v51  ;;  %v1476_v38 = vadd.f32 %v1475_v50, %v6605_v44  ;;  %5594 = vtanh.f32 %v1474_v57 }
 0x26e   :  { %v5571_v30 = vpop.eup %5570  ;;  %3502 = vmatprep.subr.bf16.mxu1 %v5342_v19  ;;  %v1862_v0 = vadd.f32 %v1861_v23, %v6607_v45  ;;  %5596 = vtanh.f32 %v1860_v17  ;;  %v1479_v18 = vpop.f32.mrb[104].mxu0  ;;  %v5343_v19 = vld [vmem:[#allocation8 + $0x1f0] ss:$8 sps:$4 sm:$0xff]  }
 0x26f   :  { %v6803_v27 = vpop.eup %5572  ;;  %3383 = vmatprep.mubr.bf16.mxu1 %v2430_v22  ;;  %v1865_v51 = vpop.f32.mrb[40].mxu1  ;;  %5598 = vtanh.f32 %v1476_v38  ;;  %v1480_v31 = vadd.f32 %v1479_v18, %v6599_v40 }
 0x270   :  { %7629 = vst [vmem:[#allocation33_spill] sm:$0xff] %v6803_v27  ;;  %v5575_v9 = vpop.eup %5574  ;;  %3384 = vmatmul.mubr.bf16.gmra.mrb[92].mxu1 %v2429_v32  ;;  %v1866_v39 = vadd.f32 %v1865_v51, %v6601_v41  ;;  %v1481_v50 = vpop.f32.mrb[105].mxu0  ;;  %5600 = vtanh.f32 %v1862_v0  ;;  %v5376_v27 = vld [vmem:[#allocation8 + $0x310] ss:$8 sps:$4 sm:$0xff]  }
 0x271   :  { %v6807_v15 = vpop.eup %5576  ;;  %3503 = vmatpush1.bf16.msra.mxu1 %v5340_v56  ;;  %v1867_v23 = vpop.f32.mrb[41].mxu1  ;;  %v1482_v32 = vadd.f32 %v1481_v50, %v6605_v44  ;;  %5602 = vtanh.f32 %v1480_v31 }
 0x272   :  { %v5579_v16 = vpop.eup %5578  ;;  %3504 = vmatprep.subr.bf16.mxu1 %v5345_v63  ;;  %v1868_v57 = vadd.f32 %v1867_v23, %v6607_v45  ;;  %v1483_v17 = vpop.f32.mrb[106].mxu0  ;;  %5604 = vtanh.f32 %v1866_v39 }
 0x273   :  { %v6811_v22 = vpop.eup %5580  ;;  %v1869_v56 = vpop.f32.mrb[42].mxu1  ;;  %v2437_v6 = vpack.c.bf16 %v5579_v16, %v5571_v30  ;;  %v1484_v38 = vadd.f32 %v1483_v17, %v6599_v40  ;;  %5606 = vtanh.f32 %v1482_v32  ;;  %2007 = vmatmul.mubr.bf16.gmra.mrb[212].mxu0 %v6432_v46 }
 0x274   :  { %7630 = vst [vmem:[#allocation34_spill] sm:$0xff] %v6811_v22  ;;  %v5583_v14 = vpop.eup %5582  ;;  %v1485_v18 = vpop.f32.mrb[107].mxu0  ;;  %v1870_v0 = vadd.f32 %v1869_v56, %v6601_v41  ;;  %5608 = vtanh.f32 %v1868_v57  ;;  %2016 = vmatprep.mubr.bf16.mxu0 %v6452_v21 }
 0x275   :  { %v1871_v51 = vpop.f32.mrb[43].mxu1  ;;  %v6818_v7 = vpop.eup %5584  ;;  %v2438_v50 = vpack.c.bf16 %v5583_v14, %v5575_v9  ;;  %3505 = vmatpush1.bf16.msra.mxu1 %v5343_v19  ;;  %v1486_v30 = vadd.f32 %v1485_v18, %v6605_v44  ;;  %v5375_v14 = vld [vmem:[#allocation8 + $0x304] ss:$8 sps:$4 sm:$0xff]   ;;  %5610 = vtanh.f32 %v1484_v38  ;;  %v5373_v19 = vld [vmem:[#allocation8 + $0x300] ss:$8 sps:$4 sm:$0xff]  }
 0x276   :  { %v5587_v23 = vpop.eup %5586  ;;  %3667 = vmatprep.subr.bf16.mxu1 %v5348_v47  ;;  %v1872_v17 = vadd.f32 %v1871_v51, %v6607_v45  ;;  %5612 = vtanh.f32 %v1870_v0  ;;  %v1489_v46 = vpop.f32.mrb[108].mxu0  ;;  %3860 = vmatprep.subr.bf16.mxu0 %v5375_v14  ;;  %v5378_v14 = vld [vmem:[#allocation8 + $0x314] ss:$8 sps:$4 sm:$0xff]  }
 0x277   :  { %v6825_v31 = vpop.eup %5588  ;;  %3393 = vmatprep.mubr.bf16.mxu1 %v2438_v50  ;;  %v1875_v47 = vpop.f32.mrb[44].mxu1  ;;  %5614 = vtanh.f32 %v1486_v30  ;;  %v1490_v57 = vadd.f32 %v1489_v46, %v6599_v40  ;;  %3861 = vmatpush1.bf16.msra.mxu0 %v5373_v19 }
 0x278   :  { %7631 = vst [vmem:[#allocation35_spill] sm:$0xff] %v6825_v31  ;;  %v5591_v9 = vpop.eup %5590  ;;  %3394 = vmatmul.mubr.bf16.gmra.mrb[96].mxu1 %v2437_v6  ;;  %v1876_v56 = vadd.f32 %v1875_v47, %v6601_v41  ;;  %v1491_v18 = vpop.f32.mrb[109].mxu0  ;;  %5616 = vtanh.f32 %v1872_v17  ;;  %3862 = vmatprep.subr.bf16.mxu0 %v5378_v14 }
 0x279   :  { %v6829_v39 = vpop.eup %5592  ;;  %v1877_v51 = vpop.f32.mrb[45].mxu1  ;;  %v1492_v6 = vadd.f32 %v1491_v18, %v6605_v44  ;;  %5618 = vtanh.f32 %v1490_v57 }
 0x27a   :  { %v5595_v32 = vpop.eup %5594  ;;  %v1878_v38 = vadd.f32 %v1877_v51, %v6607_v45  ;;  %v1493_v0 = vpop.f32.mrb[110].mxu0  ;;  %5620 = vtanh.f32 %v1876_v56  ;;  %v5384_v56 = vld [vmem:[#allocation8 + $0x324] ss:$8 sps:$4 sm:$0xff]  }
 0x27b   :  { %v6833_v21 = vpop.eup %5596  ;;  %v1879_v50 = vpop.f32.mrb[46].mxu1  ;;  %v2445_v63 = vpack.c.bf16 %v5595_v32, %v5587_v23  ;;  %v1494_v30 = vadd.f32 %v1493_v0, %v6599_v40  ;;  %5622 = vtanh.f32 %v1492_v6  ;;  %2017 = vmatmul.mubr.bf16.gmra.mrb[216].mxu0 %v6450_v20  ;;  %v5387_v32 = vld [vmem:[#allocation8 + $0x334] ss:$8 sps:$4 sm:$0xff]  }
 0x27c   :  { %7632 = vst [vmem:[#allocation36_spill] sm:$0xff] %v6833_v21  ;;  %v5599_v16 = vpop.eup %5598  ;;  %v1495_v46 = vpop.f32.mrb[111].mxu0  ;;  %v1880_v17 = vadd.f32 %v1879_v50, %v6601_v41  ;;  %5624 = vtanh.f32 %v1878_v38  ;;  %2026 = vmatprep.mubr.bf16.mxu0 %v6464_v53  ;;  %3863 = vmatpush1.bf16.msra.mxu0 %v5376_v27 }
 0x27d   :  { %v1881_v47 = vpop.f32.mrb[47].mxu1  ;;  %v6840_v22 = vpop.eup %5600  ;;  %v2446_v18 = vpack.c.bf16 %v5599_v16, %v5591_v9  ;;  %v1496_v23 = vadd.f32 %v1495_v46, %v6605_v44  ;;  %5626 = vtanh.f32 %v1494_v30  ;;  %v5382_v9 = vld [vmem:[#allocation8 + $0x320] ss:$8 sps:$4 sm:$0xff]   ;;  %3864 = vmatprep.subr.bf16.mxu0 %v5384_v56 }
 0x27e   :  { %v5603_v51 = vpop.eup %5602  ;;  %v1882_v0 = vadd.f32 %v1881_v47, %v6607_v45  ;;  %5628 = vtanh.f32 %v1880_v17  ;;  %v1499_v20 = vpop.f32.mrb[112].mxu0 }
 0x27f   :  { %v6847_v57 = vpop.eup %5604  ;;  %3403 = vmatprep.mubr.bf16.mxu1 %v2446_v18  ;;  %v1885_v50 = vpop.f32.mrb[48].mxu1  ;;  %5630 = vtanh.f32 %v1496_v23  ;;  %v1500_v38 = vadd.f32 %v1499_v20, %v6599_v40 }
 0x280   :  { %7633 = vst [vmem:[#allocation37_spill] sm:$0xff] %v6847_v57  ;;  %v5607_v16 = vpop.eup %5606  ;;  %3404 = vmatmul.mubr.bf16.gmra.mrb[100].mxu1 %v2445_v63  ;;  %v1886_v46 = vadd.f32 %v1885_v50, %v6601_v41  ;;  %v1501_v47 = vpop.f32.mrb[113].mxu0  ;;  %5632 = vtanh.f32 %v1882_v0  ;;  %3865 = vmatpush1.bf16.msra.mxu0 %v5382_v9  ;;  %v5385_v50 = vld [vmem:[#allocation8 + $0x330] ss:$8 sps:$4 sm:$0xff]   ;;  %v5396_v9 = vld [vmem:[#allocation8 + $0x354] ss:$8 sps:$4 sm:$0xff]  }
 0x281   :  { %v6851_v6 = vpop.eup %5608  ;;  %v1887_v53 = vpop.f32.mrb[49].mxu1  ;;  %v1502_v27 = vadd.f32 %v1501_v47, %v6605_v44  ;;  %5634 = vtanh.f32 %v1500_v38  ;;  %3866 = vmatprep.subr.bf16.mxu0 %v5387_v32  ;;  %v5391_v32 = vld [vmem:[#allocation8 + $0x340] ss:$8 sps:$4 sm:$0xff]  }
 0x282   :  { %v5611_v14 = vpop.eup %5610  ;;  %v1888_v63 = vadd.f32 %v1887_v53, %v6607_v45  ;;  %v1503_v30 = vpop.f32.mrb[114].mxu0  ;;  %5636 = vtanh.f32 %v1886_v46  ;;  %v5393_v46 = vld [vmem:[#allocation8 + $0x344] ss:$8 sps:$4 sm:$0xff]  }
 0x283   :  { %v6855_v18 = vpop.eup %5612  ;;  %v1889_v17 = vpop.f32.mrb[50].mxu1  ;;  %v2453_v19 = vpack.c.bf16 %v5611_v14, %v5603_v51  ;;  %v1504_v23 = vadd.f32 %v1503_v30, %v6599_v40  ;;  %5638 = vtanh.f32 %v1502_v27  ;;  %2027 = vmatmul.mubr.bf16.gmra.mrb[220].mxu0 %v6462_v52 }
 0x284   :  { %7634 = vst [vmem:[#allocation38_spill] sm:$0xff] %v6855_v18  ;;  %v5615_v56 = vpop.eup %5614  ;;  %v1505_v20 = vpop.f32.mrb[115].mxu0  ;;  %v1890_v47 = vadd.f32 %v1889_v17, %v6601_v41  ;;  %5640 = vtanh.f32 %v1888_v63  ;;  %2036 = vmatprep.mubr.bf16.mxu0 %v6478_v25  ;;  %3867 = vmatpush1.bf16.msra.mxu0 %v5385_v50 }
 0x285   :  { %v1891_v31 = vpop.f32.mrb[51].mxu1  ;;  %v6862_v0 = vpop.eup %5616  ;;  %v2454_v53 = vpack.c.bf16 %v5615_v56, %v5607_v16  ;;  %v1506_v14 = vadd.f32 %v1505_v20, %v6605_v44  ;;  %5642 = vtanh.f32 %v1504_v23  ;;  %3868 = vmatprep.subr.bf16.mxu0 %v5393_v46 }
 0x286   :  { %v5619_v51 = vpop.eup %5618  ;;  %v1892_v30 = vadd.f32 %v1891_v31, %v6607_v45  ;;  %5644 = vtanh.f32 %v1890_v47  ;;  %v1509_v52 = vpop.f32.mrb[116].mxu0 }
 0x287   :  { %v6869_v38 = vpop.eup %5620  ;;  %3413 = vmatprep.mubr.bf16.mxu1 %v2454_v53  ;;  %v1895_v17 = vpop.f32.mrb[52].mxu1  ;;  %5646 = vtanh.f32 %v1506_v14  ;;  %v1510_v63 = vadd.f32 %v1509_v52, %v6599_v40 }
 0x288   :  { %7635 = vst [vmem:[#allocation39_spill] sm:$0xff] %v6869_v38  ;;  %v5623_v16 = vpop.eup %5622  ;;  %3414 = vmatmul.mubr.bf16.gmra.mrb[104].mxu1 %v2453_v19  ;;  %v1896_v31 = vadd.f32 %v1895_v17, %v6601_v41  ;;  %v1511_v20 = vpop.f32.mrb[117].mxu0  ;;  %5648 = vtanh.f32 %v1892_v30  ;;  %3869 = vmatpush1.bf16.msra.mxu0 %v5391_v32  ;;  %v5394_v17 = vld [vmem:[#allocation8 + $0x350] ss:$8 sps:$4 sm:$0xff]   ;;  %v5405_v32 = vld [vmem:[#allocation8 + $0x374] ss:$8 sps:$4 sm:$0xff]  }
 0x289   :  { %v6873_v27 = vpop.eup %5624  ;;  %v1897_v25 = vpop.f32.mrb[53].mxu1  ;;  %v1512_v19 = vadd.f32 %v1511_v20, %v6605_v44  ;;  %5650 = vtanh.f32 %v1510_v63  ;;  %3870 = vmatprep.subr.bf16.mxu0 %v5396_v9  ;;  %v5400_v9 = vld [vmem:[#allocation8 + $0x360] ss:$8 sps:$4 sm:$0xff]  }
 0x28a   :  { %v5627_v56 = vpop.eup %5626  ;;  %v1898_v23 = vadd.f32 %v1897_v25, %v6607_v45  ;;  %v1513_v50 = vpop.f32.mrb[118].mxu0  ;;  %5652 = vtanh.f32 %v1896_v31  ;;  %v5402_v31 = vld [vmem:[#allocation8 + $0x364] ss:$8 sps:$4 sm:$0xff]  }
 0x28b   :  { %v6877_v53 = vpop.eup %5628  ;;  %v1899_v47 = vpop.f32.mrb[54].mxu1  ;;  %v2461_v21 = vpack.c.bf16 %v5627_v56, %v5619_v51  ;;  %v1514_v14 = vadd.f32 %v1513_v50, %v6599_v40  ;;  %5654 = vtanh.f32 %v1512_v19  ;;  %2037 = vmatmul.mubr.bf16.gmra.mrb[224].mxu0 %v6476_v24 }
 0x28c   :  { %7636 = vst [vmem:[#allocation40_spill] sm:$0xff] %v6877_v53  ;;  %v5631_v46 = vpop.eup %5630  ;;  %v1515_v52 = vpop.f32.mrb[119].mxu0  ;;  %v1900_v20 = vadd.f32 %v1899_v47, %v6601_v41  ;;  %5656 = vtanh.f32 %v1898_v23  ;;  %2046 = vmatprep.mubr.bf16.mxu0 %v6490_v43  ;;  %3871 = vmatpush1.bf16.msra.mxu0 %v5394_v17 }
 0x28d   :  { %v1901_v57 = vpop.f32.mrb[55].mxu1  ;;  %v6884_v30 = vpop.eup %5632  ;;  %v2462_v25 = vpack.c.bf16 %v5631_v46, %v5623_v16  ;;  %v1516_v56 = vadd.f32 %v1515_v52, %v6605_v44  ;;  %5658 = vtanh.f32 %v1514_v14  ;;  %3872 = vmatprep.subr.bf16.mxu0 %v5402_v31 }
 0x28e   :  { %v5635_v51 = vpop.eup %5634  ;;  %v1902_v50 = vadd.f32 %v1901_v57, %v6607_v45  ;;  %5660 = vtanh.f32 %v1900_v20  ;;  %v1519_v24 = vpop.f32.mrb[120].mxu0 }
 0x28f   :  { %v6891_v63 = vpop.eup %5636  ;;  %3423 = vmatprep.mubr.bf16.mxu1 %v2462_v25  ;;  %v1905_v47 = vpop.f32.mrb[56].mxu1  ;;  %5662 = vtanh.f32 %v1516_v56  ;;  %v1520_v23 = vadd.f32 %v1519_v24, %v6599_v40 }
 0x290   :  { %7637 = vst [vmem:[#allocation41_spill] sm:$0xff] %v6891_v63  ;;  %v5639_v16 = vpop.eup %5638  ;;  %3424 = vmatmul.mubr.bf16.gmra.mrb[108].mxu1 %v2461_v21  ;;  %v1906_v57 = vadd.f32 %v1905_v47, %v6601_v41  ;;  %v1521_v52 = vpop.f32.mrb[121].mxu0  ;;  %5664 = vtanh.f32 %v1902_v50  ;;  %3873 = vmatpush1.bf16.msra.mxu0 %v5400_v9  ;;  %v5403_v47 = vld [vmem:[#allocation8 + $0x370] ss:$8 sps:$4 sm:$0xff]  }
 0x291   :  { %v6895_v19 = vpop.eup %5640  ;;  %v1907_v43 = vpop.f32.mrb[57].mxu1  ;;  %v1522_v21 = vadd.f32 %v1521_v52, %v6605_v44  ;;  %5666 = vtanh.f32 %v1520_v23  ;;  %3874 = vmatprep.subr.bf16.mxu0 %v5405_v32 }
 0x292   :  { %7638 = vst [vmem:[#allocation42_spill] sm:$0xff] %v6895_v19  ;;  %v5643_v46 = vpop.eup %5642  ;;  %v1908_v14 = vadd.f32 %v1907_v43, %v6607_v45  ;;  %v1523_v17 = vpop.f32.mrb[122].mxu0  ;;  %5668 = vtanh.f32 %v1906_v57  ;;  %v5409_v57 = vld [vmem:[#allocation8 + $0x380] ss:$8 sps:$4 sm:$0xff]   ;;  %v5412_v19 = vld [vmem:[#allocation8 + $0x390] ss:$8 sps:$4 sm:$0xff]  }
 0x293   :  { %v6899_v25 = vpop.eup %5644  ;;  %v1909_v20 = vpop.f32.mrb[58].mxu1  ;;  %v2469_v18 = vpack.c.bf16 %v5643_v46, %v5635_v51  ;;  %v1524_v56 = vadd.f32 %v1523_v17, %v6599_v40  ;;  %5670 = vtanh.f32 %v1522_v21  ;;  %2047 = vmatmul.mubr.bf16.gmra.mrb[228].mxu0 %v6488_v42 }
 0x294   :  { %7639 = vst [vmem:[#allocation43_spill] sm:$0xff] %v6899_v25  ;;  %v5647_v31 = vpop.eup %5646  ;;  %v1525_v24 = vpop.f32.mrb[123].mxu0  ;;  %v1910_v52 = vadd.f32 %v1909_v20, %v6601_v41  ;;  %5672 = vtanh.f32 %v1908_v14  ;;  %2056 = vmatprep.mubr.bf16.mxu0 %v6502_v5  ;;  %3875 = vmatpush1.bf16.msra.mxu0 %v5403_v47 }
 0x295   :  { %v1911_v38 = vpop.f32.mrb[59].mxu1  ;;  %v6906_v50 = vpop.eup %5648  ;;  %v2470_v43 = vpack.c.bf16 %v5647_v31, %v5639_v16  ;;  %v1526_v46 = vadd.f32 %v1525_v24, %v6605_v44  ;;  %v5411_v16 = vld [vmem:[#allocation8 + $0x384] ss:$8 sps:$4 sm:$0xff]   ;;  %5674 = vtanh.f32 %v1524_v56  ;;  %v675_v31 = vsub.s32 2, %v6351_v11 }
 0x296   :  { %7640 = vst [vmem:[#allocation44_spill] sm:$0xff] %v6906_v50  ;;  %v6909_v51 = vpop.eup %5650  ;;  %v1912_v17 = vadd.f32 %v1911_v38, %v6607_v45  ;;  %5676 = vtanh.f32 %v1910_v52  ;;  %v1529_v42 = vpop.f32.mrb[124].mxu0  ;;  %3876 = vmatprep.subr.bf16.mxu0 %v5411_v16 }
 0x297   :  { %v6915_v23 = vpop.eup %5652  ;;  %3433 = vmatprep.mubr.bf16.mxu1 %v2470_v43  ;;  %v1915_v20 = vpop.f32.mrb[60].mxu1  ;;  %5678 = vtanh.f32 %v1526_v46  ;;  %v1530_v38 = vadd.f32 %v1529_v42, %v6599_v40  ;;  %v5414_v46 = vld [vmem:[#allocation8 + $0x394] ss:$8 sps:$4 sm:$0xff]  }
 0x298   :  { %v5655_v32 = vpop.eup %5654  ;;  %3434 = vmatmul.mubr.bf16.gmra.mrb[112].mxu1 %v2469_v18  ;;  %v1916_v5 = vadd.f32 %v1915_v20, %v6601_v41  ;;  %v1531_v24 = vpop.f32.mrb[125].mxu0  ;;  %v679_v18 = vsub.s32 3, %v6351_v11  ;;  %5680 = vtanh.f32 %v1912_v17  ;;  %3877 = vmatpush1.bf16.msra.mxu0 %v5409_v57 }
 0x299   :  { %v6919_v21 = vpop.eup %5656  ;;  %v1917_v43 = vpop.f32.mrb[61].mxu1  ;;  %v1532_v47 = vadd.f32 %v1531_v24, %v6605_v44  ;;  %5682 = vtanh.f32 %v1530_v38  ;;  %3878 = vmatprep.subr.bf16.mxu0 %v5414_v46 }
 0x29a   :  { %v5659_v14 = vpop.eup %5658  ;;  %v1918_v52 = vadd.f32 %v1917_v43, %v6607_v45  ;;  %v1533_v53 = vpop.f32.mrb[126].mxu0  ;;  %5684 = vtanh.f32 %v1916_v5 }
 0x29b   :  { %v6925_v56 = vpop.eup %5660  ;;  %v1919_v9 = vpop.f32.mrb[62].mxu1  ;;  %v2477_v16 = vpack.c.bf16 %v5659_v14, %v6909_v51  ;;  %v1534_v42 = vadd.f32 %v1533_v53, %v6599_v40  ;;  %5686 = vtanh.f32 %v1532_v47  ;;  %2057 = vmatmul.mubr.bf16.gmra.mrb[232].mxu0 %v6500_v3  ;;  %v6941_v40 = vld [vmem:[%s7569_s4] sm:$0xff] }
 0x29c   :  { %v5663_v63 = vpop.eup %5662  ;;  %v1535_v20 = vpop.f32.mrb[127].mxu0  ;;  %v2481_v17 = vpack.c.bf16 %v6925_v56, %v6915_v23  ;;  %v1920_v24 = vadd.f32 %v1919_v9, %v6601_v41  ;;  %v6944_v53 = vrot.slane %v6941_v40, %v675_v31  ;;  %5688 = vtanh.f32 %v1918_v52  ;;  %2066 = vmatprep.mubr.bf16.mxu0 %v6514_v35  ;;  %3879 = vmatpush1.bf16.msra.mxu0 %v5412_v19 }
 0x29d   :  { %v1921_v25 = vpop.f32.mrb[63].mxu1  ;;  %v6933_v50 = vpop.eup %5664  ;;  %v2478_v43 = vpack.c.bf16 %v5663_v63, %v5655_v32  ;;  %v1536_v14 = vadd.f32 %v1535_v20, %v6605_v44  ;;  %v6953_v3 = vrot.slane %v6941_v40, %v679_v18  ;;  %v5420_v44 = vld [vmem:[#allocation8 + $0x3a4] ss:$8 sps:$4 sm:$0xff]   ;;  %5690 = vtanh.f32 %v1534_v42  ;;  %v5418_v32 = vld [vmem:[#allocation8 + $0x3a0] ss:$8 sps:$4 sm:$0xff]  }
 0x29e   :  { %v5667_v51 = vpop.eup %5666  ;;  %v2482_v57 = vpack.c.bf16 %v6933_v50, %v6919_v21  ;;  %v1922_v63 = vadd.f32 %v1921_v25, %v6607_v45  ;;  %5692 = vtanh.f32 %v1920_v24  ;;  %v1572_v38 = vpop.f32.mrb[128].mxu0  ;;  %3880 = vmatprep.subr.bf16.mxu0 %v5420_v44  ;;  %v5421_v20 = vld [vmem:[#allocation8 + $0x3b0] ss:$8 sps:$4 sm:$0xff]  }
 0x29f   :  { %v6948_v41 = vpop.eup %5668  ;;  %3443 = vmatprep.mubr.bf16.mxu1 %v2478_v43  ;;  %5694 = vtanh.f32 %v1536_v14  ;;  %v1573_v45 = vadd.f32 %v1572_v38, %v6944_v53  ;;  %v1574_v25 = vpop.f32.mrb[129].mxu0 }
 0x2a0   :  { %v5671_v9 = vpop.eup %5670  ;;  %3444 = vmatmul.mubr.bf16.gmra.mrb[116].mxu1 %v2477_v16  ;;  %5696 = vtanh.f32 %v1922_v63  ;;  %v1575_v18 = vadd.f32 %v1574_v25, %v6953_v3  ;;  %v1576_v47 = vpop.f32.mrb[130].mxu0  ;;  %v5423_v16 = vld [vmem:[#allocation8 + $0x3b4] ss:$8 sps:$4 sm:$0xff]   ;;  %3881 = vmatpush1.bf16.msra.mxu0 %v5418_v32  ;;  %v5429_v32 = vld [vmem:[#allocation8 + $0x3c4] ss:$8 sps:$4 sm:$0xff]  }
 0x2a1   :  { %v6955_v31 = vpop.eup %5672  ;;  %5698 = vtanh.f32 %v1573_v45  ;;  %v1577_v46 = vadd.f32 %v1576_v47, %v6944_v53  ;;  %v1578_v42 = vpop.f32.mrb[131].mxu0  ;;  %3882 = vmatprep.subr.bf16.mxu0 %v5423_v16  ;;  %v5427_v45 = vld [vmem:[#allocation8 + $0x3c0] ss:$8 sps:$4 sm:$0xff]  }
 0x2a2   :  { %v5675_v5 = vpop.eup %5674  ;;  %5700 = vtanh.f32 %v1575_v18  ;;  %v1579_v14 = vadd.f32 %v1578_v42, %v6953_v3 }
 0x2a3   :  { %v6958_v35 = vpop.eup %5676  ;;  %v2485_v52 = vpack.c.bf16 %v5675_v5, %v5667_v51  ;;  %5702 = vtanh.f32 %v1577_v46  ;;  %2067 = vmatmul.mubr.bf16.gmra.mrb[236].mxu0 %v6512_v34 }
 0x2a4   :  { %v5679_v19 = vpop.eup %5678  ;;  %5704 = vtanh.f32 %v1579_v14  ;;  %2076 = vmatprep.mubr.bf16.mxu0 %v6526_v59  ;;  %3883 = vmatpush1.bf16.msra.mxu0 %v5421_v20  ;;  %v5432_v59 = vld [vmem:[#allocation8 + $0x3d4] ss:$8 sps:$4 sm:$0xff]  }
 0x2a5   :  { %v6964_v43 = vpop.eup %5680  ;;  %v2486_v63 = vpack.c.bf16 %v5679_v19, %v5671_v9  ;;  %3884 = vmatprep.subr.bf16.mxu0 %v5429_v32 }
 0x2a6   :  { %v5683_v44 = vpop.eup %5682  ;;  %v1582_v25 = vpop.f32.mrb[132].mxu0 }
 0x2a7   :  { %v6970_v38 = vpop.eup %5684  ;;  %3453 = vmatprep.mubr.bf16.mxu1 %v2486_v63  ;;  %v1583_v34 = vadd.f32 %v1582_v25, %v6944_v53  ;;  %v1584_v47 = vpop.f32.mrb[133].mxu0  ;;  %v5430_v63 = vld [vmem:[#allocation8 + $0x3d0] ss:$8 sps:$4 sm:$0xff]  }
 0x2a8   :  { %v5687_v5 = vpop.eup %5686  ;;  %3454 = vmatmul.mubr.bf16.gmra.mrb[120].mxu1 %v2485_v52  ;;  %v1585_v19 = vadd.f32 %v1584_v47, %v6953_v3  ;;  %v1586_v46 = vpop.f32.mrb[134].mxu0  ;;  %3885 = vmatpush1.bf16.msra.mxu0 %v5427_v45  ;;  %v5438_v45 = vld [vmem:[#allocation8 + $0x3e4] ss:$8 sps:$4 sm:$0xff]  }
 0x2a9   :  { %v6973_v9 = vpop.eup %5688  ;;  %5706 = vtanh.f32 %v1583_v34  ;;  %v1587_v52 = vadd.f32 %v1586_v46, %v6944_v53  ;;  %v1588_v20 = vpop.f32.mrb[135].mxu0  ;;  %3886 = vmatprep.subr.bf16.mxu0 %v5432_v59 }
 0x2aa   :  { %v5691_v18 = vpop.eup %5690  ;;  %5708 = vtanh.f32 %v1585_v19  ;;  %v1589_v25 = vadd.f32 %v1588_v20, %v6953_v3  ;;  %v5436_v19 = vld [vmem:[#allocation8 + $0x3e0] ss:$8 sps:$4 sm:$0xff]  }
 0x2ab   :  { %v6976_v16 = vpop.eup %5692  ;;  %v2493_v42 = vpack.c.bf16 %v5691_v18, %v5683_v44  ;;  %5710 = vtanh.f32 %v1587_v52  ;;  %2077 = vmatmul.mubr.bf16.gmra.mrb[240].mxu0 %v6524_v58 }
 0x2ac   :  { %v5695_v14 = vpop.eup %5694  ;;  %5712 = vtanh.f32 %v1589_v25  ;;  %2086 = vmatprep.mubr.bf16.mxu0 %v6538_v29  ;;  %3887 = vmatpush1.bf16.msra.mxu0 %v5430_v63  ;;  %v5441_v25 = vld [vmem:[#allocation8 + $0x3f4] ss:$8 sps:$4 sm:$0xff]  }
 0x2ad   :  { %v6982_v24 = vpop.eup %5696  ;;  %v2494_v51 = vpack.c.bf16 %v5695_v14, %v5687_v5  ;;  %3888 = vmatprep.subr.bf16.mxu0 %v5438_v45 }
 0x2ae   :  { %v5699_v47 = vpop.eup %5698  ;;  %v2498_v44 = vpack.c.bf16 %v6982_v24, %v6973_v9  ;;  %v1592_v5 = vpop.f32.mrb[136].mxu0 }
 0x2af   :  { %v5701_v18 = vpop.eup %5700  ;;  %3463 = vmatprep.mubr.bf16.mxu1 %v2494_v51  ;;  %v1593_v14 = vadd.f32 %v1592_v5, %v6944_v53  ;;  %v1594_v58 = vpop.f32.mrb[137].mxu0  ;;  %v5349_v5 = vld [vmem:[#allocation8 + $0x210] ss:$8 sps:$4 sm:$0xff]  }
 0x2b0   :  { %v5703_v34 = vpop.eup %5702  ;;  %3464 = vmatmul.mubr.bf16.gmra.mrb[124].mxu1 %v2493_v42  ;;  %v1595_v20 = vadd.f32 %v1594_v58, %v6953_v3  ;;  %v1596_v32 = vpop.f32.mrb[138].mxu0  ;;  %3889 = vmatpush1.bf16.msra.mxu0 %v5436_v19  ;;  %v5439_v42 = vld [vmem:[#allocation8 + $0x3f0] ss:$8 sps:$4 sm:$0xff]  }
 0x2b1   :  { %v5705_v46 = vpop.eup %5704  ;;  %v2375_v59 = vpack.c.bf16 %v5703_v34, %v5699_v47  ;;  %5714 = vtanh.f32 %v1593_v14  ;;  %v1597_v29 = vadd.f32 %v1596_v32, %v6944_v53  ;;  %v1598_v51 = vpop.f32.mrb[139].mxu0  ;;  %v5346_v47 = vld [vmem:[#allocation8 + $0x200] ss:$8 sps:$4 sm:$0xff]   ;;  %3890 = vmatprep.subr.bf16.mxu0 %v5441_v25  ;;  %v5354_v25 = vld [vmem:[#allocation8 + $0x224] ss:$8 sps:$4 sm:$0xff]  }
 0x2b2   :  { %v2376_v52 = vpack.c.bf16 %v5705_v46, %v5701_v18  ;;  %5716 = vtanh.f32 %v1595_v20  ;;  %v1599_v63 = vadd.f32 %v1598_v51, %v6953_v3  ;;  %v5351_v18 = vld [vmem:[#allocation8 + $0x214] ss:$8 sps:$4 sm:$0xff]  }
 0x2b3   :  { %v5707_v45 = vpop.eup %5706  ;;  %5718 = vtanh.f32 %v1597_v29  ;;  %2087 = vmatmul.mubr.bf16.gmra.mrb[244].mxu0 %v6536_v28 }
 0x2b4   :  { %3506 = vmatprep.mubr.bf16.mxu1 %v2376_v52  ;;  %v5709_v34 = vpop.eup %5708  ;;  %5720 = vtanh.f32 %v1599_v63  ;;  %2096 = vmatprep.mubr.bf16.mxu0 %v6550_v61 }
 0x2b5   :  { %v5711_v46 = vpop.eup %5710  ;;  %3891 = vmatpush1.bf16.msra.mxu0 %v5439_v42  ;;  %v5352_v42 = vld [vmem:[#allocation8 + $0x220] ss:$8 sps:$4 sm:$0xff]  }
 0x2b6   :  { %v5713_v32 = vpop.eup %5712  ;;  %v1602_v19 = vpop.f32.mrb[140].mxu0  ;;  %v2383_v14 = vpack.c.bf16 %v5711_v46, %v5707_v45 }
 0x2b7   :  { %v1603_v58 = vadd.f32 %v1602_v19, %v6944_v53  ;;  %v1604_v52 = vpop.f32.mrb[141].mxu0  ;;  %v2384_v20 = vpack.c.bf16 %v5713_v32, %v5709_v34  ;;  %v5355_v19 = vld [vmem:[#allocation8 + $0x230] ss:$8 sps:$4 sm:$0xff]  }
 0x2b8   :  { %3507 = vmatmul.mubr.bf16.vlgmr.msra.gmra.mrb[64].mxu1 %v2375_v59  ;;  %v1605_v28 = vadd.f32 %v1604_v52, %v6953_v3  ;;  %v1606_v29 = vpop.f32.mrb[142].mxu0 }
 0x2b9   :  { %3668 = vmatpush1.bf16.msra.mxu1 %v5346_v47  ;;  %5722 = vtanh.f32 %v1603_v58  ;;  %v1607_v61 = vadd.f32 %v1606_v29, %v6944_v53  ;;  %v1608_v51 = vpop.f32.mrb[143].mxu0  ;;  %3516 = vmatprep.mubr.bf16.mxu1 %v2384_v20  ;;  %v5357_v47 = vld [vmem:[#allocation8 + $0x234] ss:$8 sps:$4 sm:$0xff]   ;;  %v5360_v20 = vld [vmem:[#allocation8 + $0x244] ss:$8 sps:$4 sm:$0xff]  }
 0x2ba   :  { %3669 = vmatprep.subr.bf16.mxu1 %v5351_v18  ;;  %5724 = vtanh.f32 %v1605_v28  ;;  %v1609_v59 = vadd.f32 %v1608_v51, %v6953_v3  ;;  %v5358_v29 = vld [vmem:[#allocation8 + $0x240] ss:$8 sps:$4 sm:$0xff]   ;;  %v5363_v51 = vld [vmem:[#allocation8 + $0x254] ss:$8 sps:$4 sm:$0xff]  }
 0x2bb   :  { %v5715_v63 = vpop.eup %5714  ;;  %5726 = vtanh.f32 %v1607_v61  ;;  %2097 = vmatmul.mubr.bf16.gmra.mrb[248].mxu0 %v6548_v60 }
 0x2bc   :  { %v5717_v45 = vpop.eup %5716  ;;  %5728 = vtanh.f32 %v1609_v59  ;;  %2106 = vmatprep.mubr.bf16.mxu0 %v6562_v36 }
 0x2bd   :  { %3670 = vmatpush1.bf16.msra.mxu1 %v5349_v5  ;;  %v5719_v18 = vpop.eup %5718 }
 0x2be   :  { %3671 = vmatprep.subr.bf16.mxu1 %v5354_v25  ;;  %v5721_v34 = vpop.eup %5720  ;;  %v1612_v46 = vpop.f32.mrb[144].mxu0  ;;  %v2391_v32 = vpack.c.bf16 %v5719_v18, %v5715_v63  ;;  %v5361_v18 = vld [vmem:[#allocation8 + $0x250] ss:$8 sps:$4 sm:$0xff]  }
 0x2bf   :  { %v1613_v5 = vadd.f32 %v1612_v46, %v6944_v53  ;;  %v1614_v58 = vpop.f32.mrb[145].mxu0  ;;  %v2392_v52 = vpack.c.bf16 %v5721_v34, %v5717_v45 }
 0x2c0   :  { %3517 = vmatmul.mubr.bf16.gmra.mrb[68].mxu1 %v2383_v14  ;;  %v1615_v60 = vadd.f32 %v1614_v58, %v6953_v3  ;;  %v1616_v25 = vpop.f32.mrb[146].mxu0 }
 0x2c1   :  { %3672 = vmatpush1.bf16.msra.mxu1 %v5352_v42  ;;  %5730 = vtanh.f32 %v1613_v5  ;;  %v1617_v28 = vadd.f32 %v1616_v25, %v6944_v53  ;;  %v1618_v36 = vpop.f32.mrb[147].mxu0  ;;  %3526 = vmatprep.mubr.bf16.mxu1 %v2392_v52  ;;  %v5366_v5 = vld [vmem:[#allocation8 + $0x264] ss:$8 sps:$4 sm:$0xff]  }
 0x2c2   :  { %3673 = vmatprep.subr.bf16.mxu1 %v5357_v47  ;;  %5732 = vtanh.f32 %v1615_v60  ;;  %v1619_v14 = vadd.f32 %v1618_v36, %v6953_v3  ;;  %v5364_v60 = vld [vmem:[#allocation8 + $0x260] ss:$8 sps:$4 sm:$0xff]  }
 0x2c3   :  { %v5723_v61 = vpop.eup %5722  ;;  %5734 = vtanh.f32 %v1617_v28  ;;  %2107 = vmatmul.mubr.bf16.gmra.mrb[252].mxu0 %v6560_v33  ;;  %v5369_v28 = vld [vmem:[#allocation8 + $0x274] ss:$8 sps:$4 sm:$0xff]  }
 0x2c4   :  { %v5725_v59 = vpop.eup %5724  ;;  %5736 = vtanh.f32 %v1619_v14 }
 0x2c5   :  { %3674 = vmatpush1.bf16.msra.mxu1 %v5355_v19  ;;  %v5727_v42 = vpop.eup %5726 }
 0x2c6   :  { %3675 = vmatprep.subr.bf16.mxu1 %v5360_v20  ;;  %v5729_v63 = vpop.eup %5728  ;;  %v1622_v47 = vpop.f32.mrb[148].mxu0  ;;  %v2399_v45 = vpack.c.bf16 %v5727_v42, %v5723_v61 }
 0x2c7   :  { %v1623_v34 = vadd.f32 %v1622_v47, %v6944_v53  ;;  %v1624_v46 = vpop.f32.mrb[149].mxu0  ;;  %v2400_v19 = vpack.c.bf16 %v5729_v63, %v5725_v59  ;;  %v5367_v59 = vld [vmem:[#allocation8 + $0x270] ss:$8 sps:$4 sm:$0xff]  }
 0x2c8   :  { %3527 = vmatmul.mubr.bf16.gmra.mrb[72].mxu1 %v2391_v32  ;;  %v1625_v58 = vadd.f32 %v1624_v46, %v6953_v3  ;;  %v1626_v33 = vpop.f32.mrb[150].mxu0 }
 0x2c9   :  { %3676 = vmatpush1.bf16.msra.mxu1 %v5358_v29  ;;  %5738 = vtanh.f32 %v1623_v34  ;;  %v1627_v52 = vadd.f32 %v1626_v33, %v6944_v53  ;;  %v1628_v20 = vpop.f32.mrb[151].mxu0  ;;  %3536 = vmatprep.mubr.bf16.mxu1 %v2400_v19 }
 0x2ca   :  { %3677 = vmatprep.subr.bf16.mxu1 %v5363_v51  ;;  %5740 = vtanh.f32 %v1625_v58  ;;  %v1629_v32 = vadd.f32 %v1628_v20, %v6953_v3  ;;  %v5370_v58 = vld [vmem:[#allocation8 + $0x280] ss:$8 sps:$4 sm:$0xff]  }
 0x2cb   :  { %v5731_v25 = vpop.eup %5730  ;;  %5742 = vtanh.f32 %v1627_v52  ;;  %v5381_v52 = vld [vmem:[#allocation8 + $0x294] ss:$8 sps:$4 sm:$0xff]  }
 0x2cc   :  { %v5733_v36 = vpop.eup %5732  ;;  %5744 = vtanh.f32 %v1629_v32 }
 0x2cd   :  { %3678 = vmatpush1.bf16.msra.mxu1 %v5361_v18  ;;  %v5735_v14 = vpop.eup %5734  ;;  %v5372_v18 = vld [vmem:[#allocation8 + $0x284] ss:$8 sps:$4 sm:$0xff]  }
 0x2ce   :  { %3679 = vmatprep.subr.bf16.mxu1 %v5366_v5  ;;  %v5737_v29 = vpop.eup %5736  ;;  %v1632_v61 = vpop.f32.mrb[152].mxu0  ;;  %v2407_v51 = vpack.c.bf16 %v5735_v14, %v5731_v25 }
 0x2cf   :  { %v1633_v42 = vadd.f32 %v1632_v61, %v6944_v53  ;;  %v1634_v63 = vpop.f32.mrb[153].mxu0  ;;  %v2408_v47 = vpack.c.bf16 %v5737_v29, %v5733_v36  ;;  %v5379_v36 = vld [vmem:[#allocation8 + $0x290] ss:$8 sps:$4 sm:$0xff]  }
 0x2d0   :  { %3537 = vmatmul.mubr.bf16.gmra.mrb[76].mxu1 %v2399_v45  ;;  %v1635_v34 = vadd.f32 %v1634_v63, %v6953_v3  ;;  %v1636_v46 = vpop.f32.mrb[154].mxu0 }
 0x2d1   :  { %3680 = vmatpush1.bf16.msra.mxu1 %v5364_v60  ;;  %5746 = vtanh.f32 %v1633_v42  ;;  %v1637_v19 = vadd.f32 %v1636_v46, %v6944_v53  ;;  %v1638_v5 = vpop.f32.mrb[155].mxu0  ;;  %3546 = vmatprep.mubr.bf16.mxu1 %v2408_v47 }
 0x2d2   :  { %3681 = vmatprep.subr.bf16.mxu1 %v5369_v28  ;;  %5748 = vtanh.f32 %v1635_v34  ;;  %v1639_v45 = vadd.f32 %v1638_v5, %v6953_v3  ;;  %v5388_v34 = vld [vmem:[#allocation8 + $0x2a0] ss:$8 sps:$4 sm:$0xff]  }
 0x2d3   :  { %v5739_v33 = vpop.eup %5738  ;;  %5750 = vtanh.f32 %v1637_v19  ;;  %v5399_v19 = vld [vmem:[#allocation8 + $0x2b4] ss:$8 sps:$4 sm:$0xff]  }
 0x2d4   :  { %v5741_v20 = vpop.eup %5740  ;;  %5752 = vtanh.f32 %v1639_v45 }
 0x2d5   :  { %3682 = vmatpush1.bf16.msra.mxu1 %v5367_v59  ;;  %v5743_v32 = vpop.eup %5742  ;;  %v5390_v59 = vld [vmem:[#allocation8 + $0x2a4] ss:$8 sps:$4 sm:$0xff]  }
 0x2d6   :  { %3683 = vmatprep.subr.bf16.mxu1 %v5372_v18  ;;  %v5745_v60 = vpop.eup %5744  ;;  %v1642_v25 = vpop.f32.mrb[156].mxu0  ;;  %v2415_v28 = vpack.c.bf16 %v5743_v32, %v5739_v33 }
 0x2d7   :  { %v1643_v14 = vadd.f32 %v1642_v25, %v6944_v53  ;;  %v1644_v29 = vpop.f32.mrb[157].mxu0  ;;  %v2416_v61 = vpack.c.bf16 %v5745_v60, %v5741_v20  ;;  %v5397_v20 = vld [vmem:[#allocation8 + $0x2b0] ss:$8 sps:$4 sm:$0xff]  }
 0x2d8   :  { %3547 = vmatmul.mubr.bf16.gmra.mrb[80].mxu1 %v2407_v51  ;;  %v1645_v42 = vadd.f32 %v1644_v29, %v6953_v3  ;;  %v1646_v63 = vpop.f32.mrb[158].mxu0 }
 0x2d9   :  { %3684 = vmatpush1.bf16.msra.mxu1 %v5370_v58  ;;  %5754 = vtanh.f32 %v1643_v14  ;;  %v1647_v47 = vadd.f32 %v1646_v63, %v6944_v53  ;;  %v1648_v18 = vpop.f32.mrb[159].mxu0  ;;  %3556 = vmatprep.mubr.bf16.mxu1 %v2416_v61 }
 0x2da   :  { %3685 = vmatprep.subr.bf16.mxu1 %v5381_v52  ;;  %5756 = vtanh.f32 %v1645_v42  ;;  %v1649_v51 = vadd.f32 %v1648_v18, %v6953_v3  ;;  %v5406_v42 = vld [vmem:[#allocation8 + $0x2c0] ss:$8 sps:$4 sm:$0xff]  }
 0x2db   :  { %v5747_v46 = vpop.eup %5746  ;;  %5758 = vtanh.f32 %v1647_v47  ;;  %v5417_v47 = vld [vmem:[#allocation8 + $0x2d4] ss:$8 sps:$4 sm:$0xff]  }
 0x2dc   :  { %v5749_v5 = vpop.eup %5748  ;;  %5760 = vtanh.f32 %v1649_v51 }
 0x2dd   :  { %3686 = vmatpush1.bf16.msra.mxu1 %v5379_v36  ;;  %v5751_v45 = vpop.eup %5750  ;;  %v5408_v36 = vld [vmem:[#allocation8 + $0x2c4] ss:$8 sps:$4 sm:$0xff]  }
 0x2de   :  { %3687 = vmatprep.subr.bf16.mxu1 %v5390_v59  ;;  %v5753_v58 = vpop.eup %5752  ;;  %v1652_v33 = vpop.f32.mrb[160].mxu0  ;;  %v2423_v52 = vpack.c.bf16 %v5751_v45, %v5747_v46 }
 0x2df   :  { %v1653_v32 = vadd.f32 %v1652_v33, %v6944_v53  ;;  %v1654_v60 = vpop.f32.mrb[161].mxu0  ;;  %v2424_v25 = vpack.c.bf16 %v5753_v58, %v5749_v5  ;;  %v5415_v5 = vld [vmem:[#allocation8 + $0x2d0] ss:$8 sps:$4 sm:$0xff]  }
 0x2e0   :  { %3557 = vmatmul.mubr.bf16.gmra.mrb[84].mxu1 %v2415_v28  ;;  %v1655_v14 = vadd.f32 %v1654_v60, %v6953_v3  ;;  %v1656_v29 = vpop.f32.mrb[162].mxu0 }
 0x2e1   :  { %3688 = vmatpush1.bf16.msra.mxu1 %v5388_v34  ;;  %5762 = vtanh.f32 %v1653_v32  ;;  %v1657_v61 = vadd.f32 %v1656_v29, %v6944_v53  ;;  %v1658_v59 = vpop.f32.mrb[163].mxu0  ;;  %3566 = vmatprep.mubr.bf16.mxu1 %v2424_v25 }
 0x2e2   :  { %3689 = vmatprep.subr.bf16.mxu1 %v5399_v19  ;;  %5764 = vtanh.f32 %v1655_v14  ;;  %v1659_v28 = vadd.f32 %v1658_v59, %v6953_v3  ;;  %v5424_v14 = vld [vmem:[#allocation8 + $0x2e0] ss:$8 sps:$4 sm:$0xff]  }
 0x2e3   :  { %v5755_v63 = vpop.eup %5754  ;;  %5766 = vtanh.f32 %v1657_v61  ;;  %v5435_v61 = vld [vmem:[#allocation8 + $0x2f4] ss:$8 sps:$4 sm:$0xff]  }
 0x2e4   :  { %v5757_v18 = vpop.eup %5756  ;;  %5768 = vtanh.f32 %v1659_v28 }
 0x2e5   :  { %3690 = vmatpush1.bf16.msra.mxu1 %v5397_v20  ;;  %v5759_v51 = vpop.eup %5758  ;;  %v5426_v20 = vld [vmem:[#allocation8 + $0x2e4] ss:$8 sps:$4 sm:$0xff]  }
 0x2e6   :  { %3691 = vmatprep.subr.bf16.mxu1 %v5408_v36  ;;  %v5761_v34 = vpop.eup %5760  ;;  %v1662_v46 = vpop.f32.mrb[164].mxu0  ;;  %v2431_v19 = vpack.c.bf16 %v5759_v51, %v5755_v63 }
 0x2e7   :  { %v1663_v45 = vadd.f32 %v1662_v46, %v6944_v53  ;;  %v1664_v58 = vpop.f32.mrb[165].mxu0  ;;  %v2432_v33 = vpack.c.bf16 %v5761_v34, %v5757_v18  ;;  %v5433_v18 = vld [vmem:[#allocation8 + $0x2f0] ss:$8 sps:$4 sm:$0xff]  }
 0x2e8   :  { %3567 = vmatmul.mubr.bf16.gmra.mrb[88].mxu1 %v2423_v52  ;;  %v1665_v32 = vadd.f32 %v1664_v58, %v6953_v3  ;;  %v1666_v60 = vpop.f32.mrb[166].mxu0 }
 0x2e9   :  { %3692 = vmatpush1.bf16.msra.mxu1 %v5406_v42  ;;  %5770 = vtanh.f32 %v1663_v45  ;;  %v1667_v25 = vadd.f32 %v1666_v60, %v6944_v53  ;;  %v1668_v36 = vpop.f32.mrb[167].mxu0  ;;  %3576 = vmatprep.mubr.bf16.mxu1 %v2432_v33 }
 0x2ea   :  { %3693 = vmatprep.subr.bf16.mxu1 %v5417_v47  ;;  %5772 = vtanh.f32 %v1665_v32  ;;  %v1669_v52 = vadd.f32 %v1668_v36, %v6953_v3  ;;  %v6083_v32 = vld [vmem:[#allocation8 + $0x304] ss:$8 sps:$4 sm:$0xff]  }
 0x2eb   :  { %v5763_v29 = vpop.eup %5762  ;;  %5774 = vtanh.f32 %v1667_v25 }
 0x2ec   :  { %v5765_v59 = vpop.eup %5764  ;;  %5776 = vtanh.f32 %v1669_v52 }
 0x2ed   :  { %3694 = vmatpush1.bf16.msra.mxu1 %v5415_v5  ;;  %v5767_v28 = vpop.eup %5766 }
 0x2ee   :  { %3695 = vmatprep.subr.bf16.mxu1 %v5426_v20  ;;  %v5769_v42 = vpop.eup %5768  ;;  %v1672_v63 = vpop.f32.mrb[168].mxu0  ;;  %v2439_v47 = vpack.c.bf16 %v5767_v28, %v5763_v29 }
 0x2ef   :  { %v1673_v51 = vadd.f32 %v1672_v63, %v6944_v53  ;;  %v1674_v34 = vpop.f32.mrb[169].mxu0  ;;  %v2440_v46 = vpack.c.bf16 %v5769_v42, %v5765_v59 }
 0x2f0   :  { %3577 = vmatmul.mubr.bf16.gmra.mrb[92].mxu1 %v2431_v19  ;;  %v1675_v5 = vadd.f32 %v1674_v34, %v6953_v3  ;;  %v1676_v45 = vpop.f32.mrb[170].mxu0 }
 0x2f1   :  { %3696 = vmatpush1.bf16.msra.mxu1 %v5424_v14  ;;  %5778 = vtanh.f32 %v1673_v51  ;;  %v1677_v58 = vadd.f32 %v1676_v45, %v6944_v53  ;;  %v1678_v33 = vpop.f32.mrb[171].mxu0  ;;  %3586 = vmatprep.mubr.bf16.mxu1 %v2440_v46 }
 0x2f2   :  { %3697 = vmatprep.subr.bf16.mxu1 %v5435_v61  ;;  %5780 = vtanh.f32 %v1675_v5  ;;  %v1679_v19 = vadd.f32 %v1678_v33, %v6953_v3 }
 0x2f3   :  { %v5771_v20 = vpop.eup %5770  ;;  %5782 = vtanh.f32 %v1677_v58 }
 0x2f4   :  { %v5773_v60 = vpop.eup %5772  ;;  %5784 = vtanh.f32 %v1679_v19 }
 0x2f5   :  { %3698 = vmatpush1.bf16.msra.mxu1 %v5433_v18  ;;  %v5775_v25 = vpop.eup %5774 }
 0x2f6   :  { %4929 = vmatprep.subr.bf16.mxu1 %v6083_v32  ;;  %v5777_v36 = vpop.eup %5776  ;;  %v1682_v52 = vpop.f32.mrb[172].mxu0  ;;  %v2447_v14 = vpack.c.bf16 %v5775_v25, %v5771_v20 }
 0x2f7   :  { %v1683_v29 = vadd.f32 %v1682_v52, %v6944_v53  ;;  %v1684_v61 = vpop.f32.mrb[173].mxu0  ;;  %v2448_v59 = vpack.c.bf16 %v5777_v36, %v5773_v60 }
 0x2f8   :  { %3587 = vmatmul.mubr.bf16.gmra.mrb[96].mxu1 %v2439_v47  ;;  %v1685_v28 = vadd.f32 %v1684_v61, %v6953_v3  ;;  %v1686_v42 = vpop.f32.mrb[174].mxu0 }
 0x2f9   :  { %5786 = vtanh.f32 %v1683_v29  ;;  %v1687_v63 = vadd.f32 %v1686_v42, %v6944_v53  ;;  %v1688_v18 = vpop.f32.mrb[175].mxu0  ;;  %3596 = vmatprep.mubr.bf16.mxu1 %v2448_v59 }
 0x2fa   :  { %5788 = vtanh.f32 %v1685_v28  ;;  %v1689_v51 = vadd.f32 %v1688_v18, %v6953_v3 }
 0x2fb   :  { %v5779_v34 = vpop.eup %5778  ;;  %5790 = vtanh.f32 %v1687_v63 }
 0x2fc   :  { %v5781_v47 = vpop.eup %5780  ;;  %5792 = vtanh.f32 %v1689_v51 }
 0x2fd   :  { %v5783_v46 = vpop.eup %5782 }
 0x2fe   :  { %v5785_v5 = vpop.eup %5784  ;;  %v1692_v45 = vpop.f32.mrb[176].mxu0  ;;  %v2455_v58 = vpack.c.bf16 %v5783_v46, %v5779_v34 }
 0x2ff   :  { %v1693_v33 = vadd.f32 %v1692_v45, %v6944_v53  ;;  %v1694_v19 = vpop.f32.mrb[177].mxu0  ;;  %v2456_v20 = vpack.c.bf16 %v5785_v5, %v5781_v47 }
 0x300   :  { %3597 = vmatmul.mubr.bf16.gmra.mrb[100].mxu1 %v2447_v14  ;;  %v1695_v32 = vadd.f32 %v1694_v19, %v6953_v3  ;;  %v1696_v60 = vpop.f32.mrb[178].mxu0 }
 0x301   :  { %5794 = vtanh.f32 %v1693_v33  ;;  %v1697_v25 = vadd.f32 %v1696_v60, %v6944_v53  ;;  %v1698_v36 = vpop.f32.mrb[179].mxu0  ;;  %3606 = vmatprep.mubr.bf16.mxu1 %v2456_v20 }
 0x302   :  { %5796 = vtanh.f32 %v1695_v32  ;;  %v1699_v52 = vadd.f32 %v1698_v36, %v6953_v3 }
 0x303   :  { %v5787_v29 = vpop.eup %5786  ;;  %5798 = vtanh.f32 %v1697_v25 }
 0x304   :  { %v5789_v14 = vpop.eup %5788  ;;  %5800 = vtanh.f32 %v1699_v52 }
 0x305   :  { %v5791_v61 = vpop.eup %5790 }
 0x306   :  { %v5793_v59 = vpop.eup %5792  ;;  %v1702_v28 = vpop.f32.mrb[180].mxu0  ;;  %v2463_v42 = vpack.c.bf16 %v5791_v61, %v5787_v29 }
 0x307   :  { %v1703_v63 = vadd.f32 %v1702_v28, %v6944_v53  ;;  %v1704_v18 = vpop.f32.mrb[181].mxu0  ;;  %v2464_v51 = vpack.c.bf16 %v5793_v59, %v5789_v14 }
 0x308   :  { %3607 = vmatmul.mubr.bf16.gmra.mrb[104].mxu1 %v2455_v58  ;;  %v1705_v34 = vadd.f32 %v1704_v18, %v6953_v3  ;;  %v1706_v47 = vpop.f32.mrb[182].mxu0 }
 0x309   :  { %5802 = vtanh.f32 %v1703_v63  ;;  %v1707_v46 = vadd.f32 %v1706_v47, %v6944_v53  ;;  %v1708_v5 = vpop.f32.mrb[183].mxu0  ;;  %3616 = vmatprep.mubr.bf16.mxu1 %v2464_v51 }
 0x30a   :  { %5804 = vtanh.f32 %v1705_v34  ;;  %v1709_v45 = vadd.f32 %v1708_v5, %v6953_v3 }
 0x30b   :  { %v5795_v33 = vpop.eup %5794  ;;  %5806 = vtanh.f32 %v1707_v46 }
 0x30c   :  { %v5797_v58 = vpop.eup %5796  ;;  %5808 = vtanh.f32 %v1709_v45 }
 0x30d   :  { %v5799_v19 = vpop.eup %5798 }
 0x30e   :  { %v5801_v20 = vpop.eup %5800  ;;  %v1712_v32 = vpop.f32.mrb[184].mxu0  ;;  %v2471_v60 = vpack.c.bf16 %v5799_v19, %v5795_v33  ;;  %v691_v33 = vsub.s32 6, %v6351_v11 }
 0x30f   :  { %v1713_v25 = vadd.f32 %v1712_v32, %v6944_v53  ;;  %v1714_v36 = vpop.f32.mrb[185].mxu0  ;;  %v2472_v52 = vpack.c.bf16 %v5801_v20, %v5797_v58  ;;  %v695_v20 = vsub.s32 7, %v6351_v11 }
 0x310   :  { %3617 = vmatmul.mubr.bf16.gmra.mrb[108].mxu1 %v2463_v42  ;;  %v1715_v29 = vadd.f32 %v1714_v36, %v6953_v3  ;;  %v1716_v14 = vpop.f32.mrb[186].mxu0 }
 0x311   :  { %5810 = vtanh.f32 %v1713_v25  ;;  %v1717_v61 = vadd.f32 %v1716_v14, %v6944_v53  ;;  %v1718_v59 = vpop.f32.mrb[187].mxu0  ;;  %3626 = vmatprep.mubr.bf16.mxu1 %v2472_v52  ;;  %v7053_v52 = vrot.slane %v6941_v40, %v691_v33  ;;  %v7056_v14 = vrot.slane %v6941_v40, %v695_v20 }
 0x312   :  { %5812 = vtanh.f32 %v1715_v29  ;;  %v1719_v28 = vadd.f32 %v1718_v59, %v6953_v3 }
 0x313   :  { %v5803_v63 = vpop.eup %5802  ;;  %5814 = vtanh.f32 %v1717_v61 }
 0x314   :  { %v5805_v42 = vpop.eup %5804  ;;  %5816 = vtanh.f32 %v1719_v28 }
 0x315   :  { %v5807_v18 = vpop.eup %5806 }
 0x316   :  { %v5809_v51 = vpop.eup %5808  ;;  %v1722_v34 = vpop.f32.mrb[188].mxu0  ;;  %v2479_v47 = vpack.c.bf16 %v5807_v18, %v5803_v63 }
 0x317   :  { %v1723_v46 = vadd.f32 %v1722_v34, %v6944_v53  ;;  %v1724_v5 = vpop.f32.mrb[189].mxu0  ;;  %v2480_v45 = vpack.c.bf16 %v5809_v51, %v5805_v42 }
 0x318   :  { %3627 = vmatmul.mubr.bf16.gmra.mrb[112].mxu1 %v2471_v60  ;;  %v1725_v58 = vadd.f32 %v1724_v5, %v6953_v3  ;;  %v1726_v19 = vpop.f32.mrb[190].mxu0 }
 0x319   :  { %5818 = vtanh.f32 %v1723_v46  ;;  %v1727_v32 = vadd.f32 %v1726_v19, %v6944_v53  ;;  %v1728_v25 = vpop.f32.mrb[191].mxu0  ;;  %3636 = vmatprep.mubr.bf16.mxu1 %v2480_v45 }
 0x31a   :  { %5820 = vtanh.f32 %v1725_v58  ;;  %v1729_v60 = vadd.f32 %v1728_v25, %v6953_v3 }
 0x31b   :  { %v5811_v36 = vpop.eup %5810  ;;  %5822 = vtanh.f32 %v1727_v32 }
 0x31c   :  { %v5813_v29 = vpop.eup %5812  ;;  %5824 = vtanh.f32 %v1729_v60 }
 0x31d   :  { %v5815_v61 = vpop.eup %5814 }
 0x31e   :  { %v5817_v11 = vpop.eup %5816  ;;  %v1958_v59 = vpop.f32.mrb[192].mxu0  ;;  %v2487_v53 = vpack.c.bf16 %v5815_v61, %v5811_v36 }
 0x31f   :  { %v1959_v28 = vadd.f32 %v1958_v59, %v7053_v52  ;;  %v1960_v63 = vpop.f32.mrb[193].mxu0  ;;  %v2488_v42 = vpack.c.bf16 %v5817_v11, %v5813_v29 }
 0x320   :  { %3637 = vmatmul.mubr.bf16.gmra.mrb[116].mxu1 %v2479_v47  ;;  %v1961_v3 = vadd.f32 %v1960_v63, %v7056_v14  ;;  %v1962_v18 = vpop.f32.mrb[194].mxu0 }
 0x321   :  { %5826 = vtanh.f32 %v1959_v28  ;;  %v1963_v51 = vadd.f32 %v1962_v18, %v7053_v52  ;;  %v1964_v34 = vpop.f32.mrb[195].mxu0  ;;  %3646 = vmatprep.mubr.bf16.mxu1 %v2488_v42  ;;  %v7641_v42 = vpack.c.bf16 %v6642_v62, %v6631_v2 }
 0x322   :  { %5828 = vtanh.f32 %v1961_v3  ;;  %v1965_v40 = vadd.f32 %v1964_v34, %v7056_v14 }
 0x323   :  { %v5819_v46 = vpop.eup %5818  ;;  %5830 = vtanh.f32 %v1963_v51 }
 0x324   :  { %v5821_v47 = vpop.eup %5820  ;;  %5832 = vtanh.f32 %v1965_v40 }
 0x325   :  { %v5823_v5 = vpop.eup %5822 }
 0x326   :  { %v5825_v45 = vpop.eup %5824  ;;  %v1968_v33 = vpop.f32.mrb[196].mxu0  ;;  %v2495_v58 = vpack.c.bf16 %v5823_v5, %v5819_v46 }
 0x327   :  { %v1969_v19 = vadd.f32 %v1968_v33, %v7053_v52  ;;  %v1970_v20 = vpop.f32.mrb[197].mxu0  ;;  %v2496_v32 = vpack.c.bf16 %v5825_v45, %v5821_v47 }
 0x328   :  { %3647 = vmatmul.mubr.bf16.gmra.mrb[120].mxu1 %v2487_v53  ;;  %v1971_v25 = vadd.f32 %v1970_v20, %v7056_v14  ;;  %v1972_v60 = vpop.f32.mrb[198].mxu0 }
 0x329   :  { %5834 = vtanh.f32 %v1969_v19  ;;  %v1973_v36 = vadd.f32 %v1972_v60, %v7053_v52  ;;  %v1974_v29 = vpop.f32.mrb[199].mxu0  ;;  %3656 = vmatprep.mubr.bf16.mxu1 %v2496_v32  ;;  %v7643_v19 = vld [vmem:[#allocation15_spill] sm:$0xff]  ;;  %v6084_v60 = vld [vmem:[#allocation8 + $0x300] ss:$8 sps:$4 sm:$0xff]  }
 0x32a   :  { %5836 = vtanh.f32 %v1971_v25  ;;  %v1975_v61 = vadd.f32 %v1974_v29, %v7056_v14  ;;  %v7646_v29 = vld [vmem:[#allocation18_spill] sm:$0xff] }
 0x32b   :  { %v5827_v11 = vpop.eup %5826  ;;  %5838 = vtanh.f32 %v1973_v36  ;;  %v7645_v36 = vld [vmem:[#allocation20_spill] sm:$0xff] }
 0x32c   :  { %v5829_v59 = vpop.eup %5828  ;;  %5840 = vtanh.f32 %v1975_v61  ;;  %v7647_v61 = vpack.c.bf16 %v7645_v36, %v7646_v29  ;;  %v6088_v36 = vld [vmem:[#allocation8 + $0x320] ss:$8 sps:$4 sm:$0xff]  }
 0x32d   :  { %v5831_v53 = vpop.eup %5830 }
 0x32e   :  { %v5833_v28 = vpop.eup %5832  ;;  %v2379_v63 = vpack.c.bf16 %v5831_v53, %v5827_v11  ;;  %v1978_v3 = vpop.f32.mrb[200].mxu0 }
 0x32f   :  { %v1979_v18 = vadd.f32 %v1978_v3, %v7053_v52  ;;  %v1980_v51 = vpop.f32.mrb[201].mxu0  ;;  %v2380_v34 = vpack.c.bf16 %v5833_v28, %v5829_v59  ;;  %v6085_v28 = vld [vmem:[#allocation8 + $0x314] ss:$8 sps:$4 sm:$0xff]  }
 0x330   :  { %3657 = vmatmul.mubr.bf16.gmra.mrb[124].mxu1 %v2495_v58  ;;  %v1981_v40 = vadd.f32 %v1980_v51, %v7056_v14  ;;  %v1982_v46 = vpop.f32.mrb[202].mxu0  ;;  %v7642_v58 = vld [vmem:[#allocation16_spill] sm:$0xff] }
 0x331   :  { %3699 = vmatprep.mubr.bf16.mxu1 %v7641_v42  ;;  %5842 = vtanh.f32 %v1979_v18  ;;  %v1983_v47 = vadd.f32 %v1982_v46, %v7053_v52  ;;  %v1984_v5 = vpop.f32.mrb[203].mxu0  ;;  %3892 = vmatprep.mubr.bf16.mxu0 %v2380_v34  ;;  %v7644_v20 = vpack.c.bf16 %v7642_v58, %v7643_v19 }
 0x332   :  { %5844 = vtanh.f32 %v1981_v40  ;;  %v1985_v45 = vadd.f32 %v1984_v5, %v7056_v14  ;;  %3893 = vmatmul.mubr.bf16.vlgmr.msra.gmra.mrb[0].mxu0 %v2379_v63  ;;  %v6086_v40 = vld [vmem:[#allocation8 + $0x310] ss:$8 sps:$4 sm:$0xff]  }
 0x333   :  { %v5835_v33 = vpop.eup %5834  ;;  %5846 = vtanh.f32 %v1983_v47  ;;  %v6087_v47 = vld [vmem:[#allocation8 + $0x324] ss:$8 sps:$4 sm:$0xff]  }
 0x334   :  { %v5837_v2 = vpop.eup %5836  ;;  %5848 = vtanh.f32 %v1985_v45 }
 0x335   :  { %v5839_v62 = vpop.eup %5838 }
 0x336   :  { %v5841_v32 = vpop.eup %5840  ;;  %v2387_v25 = vpack.c.bf16 %v5839_v62, %v5835_v33  ;;  %v1988_v11 = vpop.f32.mrb[204].mxu0  ;;  %v7648_v33 = vld [vmem:[#allocation19_spill] sm:$0xff] }
 0x337   :  { %v1989_v59 = vadd.f32 %v1988_v11, %v7053_v52  ;;  %v1990_v53 = vpop.f32.mrb[205].mxu0  ;;  %v2388_v63 = vpack.c.bf16 %v5841_v32, %v5837_v2  ;;  %v7649_v2 = vld [vmem:[#allocation17_spill] sm:$0xff]  ;;  %v6089_v11 = vld [vmem:[#allocation8 + $0x334] ss:$8 sps:$4 sm:$0xff]  }
 0x338   :  { %3700 = vmatmul.mubr.bf16.vlgmr.msra.gmra.mrb[64].mxu1 %v7644_v20  ;;  %v1991_v42 = vadd.f32 %v1990_v53, %v7056_v14  ;;  %v1992_v3 = vpop.f32.mrb[206].mxu0  ;;  %v7650_v62 = vpack.c.bf16 %v7648_v33, %v7649_v2  ;;  %v7651_v20 = vld [vmem:[#allocation22_spill] sm:$0xff]  ;;  %v7656_v33 = vpack.c.bf16 %v6708_v49, %v6697_v12  ;;  %v6094_v12 = vld [vmem:[#allocation8 + $0x350] ss:$8 sps:$4 sm:$0xff]  }
 0x339   :  { %4945 = vmatpush1.bf16.msra.mxu1 %v6084_v60  ;;  %3709 = vmatprep.mubr.bf16.mxu1 %v7647_v61  ;;  %5850 = vtanh.f32 %v1989_v59  ;;  %v1993_v18 = vadd.f32 %v1992_v3, %v7053_v52  ;;  %v1994_v51 = vpop.f32.mrb[207].mxu0  ;;  %v7652_v32 = vpack.c.bf16 %v6686_v13, %v7651_v20 }
 0x33a   :  { %4930 = vmatprep.subr.bf16.mxu1 %v6085_v28  ;;  %3902 = vmatprep.mubr.bf16.mxu0 %v2388_v63  ;;  %5852 = vtanh.f32 %v1991_v42  ;;  %v1995_v34 = vadd.f32 %v1994_v51, %v7056_v14  ;;  %v6090_v42 = vld [vmem:[#allocation8 + $0x330] ss:$8 sps:$4 sm:$0xff]  }
 0x33b   :  { %3903 = vmatmul.mubr.bf16.gmra.mrb[4].mxu0 %v2387_v25  ;;  %v5843_v46 = vpop.eup %5842  ;;  %5854 = vtanh.f32 %v1993_v18  ;;  %v6091_v18 = vld [vmem:[#allocation8 + $0x344] ss:$8 sps:$4 sm:$0xff]  }
 0x33c   :  { %v5845_v5 = vpop.eup %5844  ;;  %5856 = vtanh.f32 %v1995_v34 }
 0x33d   :  { %4946 = vmatpush1.bf16.msra.mxu1 %v6086_v40  ;;  %v5847_v45 = vpop.eup %5846  ;;  %v7653_v40 = vld [vmem:[#allocation23_spill] sm:$0xff] }
 0x33e   :  { %4931 = vmatprep.subr.bf16.mxu1 %v6087_v47  ;;  %v5849_v58 = vpop.eup %5848  ;;  %v2395_v19 = vpack.c.bf16 %v5847_v45, %v5843_v46  ;;  %v1998_v60 = vpop.f32.mrb[208].mxu0  ;;  %v7654_v46 = vld [vmem:[#allocation21_spill] sm:$0xff] }
 0x33f   :  { %v1999_v25 = vadd.f32 %v1998_v60, %v7053_v52  ;;  %v2000_v29 = vpop.f32.mrb[209].mxu0  ;;  %v2396_v61 = vpack.c.bf16 %v5849_v58, %v5845_v5  ;;  %v7655_v47 = vpack.c.bf16 %v7653_v40, %v7654_v46 }
 0x340   :  { %3710 = vmatmul.mubr.bf16.gmra.mrb[68].mxu1 %v7650_v62  ;;  %v2001_v59 = vadd.f32 %v2000_v29, %v7056_v14  ;;  %v2002_v53 = vpop.f32.mrb[210].mxu0  ;;  %v6092_v62 = vld [vmem:[#allocation8 + $0x340] ss:$8 sps:$4 sm:$0xff]  }
 0x341   :  { %3719 = vmatprep.mubr.bf16.mxu1 %v7652_v32  ;;  %4947 = vmatpush1.bf16.msra.mxu1 %v6088_v36  ;;  %5858 = vtanh.f32 %v1999_v25  ;;  %v2003_v28 = vadd.f32 %v2002_v53, %v7053_v52  ;;  %v2004_v63 = vpop.f32.mrb[211].mxu0  ;;  %v6093_v32 = vld [vmem:[#allocation8 + $0x354] ss:$8 sps:$4 sm:$0xff]  }
 0x342   :  { %4932 = vmatprep.subr.bf16.mxu1 %v6089_v11  ;;  %3912 = vmatprep.mubr.bf16.mxu0 %v2396_v61  ;;  %5860 = vtanh.f32 %v2001_v59  ;;  %v2005_v13 = vadd.f32 %v2004_v63, %v7056_v14  ;;  %v6095_v11 = vld [vmem:[#allocation8 + $0x364] ss:$8 sps:$4 sm:$0xff]   ;;  %v7658_v63 = vld [vmem:[#allocation24_spill] sm:$0xff] }
 0x343   :  { %3913 = vmatmul.mubr.bf16.gmra.mrb[8].mxu0 %v2395_v19  ;;  %v5851_v3 = vpop.eup %5850  ;;  %5862 = vtanh.f32 %v2003_v28  ;;  %v7657_v28 = vld [vmem:[#allocation25_spill] sm:$0xff] }
 0x344   :  { %v5853_v51 = vpop.eup %5852  ;;  %5864 = vtanh.f32 %v2005_v13  ;;  %v7659_v13 = vpack.c.bf16 %v7657_v28, %v7658_v63  ;;  %v6101_v63 = vld [vmem:[#allocation8 + $0x394] ss:$8 sps:$4 sm:$0xff]  }
 0x345   :  { %4948 = vmatpush1.bf16.msra.mxu1 %v6090_v42  ;;  %v5855_v34 = vpop.eup %5854 }
 0x346   :  { %4933 = vmatprep.subr.bf16.mxu1 %v6091_v18  ;;  %v5857_v5 = vpop.eup %5856  ;;  %v2403_v45 = vpack.c.bf16 %v5855_v34, %v5851_v3  ;;  %v2008_v2 = vpop.f32.mrb[212].mxu0  ;;  %v7660_v18 = vpack.c.bf16 %v6730_v26, %v6719_v10  ;;  %v6096_v34 = vld [vmem:[#allocation8 + $0x360] ss:$8 sps:$4 sm:$0xff]   ;;  %v6098_v10 = vld [vmem:[#allocation8 + $0x370] ss:$8 sps:$4 sm:$0xff]  }
 0x347   :  { %v2009_v58 = vadd.f32 %v2008_v2, %v7053_v52  ;;  %v2010_v19 = vpop.f32.mrb[213].mxu0  ;;  %v2404_v20 = vpack.c.bf16 %v5857_v5, %v5853_v51  ;;  %v6097_v5 = vld [vmem:[#allocation8 + $0x374] ss:$8 sps:$4 sm:$0xff]  }
 0x348   :  { %3720 = vmatmul.mubr.bf16.gmra.mrb[72].mxu1 %v7655_v47  ;;  %v2011_v60 = vadd.f32 %v2010_v19, %v7056_v14  ;;  %v2012_v36 = vpop.f32.mrb[214].mxu0  ;;  %v6099_v19 = vld [vmem:[#allocation8 + $0x384] ss:$8 sps:$4 sm:$0xff]  }
 0x349   :  { %3729 = vmatprep.mubr.bf16.mxu1 %v7656_v33  ;;  %4949 = vmatpush1.bf16.msra.mxu1 %v6092_v62  ;;  %5866 = vtanh.f32 %v2009_v58  ;;  %v2013_v25 = vadd.f32 %v2012_v36, %v7053_v52  ;;  %v2014_v29 = vpop.f32.mrb[215].mxu0  ;;  %v7662_v36 = vld [vmem:[#allocation26_spill] sm:$0xff] }
 0x34a   :  { %4934 = vmatprep.subr.bf16.mxu1 %v6093_v32  ;;  %3922 = vmatprep.mubr.bf16.mxu0 %v2404_v20  ;;  %5868 = vtanh.f32 %v2011_v60  ;;  %v2015_v49 = vadd.f32 %v2014_v29, %v7056_v14  ;;  %v7661_v60 = vld [vmem:[#allocation27_spill] sm:$0xff] }
 0x34b   :  { %3923 = vmatmul.mubr.bf16.gmra.mrb[12].mxu0 %v2403_v45  ;;  %v5859_v61 = vpop.eup %5858  ;;  %5870 = vtanh.f32 %v2013_v25  ;;  %v7663_v25 = vpack.c.bf16 %v7661_v60, %v7662_v36 }
 0x34c   :  { %v5861_v59 = vpop.eup %5860  ;;  %5872 = vtanh.f32 %v2015_v49 }
 0x34d   :  { %4950 = vmatpush1.bf16.msra.mxu1 %v6094_v12  ;;  %v5863_v53 = vpop.eup %5862  ;;  %v7664_v12 = vpack.c.bf16 %v6752_v1, %v6741_v8  ;;  %v6102_v8 = vld [vmem:[#allocation8 + $0x390] ss:$8 sps:$4 sm:$0xff]  }
 0x34e   :  { %4935 = vmatprep.subr.bf16.mxu1 %v6095_v11  ;;  %v5865_v42 = vpop.eup %5864  ;;  %v2411_v3 = vpack.c.bf16 %v5863_v53, %v5859_v61  ;;  %v2018_v51 = vpop.f32.mrb[216].mxu0  ;;  %v6100_v11 = vld [vmem:[#allocation8 + $0x380] ss:$8 sps:$4 sm:$0xff]  }
 0x34f   :  { %v2019_v40 = vadd.f32 %v2018_v51, %v7053_v52  ;;  %v2020_v46 = vpop.f32.mrb[217].mxu0  ;;  %v2412_v47 = vpack.c.bf16 %v5865_v42, %v5861_v59 }
 0x350   :  { %3730 = vmatmul.mubr.bf16.gmra.mrb[76].mxu1 %v7659_v13  ;;  %v2021_v45 = vadd.f32 %v2020_v46, %v7056_v14  ;;  %v2022_v33 = vpop.f32.mrb[218].mxu0 }
 0x351   :  { %3739 = vmatprep.mubr.bf16.mxu1 %v7660_v18  ;;  %4951 = vmatpush1.bf16.msra.mxu1 %v6096_v34  ;;  %5874 = vtanh.f32 %v2019_v40  ;;  %v2023_v2 = vadd.f32 %v2022_v33, %v7053_v52  ;;  %v2024_v62 = vpop.f32.mrb[219].mxu0  ;;  %v6103_v34 = vld [vmem:[#allocation8 + $0x3a4] ss:$8 sps:$4 sm:$0xff]  }
 0x352   :  { %4936 = vmatprep.subr.bf16.mxu1 %v6097_v5  ;;  %3932 = vmatprep.mubr.bf16.mxu0 %v2412_v47  ;;  %5876 = vtanh.f32 %v2021_v45  ;;  %v2025_v26 = vadd.f32 %v2024_v62, %v7056_v14  ;;  %v7665_v47 = vld [vmem:[#allocation29_spill] sm:$0xff]  ;;  %v7666_v5 = vld [vmem:[#allocation28_spill] sm:$0xff]  ;;  %v7668_v62 = vpack.c.bf16 %v6774_v48, %v6763_v37 }
 0x353   :  { %3933 = vmatmul.mubr.bf16.gmra.mrb[16].mxu0 %v2411_v3  ;;  %v5867_v58 = vpop.eup %5866  ;;  %5878 = vtanh.f32 %v2023_v2  ;;  %v7667_v45 = vpack.c.bf16 %v7665_v47, %v7666_v5  ;;  %v6106_v37 = vld [vmem:[#allocation8 + $0x3b0] ss:$8 sps:$4 sm:$0xff]  }
 0x354   :  { %v5869_v20 = vpop.eup %5868  ;;  %5880 = vtanh.f32 %v2025_v26 }
 0x355   :  { %4952 = vmatpush1.bf16.msra.mxu1 %v6098_v10  ;;  %v5871_v32 = vpop.eup %5870  ;;  %v6104_v10 = vld [vmem:[#allocation8 + $0x3a0] ss:$8 sps:$4 sm:$0xff]  }
 0x356   :  { %4937 = vmatprep.subr.bf16.mxu1 %v6099_v19  ;;  %v5873_v29 = vpop.eup %5872  ;;  %v2419_v49 = vpack.c.bf16 %v5871_v32, %v5867_v58  ;;  %v2028_v61 = vpop.f32.mrb[220].mxu0  ;;  %v6105_v32 = vld [vmem:[#allocation8 + $0x3b4] ss:$8 sps:$4 sm:$0xff]  }
 0x357   :  { %v2029_v59 = vadd.f32 %v2028_v61, %v7053_v52  ;;  %v2030_v53 = vpop.f32.mrb[221].mxu0  ;;  %v2420_v28 = vpack.c.bf16 %v5873_v29, %v5869_v20 }
 0x358   :  { %3740 = vmatmul.mubr.bf16.gmra.mrb[80].mxu1 %v7663_v25  ;;  %v2031_v13 = vadd.f32 %v2030_v53, %v7056_v14  ;;  %v2032_v42 = vpop.f32.mrb[222].mxu0  ;;  %v7670_v53 = vld [vmem:[#allocation30_spill] sm:$0xff] }
 0x359   :  { %3749 = vmatprep.mubr.bf16.mxu1 %v7664_v12  ;;  %4953 = vmatpush1.bf16.msra.mxu1 %v6100_v11  ;;  %5882 = vtanh.f32 %v2029_v59  ;;  %v2033_v3 = vadd.f32 %v2032_v42, %v7053_v52  ;;  %v2034_v18 = vpop.f32.mrb[223].mxu0  ;;  %v6107_v12 = vld [vmem:[#allocation8 + $0x3c4] ss:$8 sps:$4 sm:$0xff]   ;;  %v7669_v59 = vld [vmem:[#allocation31_spill] sm:$0xff]  ;;  %v7672_v42 = vpack.c.bf16 %v6796_v4, %v6785_v54 }
 0x35a   :  { %4938 = vmatprep.subr.bf16.mxu1 %v6101_v63  ;;  %3942 = vmatprep.mubr.bf16.mxu0 %v2420_v28  ;;  %5884 = vtanh.f32 %v2031_v13  ;;  %v2035_v1 = vadd.f32 %v2034_v18, %v7056_v14  ;;  %v7671_v28 = vpack.c.bf16 %v7669_v59, %v7670_v53  ;;  %v6108_v18 = vld [vmem:[#allocation8 + $0x3c0] ss:$8 sps:$4 sm:$0xff]   ;;  %v6110_v54 = vld [vmem:[#allocation8 + $0x3d0] ss:$8 sps:$4 sm:$0xff]  }
 0x35b   :  { %3943 = vmatmul.mubr.bf16.gmra.mrb[20].mxu0 %v2419_v49  ;;  %v5875_v51 = vpop.eup %5874  ;;  %5886 = vtanh.f32 %v2033_v3  ;;  %v7676_v53 = vld [vmem:[#allocation34_spill] sm:$0xff] }
 0x35c   :  { %v5877_v40 = vpop.eup %5876  ;;  %5888 = vtanh.f32 %v2035_v1 }
 0x35d   :  { %4954 = vmatpush1.bf16.msra.mxu1 %v6102_v8  ;;  %v5879_v46 = vpop.eup %5878 }
 0x35e   :  { %4939 = vmatprep.subr.bf16.mxu1 %v6103_v34  ;;  %v5881_v33 = vpop.eup %5880  ;;  %v2427_v2 = vpack.c.bf16 %v5879_v46, %v5875_v51  ;;  %v2038_v26 = vpop.f32.mrb[224].mxu0  ;;  %v6109_v34 = vld [vmem:[#allocation8 + $0x3d4] ss:$8 sps:$4 sm:$0xff]  }
 0x35f   :  { %v2039_v58 = vadd.f32 %v2038_v26, %v7053_v52  ;;  %v2040_v19 = vpop.f32.mrb[225].mxu0  ;;  %v2428_v20 = vpack.c.bf16 %v5881_v33, %v5877_v40  ;;  %v6111_v33 = vld [vmem:[#allocation8 + $0x3e4] ss:$8 sps:$4 sm:$0xff]   ;;  %v7673_v26 = vld [vmem:[#allocation32_spill] sm:$0xff] }
 0x360   :  { %3750 = vmatmul.mubr.bf16.gmra.mrb[84].mxu1 %v7667_v45  ;;  %v2041_v60 = vadd.f32 %v2040_v19, %v7056_v14  ;;  %v2042_v36 = vpop.f32.mrb[226].mxu0 }
 0x361   :  { %3759 = vmatprep.mubr.bf16.mxu1 %v7668_v62  ;;  %4955 = vmatpush1.bf16.msra.mxu1 %v6104_v10  ;;  %5890 = vtanh.f32 %v2039_v58  ;;  %v2043_v25 = vadd.f32 %v2042_v36, %v7053_v52  ;;  %v2044_v29 = vpop.f32.mrb[227].mxu0  ;;  %v7674_v10 = vpack.c.bf16 %v6789_v55, %v7673_v26 }
 0x362   :  { %4940 = vmatprep.subr.bf16.mxu1 %v6105_v32  ;;  %3952 = vmatprep.mubr.bf16.mxu0 %v2428_v20  ;;  %5892 = vtanh.f32 %v2041_v60  ;;  %v2045_v48 = vadd.f32 %v2044_v29, %v7056_v14  ;;  %v7675_v20 = vpack.c.bf16 %v6818_v7, %v6807_v15  ;;  %v6112_v60 = vld [vmem:[#allocation8 + $0x3e0] ss:$8 sps:$4 sm:$0xff]   ;;  %v6114_v15 = vld [vmem:[#allocation8 + $0x3f0] ss:$8 sps:$4 sm:$0xff]  }
 0x363   :  { %3953 = vmatmul.mubr.bf16.gmra.mrb[24].mxu0 %v2427_v2  ;;  %v5883_v49 = vpop.eup %5882  ;;  %5894 = vtanh.f32 %v2043_v25 }
 0x364   :  { %v5885_v61 = vpop.eup %5884  ;;  %5896 = vtanh.f32 %v2045_v48  ;;  %v6113_v48 = vld [vmem:[#allocation8 + $0x3f4] ss:$8 sps:$4 sm:$0xff]  }
 0x365   :  { %4956 = vmatpush1.bf16.msra.mxu1 %v6106_v37  ;;  %v5887_v11 = vpop.eup %5886 }
 0x366   :  { %4941 = vmatprep.subr.bf16.mxu1 %v6107_v12  ;;  %v5889_v63 = vpop.eup %5888  ;;  %v2435_v13 = vpack.c.bf16 %v5887_v11, %v5883_v49  ;;  %v2048_v3 = vpop.f32.mrb[228].mxu0 }
 0x367   :  { %v2049_v1 = vadd.f32 %v2048_v3, %v7053_v52  ;;  %v2050_v8 = vpop.f32.mrb[229].mxu0  ;;  %v2436_v51 = vpack.c.bf16 %v5889_v63, %v5885_v61  ;;  %v7679_v3 = vpack.c.bf16 %v6840_v22, %v6829_v39 }
 0x368   :  { %3760 = vmatmul.mubr.bf16.gmra.mrb[88].mxu1 %v7671_v28  ;;  %v2051_v40 = vadd.f32 %v2050_v8, %v7056_v14  ;;  %v2052_v46 = vpop.f32.mrb[230].mxu0  ;;  %v7677_v28 = vld [vmem:[#allocation33_spill] sm:$0xff] }
 0x369   :  { %3769 = vmatprep.mubr.bf16.mxu1 %v7672_v42  ;;  %4957 = vmatpush1.bf16.msra.mxu1 %v6108_v18  ;;  %5898 = vtanh.f32 %v2049_v1  ;;  %v2053_v47 = vadd.f32 %v2052_v46, %v7053_v52  ;;  %v2054_v5 = vpop.f32.mrb[231].mxu0  ;;  %v7678_v63 = vpack.c.bf16 %v7676_v53, %v7677_v28 }
 0x36a   :  { %4942 = vmatprep.subr.bf16.mxu1 %v6109_v34  ;;  %3962 = vmatprep.mubr.bf16.mxu0 %v2436_v51  ;;  %5900 = vtanh.f32 %v2051_v40  ;;  %v2055_v4 = vadd.f32 %v2054_v5, %v7056_v14 }
 0x36b   :  { %3963 = vmatmul.mubr.bf16.gmra.mrb[28].mxu0 %v2435_v13  ;;  %v5891_v45 = vpop.eup %5890  ;;  %5902 = vtanh.f32 %v2053_v47 }
 0x36c   :  { %v5893_v2 = vpop.eup %5892  ;;  %5904 = vtanh.f32 %v2055_v4 }
 0x36d   :  { %4958 = vmatpush1.bf16.msra.mxu1 %v6110_v54  ;;  %v5895_v62 = vpop.eup %5894  ;;  %v7680_v54 = vld [vmem:[#allocation36_spill] sm:$0xff] }
 0x36e   :  { %4943 = vmatprep.subr.bf16.mxu1 %v6111_v33  ;;  %v5897_v58 = vpop.eup %5896  ;;  %v2443_v19 = vpack.c.bf16 %v5895_v62, %v5891_v45  ;;  %v2058_v32 = vpop.f32.mrb[232].mxu0  ;;  %v7681_v45 = vld [vmem:[#allocation35_spill] sm:$0xff]  ;;  %v7683_v62 = vpack.c.bf16 %v6862_v0, %v6851_v6 }
 0x36f   :  { %v2059_v36 = vadd.f32 %v2058_v32, %v7053_v52  ;;  %v2060_v25 = vpop.f32.mrb[233].mxu0  ;;  %v2444_v29 = vpack.c.bf16 %v5897_v58, %v5893_v2  ;;  %v7682_v33 = vpack.c.bf16 %v7680_v54, %v7681_v45 }
 0x370   :  { %3770 = vmatmul.mubr.bf16.gmra.mrb[92].mxu1 %v7674_v10  ;;  %v2061_v37 = vadd.f32 %v2060_v25, %v7056_v14  ;;  %v2062_v49 = vpop.f32.mrb[234].mxu0 }
 0x371   :  { %3779 = vmatprep.mubr.bf16.mxu1 %v7675_v20  ;;  %4959 = vmatpush1.bf16.msra.mxu1 %v6112_v60  ;;  %5906 = vtanh.f32 %v2059_v36  ;;  %v2063_v55 = vadd.f32 %v2062_v49, %v7053_v52  ;;  %v2064_v12 = vpop.f32.mrb[235].mxu0  ;;  %v7685_v49 = vld [vmem:[#allocation37_spill] sm:$0xff] }
 0x372   :  { %4944 = vmatprep.subr.bf16.mxu1 %v6113_v48  ;;  %3972 = vmatprep.mubr.bf16.mxu0 %v2444_v29  ;;  %5908 = vtanh.f32 %v2061_v37  ;;  %v2065_v7 = vadd.f32 %v2064_v12, %v7056_v14  ;;  %v7684_v37 = vld [vmem:[#allocation38_spill] sm:$0xff] }
 0x373   :  { %3973 = vmatmul.mubr.bf16.gmra.mrb[32].mxu0 %v2443_v19  ;;  %v5899_v61 = vpop.eup %5898  ;;  %5910 = vtanh.f32 %v2063_v55  ;;  %v7686_v55 = vpack.c.bf16 %v7684_v37, %v7685_v49  ;;  %v7694_v37 = vld [vmem:[#allocation43_spill] sm:$0xff]  ;;  %v7695_v49 = vld [vmem:[#allocation41_spill] sm:$0xff] }
 0x374   :  { %v5901_v11 = vpop.eup %5900  ;;  %5912 = vtanh.f32 %v2065_v7  ;;  %v7687_v7 = vpack.c.bf16 %v6884_v30, %v6873_v27 }
 0x375   :  { %4960 = vmatpush1.bf16.msra.mxu1 %v6114_v15  ;;  %v5903_v59 = vpop.eup %5902 }
 0x376   :  { %v5905_v13 = vpop.eup %5904  ;;  %v2451_v42 = vpack.c.bf16 %v5903_v59, %v5899_v61  ;;  %v2068_v18 = vpop.f32.mrb[236].mxu0 }
 0x377   :  { %v2069_v1 = vadd.f32 %v2068_v18, %v7053_v52  ;;  %v2070_v8 = vpop.f32.mrb[237].mxu0  ;;  %v2452_v51 = vpack.c.bf16 %v5905_v13, %v5901_v11 }
 0x378   :  { %3780 = vmatmul.mubr.bf16.gmra.mrb[96].mxu1 %v7678_v63  ;;  %v2071_v34 = vadd.f32 %v2070_v8, %v7056_v14  ;;  %v2072_v40 = vpop.f32.mrb[238].mxu0  ;;  %v7689_v8 = vld [vmem:[#allocation39_spill] sm:$0xff] }
 0x379   :  { %3789 = vmatprep.mubr.bf16.mxu1 %v7679_v3  ;;  %5914 = vtanh.f32 %v2069_v1  ;;  %v2073_v46 = vadd.f32 %v2072_v40, %v7053_v52  ;;  %v2074_v47 = vpop.f32.mrb[239].mxu0  ;;  %3982 = vmatprep.mubr.bf16.mxu0 %v2452_v51  ;;  %v7688_v1 = vld [vmem:[#allocation40_spill] sm:$0xff] }
 0x37a   :  { %5916 = vtanh.f32 %v2071_v34  ;;  %v2075_v5 = vadd.f32 %v2074_v47, %v7056_v14  ;;  %v7690_v51 = vpack.c.bf16 %v7688_v1, %v7689_v8  ;;  %v7691_v40 = vld [vmem:[#allocation44_spill] sm:$0xff]  ;;  %v7697_v1 = vpack.c.bf16 %v6964_v43, %v6955_v31  ;;  %v7700_v31 = vld [vmem:[#allocation13_spill] sm:$0xff]  ;;  %v7701_v43 = vld [vmem:[#allocation14_spill] sm:$0xff] }
 0x37b   :  { %3983 = vmatmul.mubr.bf16.gmra.mrb[36].mxu0 %v2451_v42  ;;  %v7163_v4 = vpop.eup %5906  ;;  %5918 = vtanh.f32 %v2073_v46  ;;  %v7692_v46 = vld [vmem:[#allocation42_spill] sm:$0xff] }
 0x37c   :  { %v7165_v22 = vpop.eup %5908  ;;  %5920 = vtanh.f32 %v2075_v5  ;;  %v7693_v47 = vpack.c.bf16 %v7691_v40, %v7692_v46 }
 0x37d   :  { %v7167_v39 = vpop.eup %5910 }
 0x37e   :  { %v7172_v2 = vpop.eup %5912  ;;  %v2078_v26 = vpop.f32.mrb[240].mxu0  ;;  %v2459_v10 = vpack.c.bf16 %v7167_v39, %v7163_v4 }
 0x37f   :  { %v2079_v58 = vadd.f32 %v2078_v26, %v7053_v52  ;;  %v2080_v19 = vpop.f32.mrb[241].mxu0  ;;  %v2460_v20 = vpack.c.bf16 %v7172_v2, %v7165_v22 }
 0x380   :  { %3790 = vmatmul.mubr.bf16.gmra.mrb[100].mxu1 %v7682_v33  ;;  %v2081_v32 = vadd.f32 %v2080_v19, %v7056_v14  ;;  %v2082_v60 = vpop.f32.mrb[242].mxu0 }
 0x381   :  { %3799 = vmatprep.mubr.bf16.mxu1 %v7683_v62  ;;  %5922 = vtanh.f32 %v2079_v58  ;;  %v2083_v36 = vadd.f32 %v2082_v60, %v7053_v52  ;;  %v2084_v25 = vpop.f32.mrb[243].mxu0 }
 0x382   :  { %5924 = vtanh.f32 %v2081_v32  ;;  %v2085_v6 = vadd.f32 %v2084_v25, %v7056_v14 }
 0x383   :  { %v7185_v0 = vpop.eup %5914  ;;  %5926 = vtanh.f32 %v2083_v36 }
 0x384   :  { %v7187_v29 = vpop.eup %5916  ;;  %5928 = vtanh.f32 %v2085_v6 }
 0x385   :  { %v7189_v48 = vpop.eup %5918 }
 0x386   :  { %v7194_v12 = vpop.eup %5920  ;;  %v2088_v15 = vpop.f32.mrb[244].mxu0  ;;  %v2467_v61 = vpack.c.bf16 %v7189_v48, %v7185_v0 }
 0x387   :  { %v2089_v11 = vadd.f32 %v2088_v15, %v7053_v52  ;;  %v2090_v59 = vpop.f32.mrb[245].mxu0  ;;  %v2468_v53 = vpack.c.bf16 %v7194_v12, %v7187_v29 }
 0x388   :  { %3800 = vmatmul.mubr.bf16.gmra.mrb[104].mxu1 %v7686_v55  ;;  %v2091_v28 = vadd.f32 %v2090_v59, %v7056_v14  ;;  %v2092_v63 = vpop.f32.mrb[246].mxu0  ;;  %v7696_v55 = vpack.c.bf16 %v7694_v37, %v7695_v49 }
 0x389   :  { %3809 = vmatprep.mubr.bf16.mxu1 %v7687_v7  ;;  %5930 = vtanh.f32 %v2089_v11  ;;  %v2093_v13 = vadd.f32 %v2092_v63, %v7053_v52  ;;  %v2094_v42 = vpop.f32.mrb[247].mxu0 }
 0x38a   :  { %5932 = vtanh.f32 %v2091_v28  ;;  %v2095_v27 = vadd.f32 %v2094_v42, %v7056_v14 }
 0x38b   :  { %v7207_v30 = vpop.eup %5922  ;;  %5934 = vtanh.f32 %v2093_v13 }
 0x38c   :  { %v5925_v3 = vpop.eup %5924  ;;  %5936 = vtanh.f32 %v2095_v27 }
 0x38d   :  { %v5927_v18 = vpop.eup %5926 }
 0x38e   :  { %v5929_v34 = vpop.eup %5928  ;;  %v2098_v5 = vpop.f32.mrb[248].mxu0  ;;  %v2475_v54 = vpack.c.bf16 %v5927_v18, %v7207_v30 }
 0x38f   :  { %v2099_v45 = vadd.f32 %v2098_v5, %v7053_v52  ;;  %v2100_v33 = vpop.f32.mrb[249].mxu0  ;;  %v2476_v62 = vpack.c.bf16 %v5929_v34, %v5925_v3 }
 0x390   :  { %3810 = vmatmul.mubr.bf16.gmra.mrb[108].mxu1 %v7690_v51  ;;  %v2101_v26 = vadd.f32 %v2100_v33, %v7056_v14  ;;  %v2102_v58 = vpop.f32.mrb[250].mxu0 }
 0x391   :  { %3819 = vmatprep.mubr.bf16.mxu1 %v7693_v47  ;;  %5938 = vtanh.f32 %v2099_v45  ;;  %v2103_v19 = vadd.f32 %v2102_v58, %v7053_v52  ;;  %v2104_v32 = vpop.f32.mrb[251].mxu0 }
 0x392   :  { %5940 = vtanh.f32 %v2101_v26  ;;  %v2105_v60 = vadd.f32 %v2104_v32, %v7056_v14 }
 0x393   :  { %v5931_v36 = vpop.eup %5930  ;;  %5942 = vtanh.f32 %v2103_v19 }
 0x394   :  { %v5933_v25 = vpop.eup %5932  ;;  %5944 = vtanh.f32 %v2105_v60 }
 0x395   :  { %v5935_v6 = vpop.eup %5934 }
 0x396   :  { %v5937_v7 = vpop.eup %5936  ;;  %v2108_v15 = vpop.f32.mrb[252].mxu0  ;;  %v2483_v11 = vpack.c.bf16 %v5935_v6, %v5931_v36 }
 0x397   :  { %v2109_v59 = vadd.f32 %v2108_v15, %v7053_v52  ;;  %v2110_v28 = vpop.f32.mrb[253].mxu0  ;;  %v2484_v63 = vpack.c.bf16 %v5937_v7, %v5933_v25 }
 0x398   :  { %3820 = vmatmul.mubr.bf16.gmra.mrb[112].mxu1 %v7696_v55  ;;  %v2111_v13 = vadd.f32 %v2110_v28, %v7056_v14  ;;  %v2112_v42 = vpop.f32.mrb[254].mxu0 }
 0x399   :  { %3829 = vmatprep.mubr.bf16.mxu1 %v2482_v57  ;;  %5946 = vtanh.f32 %v2109_v59  ;;  %v2113_v27 = vadd.f32 %v2112_v42, %v7053_v52  ;;  %v2114_v30 = vpop.f32.mrb[255].mxu0 }
 0x39a   :  { %5948 = vtanh.f32 %v2111_v13  ;;  %v2115_v3 = vadd.f32 %v2114_v30, %v7056_v14  ;;  %v7698_v14 = vpack.c.bf16 %v6958_v35, %v6948_v41  ;;  %v2629_v41 = vld [vmem:[%s7571_s6] sm:$0x3] }
 0x39b   :  { %v5939_v18 = vpop.eup %5938  ;;  %5950 = vtanh.f32 %v2113_v27  ;;  %v7261_v35 = vrot.slane %v2629_v41, %v7700_v31 }
 0x39c   :  { %v5941_v50 = vpop.eup %5940  ;;  %5952 = vtanh.f32 %v2115_v3 }
 0x39d   :  { %v5943_v21 = vpop.eup %5942 }
 0x39e   :  { %v5945_v57 = vpop.eup %5944  ;;  %v2491_v8 = vpack.c.bf16 %v5943_v21, %v5939_v18 }
 0x39f   :  { %v2492_v52 = vpack.c.bf16 %v5945_v57, %v5941_v50 }
 0x3a0   :  { %3830 = vmatmul.mubr.bf16.gmra.mrb[116].mxu1 %v2481_v17  ;;  %v7699_v17 = vpack.c.bf16 %v6976_v16, %v6970_v38  ;;  %v7264_v38 = vrot.slane %v2629_v41, %v7701_v43 }
 0x3a1   :  { %3839 = vmatprep.mubr.bf16.mxu1 %v7697_v1 }
 0x3a3   :  { %v5947_v51 = vpop.eup %5946 }
 0x3a4   :  { %v5949_v34 = vpop.eup %5948 }
 0x3a5   :  { %v5951_v40 = vpop.eup %5950 }
 0x3a6   :  { %v5953_v46 = vpop.eup %5952  ;;  %v2499_v23 = vpack.c.bf16 %v5951_v40, %v5947_v51 }
 0x3a7   :  { %v2500_v56 = vpack.c.bf16 %v5953_v46, %v5949_v34 }
 0x3a8   :  { %3840 = vmatmul.mubr.bf16.gmra.mrb[120].mxu1 %v7698_v14 }
 0x3a9   :  { %3849 = vmatprep.mubr.bf16.mxu1 %v2498_v44 }
 0x3b0   :  { %3850 = vmatmul.mubr.bf16.gmra.mrb[124].mxu1 %v7699_v17 }
 0x3b1   :  { %3992 = vmatprep.mubr.bf16.mxu1 %v2460_v20  ;;  %v4181_v20 = vld [vmem:[%s7572_s7] sm:$0x3] }
 0x3b2   :  { %v7277_v26 = vrot.slane %v4181_v20, %v7701_v43 }
 0x3b8   :  { %3993 = vmatmul.mubr.bf16.vlgmr.msra.gmra.mrb[104].mxu1 %v2459_v10 }
 0x3b9   :  { %4002 = vmatprep.mubr.bf16.mxu1 %v2468_v53 }
 0x3c0   :  { %4003 = vmatmul.mubr.bf16.gmra.mrb[108].mxu1 %v2467_v61 }
 0x3c1   :  { %4012 = vmatprep.mubr.bf16.mxu1 %v2476_v62 }
 0x3c8   :  { %4013 = vmatmul.mubr.bf16.gmra.mrb[112].mxu1 %v2475_v54  ;;  %v7274_v54 = vrot.slane %v4181_v20, %v7700_v31 }
 0x3c9   :  { %4022 = vmatprep.mubr.bf16.mxu1 %v2484_v63 }
 0x3d0   :  { %4023 = vmatmul.mubr.bf16.gmra.mrb[116].mxu1 %v2483_v11 }
 0x3d1   :  { %4032 = vmatprep.mubr.bf16.mxu1 %v2492_v52 }
 0x3d8   :  { %4033 = vmatmul.mubr.bf16.gmra.mrb[120].mxu1 %v2491_v8 }
 0x3d9   :  { %4042 = vmatprep.mubr.bf16.mxu1 %v2500_v56 }
 0x3e0   :  { %4043 = vmatmul.mubr.bf16.gmra.mrb[124].mxu1 %v2499_v23 }
 0x405   :  { %v3894_v24 = vpop.f32.mrb[0].mxu0 }
 0x406   :  { %v3896_v9 = vpop.f32.mrb[1].mxu0 }
 0x407   :  { %v3898_v16 = vpop.f32.mrb[2].mxu0 }
 0x408   :  { %v3900_v4 = vpop.f32.mrb[3].mxu0 }
 0x40b   :  { %v3701_v44 = vpop.f32.mrb[64].mxu1 }
 0x40c   :  { %v4961_v22 = vadd.f32 %v3701_v44, %v7261_v35  ;;  %v3703_v39 = vpop.f32.mrb[65].mxu1 }
 0x40d   :  { %v4963_v2 = vadd.f32 %v3703_v39, %v7264_v38  ;;  %v3705_v10 = vpop.f32.mrb[66].mxu1 }
 0x40e   :  { %v4962_v0 = vadd.f32 %v4961_v22, %v3894_v24  ;;  %v4965_v29 = vadd.f32 %v3705_v10, %v7261_v35  ;;  %v3707_v48 = vpop.f32.mrb[67].mxu1  ;;  %v3904_v5 = vpop.f32.mrb[4].mxu0 }
 0x40f   :  { %v4964_v12 = vadd.f32 %v4963_v2, %v3896_v9  ;;  %v4967_v61 = vadd.f32 %v3707_v48, %v7264_v38  ;;  %v3906_v62 = vpop.f32.mrb[5].mxu0 }
 0x410   :  { %v4053_v53 = vmul.f32 0.2, %v4962_v0  ;;  %v4966_v47 = vadd.f32 %v4965_v29, %v3898_v16  ;;  %v3908_v32 = vpop.f32.mrb[6].mxu0 }
 0x411   :  { %v4054_v45 = vmul.f32 0.2, %v4964_v12  ;;  %v4968_v33 = vadd.f32 %v4967_v61, %v3900_v4  ;;  %v3910_v6 = vpop.f32.mrb[7].mxu0 }
 0x412   :  { %v4117_v58 = vmax.f32 %v4962_v0, %v4053_v53  ;;  %v4055_v19 = vmul.f32 0.2, %v4966_v47 }
 0x413   :  { %v4118_v60 = vmax.f32 %v4964_v12, %v4054_v45  ;;  %v4056_v36 = vmul.f32 0.2, %v4968_v33  ;;  %v3711_v25 = vpop.f32.mrb[68].mxu1 }
 0x414   :  { %v4119_v37 = vmax.f32 %v4966_v47, %v4055_v19  ;;  %v4969_v49 = vadd.f32 %v3711_v25, %v7261_v35  ;;  %v3713_v55 = vpop.f32.mrb[69].mxu1  ;;  %v4193_v7 = vmul.f32 %v7274_v54, %v4117_v58 }
 0x415   :  { %v4120_v15 = vmax.f32 %v4968_v33, %v4056_v36  ;;  %v4971_v11 = vadd.f32 %v3713_v55, %v7264_v38  ;;  %v3715_v59 = vpop.f32.mrb[70].mxu1  ;;  %v4194_v28 = vmul.f32 %v7277_v26, %v4118_v60 }
 0x416   :  { %v4970_v63 = vadd.f32 %v4969_v49, %v3904_v5  ;;  %v4973_v13 = vadd.f32 %v3715_v59, %v7261_v35  ;;  %v3717_v42 = vpop.f32.mrb[71].mxu1  ;;  %v4195_v27 = vmul.f32 %v7274_v54, %v4119_v37  ;;  %v3914_v1 = vpop.f32.mrb[8].mxu0 }
 0x417   :  { %v4972_v30 = vadd.f32 %v4971_v11, %v3906_v62  ;;  %v4975_v3 = vadd.f32 %v3717_v42, %v7264_v38  ;;  %v4257_v18 = vadd.f32 %v4194_v28, %v4193_v7  ;;  %v4196_v50 = vmul.f32 %v7277_v26, %v4120_v15  ;;  %v3916_v51 = vpop.f32.mrb[9].mxu0 }
 0x418   :  { %v4057_v21 = vmul.f32 0.2, %v4970_v63  ;;  %v4974_v57 = vadd.f32 %v4973_v13, %v3908_v32  ;;  %v3918_v46 = vpop.f32.mrb[10].mxu0 }
 0x419   :  { %v4058_v8 = vmul.f32 0.2, %v4972_v30  ;;  %v4976_v52 = vadd.f32 %v4975_v3, %v3910_v6  ;;  %4258 = vadd.xlane.f32.xlu0 %v4257_v18  ;;  %v4260_v34 = vadd.f32 %v4196_v50, %v4195_v27  ;;  %v3920_v41 = vpop.f32.mrb[11].mxu0 }
 0x41a   :  { %v4121_v40 = vmax.f32 %v4970_v63, %v4057_v21  ;;  %v4059_v14 = vmul.f32 0.2, %v4974_v57 }
 0x41b   :  { %v4122_v23 = vmax.f32 %v4972_v30, %v4058_v8  ;;  %v4060_v56 = vmul.f32 0.2, %v4976_v52  ;;  %v3721_v17 = vpop.f32.mrb[72].mxu1 }
 0x41c   :  { %v4123_v31 = vmax.f32 %v4974_v57, %v4059_v14  ;;  %v4977_v24 = vadd.f32 %v3721_v17, %v7261_v35  ;;  %v3723_v43 = vpop.f32.mrb[73].mxu1  ;;  %v4197_v9 = vmul.f32 %v7274_v54, %v4121_v40 }
 0x41d   :  { %v4124_v16 = vmax.f32 %v4976_v52, %v4060_v56  ;;  %v4979_v44 = vadd.f32 %v3723_v43, %v7264_v38  ;;  %4261 = vadd.xlane.f32.xlu0 %v4260_v34  ;;  %v3725_v4 = vpop.f32.mrb[74].mxu1  ;;  %v4198_v22 = vmul.f32 %v7277_v26, %v4122_v23 }
 0x41e   :  { %v4978_v39 = vadd.f32 %v4977_v24, %v3914_v1  ;;  %v4981_v2 = vadd.f32 %v3725_v4, %v7261_v35  ;;  %v3727_v10 = vpop.f32.mrb[75].mxu1  ;;  %v4199_v20 = vmul.f32 %v7274_v54, %v4123_v31  ;;  %v3924_v47 = vpop.f32.mrb[12].mxu0 }
 0x41f   :  { %v4980_v0 = vadd.f32 %v4979_v44, %v3916_v51  ;;  %v4983_v29 = vadd.f32 %v3727_v10, %v7264_v38  ;;  %v4263_v48 = vadd.f32 %v4198_v22, %v4197_v9  ;;  %v4200_v12 = vmul.f32 %v7277_v26, %v4124_v16  ;;  %v3926_v33 = vpop.f32.mrb[13].mxu0 }
 0x420   :  { %v4061_v61 = vmul.f32 0.2, %v4978_v39  ;;  %v4982_v53 = vadd.f32 %v4981_v2, %v3918_v46  ;;  %v3928_v32 = vpop.f32.mrb[14].mxu0 }
 0x421   :  { %v4062_v5 = vmul.f32 0.2, %v4980_v0  ;;  %v4984_v45 = vadd.f32 %v4983_v29, %v3920_v41  ;;  %4264 = vadd.xlane.f32.xlu1 %v4263_v48  ;;  %v4266_v62 = vadd.f32 %v4200_v12, %v4199_v20  ;;  %v3930_v6 = vpop.f32.mrb[15].mxu0 }
 0x422   :  { %v4125_v58 = vmax.f32 %v4978_v39, %v4061_v61  ;;  %v4063_v19 = vmul.f32 0.2, %v4982_v53 }
 0x423   :  { %v4126_v60 = vmax.f32 %v4980_v0, %v4062_v5  ;;  %v4064_v36 = vmul.f32 0.2, %v4984_v45  ;;  %v3731_v25 = vpop.f32.mrb[76].mxu1 }
 0x424   :  { %v4127_v37 = vmax.f32 %v4982_v53, %v4063_v19  ;;  %v4985_v49 = vadd.f32 %v3731_v25, %v7261_v35  ;;  %v3733_v55 = vpop.f32.mrb[77].mxu1  ;;  %v4201_v7 = vmul.f32 %v7274_v54, %v4125_v58 }
 0x425   :  { %v4128_v15 = vmax.f32 %v4984_v45, %v4064_v36  ;;  %v4987_v11 = vadd.f32 %v3733_v55, %v7264_v38  ;;  %4267 = vadd.xlane.f32.xlu1 %v4266_v62  ;;  %v3735_v59 = vpop.f32.mrb[78].mxu1  ;;  %v4202_v28 = vmul.f32 %v7277_v26, %v4126_v60 }
 0x426   :  { %v4986_v63 = vadd.f32 %v4985_v49, %v3924_v47  ;;  %v4989_v13 = vadd.f32 %v3735_v59, %v7261_v35  ;;  %v3737_v42 = vpop.f32.mrb[79].mxu1  ;;  %v4203_v27 = vmul.f32 %v7274_v54, %v4127_v37  ;;  %v3934_v1 = vpop.f32.mrb[16].mxu0 }
 0x427   :  { %v4988_v30 = vadd.f32 %v4987_v11, %v3926_v33  ;;  %v4991_v3 = vadd.f32 %v3737_v42, %v7264_v38  ;;  %v4269_v18 = vadd.f32 %v4202_v28, %v4201_v7  ;;  %v4204_v50 = vmul.f32 %v7277_v26, %v4128_v15  ;;  %v3936_v34 = vpop.f32.mrb[17].mxu0 }
 0x428   :  { %v4065_v21 = vmul.f32 0.2, %v4986_v63  ;;  %v4990_v57 = vadd.f32 %v4989_v13, %v3928_v32  ;;  %v3938_v46 = vpop.f32.mrb[18].mxu0 }
 0x429   :  { %v4066_v8 = vmul.f32 0.2, %v4988_v30  ;;  %v4992_v52 = vadd.f32 %v4991_v3, %v3930_v6  ;;  %4270 = vadd.xlane.f32.xlu0 %v4269_v18  ;;  %v4272_v51 = vadd.f32 %v4204_v50, %v4203_v27  ;;  %v3940_v41 = vpop.f32.mrb[19].mxu0 }
 0x42a   :  { %v4129_v40 = vmax.f32 %v4986_v63, %v4065_v21  ;;  %v4067_v14 = vmul.f32 0.2, %v4990_v57 }
 0x42b   :  { %v4130_v23 = vmax.f32 %v4988_v30, %v4066_v8  ;;  %v4068_v56 = vmul.f32 0.2, %v4992_v52  ;;  %4273 = vadd.xlane.f32.xlu1 %v4272_v51  ;;  %v3741_v17 = vpop.f32.mrb[80].mxu1 }
 0x42c   :  { %v4131_v31 = vmax.f32 %v4990_v57, %v4067_v14  ;;  %v4993_v24 = vadd.f32 %v3741_v17, %v7261_v35  ;;  %v3743_v43 = vpop.f32.mrb[81].mxu1  ;;  %v4205_v9 = vmul.f32 %v7274_v54, %v4129_v40 }
 0x42d   :  { %v4132_v16 = vmax.f32 %v4992_v52, %v4068_v56  ;;  %v4995_v44 = vadd.f32 %v3743_v43, %v7264_v38  ;;  %v3745_v4 = vpop.f32.mrb[82].mxu1  ;;  %v4206_v22 = vmul.f32 %v7277_v26, %v4130_v23 }
 0x42e   :  { %v4994_v39 = vadd.f32 %v4993_v24, %v3934_v1  ;;  %v4997_v2 = vadd.f32 %v3745_v4, %v7261_v35  ;;  %v3747_v10 = vpop.f32.mrb[83].mxu1  ;;  %v4207_v20 = vmul.f32 %v7274_v54, %v4131_v31  ;;  %v3944_v47 = vpop.f32.mrb[20].mxu0 }
 0x42f   :  { %v4996_v0 = vadd.f32 %v4995_v44, %v3936_v34  ;;  %v4999_v29 = vadd.f32 %v3747_v10, %v7264_v38  ;;  %v4275_v48 = vadd.f32 %v4206_v22, %v4205_v9  ;;  %v4208_v12 = vmul.f32 %v7277_v26, %v4132_v16  ;;  %v3946_v62 = vpop.f32.mrb[21].mxu0 }
 0x430   :  { %v4069_v61 = vmul.f32 0.2, %v4994_v39  ;;  %v4998_v53 = vadd.f32 %v4997_v2, %v3938_v46  ;;  %v3948_v32 = vpop.f32.mrb[22].mxu0 }
 0x431   :  { %v4070_v5 = vmul.f32 0.2, %v4996_v0  ;;  %v5000_v45 = vadd.f32 %v4999_v29, %v3940_v41  ;;  %4276 = vadd.xlane.f32.xlu0 %v4275_v48  ;;  %v4278_v33 = vadd.f32 %v4208_v12, %v4207_v20  ;;  %v3950_v6 = vpop.f32.mrb[23].mxu0 }
 0x432   :  { %v4133_v58 = vmax.f32 %v4994_v39, %v4069_v61  ;;  %v4071_v19 = vmul.f32 0.2, %v4998_v53 }
 0x433   :  { %v4134_v60 = vmax.f32 %v4996_v0, %v4070_v5  ;;  %v4072_v36 = vmul.f32 0.2, %v5000_v45  ;;  %4279 = vadd.xlane.f32.xlu1 %v4278_v33  ;;  %v3751_v25 = vpop.f32.mrb[84].mxu1 }
 0x434   :  { %v4135_v37 = vmax.f32 %v4998_v53, %v4071_v19  ;;  %v5001_v49 = vadd.f32 %v3751_v25, %v7261_v35  ;;  %v3753_v55 = vpop.f32.mrb[85].mxu1  ;;  %v4209_v7 = vmul.f32 %v7274_v54, %v4133_v58 }
 0x435   :  { %v4136_v15 = vmax.f32 %v5000_v45, %v4072_v36  ;;  %v5003_v11 = vadd.f32 %v3753_v55, %v7264_v38  ;;  %v3755_v59 = vpop.f32.mrb[86].mxu1  ;;  %v4210_v28 = vmul.f32 %v7277_v26, %v4134_v60 }
 0x436   :  { %v5002_v63 = vadd.f32 %v5001_v49, %v3944_v47  ;;  %v5005_v13 = vadd.f32 %v3755_v59, %v7261_v35  ;;  %v3757_v42 = vpop.f32.mrb[87].mxu1  ;;  %v4211_v27 = vmul.f32 %v7274_v54, %v4135_v37  ;;  %v3954_v1 = vpop.f32.mrb[24].mxu0 }
 0x437   :  { %v5004_v30 = vadd.f32 %v5003_v11, %v3946_v62  ;;  %v5007_v3 = vadd.f32 %v3757_v42, %v7264_v38  ;;  %v4281_v18 = vadd.f32 %v4210_v28, %v4209_v7  ;;  %v4212_v50 = vmul.f32 %v7277_v26, %v4136_v15  ;;  %v3956_v34 = vpop.f32.mrb[25].mxu0 }
 0x438   :  { %v4073_v21 = vmul.f32 0.2, %v5002_v63  ;;  %v5006_v57 = vadd.f32 %v5005_v13, %v3948_v32  ;;  %v3958_v46 = vpop.f32.mrb[26].mxu0 }
 0x439   :  { %v4074_v8 = vmul.f32 0.2, %v5004_v30  ;;  %v5008_v52 = vadd.f32 %v5007_v3, %v3950_v6  ;;  %4282 = vadd.xlane.f32.xlu0 %v4281_v18  ;;  %v4284_v51 = vadd.f32 %v4212_v50, %v4211_v27  ;;  %v3960_v41 = vpop.f32.mrb[27].mxu0 }
 0x43a   :  { %v4137_v40 = vmax.f32 %v5002_v63, %v4073_v21  ;;  %v4075_v14 = vmul.f32 0.2, %v5006_v57 }
 0x43b   :  { %v4138_v23 = vmax.f32 %v5004_v30, %v4074_v8  ;;  %v4076_v56 = vmul.f32 0.2, %v5008_v52  ;;  %4285 = vadd.xlane.f32.xlu1 %v4284_v51  ;;  %v3761_v17 = vpop.f32.mrb[88].mxu1 }
 0x43c   :  { %v4139_v31 = vmax.f32 %v5006_v57, %v4075_v14  ;;  %v5009_v24 = vadd.f32 %v3761_v17, %v7261_v35  ;;  %v3763_v43 = vpop.f32.mrb[89].mxu1  ;;  %v4213_v9 = vmul.f32 %v7274_v54, %v4137_v40 }
 0x43d   :  { %v4140_v16 = vmax.f32 %v5008_v52, %v4076_v56  ;;  %v5011_v44 = vadd.f32 %v3763_v43, %v7264_v38  ;;  %v3765_v4 = vpop.f32.mrb[90].mxu1  ;;  %v4214_v22 = vmul.f32 %v7277_v26, %v4138_v23 }
 0x43e   :  { %v5010_v39 = vadd.f32 %v5009_v24, %v3954_v1  ;;  %v5013_v2 = vadd.f32 %v3765_v4, %v7261_v35  ;;  %v3767_v10 = vpop.f32.mrb[91].mxu1  ;;  %v4215_v20 = vmul.f32 %v7274_v54, %v4139_v31  ;;  %v3964_v47 = vpop.f32.mrb[28].mxu0 }
 0x43f   :  { %v5012_v0 = vadd.f32 %v5011_v44, %v3956_v34  ;;  %v5015_v29 = vadd.f32 %v3767_v10, %v7264_v38  ;;  %v4287_v48 = vadd.f32 %v4214_v22, %v4213_v9  ;;  %v4216_v12 = vmul.f32 %v7277_v26, %v4140_v16  ;;  %v3966_v62 = vpop.f32.mrb[29].mxu0 }
 0x440   :  { %v4077_v61 = vmul.f32 0.2, %v5010_v39  ;;  %v5014_v53 = vadd.f32 %v5013_v2, %v3958_v46  ;;  %v3968_v32 = vpop.f32.mrb[30].mxu0 }
 0x441   :  { %v4078_v5 = vmul.f32 0.2, %v5012_v0  ;;  %v5016_v45 = vadd.f32 %v5015_v29, %v3960_v41  ;;  %4288 = vadd.xlane.f32.xlu0 %v4287_v48  ;;  %v4290_v33 = vadd.f32 %v4216_v12, %v4215_v20  ;;  %v3970_v6 = vpop.f32.mrb[31].mxu0 }
 0x442   :  { %v4141_v58 = vmax.f32 %v5010_v39, %v4077_v61  ;;  %v4079_v19 = vmul.f32 0.2, %v5014_v53 }
 0x443   :  { %v4142_v60 = vmax.f32 %v5012_v0, %v4078_v5  ;;  %v4080_v36 = vmul.f32 0.2, %v5016_v45  ;;  %4291 = vadd.xlane.f32.xlu1 %v4290_v33  ;;  %v3771_v25 = vpop.f32.mrb[92].mxu1 }
 0x444   :  { %v4143_v37 = vmax.f32 %v5014_v53, %v4079_v19  ;;  %v5017_v49 = vadd.f32 %v3771_v25, %v7261_v35  ;;  %v3773_v55 = vpop.f32.mrb[93].mxu1  ;;  %v4217_v7 = vmul.f32 %v7274_v54, %v4141_v58 }
 0x445   :  { %v4144_v15 = vmax.f32 %v5016_v45, %v4080_v36  ;;  %v5019_v11 = vadd.f32 %v3773_v55, %v7264_v38  ;;  %v3775_v59 = vpop.f32.mrb[94].mxu1  ;;  %v4218_v28 = vmul.f32 %v7277_v26, %v4142_v60 }
 0x446   :  { %v5018_v63 = vadd.f32 %v5017_v49, %v3964_v47  ;;  %v5021_v13 = vadd.f32 %v3775_v59, %v7261_v35  ;;  %v3777_v42 = vpop.f32.mrb[95].mxu1  ;;  %v4219_v27 = vmul.f32 %v7274_v54, %v4143_v37  ;;  %v3974_v1 = vpop.f32.mrb[32].mxu0 }
 0x447   :  { %v5020_v30 = vadd.f32 %v5019_v11, %v3966_v62  ;;  %v5023_v3 = vadd.f32 %v3777_v42, %v7264_v38  ;;  %v4293_v18 = vadd.f32 %v4218_v28, %v4217_v7  ;;  %v4220_v50 = vmul.f32 %v7277_v26, %v4144_v15  ;;  %v3976_v34 = vpop.f32.mrb[33].mxu0 }
 0x448   :  { %v4081_v21 = vmul.f32 0.2, %v5018_v63  ;;  %v5022_v57 = vadd.f32 %v5021_v13, %v3968_v32  ;;  %v3978_v46 = vpop.f32.mrb[34].mxu0 }
 0x449   :  { %v4082_v8 = vmul.f32 0.2, %v5020_v30  ;;  %v5024_v52 = vadd.f32 %v5023_v3, %v3970_v6  ;;  %4294 = vadd.xlane.f32.xlu0 %v4293_v18  ;;  %v4296_v51 = vadd.f32 %v4220_v50, %v4219_v27  ;;  %v3980_v41 = vpop.f32.mrb[35].mxu0 }
 0x44a   :  { %v4145_v40 = vmax.f32 %v5018_v63, %v4081_v21  ;;  %v4083_v14 = vmul.f32 0.2, %v5022_v57 }
 0x44b   :  { %v4146_v23 = vmax.f32 %v5020_v30, %v4082_v8  ;;  %v4084_v56 = vmul.f32 0.2, %v5024_v52  ;;  %4297 = vadd.xlane.f32.xlu1 %v4296_v51  ;;  %v3781_v17 = vpop.f32.mrb[96].mxu1 }
 0x44c   :  { %v4147_v31 = vmax.f32 %v5022_v57, %v4083_v14  ;;  %v5025_v24 = vadd.f32 %v3781_v17, %v7261_v35  ;;  %v3783_v43 = vpop.f32.mrb[97].mxu1  ;;  %v4221_v9 = vmul.f32 %v7274_v54, %v4145_v40 }
 0x44d   :  { %v4148_v16 = vmax.f32 %v5024_v52, %v4084_v56  ;;  %v5027_v44 = vadd.f32 %v3783_v43, %v7264_v38  ;;  %v3785_v4 = vpop.f32.mrb[98].mxu1  ;;  %v4222_v22 = vmul.f32 %v7277_v26, %v4146_v23 }
 0x44e   :  { %v5026_v39 = vadd.f32 %v5025_v24, %v3974_v1  ;;  %v5029_v2 = vadd.f32 %v3785_v4, %v7261_v35  ;;  %v3787_v10 = vpop.f32.mrb[99].mxu1  ;;  %v4223_v20 = vmul.f32 %v7274_v54, %v4147_v31  ;;  %v3984_v47 = vpop.f32.mrb[36].mxu0 }
 0x44f   :  { %v5028_v0 = vadd.f32 %v5027_v44, %v3976_v34  ;;  %v5031_v29 = vadd.f32 %v3787_v10, %v7264_v38  ;;  %v4299_v48 = vadd.f32 %v4222_v22, %v4221_v9  ;;  %v4224_v12 = vmul.f32 %v7277_v26, %v4148_v16  ;;  %v3986_v62 = vpop.f32.mrb[37].mxu0 }
 0x450   :  { %v4085_v61 = vmul.f32 0.2, %v5026_v39  ;;  %v5030_v53 = vadd.f32 %v5029_v2, %v3978_v46  ;;  %v3988_v32 = vpop.f32.mrb[38].mxu0 }
 0x451   :  { %v4086_v5 = vmul.f32 0.2, %v5028_v0  ;;  %v5032_v45 = vadd.f32 %v5031_v29, %v3980_v41  ;;  %4300 = vadd.xlane.f32.xlu0 %v4299_v48  ;;  %v4302_v33 = vadd.f32 %v4224_v12, %v4223_v20  ;;  %v3990_v6 = vpop.f32.mrb[39].mxu0 }
 0x452   :  { %v4149_v58 = vmax.f32 %v5026_v39, %v4085_v61  ;;  %v4087_v19 = vmul.f32 0.2, %v5030_v53 }
 0x453   :  { %v4150_v60 = vmax.f32 %v5028_v0, %v4086_v5  ;;  %v4088_v36 = vmul.f32 0.2, %v5032_v45  ;;  %4303 = vadd.xlane.f32.xlu1 %v4302_v33  ;;  %v3791_v25 = vpop.f32.mrb[100].mxu1 }
 0x454   :  { %v4151_v37 = vmax.f32 %v5030_v53, %v4087_v19  ;;  %v5033_v49 = vadd.f32 %v3791_v25, %v7261_v35  ;;  %v3793_v55 = vpop.f32.mrb[101].mxu1  ;;  %v4225_v7 = vmul.f32 %v7274_v54, %v4149_v58 }
 0x455   :  { %v4152_v15 = vmax.f32 %v5032_v45, %v4088_v36  ;;  %v5035_v11 = vadd.f32 %v3793_v55, %v7264_v38  ;;  %v3795_v59 = vpop.f32.mrb[102].mxu1  ;;  %v4226_v28 = vmul.f32 %v7277_v26, %v4150_v60 }
 0x456   :  { %v5034_v63 = vadd.f32 %v5033_v49, %v3984_v47  ;;  %v5037_v13 = vadd.f32 %v3795_v59, %v7261_v35  ;;  %v3797_v42 = vpop.f32.mrb[103].mxu1  ;;  %v4227_v27 = vmul.f32 %v7274_v54, %v4151_v37 }
 0x457   :  { %v5036_v30 = vadd.f32 %v5035_v11, %v3986_v62  ;;  %v5039_v3 = vadd.f32 %v3797_v42, %v7264_v38  ;;  %v4305_v18 = vadd.f32 %v4226_v28, %v4225_v7  ;;  %v4228_v50 = vmul.f32 %v7277_v26, %v4152_v15 }
 0x458   :  { %v4089_v21 = vmul.f32 0.2, %v5034_v63  ;;  %v5038_v57 = vadd.f32 %v5037_v13, %v3988_v32 }
 0x459   :  { %v4090_v1 = vmul.f32 0.2, %v5036_v30  ;;  %v5040_v8 = vadd.f32 %v5039_v3, %v3990_v6  ;;  %4306 = vadd.xlane.f32.xlu0 %v4305_v18  ;;  %v4308_v52 = vadd.f32 %v4228_v50, %v4227_v27 }
 0x45a   :  { %v4153_v51 = vmax.f32 %v5034_v63, %v4089_v21  ;;  %v4091_v34 = vmul.f32 0.2, %v5038_v57 }
 0x45b   :  { %v4154_v40 = vmax.f32 %v5036_v30, %v4090_v1  ;;  %v4092_v14 = vmul.f32 0.2, %v5040_v8  ;;  %4309 = vadd.xlane.f32.xlu1 %v4308_v52 }
 0x45c   :  { %v4155_v46 = vmax.f32 %v5038_v57, %v4091_v34  ;;  %v4229_v23 = vmul.f32 %v7274_v54, %v4153_v51 }
 0x45d   :  { %v4156_v56 = vmax.f32 %v5040_v8, %v4092_v14  ;;  %v4230_v17 = vmul.f32 %v7277_v26, %v4154_v40 }
 0x45e   :  { %v4231_v41 = vmul.f32 %v7274_v54, %v4155_v46 }
 0x45f   :  { %v4311_v31 = vadd.f32 %v4230_v17, %v4229_v23  ;;  %v4232_v24 = vmul.f32 %v7277_v26, %v4156_v56 }
 0x461   :  { %4312 = vadd.xlane.f32.xlu0 %v4311_v31  ;;  %v4314_v43 = vadd.f32 %v4232_v24, %v4231_v41 }
 0x463   :  { %4315 = vadd.xlane.f32.xlu1 %v4314_v43 }
 0x48b   :  { %v3994_v9 = vpop.f32.mrb[104].mxu1 }
 0x48c   :  { %v5041_v16 = vadd.f32 %v3994_v9, %v7261_v35  ;;  %v3996_v44 = vpop.f32.mrb[105].mxu1 }
 0x48d   :  { %v5042_v4 = vadd.f32 %v3996_v44, %v7264_v38  ;;  %v3998_v22 = vpop.f32.mrb[106].mxu1 }
 0x48e   :  { %v4093_v39 = vmul.f32 0.2, %v5041_v16  ;;  %v5043_v2 = vadd.f32 %v3998_v22, %v7261_v35  ;;  %v4000_v10 = vpop.f32.mrb[107].mxu1 }
 0x48f   :  { %v4094_v20 = vmul.f32 0.2, %v5042_v4  ;;  %v5044_v0 = vadd.f32 %v4000_v10, %v7264_v38 }
 0x490   :  { %v4157_v29 = vmax.f32 %v5041_v16, %v4093_v39  ;;  %v4095_v48 = vmul.f32 0.2, %v5043_v2  ;;  %v7378_v39 = vld [vmem:[#allocation2] ss:$0 sm:$0xff] }
 0x491   :  { %v4158_v12 = vmax.f32 %v5042_v4, %v4094_v20  ;;  %v4096_v61 = vmul.f32 0.2, %v5044_v0 }
 0x492   :  { %v4159_v53 = vmax.f32 %v5043_v2, %v4095_v48  ;;  %v4233_v47 = vmul.f32 %v7274_v54, %v4157_v29 }
 0x493   :  { %v4160_v5 = vmax.f32 %v5044_v0, %v4096_v61  ;;  %v4004_v45 = vpop.f32.mrb[108].mxu1  ;;  %v4234_v33 = vmul.f32 %v7277_v26, %v4158_v12 }
 0x494   :  { %v5045_v62 = vadd.f32 %v4004_v45, %v7261_v35  ;;  %v4006_v58 = vpop.f32.mrb[109].mxu1  ;;  %v4235_v19 = vmul.f32 %v7274_v54, %v4159_v53 }
 0x495   :  { %v5046_v32 = vadd.f32 %v4006_v58, %v7264_v38  ;;  %v4008_v60 = vpop.f32.mrb[110].mxu1  ;;  %v4317_v36 = vadd.f32 %v4234_v33, %v4233_v47  ;;  %v4236_v25 = vmul.f32 %v7277_v26, %v4160_v5 }
 0x496   :  { %v4097_v6 = vmul.f32 0.2, %v5045_v62  ;;  %v5047_v37 = vadd.f32 %v4008_v60, %v7261_v35  ;;  %v4010_v49 = vpop.f32.mrb[111].mxu1 }
 0x497   :  { %v4098_v55 = vmul.f32 0.2, %v5046_v32  ;;  %v5048_v7 = vadd.f32 %v4010_v49, %v7264_v38  ;;  %4318 = vadd.xlane.f32.xlu0 %v4317_v36  ;;  %v4320_v15 = vadd.f32 %v4236_v25, %v4235_v19 }
 0x498   :  { %v4161_v11 = vmax.f32 %v5045_v62, %v4097_v6  ;;  %v4099_v59 = vmul.f32 0.2, %v5047_v37 }
 0x499   :  { %v4162_v28 = vmax.f32 %v5046_v32, %v4098_v55  ;;  %v4100_v63 = vmul.f32 0.2, %v5048_v7  ;;  %4321 = vadd.xlane.f32.xlu1 %v4320_v15 }
 0x49a   :  { %v4163_v13 = vmax.f32 %v5047_v37, %v4099_v59  ;;  %v4237_v42 = vmul.f32 %v7274_v54, %v4161_v11 }
 0x49b   :  { %v4164_v27 = vmax.f32 %v5048_v7, %v4100_v63  ;;  %v4014_v30 = vpop.f32.mrb[112].mxu1  ;;  %v4238_v3 = vmul.f32 %v7277_v26, %v4162_v28 }
 0x49c   :  { %v5049_v18 = vadd.f32 %v4014_v30, %v7261_v35  ;;  %v4016_v50 = vpop.f32.mrb[113].mxu1  ;;  %v4239_v21 = vmul.f32 %v7274_v54, %v4163_v13 }
 0x49d   :  { %v5050_v57 = vadd.f32 %v4016_v50, %v7264_v38  ;;  %v4018_v1 = vpop.f32.mrb[114].mxu1  ;;  %v4323_v8 = vadd.f32 %v4238_v3, %v4237_v42  ;;  %v4240_v52 = vmul.f32 %v7277_v26, %v4164_v27 }
 0x49e   :  { %v4101_v51 = vmul.f32 0.2, %v5049_v18  ;;  %v5051_v34 = vadd.f32 %v4018_v1, %v7261_v35  ;;  %v4020_v40 = vpop.f32.mrb[115].mxu1 }
 0x49f   :  { %v4102_v14 = vmul.f32 0.2, %v5050_v57  ;;  %v5052_v46 = vadd.f32 %v4020_v40, %v7264_v38  ;;  %4324 = vadd.xlane.f32.xlu0 %v4323_v8  ;;  %v4326_v23 = vadd.f32 %v4240_v52, %v4239_v21 }
 0x4a0   :  { %v4165_v56 = vmax.f32 %v5049_v18, %v4101_v51  ;;  %v4103_v17 = vmul.f32 0.2, %v5051_v34 }
 0x4a1   :  { %v4166_v41 = vmax.f32 %v5050_v57, %v4102_v14  ;;  %v4104_v31 = vmul.f32 0.2, %v5052_v46  ;;  %4327 = vadd.xlane.f32.xlu1 %v4326_v23 }
 0x4a2   :  { %v4167_v24 = vmax.f32 %v5051_v34, %v4103_v17  ;;  %v4241_v43 = vmul.f32 %v7274_v54, %v4165_v56 }
 0x4a3   :  { %v4168_v9 = vmax.f32 %v5052_v46, %v4104_v31  ;;  %v4024_v16 = vpop.f32.mrb[116].mxu1  ;;  %v4242_v44 = vmul.f32 %v7277_v26, %v4166_v41 }
 0x4a4   :  { %v5053_v4 = vadd.f32 %v4024_v16, %v7261_v35  ;;  %v4026_v22 = vpop.f32.mrb[117].mxu1  ;;  %v4243_v2 = vmul.f32 %v7274_v54, %v4167_v24 }
 0x4a5   :  { %v5054_v10 = vadd.f32 %v4026_v22, %v7264_v38  ;;  %v4028_v20 = vpop.f32.mrb[118].mxu1  ;;  %v4329_v0 = vadd.f32 %v4242_v44, %v4241_v43  ;;  %v4244_v29 = vmul.f32 %v7277_v26, %v4168_v9 }
 0x4a6   :  { %v4105_v48 = vmul.f32 0.2, %v5053_v4  ;;  %v5055_v12 = vadd.f32 %v4028_v20, %v7261_v35  ;;  %v4259_v61 = vpop.xlane.xlu0 %4258  ;;  %v4030_v53 = vpop.f32.mrb[119].mxu1 }
 0x4a7   :  { %v4106_v47 = vmul.f32 0.2, %v5054_v10  ;;  %v4360_v5 = vadd.f32 %v7378_v39, %v4259_v61  ;;  %v5056_v45 = vadd.f32 %v4030_v53, %v7264_v38  ;;  %4330 = vadd.xlane.f32.xlu0 %v4329_v0  ;;  %v4332_v33 = vadd.f32 %v4244_v29, %v4243_v2 }
 0x4a8   :  { %v4169_v62 = vmax.f32 %v5053_v4, %v4105_v48  ;;  %v4107_v58 = vmul.f32 0.2, %v5055_v12 }
 0x4a9   :  { %v4170_v19 = vmax.f32 %v5054_v10, %v4106_v47  ;;  %v4897_v32 = vmul.f32 -1.442695, %v4360_v5  ;;  %v4108_v60 = vmul.f32 0.2, %v5056_v45  ;;  %4333 = vadd.xlane.f32.xlu1 %v4332_v33 }
 0x4aa   :  { %v4171_v36 = vmax.f32 %v5055_v12, %v4107_v58  ;;  %v4262_v25 = vpop.xlane.xlu0 %4261  ;;  %v4245_v6 = vmul.f32 %v7274_v54, %v4169_v62 }
 0x4ab   :  { %5954 = vpow2.f32 %v4897_v32  ;;  %v4172_v37 = vmax.f32 %v5056_v45, %v4108_v60  ;;  %v4361_v49 = vadd.f32 %v7378_v39, %v4262_v25  ;;  %v4034_v55 = vpop.f32.mrb[120].mxu1  ;;  %v4246_v7 = vmul.f32 %v7277_v26, %v4170_v19 }
 0x4ac   :  { %v5057_v15 = vadd.f32 %v4034_v55, %v7261_v35  ;;  %v4036_v11 = vpop.f32.mrb[121].mxu1  ;;  %v4247_v59 = vmul.f32 %v7274_v54, %v4171_v36 }
 0x4ad   :  { %v4898_v28 = vmul.f32 -1.442695, %v4361_v49  ;;  %v5058_v63 = vadd.f32 %v4036_v11, %v7264_v38  ;;  %v4038_v13 = vpop.f32.mrb[122].mxu1  ;;  %v4335_v42 = vadd.f32 %v4246_v7, %v4245_v6  ;;  %v4248_v27 = vmul.f32 %v7277_v26, %v4172_v37 }
 0x4ae   :  { %v4109_v30 = vmul.f32 0.2, %v5057_v15  ;;  %v5059_v3 = vadd.f32 %v4038_v13, %v7261_v35  ;;  %v4265_v18 = vpop.xlane.xlu1 %4264  ;;  %v4040_v50 = vpop.f32.mrb[123].mxu1 }
 0x4af   :  { %5956 = vpow2.f32 %v4898_v28  ;;  %v4110_v21 = vmul.f32 0.2, %v5058_v63  ;;  %v4362_v57 = vadd.f32 %v7378_v39, %v4265_v18  ;;  %v5060_v1 = vadd.f32 %v4040_v50, %v7264_v38  ;;  %4336 = vadd.xlane.f32.xlu0 %v4335_v42 }
 0x4b0   :  { %v4173_v8 = vmax.f32 %v5057_v15, %v4109_v30  ;;  %v4111_v52 = vmul.f32 0.2, %v5059_v3  ;;  %v4338_v51 = vadd.f32 %v4248_v27, %v4247_v59 }
 0x4b1   :  { %v4174_v34 = vmax.f32 %v5058_v63, %v4110_v21  ;;  %v4899_v40 = vmul.f32 -1.442695, %v4362_v57  ;;  %v4112_v14 = vmul.f32 0.2, %v5060_v1 }
 0x4b2   :  { %v4175_v46 = vmax.f32 %v5059_v3, %v4111_v52  ;;  %4339 = vadd.xlane.f32.xlu1 %v4338_v51  ;;  %v4268_v23 = vpop.xlane.xlu1 %4267  ;;  %v4249_v56 = vmul.f32 %v7274_v54, %v4173_v8 }
 0x4b3   :  { %5958 = vpow2.f32 %v4899_v40  ;;  %v4176_v17 = vmax.f32 %v5060_v1, %v4112_v14  ;;  %v4363_v41 = vadd.f32 %v7378_v39, %v4268_v23  ;;  %v4044_v31 = vpop.f32.mrb[124].mxu1  ;;  %v4250_v24 = vmul.f32 %v7277_v26, %v4174_v34 }
 0x4b4   :  { %v5061_v43 = vadd.f32 %v4044_v31, %v7261_v35  ;;  %v4046_v9 = vpop.f32.mrb[125].mxu1  ;;  %v4251_v16 = vmul.f32 %v7274_v54, %v4175_v46 }
 0x4b5   :  { %v5955_v44 = vpop.eup %5954  ;;  %v4900_v4 = vmul.f32 -1.442695, %v4363_v41  ;;  %v5062_v22 = vadd.f32 %v4046_v9, %v7264_v38  ;;  %v4048_v2 = vpop.f32.mrb[126].mxu1  ;;  %v4341_v10 = vadd.f32 %v4250_v24, %v4249_v56  ;;  %v4252_v20 = vmul.f32 %v7277_v26, %v4176_v17 }
 0x4b6   :  { %v4488_v0 = vadd.f32 1.0, %v5955_v44  ;;  %v4113_v29 = vmul.f32 0.2, %v5061_v43  ;;  %v5063_v48 = vadd.f32 %v4048_v2, %v7261_v35  ;;  %v4271_v12 = vpop.xlane.xlu0 %4270  ;;  %v4050_v61 = vpop.f32.mrb[127].mxu1 }
 0x4b7   :  { %5960 = vpow2.f32 %v4900_v4  ;;  %v4114_v53 = vmul.f32 0.2, %v5062_v22  ;;  %v4364_v47 = vadd.f32 %v7378_v39, %v4271_v12  ;;  %v5064_v5 = vadd.f32 %v4050_v61, %v7264_v38  ;;  %4342 = vadd.xlane.f32.xlu0 %v4341_v10 }
 0x4b8   :  { %5962 = vrcp.f32 %v4488_v0  ;;  %v4177_v45 = vmax.f32 %v5061_v43, %v4113_v29  ;;  %v4115_v33 = vmul.f32 0.2, %v5063_v48  ;;  %v4274_v62 = vpop.xlane.xlu1 %4273  ;;  %v4344_v58 = vadd.f32 %v4252_v20, %v4251_v16 }
 0x4b9   :  { %v5957_v19 = vpop.eup %5956  ;;  %v4178_v32 = vmax.f32 %v5062_v22, %v4114_v53  ;;  %v4901_v60 = vmul.f32 -1.442695, %v4364_v47  ;;  %v4116_v36 = vmul.f32 0.2, %v5064_v5  ;;  %v4365_v35 = vadd.f32 %v7378_v39, %v4274_v62 }
 0x4ba   :  { %v4489_v25 = vadd.f32 1.0, %v5957_v19  ;;  %v4179_v6 = vmax.f32 %v5063_v48, %v4115_v33  ;;  %4345 = vadd.xlane.f32.xlu1 %v4344_v58  ;;  %v4253_v37 = vmul.f32 %v7274_v54, %v4177_v45 }
 0x4bb   :  { %5964 = vpow2.f32 %v4901_v60  ;;  %v4180_v49 = vmax.f32 %v5064_v5, %v4116_v36  ;;  %v4902_v38 = vmul.f32 -1.442695, %v4365_v35  ;;  %v4254_v55 = vmul.f32 %v7277_v26, %v4178_v32 }
 0x4bc   :  { %5966 = vrcp.f32 %v4489_v25  ;;  %v4255_v7 = vmul.f32 %v7274_v54, %v4179_v6 }
 0x4bd   :  { %v5959_v15 = vpop.eup %5958  ;;  %5968 = vpow2.f32 %v4902_v38  ;;  %v4347_v11 = vadd.f32 %v4254_v55, %v4253_v37  ;;  %v4256_v59 = vmul.f32 %v7277_v26, %v4180_v49 }
 0x4be   :  { %v4490_v28 = vadd.f32 1.0, %v5959_v15  ;;  %v4277_v63 = vpop.xlane.xlu0 %4276 }
 0x4bf   :  { %v4366_v13 = vadd.f32 %v7378_v39, %v4277_v63  ;;  %4348 = vadd.xlane.f32.xlu0 %v4347_v11  ;;  %v4350_v42 = vadd.f32 %v4256_v59, %v4255_v7 }
 0x4c0   :  { %5970 = vrcp.f32 %v4490_v28  ;;  %v4280_v27 = vpop.xlane.xlu1 %4279 }
 0x4c1   :  { %v5961_v30 = vpop.eup %5960  ;;  %v4903_v3 = vmul.f32 -1.442695, %v4366_v13  ;;  %v4367_v18 = vadd.f32 %v7378_v39, %v4280_v27  ;;  %4351 = vadd.xlane.f32.xlu1 %v4350_v42 }
 0x4c2   :  { %v5963_v54 = vpop.eup %5962  ;;  %v4491_v50 = vadd.f32 1.0, %v5961_v30 }
 0x4c3   :  { %4585 = vst.msk [vmem:[%s7574_s9] sm:$0xff] %vm4584_vm0, %v5963_v54  ;;  %5972 = vpow2.f32 %v4903_v3  ;;  %v4904_v26 = vmul.f32 -1.442695, %v4367_v18 }
 0x4c4   :  { %5974 = vrcp.f32 %v4491_v50 }
 0x4c5   :  { %v5965_v21 = vpop.eup %5964  ;;  %5976 = vpow2.f32 %v4904_v26 }
 0x4c6   :  { %v5967_v57 = vpop.eup %5966  ;;  %v4492_v1 = vadd.f32 1.0, %v5965_v21  ;;  %v4283_v8 = vpop.xlane.xlu0 %4282 }
 0x4c7   :  { %v5969_v52 = vpop.eup %5968  ;;  %4586 = vst.msk [vmem:[%s7574_s9 + $0x8] sm:$0xff] %vm4584_vm0, %v5967_v57  ;;  %v4368_v51 = vadd.f32 %v7378_v39, %v4283_v8 }
 0x4c8   :  { %5978 = vrcp.f32 %v4492_v1  ;;  %v4493_v34 = vadd.f32 1.0, %v5969_v52  ;;  %v4286_v40 = vpop.xlane.xlu1 %4285 }
 0x4c9   :  { %v4905_v14 = vmul.f32 -1.442695, %v4368_v51  ;;  %v4369_v46 = vadd.f32 %v7378_v39, %v4286_v40 }
 0x4ca   :  { %v5971_v23 = vpop.eup %5970  ;;  %5980 = vrcp.f32 %v4493_v34 }
 0x4cb   :  { %4587 = vst.msk [vmem:[%s7574_s9 + $0x10] sm:$0xff] %vm4584_vm0, %v5971_v23  ;;  %5982 = vpow2.f32 %v4905_v14  ;;  %v4906_v56 = vmul.f32 -1.442695, %v4369_v46 }
 0x4cd   :  { %v5973_v17 = vpop.eup %5972  ;;  %5984 = vpow2.f32 %v4906_v56 }
 0x4ce   :  { %v5975_v41 = vpop.eup %5974  ;;  %v4494_v31 = vadd.f32 1.0, %v5973_v17  ;;  %v4289_v24 = vpop.xlane.xlu0 %4288 }
 0x4cf   :  { %v5977_v43 = vpop.eup %5976  ;;  %4588 = vst.msk [vmem:[%s7574_s9 + $0x18] sm:$0xff] %vm4584_vm0, %v5975_v41  ;;  %v4370_v9 = vadd.f32 %v7378_v39, %v4289_v24 }
 0x4d0   :  { %5986 = vrcp.f32 %v4494_v31  ;;  %v4495_v16 = vadd.f32 1.0, %v5977_v43  ;;  %v4292_v44 = vpop.xlane.xlu1 %4291 }
 0x4d1   :  { %v4907_v4 = vmul.f32 -1.442695, %v4370_v9  ;;  %v4371_v22 = vadd.f32 %v7378_v39, %v4292_v44 }
 0x4d2   :  { %v5979_v2 = vpop.eup %5978  ;;  %5988 = vrcp.f32 %v4495_v16 }
 0x4d3   :  { %4589 = vst.msk [vmem:[%s7574_s9 + $0x20] sm:$0xff] %vm4584_vm0, %v5979_v2  ;;  %5990 = vpow2.f32 %v4907_v4  ;;  %v4908_v10 = vmul.f32 -1.442695, %v4371_v22 }
 0x4d4   :  { %v5981_v20 = vpop.eup %5980 }
 0x4d5   :  { %v5983_v0 = vpop.eup %5982  ;;  %4590 = vst.msk [vmem:[%s7574_s9 + $0x28] sm:$0xff] %vm4584_vm0, %v5981_v20  ;;  %5992 = vpow2.f32 %v4908_v10 }
 0x4d6   :  { %v4496_v29 = vadd.f32 1.0, %v5983_v0  ;;  %v4295_v48 = vpop.xlane.xlu0 %4294 }
 0x4d7   :  { %v5985_v12 = vpop.eup %5984  ;;  %v4372_v61 = vadd.f32 %v7378_v39, %v4295_v48 }
 0x4d8   :  { %5994 = vrcp.f32 %v4496_v29  ;;  %v4497_v53 = vadd.f32 1.0, %v5985_v12  ;;  %v4298_v47 = vpop.xlane.xlu1 %4297 }
 0x4d9   :  { %v4909_v5 = vmul.f32 -1.442695, %v4372_v61  ;;  %v4373_v45 = vadd.f32 %v7378_v39, %v4298_v47 }
 0x4da   :  { %v5987_v33 = vpop.eup %5986  ;;  %5996 = vrcp.f32 %v4497_v53 }
 0x4db   :  { %4591 = vst.msk [vmem:[%s7574_s9 + $0x30] sm:$0xff] %vm4584_vm0, %v5987_v33  ;;  %5998 = vpow2.f32 %v4909_v5  ;;  %v4910_v62 = vmul.f32 -1.442695, %v4373_v45 }
 0x4dc   :  { %v5989_v58 = vpop.eup %5988 }
 0x4dd   :  { %v5991_v19 = vpop.eup %5990  ;;  %4592 = vst.msk [vmem:[%s7574_s9 + $0x38] sm:$0xff] %vm4584_vm0, %v5989_v58  ;;  %6000 = vpow2.f32 %v4910_v62 }
 0x4de   :  { %v4498_v32 = vadd.f32 1.0, %v5991_v19  ;;  %v4301_v60 = vpop.xlane.xlu0 %4300 }
 0x4df   :  { %v5993_v36 = vpop.eup %5992  ;;  %v4374_v35 = vadd.f32 %v7378_v39, %v4301_v60 }
 0x4e0   :  { %6002 = vrcp.f32 %v4498_v32  ;;  %v4499_v25 = vadd.f32 1.0, %v5993_v36  ;;  %v4304_v6 = vpop.xlane.xlu1 %4303 }
 0x4e1   :  { %v4911_v37 = vmul.f32 -1.442695, %v4374_v35  ;;  %v4375_v49 = vadd.f32 %v7378_v39, %v4304_v6 }
 0x4e2   :  { %v5995_v38 = vpop.eup %5994  ;;  %6004 = vrcp.f32 %v4499_v25 }
 0x4e3   :  { %4593 = vst.msk [vmem:[%s7574_s9 + $0x40] sm:$0xff] %vm4584_vm0, %v5995_v38  ;;  %6006 = vpow2.f32 %v4911_v37  ;;  %v4912_v55 = vmul.f32 -1.442695, %v4375_v49 }
 0x4e4   :  { %v5997_v7 = vpop.eup %5996 }
 0x4e5   :  { %v5999_v15 = vpop.eup %5998  ;;  %4594 = vst.msk [vmem:[%s7574_s9 + $0x48] sm:$0xff] %vm4584_vm0, %v5997_v7  ;;  %6008 = vpow2.f32 %v4912_v55 }
 0x4e6   :  { %v4500_v11 = vadd.f32 1.0, %v5999_v15  ;;  %v4307_v59 = vpop.xlane.xlu0 %4306 }
 0x4e7   :  { %v6001_v28 = vpop.eup %6000  ;;  %v4376_v63 = vadd.f32 %v7378_v39, %v4307_v59 }
 0x4e8   :  { %6010 = vrcp.f32 %v4500_v11  ;;  %v4501_v13 = vadd.f32 1.0, %v6001_v28  ;;  %v4310_v42 = vpop.xlane.xlu1 %4309 }
 0x4e9   :  { %v4913_v27 = vmul.f32 -1.442695, %v4376_v63  ;;  %v4377_v30 = vadd.f32 %v7378_v39, %v4310_v42 }
 0x4ea   :  { %v6003_v3 = vpop.eup %6002  ;;  %6012 = vrcp.f32 %v4501_v13 }
 0x4eb   :  { %4595 = vst.msk [vmem:[%s7574_s9 + $0x50] sm:$0xff] %vm4584_vm0, %v6003_v3  ;;  %6014 = vpow2.f32 %v4913_v27  ;;  %v4914_v18 = vmul.f32 -1.442695, %v4377_v30 }
 0x4ec   :  { %v6005_v54 = vpop.eup %6004 }
 0x4ed   :  { %v6007_v50 = vpop.eup %6006  ;;  %4596 = vst.msk [vmem:[%s7574_s9 + $0x58] sm:$0xff] %vm4584_vm0, %v6005_v54  ;;  %6016 = vpow2.f32 %v4914_v18 }
 0x4ee   :  { %v4502_v26 = vadd.f32 1.0, %v6007_v50  ;;  %v4313_v21 = vpop.xlane.xlu0 %4312 }
 0x4ef   :  { %v6009_v57 = vpop.eup %6008  ;;  %v4378_v1 = vadd.f32 %v7378_v39, %v4313_v21 }
 0x4f0   :  { %6018 = vrcp.f32 %v4502_v26  ;;  %v4503_v8 = vadd.f32 1.0, %v6009_v57  ;;  %v4316_v52 = vpop.xlane.xlu1 %4315 }
 0x4f1   :  { %v4915_v51 = vmul.f32 -1.442695, %v4378_v1  ;;  %v4379_v34 = vadd.f32 %v7378_v39, %v4316_v52 }
 0x4f2   :  { %v6011_v40 = vpop.eup %6010  ;;  %6020 = vrcp.f32 %v4503_v8 }
 0x4f3   :  { %4597 = vst.msk [vmem:[%s7574_s9 + $0x60] sm:$0xff] %vm4584_vm0, %v6011_v40  ;;  %6022 = vpow2.f32 %v4915_v51  ;;  %v4916_v14 = vmul.f32 -1.442695, %v4379_v34 }
 0x4f4   :  { %v6013_v46 = vpop.eup %6012 }
 0x4f5   :  { %v6015_v23 = vpop.eup %6014  ;;  %4598 = vst.msk [vmem:[%s7574_s9 + $0x68] sm:$0xff] %vm4584_vm0, %v6013_v46  ;;  %6024 = vpow2.f32 %v4916_v14 }
 0x4f6   :  { %v4504_v56 = vadd.f32 1.0, %v6015_v23 }
 0x4f7   :  { %v6017_v17 = vpop.eup %6016 }
 0x4f8   :  { %6026 = vrcp.f32 %v4504_v56  ;;  %v4505_v41 = vadd.f32 1.0, %v6017_v17 }
 0x4fa   :  { %v6019_v31 = vpop.eup %6018  ;;  %6028 = vrcp.f32 %v4505_v41 }
 0x4fb   :  { %4599 = vst.msk [vmem:[%s7574_s9 + $0x70] sm:$0xff] %vm4584_vm0, %v6019_v31 }
 0x4fc   :  { %v6021_v24 = vpop.eup %6020 }
 0x4fd   :  { %v6023_v43 = vpop.eup %6022  ;;  %4600 = vst.msk [vmem:[%s7574_s9 + $0x78] sm:$0xff] %vm4584_vm0, %v6021_v24 }
 0x4fe   :  { %v4506_v9 = vadd.f32 1.0, %v6023_v43 }
 0x4ff   :  { %v6025_v16 = vpop.eup %6024 }
 0x500   :  { %6030 = vrcp.f32 %v4506_v9  ;;  %v4507_v44 = vadd.f32 1.0, %v6025_v16 }
 0x502   :  { %v6027_v4 = vpop.eup %6026  ;;  %6032 = vrcp.f32 %v4507_v44 }
 0x503   :  { %4601 = vst.msk [vmem:[%s7574_s9 + $0x80] sm:$0xff] %vm4584_vm0, %v6027_v4 }
 0x504   :  { %v6029_v22 = vpop.eup %6028 }
 0x505   :  { %4602 = vst.msk [vmem:[%s7574_s9 + $0x88] sm:$0xff] %vm4584_vm0, %v6029_v22 }
 0x50a   :  { %v6031_v2 = vpop.eup %6030 }
 0x50b   :  { %4603 = vst.msk [vmem:[%s7574_s9 + $0x90] sm:$0xff] %vm4584_vm0, %v6031_v2 }
 0x50c   :  { %v6033_v10 = vpop.eup %6032 }
 0x50d   :  { %4604 = vst.msk [vmem:[%s7574_s9 + $0x98] sm:$0xff] %vm4584_vm0, %v6033_v10 }
 0x524   :  { %v4319_v20 = vpop.xlane.xlu0 %4318 }
 0x525   :  { %v4380_v0 = vadd.f32 %v7378_v39, %v4319_v20 }
 0x526   :  { %v4322_v29 = vpop.xlane.xlu1 %4321 }
 0x527   :  { %v4917_v48 = vmul.f32 -1.442695, %v4380_v0  ;;  %v4381_v12 = vadd.f32 %v7378_v39, %v4322_v29 }
 0x529   :  { %6034 = vpow2.f32 %v4917_v48  ;;  %v4918_v61 = vmul.f32 -1.442695, %v4381_v12 }
 0x52b   :  { %6036 = vpow2.f32 %v4918_v61 }
 0x52c   :  { %v4325_v53 = vpop.xlane.xlu0 %4324 }
 0x52d   :  { %v4382_v47 = vadd.f32 %v7378_v39, %v4325_v53 }
 0x52e   :  { %v4328_v5 = vpop.xlane.xlu1 %4327 }
 0x52f   :  { %v4919_v45 = vmul.f32 -1.442695, %v4382_v47  ;;  %v4383_v33 = vadd.f32 %v7378_v39, %v4328_v5 }
 0x531   :  { %6038 = vpow2.f32 %v4919_v45  ;;  %v4920_v62 = vmul.f32 -1.442695, %v4383_v33 }
 0x533   :  { %v6035_v58 = vpop.eup %6034  ;;  %6040 = vpow2.f32 %v4920_v62 }
 0x534   :  { %v4508_v19 = vadd.f32 1.0, %v6035_v58  ;;  %v4331_v32 = vpop.xlane.xlu0 %4330 }
 0x535   :  { %v6037_v60 = vpop.eup %6036  ;;  %v4384_v36 = vadd.f32 %v7378_v39, %v4331_v32 }
 0x536   :  { %6042 = vrcp.f32 %v4508_v19  ;;  %v4509_v35 = vadd.f32 1.0, %v6037_v60  ;;  %v4334_v25 = vpop.xlane.xlu1 %4333 }
 0x537   :  { %v4921_v6 = vmul.f32 -1.442695, %v4384_v36  ;;  %v4385_v37 = vadd.f32 %v7378_v39, %v4334_v25 }
 0x538   :  { %6044 = vrcp.f32 %v4509_v35 }
 0x539   :  { %6046 = vpow2.f32 %v4921_v6  ;;  %v4922_v49 = vmul.f32 -1.442695, %v4385_v37 }
 0x53b   :  { %v6039_v38 = vpop.eup %6038  ;;  %6048 = vpow2.f32 %v4922_v49 }
 0x53c   :  { %v4510_v55 = vadd.f32 1.0, %v6039_v38  ;;  %v4337_v7 = vpop.xlane.xlu0 %4336 }
 0x53d   :  { %v6041_v15 = vpop.eup %6040  ;;  %v4386_v11 = vadd.f32 %v7378_v39, %v4337_v7 }
 0x53e   :  { %6050 = vrcp.f32 %v4510_v55  ;;  %v4511_v59 = vadd.f32 1.0, %v6041_v15 }
 0x53f   :  { %v4923_v28 = vmul.f32 -1.442695, %v4386_v11  ;;  %v4340_v63 = vpop.xlane.xlu1 %4339 }
 0x540   :  { %v6043_v13 = vpop.eup %6042  ;;  %6052 = vrcp.f32 %v4511_v59  ;;  %v4387_v42 = vadd.f32 %v7378_v39, %v4340_v63 }
 0x541   :  { %4605 = vst.msk [vmem:[%s7574_s9 + $0xa0] sm:$0xff] %vm4584_vm0, %v6043_v13  ;;  %6054 = vpow2.f32 %v4923_v28 }
 0x542   :  { %v6045_v27 = vpop.eup %6044  ;;  %v4924_v30 = vmul.f32 -1.442695, %v4387_v42 }
 0x543   :  { %v6047_v3 = vpop.eup %6046  ;;  %4606 = vst.msk [vmem:[%s7574_s9 + $0xa8] sm:$0xff] %vm4584_vm0, %v6045_v27 }
 0x544   :  { %v4512_v18 = vadd.f32 1.0, %v6047_v3  ;;  %6056 = vpow2.f32 %v4924_v30  ;;  %v4343_v54 = vpop.xlane.xlu0 %4342 }
 0x545   :  { %v6049_v50 = vpop.eup %6048  ;;  %v4388_v26 = vadd.f32 %v7378_v39, %v4343_v54 }
 0x546   :  { %6058 = vrcp.f32 %v4512_v18  ;;  %v4513_v21 = vadd.f32 1.0, %v6049_v50 }
 0x547   :  { %v4925_v57 = vmul.f32 -1.442695, %v4388_v26  ;;  %v4346_v1 = vpop.xlane.xlu1 %4345 }
 0x548   :  { %v6051_v8 = vpop.eup %6050  ;;  %6060 = vrcp.f32 %v4513_v21  ;;  %v4389_v52 = vadd.f32 %v7378_v39, %v4346_v1 }
 0x549   :  { %4607 = vst.msk [vmem:[%s7574_s9 + $0xb0] sm:$0xff] %vm4584_vm0, %v6051_v8  ;;  %6062 = vpow2.f32 %v4925_v57 }
 0x54a   :  { %v6053_v51 = vpop.eup %6052  ;;  %v4926_v34 = vmul.f32 -1.442695, %v4389_v52 }
 0x54b   :  { %v6055_v40 = vpop.eup %6054  ;;  %4608 = vst.msk [vmem:[%s7574_s9 + $0xb8] sm:$0xff] %vm4584_vm0, %v6053_v51 }
 0x54c   :  { %v4514_v14 = vadd.f32 1.0, %v6055_v40  ;;  %6064 = vpow2.f32 %v4926_v34  ;;  %v4349_v46 = vpop.xlane.xlu0 %4348 }
 0x54d   :  { %v4390_v23 = vadd.f32 %v7378_v39, %v4349_v46 }
 0x54e   :  { %v6057_v56 = vpop.eup %6056  ;;  %6066 = vrcp.f32 %v4514_v14  ;;  %v4352_v17 = vpop.xlane.xlu1 %4351 }
 0x54f   :  { %v4515_v41 = vadd.f32 1.0, %v6057_v56  ;;  %v4927_v31 = vmul.f32 -1.442695, %v4390_v23  ;;  %v4391_v24 = vadd.f32 %v7378_v39, %v4352_v17 }
 0x550   :  { %v6059_v43 = vpop.eup %6058 }
 0x551   :  { %4609 = vst.msk [vmem:[%s7574_s9 + $0xc0] sm:$0xff] %vm4584_vm0, %v6059_v43  ;;  %6068 = vrcp.f32 %v4515_v41  ;;  %v4928_v9 = vmul.f32 -1.442695, %v4391_v24 }
 0x552   :  { %v6061_v16 = vpop.eup %6060  ;;  %6070 = vpow2.f32 %v4927_v31 }
 0x553   :  { %v6063_v44 = vpop.eup %6062  ;;  %4610 = vst.msk [vmem:[%s7574_s9 + $0xc8] sm:$0xff] %vm4584_vm0, %v6061_v16  ;;  %6072 = vpow2.f32 %v4928_v9 }
 0x554   :  { %v4516_v4 = vadd.f32 1.0, %v6063_v44 }
 0x556   :  { %v6065_v22 = vpop.eup %6064  ;;  %6074 = vrcp.f32 %v4516_v4 }
 0x557   :  { %v4517_v39 = vadd.f32 1.0, %v6065_v22 }
 0x558   :  { %v6067_v2 = vpop.eup %6066 }
 0x559   :  { %4611 = vst.msk [vmem:[%s7574_s9 + $0xd0] sm:$0xff] %vm4584_vm0, %v6067_v2  ;;  %6076 = vrcp.f32 %v4517_v39 }
 0x55b   :  { %v6069_v10 = vpop.eup %6068 }
 0x55c   :  { %v6071_v20 = vpop.eup %6070  ;;  %4612 = vst.msk [vmem:[%s7574_s9 + $0xd8] sm:$0xff] %vm4584_vm0, %v6069_v10 }
 0x55d   :  { %v6073_v0 = vpop.eup %6072  ;;  %v4518_v29 = vadd.f32 1.0, %v6071_v20 }
 0x55e   :  { %v4519_v48 = vadd.f32 1.0, %v6073_v0 }
 0x55f   :  { %6078 = vrcp.f32 %v4518_v29 }
 0x560   :  { %v6075_v12 = vpop.eup %6074  ;;  %6080 = vrcp.f32 %v4519_v48 }
 0x561   :  { %4613 = vst.msk [vmem:[%s7574_s9 + $0xe0] sm:$0xff] %vm4584_vm0, %v6075_v12 }
 0x563   :  { %v6077_v61 = vpop.eup %6076 }
 0x564   :  { %4614 = vst.msk [vmem:[%s7574_s9 + $0xe8] sm:$0xff] %vm4584_vm0, %v6077_v61 }
 0x569   :  { %v6079_v53 = vpop.eup %6078 }
 0x56a   :  { %v6081_v47 = vpop.eup %6080  ;;  %4615 = vst.msk [vmem:[%s7574_s9 + $0xf0] sm:$0xff] %vm4584_vm0, %v6079_v53 }
 0x56b   :  { %4616 = vst.msk [vmem:[%s7574_s9 + $0xf8] sm:$0xff] %vm4584_vm0, %v6081_v47 }
 0x56c   :  { %4621 = vsyncpa [#allocation4], 1 }
 0x56d   :  { %4622 = vsyncpa [#allocation6], 1 }
 0x56e   :  { %4623 = vsyncpa [#allocation9], 1 }

</bundles_post_ra>
